<compile_context>
chip_gen: v7x
topology: tpu7x:2x2x1
jax: 0.10.0
libtpu: 0.0.40
codegen_flags: <defaults>
</compile_context>

<pallas_src>
import jax
import jax.numpy as jnp
from jax import lax
from jax.experimental import pallas as pl
from jax.experimental.pallas import tpu as pltpu

LEAKY_SLOPE = 0.01      # nn.LeakyReLU default negative_slope
FC1_PAD = 640           # 625 padded up to 5 * 128 lanes
OUT_PAD = 128           # 10 logits padded up to one full lane group


# ----------------------------------------------------------------------------
# Fused kernel
# ----------------------------------------------------------------------------
def _leaky(v):
    return jnp.where(v >= 0.0, v, LEAKY_SLOPE * v)


def _pool_selectors(w_out, w_in, pad):
    """0/1 matrices SA, SB of shape (w_out, w_in) such that
    max(SA @ v, SB @ v) is a width-2 / stride-2 max-pool along axis 0 of v
    (with an optional single-element -inf left pad folded in)."""
    rows = lax.broadcasted_iota(jnp.int32, (w_out, w_in), 0)
    cols = lax.broadcasted_iota(jnp.int32, (w_out, w_in), 1)
    sa = (cols == jnp.maximum(2 * rows - pad, 0)).astype(jnp.float32)
    sb = (cols == (2 * rows + 1 - pad)).astype(jnp.float32)
    return sa, sb


def _cnn2_kernel(x_ref, w1_ref, b1_ref, w2_ref, b2_ref, w3_ref, b3_ref,
                 wfc1_ref, bfc1_ref, wfc2_ref, bfc2_ref,
                 out_ref,
                 act1_ref, act2_ref, fcin_ref):
    f32 = jnp.float32
    sa1, sb1 = _pool_selectors(14, 28, 0)
    sa2, sb2 = _pool_selectors(7, 14, 0)
    sa3, sb3 = _pool_selectors(4, 7, 1)

    # Zero the padded activation scratches (this *is* the conv zero padding).
    act1_ref[...] = jnp.zeros_like(act1_ref)
    act2_ref[...] = jnp.zeros_like(act2_ref)

    # ---------- layer1: conv(1->32, pad=1) + LeakyReLU + maxpool 2x2 --------
    def conv1_row(h):                                       # -> (28, 32)
        acc = jnp.zeros((28, 32), f32) + b1_ref[...]
        for ky in range(3):
            for kx in range(3):
                col = x_ref[0, h + ky, pl.ds(kx, 28), :]     # (28, 1)
                acc = acc + col * w1_ref[ky * 3 + kx]        # VPU mul-add
        return _leaky(acc)

    def l1_body(hp, carry):
        v = jnp.maximum(conv1_row(2 * hp), conv1_row(2 * hp + 1))   # (28, 32)
        pooled = jnp.maximum(jnp.dot(sa1, v, preferred_element_type=f32),
                             jnp.dot(sb1, v, preferred_element_type=f32))
        act1_ref[1 + hp, pl.ds(1, 14), :] = pooled                   # (14, 32)
        return carry

    lax.fori_loop(0, 14, l1_body, 0)

    # ---------- layer2: conv(32->64, pad=1) + LeakyReLU + maxpool 2x2 -------
    def conv2_row(h):                                       # -> (14, 64)
        acc = jnp.zeros((14, 64), f32) + b2_ref[...]
        for ky in range(3):
            for kx in range(3):
                xs = act1_ref[h + ky, pl.ds(kx, 14), :]      # (14, 32)
                acc = acc + jnp.dot(xs, w2_ref[ky * 3 + kx],
                                    preferred_element_type=f32)
        return _leaky(acc)

    def l2_body(hp, carry):
        v = jnp.maximum(conv2_row(2 * hp), conv2_row(2 * hp + 1))   # (14, 64)
        pooled = jnp.maximum(jnp.dot(sa2, v, preferred_element_type=f32),
                             jnp.dot(sb2, v, preferred_element_type=f32))
        act2_ref[1 + hp, pl.ds(1, 7), :] = pooled                    # (7, 64)
        return carry

    lax.fori_loop(0, 7, l2_body, 0)

    # ---- layer3: conv(64->128, pad=1) + LeakyReLU + maxpool(2,2,padding=1) -
    def conv3_row(h):                                       # h static; (7,128)
        acc = jnp.zeros((7, 128), f32) + b3_ref[...]
        for ky in range(3):
            for kx in range(3):
                xs = act2_ref[h + ky, pl.ds(kx, 7), :]       # (7, 64)
                acc = acc + jnp.dot(xs, w3_ref[ky * 3 + kx],
                                    preferred_element_type=f32)
        return _leaky(acc)

    for hp in range(4):                 # unrolled -> static sublane offsets
        r0, r1 = max(2 * hp - 1, 0), 2 * hp
        if r0 == r1:                    # first pooled row: top neighbor is pad
            v = conv3_row(r1)
        else:
            v = jnp.maximum(conv3_row(r0), conv3_row(r1))            # (7, 128)
        pooled = jnp.maximum(jnp.dot(sa3, v, preferred_element_type=f32),
                             jnp.dot(sb3, v, preferred_element_type=f32))
        fcin_ref[pl.ds(4 * hp, 4), :] = pooled                       # (4, 128)

    # ---------- fc1 (2048 -> 640 padded): bf16 matmul, f32 accumulation -----
    acc = jnp.zeros((1, FC1_PAD), f32) + bfc1_ref[...]
    for p in range(16):
        row = fcin_ref[pl.ds(p, 1), :].astype(jnp.bfloat16)          # (1, 128)
        acc = acc + jnp.dot(row, wfc1_ref[p], preferred_element_type=f32)
    a1 = _leaky(acc)
    # TODO(synk): nn.Dropout() -> identity (eval-mode).

    # ---------- fc2 (640 -> 128 padded logits) ------------------------------
    logits = (jnp.dot(a1, wfc2_ref[...], preferred_element_type=f32)
              + bfc2_ref[...])                                       # (1, 128)
    out_ref[0] = logits


def _full_spec(arr):
    nd = arr.ndim
    return pl.BlockSpec(arr.shape, lambda b: (0,) * nd)


@jax.jit
def cnn2_forward(x_nchw, prep):
    n = x_nchw.shape[0]
    x = jnp.transpose(x_nchw.astype(jnp.float32), (0, 2, 3, 1))      # NHWC
    xpad = jnp.pad(x, ((0, 0), (1, 1), (1, 1), (0, 0)))              # (n,30,30,1)

    weight_args = (prep["w1"], prep["b1"], prep["w2"], prep["b2"],
                   prep["w3"], prep["b3"], prep["wfc1"], prep["bfc1"],
                   prep["wfc2"], prep["bfc2"])

    flops = 2 * n * (28 * 28 * 9 * 1 * 32 + 14 * 14 * 9 * 32 * 64
                     + 7 * 7 * 9 * 64 * 128 + 16 * 128 * FC1_PAD
                     + FC1_PAD * OUT_PAD)
    wbytes = sum(int(w.size) * w.dtype.itemsize for w in weight_args)
    bytes_accessed = int(xpad.size) * 4 + wbytes + n * OUT_PAD * 4

    out = pl.pallas_call(
        _cnn2_kernel,
        out_shape=jax.ShapeDtypeStruct((n, 1, OUT_PAD), jnp.float32),
        grid_spec=pltpu.PrefetchScalarGridSpec(
            num_scalar_prefetch=0,
            grid=(n,),                                   # one image per step
            in_specs=[pl.BlockSpec((1, 30, 30, 1), lambda b: (b, 0, 0, 0))]
                     + [_full_spec(w) for w in weight_args],
            out_specs=pl.BlockSpec((1, 1, OUT_PAD), lambda b: (b, 0, 0)),
            scratch_shapes=[
                pltpu.VMEM((16, 16, 32), jnp.float32),   # layer2 padded input
                pltpu.VMEM((9, 9, 64), jnp.float32),     # layer3 padded input
                pltpu.VMEM((16, 128), jnp.float32),      # flattened fc input
            ],
        ),
        compiler_params=pltpu.CompilerParams(
            dimension_semantics=("parallel",),           # megacore batch split
            vmem_limit_bytes=32 * 1024 * 1024,           # ~8 MiB actually used
        ),
        cost_estimate=pl.CostEstimate(flops=flops, transcendentals=0,
                                      bytes_accessed=bytes_accessed),
    )(xpad, *weight_args)

    return out.reshape(n, OUT_PAD)[:, :10]


# ----------------------------------------------------------------------------
# Parameters: PyTorch-style init + one-time kernel-layout preparation
# ----------------------------------------------------------------------------
def init_params(key):
    ks = jax.random.split(key, 10)

    def conv_init(kw, kb, cout, cin):
        fan_in = cin * 9
        bound = 1.0 / jnp.sqrt(fan_in)
        w = jax.random.uniform(kw, (cout, cin, 3, 3), jnp.float32, -bound, bound)
        b = jax.random.uniform(kb, (cout,), jnp.float32, -bound, bound)
        return w, b

    def fc_init(kw, kb, fan_out, fan_in):
        bound_w = jnp.sqrt(6.0 / (fan_in + fan_out))     # xavier_uniform_
        bound_b = 1.0 / jnp.sqrt(fan_in)
        w = jax.random.uniform(kw, (fan_out, fan_in), jnp.float32, -bound_w, bound_w)
        b = jax.random.uniform(kb, (fan_out,), jnp.float32, -bound_b, bound_b)
        return w, b

    p = {}
    p["conv1_w"], p["conv1_b"] = conv_init(ks[0], ks[1], 32, 1)
    p["conv2_w"], p["conv2_b"] = conv_init(ks[2], ks[3], 64, 32)
    p["conv3_w"], p["conv3_b"] = conv_init(ks[4], ks[5], 128, 64)
    p["fc1_w"], p["fc1_b"] = fc_init(ks[6], ks[7], 625, 4 * 4 * 128)
    p["fc2_w"], p["fc2_b"] = fc_init(ks[8], ks[9], 10, 625)
    return p


def prepare_params(p):
    """One-time repack of PyTorch-layout params into kernel-friendly layouts."""
    def conv_prep(w):   # (Cout, Cin, 3, 3) -> (9, Cin, Cout), tap = ky*3 + kx
        return jnp.transpose(w, (2, 3, 1, 0)).reshape(9, w.shape[1], w.shape[0])

    # fc1: rows reordered from NCHW-flatten (i = c*16 + p) to kernel order
    # (p, c), output dim padded 625 -> 640, stored as 16 blocks of 128 rows.
    fc1_w_pad = jnp.pad(p["fc1_w"], ((0, FC1_PAD - 625), (0, 0)))    # (640, 2048)
    wfc1 = jnp.transpose(fc1_w_pad.reshape(FC1_PAD, 128, 16), (2, 1, 0))
    # fc2: transposed, padded to (640, 128); extra rows/cols are zero.
    wfc2 = jnp.pad(p["fc2_w"].T, ((0, FC1_PAD - 625), (0, OUT_PAD - 10)))

    return {
        "w1": conv_prep(p["conv1_w"]), "b1": p["conv1_b"].reshape(1, 32),
        "w2": conv_prep(p["conv2_w"]), "b2": p["conv2_b"].reshape(1, 64),
        "w3": conv_prep(p["conv3_w"]), "b3": p["conv3_b"].reshape(1, 128),
        "wfc1": wfc1.astype(jnp.bfloat16),               # bf16 MXU path
        "bfc1": jnp.pad(p["fc1_b"], (0, FC1_PAD - 625)).reshape(1, FC1_PAD),
        "wfc2": wfc2.astype(jnp.float32),
        "bfc2": jnp.pad(p["fc2_b"], (0, OUT_PAD - 10)).reshape(1, OUT_PAD),
    }


# ----------------------------------------------------------------------------
# Pure-JAX reference (f32, highest precision) for validation
# ----------------------------------------------------------------------------
def cnn2_reference(x_nchw, params):
    hi = lax.Precision.HIGHEST
    x = x_nchw.astype(jnp.float32)

    def conv(v, w, b):
        y = lax.conv_general_dilated(
            v, w, window_strides=(1, 1), padding=((1, 1), (1, 1)),
            dimension_numbers=("NCHW", "OIHW", "NCHW"), precision=hi)
        return y + b[None, :, None, None]

    def pool(v, pad):
        return lax.reduce_window(
            v, -jnp.inf, lax.max, (1, 1, 2, 2), (1, 1, 2, 2),
            ((0, 0), (0, 0), (pad, pad), (pad, pad)))

    def leaky(v):
        return jnp.where(v >= 0.0, v, LEAKY_SLOPE * v)

    y = pool(leaky(conv(x, params["conv1_w"], params["conv1_b"])), 0)
    y = pool(leaky(conv(y, params["conv2_w"], params["conv2_b"])), 0)
    y = pool(leaky(conv(y, params["conv3_w"], params["conv3_b"])), 1)
    y = y.reshape(y.shape[0], -1)                        # NCHW flatten
    y = leaky(jnp.dot(y, params["fc1_w"].T, precision=hi) + params["fc1_b"])
    y = jnp.dot(y, params["fc2_w"].T, precision=hi) + params["fc2_b"]
    return y


if __name__ == "__main__":
    key = jax.random.PRNGKey(0)
    k_params, k_x = jax.random.split(key)
    params = init_params(k_params)
    prep = prepare_params(params)

    x = jax.random.normal(k_x, (2, 1, 28, 28), dtype=jnp.float32)    # NCHW

    logits = cnn2_forward(x, prep)
    jax.block_until_ready(logits)
    assert logits.shape == (2, 10) and logits.dtype == jnp.float32

    ref = cnn2_reference(x, params)
    err = float(jnp.max(jnp.abs(logits - ref)))
    tol = 3e-2 * max(1.0, float(jnp.max(jnp.abs(ref))))   # bf16-fc1 headroom
    assert err <= tol, f"kernel/reference mismatch: max|diff|={err:.4e} tol={tol:.4e}"
    print("KERNEL_OK")
</pallas_src>

<mosaic_0001>
module attributes {stable_mosaic.version = 11 : i64} {
  func.func @_cnn2_kernel(%arg0: i32, %arg1: memref<1x30x30x1xf32, #tpu.memory_space<vmem>>, %arg2: memref<9x1x32xf32, #tpu.memory_space<vmem>>, %arg3: memref<1x32xf32, #tpu.memory_space<vmem>>, %arg4: memref<9x32x64xf32, #tpu.memory_space<vmem>>, %arg5: memref<1x64xf32, #tpu.memory_space<vmem>>, %arg6: memref<9x64x128xf32, #tpu.memory_space<vmem>>, %arg7: memref<1x128xf32, #tpu.memory_space<vmem>>, %arg8: memref<16x128x640xbf16, #tpu.memory_space<vmem>>, %arg9: memref<1x640xf32, #tpu.memory_space<vmem>>, %arg10: memref<640x128xf32, #tpu.memory_space<vmem>>, %arg11: memref<1x128xf32, #tpu.memory_space<vmem>>, %arg12: memref<1x1x128xf32, #tpu.memory_space<vmem>>, %arg13: memref<16x16x32xf32, #tpu.memory_space<vmem>>, %arg14: memref<9x9x64xf32, #tpu.memory_space<vmem>>, %arg15: memref<16x128xf32, #tpu.memory_space<vmem>>) attributes {dimension_semantics = [#tpu.dimension_semantics<parallel>], iteration_bounds = array<i64: 2>, scalar_prefetch = 0 : i64, scratch_operands = 3 : i64, tpu.core_type = #tpu.core_type<tc>, window_params = [{transform_indices = @transform_0, window_bounds = array<i64: 1, 30, 30, 1>}, {pipeline_mode = #tpu.pipeline_mode<synchronous>, transform_indices = @transform_1, window_bounds = array<i64: 9, 1, 32>}, {pipeline_mode = #tpu.pipeline_mode<synchronous>, transform_indices = @transform_2, window_bounds = array<i64: 1, 32>}, {pipeline_mode = #tpu.pipeline_mode<synchronous>, transform_indices = @transform_3, window_bounds = array<i64: 9, 32, 64>}, {pipeline_mode = #tpu.pipeline_mode<synchronous>, transform_indices = @transform_4, window_bounds = array<i64: 1, 64>}, {pipeline_mode = #tpu.pipeline_mode<synchronous>, transform_indices = @transform_5, window_bounds = array<i64: 9, 64, 128>}, {pipeline_mode = #tpu.pipeline_mode<synchronous>, transform_indices = @transform_6, window_bounds = array<i64: 1, 128>}, {pipeline_mode = #tpu.pipeline_mode<synchronous>, transform_indices = @transform_7, window_bounds = array<i64: 16, 128, 640>}, {pipeline_mode = #tpu.pipeline_mode<synchronous>, transform_indices = @transform_8, window_bounds = array<i64: 1, 640>}, {pipeline_mode = #tpu.pipeline_mode<synchronous>, transform_indices = @transform_9, window_bounds = array<i64: 640, 128>}, {pipeline_mode = #tpu.pipeline_mode<synchronous>, transform_indices = @transform_10, window_bounds = array<i64: 1, 128>}, {transform_indices = @transform_11, window_bounds = array<i64: 1, 1, 128>}]} {
    %0 = tpu.iota {dimensions = array<i32: 0>} : vector<14x28xi32>
    %1 = tpu.iota {dimensions = array<i32: 1>} : vector<14x28xi32>
    %c2_i32 = arith.constant 2 : i32
    %2 = vector.broadcast %c2_i32 : i32 to vector<14x28xi32>
    %3 = arith.muli %2, %0 : vector<14x28xi32>
    %c0_i32 = arith.constant 0 : i32
    %4 = vector.broadcast %c0_i32 : i32 to vector<14x28xi32>
    %5 = arith.subi %3, %4 : vector<14x28xi32>
    %c0_i32_0 = arith.constant 0 : i32
    %6 = vector.broadcast %c0_i32_0 : i32 to vector<14x28xi32>
    %7 = arith.maxsi %5, %6 : vector<14x28xi32>
    %8 = arith.cmpi eq, %1, %7 : vector<14x28xi32>
    %9 = arith.extui %8 : vector<14x28xi1> to vector<14x28xi32>
    %10 = arith.sitofp %9 : vector<14x28xi32> to vector<14x28xf32>
    %c2_i32_1 = arith.constant 2 : i32
    %11 = vector.broadcast %c2_i32_1 : i32 to vector<14x28xi32>
    %12 = arith.muli %11, %0 : vector<14x28xi32>
    %c1_i32 = arith.constant 1 : i32
    %13 = vector.broadcast %c1_i32 : i32 to vector<14x28xi32>
    %14 = arith.addi %12, %13 : vector<14x28xi32>
    %c0_i32_2 = arith.constant 0 : i32
    %15 = vector.broadcast %c0_i32_2 : i32 to vector<14x28xi32>
    %16 = arith.subi %14, %15 : vector<14x28xi32>
    %17 = arith.cmpi eq, %1, %16 : vector<14x28xi32>
    %18 = arith.extui %17 : vector<14x28xi1> to vector<14x28xi32>
    %19 = arith.sitofp %18 : vector<14x28xi32> to vector<14x28xf32>
    %20 = tpu.iota {dimensions = array<i32: 0>} : vector<7x14xi32>
    %21 = tpu.iota {dimensions = array<i32: 1>} : vector<7x14xi32>
    %c2_i32_3 = arith.constant 2 : i32
    %22 = vector.broadcast %c2_i32_3 : i32 to vector<7x14xi32>
    %23 = arith.muli %22, %20 : vector<7x14xi32>
    %c0_i32_4 = arith.constant 0 : i32
    %24 = vector.broadcast %c0_i32_4 : i32 to vector<7x14xi32>
    %25 = arith.subi %23, %24 : vector<7x14xi32>
    %c0_i32_5 = arith.constant 0 : i32
    %26 = vector.broadcast %c0_i32_5 : i32 to vector<7x14xi32>
    %27 = arith.maxsi %25, %26 : vector<7x14xi32>
    %28 = arith.cmpi eq, %21, %27 : vector<7x14xi32>
    %29 = arith.extui %28 : vector<7x14xi1> to vector<7x14xi32>
    %30 = arith.sitofp %29 : vector<7x14xi32> to vector<7x14xf32>
    %c2_i32_6 = arith.constant 2 : i32
    %31 = vector.broadcast %c2_i32_6 : i32 to vector<7x14xi32>
    %32 = arith.muli %31, %20 : vector<7x14xi32>
    %c1_i32_7 = arith.constant 1 : i32
    %33 = vector.broadcast %c1_i32_7 : i32 to vector<7x14xi32>
    %34 = arith.addi %32, %33 : vector<7x14xi32>
    %c0_i32_8 = arith.constant 0 : i32
    %35 = vector.broadcast %c0_i32_8 : i32 to vector<7x14xi32>
    %36 = arith.subi %34, %35 : vector<7x14xi32>
    %37 = arith.cmpi eq, %21, %36 : vector<7x14xi32>
    %38 = arith.extui %37 : vector<7x14xi1> to vector<7x14xi32>
    %39 = arith.sitofp %38 : vector<7x14xi32> to vector<7x14xf32>
    %40 = tpu.iota {dimensions = array<i32: 0>} : vector<4x7xi32>
    %41 = tpu.iota {dimensions = array<i32: 1>} : vector<4x7xi32>
    %c2_i32_9 = arith.constant 2 : i32
    %42 = vector.broadcast %c2_i32_9 : i32 to vector<4x7xi32>
    %43 = arith.muli %42, %40 : vector<4x7xi32>
    %c1_i32_10 = arith.constant 1 : i32
    %44 = vector.broadcast %c1_i32_10 : i32 to vector<4x7xi32>
    %45 = arith.subi %43, %44 : vector<4x7xi32>
    %c0_i32_11 = arith.constant 0 : i32
    %46 = vector.broadcast %c0_i32_11 : i32 to vector<4x7xi32>
    %47 = arith.maxsi %45, %46 : vector<4x7xi32>
    %48 = arith.cmpi eq, %41, %47 : vector<4x7xi32>
    %49 = arith.extui %48 : vector<4x7xi1> to vector<4x7xi32>
    %50 = arith.sitofp %49 : vector<4x7xi32> to vector<4x7xf32>
    %c2_i32_12 = arith.constant 2 : i32
    %51 = vector.broadcast %c2_i32_12 : i32 to vector<4x7xi32>
    %52 = arith.muli %51, %40 : vector<4x7xi32>
    %c1_i32_13 = arith.constant 1 : i32
    %53 = vector.broadcast %c1_i32_13 : i32 to vector<4x7xi32>
    %54 = arith.addi %52, %53 : vector<4x7xi32>
    %c1_i32_14 = arith.constant 1 : i32
    %55 = vector.broadcast %c1_i32_14 : i32 to vector<4x7xi32>
    %56 = arith.subi %54, %55 : vector<4x7xi32>
    %57 = arith.cmpi eq, %41, %56 : vector<4x7xi32>
    %58 = arith.extui %57 : vector<4x7xi1> to vector<4x7xi32>
    %59 = arith.sitofp %58 : vector<4x7xi32> to vector<4x7xf32>
    %cst = arith.constant 0.000000e+00 : f32
    %60 = vector.broadcast %cst : f32 to vector<16x16x32xf32>
    %c0 = arith.constant 0 : index
    %c0_15 = arith.constant 0 : index
    %c0_16 = arith.constant 0 : index
    %61 = vector.load %arg13[%c0, %c0_15, %c0_16] : memref<16x16x32xf32, #tpu.memory_space<vmem>>, vector<16x16x32xf32>
    tpu.vector_store %arg13[%c0, %c0_15, %c0_16], %60 {strides = array<i32>} : memref<16x16x32xf32, #tpu.memory_space<vmem>>, vector<16x16x32xf32>,
    %cst_17 = arith.constant 0.000000e+00 : f32
    %62 = vector.broadcast %cst_17 : f32 to vector<9x9x64xf32>
    %c0_18 = arith.constant 0 : index
    %c0_19 = arith.constant 0 : index
    %c0_20 = arith.constant 0 : index
    %63 = vector.load %arg14[%c0_18, %c0_19, %c0_20] : memref<9x9x64xf32, #tpu.memory_space<vmem>>, vector<9x9x64xf32>
    tpu.vector_store %arg14[%c0_18, %c0_19, %c0_20], %62 {strides = array<i32>} : memref<9x9x64xf32, #tpu.memory_space<vmem>>, vector<9x9x64xf32>,
    %c0_i32_21 = arith.constant 0 : i32
    %c14_i32 = arith.constant 14 : i32
    %64 = arith.addi %c0_i32_21, %c14_i32 : i32
    %c1_i32_22 = arith.constant 1 : i32
    scf.for %arg16 = %c0_i32_21 to %64 step %c1_i32_22  : i32 {
      %c2_i32_613 = arith.constant 2 : i32
      %637 = arith.muli %c2_i32_613, %arg16 : i32
      %cst_614 = arith.constant 0.000000e+00 : f32
      %638 = vector.broadcast %cst_614 : f32 to vector<28x32xf32>
      %c0_615 = arith.constant 0 : index
      %c0_616 = arith.constant 0 : index
      %639 = vector.load %arg3[%c0_615, %c0_616] : memref<1x32xf32, #tpu.memory_space<vmem>>, vector<1x32xf32>
      %640 = vector.broadcast %639 : vector<1x32xf32> to vector<28x32xf32>
      %641 = arith.addf %638, %640 : vector<28x32xf32>
      %c0_i32_617 = arith.constant 0 : i32
      %642 = arith.addi %637, %c0_i32_617 : i32
      %c0_618 = arith.constant 0 : index
      %643 = arith.index_cast %642 : i32 to index
      %c0_619 = arith.constant 0 : index
      %c0_620 = arith.constant 0 : index
      %644 = vector.load %arg1[%c0_618, %643, %c0_619, %c0_620] : memref<1x30x30x1xf32, #tpu.memory_space<vmem>>, vector<1x1x28x1xf32>
      %645 = vector.shape_cast %644 : vector<1x1x28x1xf32> to vector<28x1xf32>
      %c0_621 = arith.constant 0 : index
      %c0_622 = arith.constant 0 : index
      %c0_623 = arith.constant 0 : index
      %646 = vector.load %arg2[%c0_621, %c0_622, %c0_623] : memref<9x1x32xf32, #tpu.memory_space<vmem>>, vector<1x1x32xf32>
      %647 = vector.shape_cast %646 : vector<1x1x32xf32> to vector<1x32xf32>
      %648 = vector.broadcast %645 : vector<28x1xf32> to vector<28x32xf32>
      %649 = vector.broadcast %647 : vector<1x32xf32> to vector<28x32xf32>
      %650 = arith.mulf %648, %649 : vector<28x32xf32>
      %651 = arith.addf %641, %650 : vector<28x32xf32>
      %c0_i32_624 = arith.constant 0 : i32
      %652 = arith.addi %637, %c0_i32_624 : i32
      %c0_625 = arith.constant 0 : index
      %653 = arith.index_cast %652 : i32 to index
      %c1_626 = arith.constant 1 : index
      %c0_627 = arith.constant 0 : index
      %654 = vector.load %arg1[%c0_625, %653, %c1_626, %c0_627] : memref<1x30x30x1xf32, #tpu.memory_space<vmem>>, vector<1x1x28x1xf32>
      %655 = vector.shape_cast %654 : vector<1x1x28x1xf32> to vector<28x1xf32>
      %c1_628 = arith.constant 1 : index
      %c0_629 = arith.constant 0 : index
      %c0_630 = arith.constant 0 : index
      %656 = vector.load %arg2[%c1_628, %c0_629, %c0_630] : memref<9x1x32xf32, #tpu.memory_space<vmem>>, vector<1x1x32xf32>
      %657 = vector.shape_cast %656 : vector<1x1x32xf32> to vector<1x32xf32>
      %658 = vector.broadcast %655 : vector<28x1xf32> to vector<28x32xf32>
      %659 = vector.broadcast %657 : vector<1x32xf32> to vector<28x32xf32>
      %660 = arith.mulf %658, %659 : vector<28x32xf32>
      %661 = arith.addf %651, %660 : vector<28x32xf32>
      %c0_i32_631 = arith.constant 0 : i32
      %662 = arith.addi %637, %c0_i32_631 : i32
      %c0_632 = arith.constant 0 : index
      %663 = arith.index_cast %662 : i32 to index
      %c2_633 = arith.constant 2 : index
      %c0_634 = arith.constant 0 : index
      %664 = vector.load %arg1[%c0_632, %663, %c2_633, %c0_634] : memref<1x30x30x1xf32, #tpu.memory_space<vmem>>, vector<1x1x28x1xf32>
      %665 = vector.shape_cast %664 : vector<1x1x28x1xf32> to vector<28x1xf32>
      %c2_635 = arith.constant 2 : index
      %c0_636 = arith.constant 0 : index
      %c0_637 = arith.constant 0 : index
      %666 = vector.load %arg2[%c2_635, %c0_636, %c0_637] : memref<9x1x32xf32, #tpu.memory_space<vmem>>, vector<1x1x32xf32>
      %667 = vector.shape_cast %666 : vector<1x1x32xf32> to vector<1x32xf32>
      %668 = vector.broadcast %665 : vector<28x1xf32> to vector<28x32xf32>
      %669 = vector.broadcast %667 : vector<1x32xf32> to vector<28x32xf32>
      %670 = arith.mulf %668, %669 : vector<28x32xf32>
      %671 = arith.addf %661, %670 : vector<28x32xf32>
      %c1_i32_638 = arith.constant 1 : i32
      %672 = arith.addi %637, %c1_i32_638 : i32
      %c0_639 = arith.constant 0 : index
      %673 = arith.index_cast %672 : i32 to index
      %c0_640 = arith.constant 0 : index
      %c0_641 = arith.constant 0 : index
      %674 = vector.load %arg1[%c0_639, %673, %c0_640, %c0_641] : memref<1x30x30x1xf32, #tpu.memory_space<vmem>>, vector<1x1x28x1xf32>
      %675 = vector.shape_cast %674 : vector<1x1x28x1xf32> to vector<28x1xf32>
      %c3_642 = arith.constant 3 : index
      %c0_643 = arith.constant 0 : index
      %c0_644 = arith.constant 0 : index
      %676 = vector.load %arg2[%c3_642, %c0_643, %c0_644] : memref<9x1x32xf32, #tpu.memory_space<vmem>>, vector<1x1x32xf32>
      %677 = vector.shape_cast %676 : vector<1x1x32xf32> to vector<1x32xf32>
      %678 = vector.broadcast %675 : vector<28x1xf32> to vector<28x32xf32>
      %679 = vector.broadcast %677 : vector<1x32xf32> to vector<28x32xf32>
      %680 = arith.mulf %678, %679 : vector<28x32xf32>
      %681 = arith.addf %671, %680 : vector<28x32xf32>
      %c1_i32_645 = arith.constant 1 : i32
      %682 = arith.addi %637, %c1_i32_645 : i32
      %c0_646 = arith.constant 0 : index
      %683 = arith.index_cast %682 : i32 to index
      %c1_647 = arith.constant 1 : index
      %c0_648 = arith.constant 0 : index
      %684 = vector.load %arg1[%c0_646, %683, %c1_647, %c0_648] : memref<1x30x30x1xf32, #tpu.memory_space<vmem>>, vector<1x1x28x1xf32>
      %685 = vector.shape_cast %684 : vector<1x1x28x1xf32> to vector<28x1xf32>
      %c4_649 = arith.constant 4 : index
      %c0_650 = arith.constant 0 : index
      %c0_651 = arith.constant 0 : index
      %686 = vector.load %arg2[%c4_649, %c0_650, %c0_651] : memref<9x1x32xf32, #tpu.memory_space<vmem>>, vector<1x1x32xf32>
      %687 = vector.shape_cast %686 : vector<1x1x32xf32> to vector<1x32xf32>
      %688 = vector.broadcast %685 : vector<28x1xf32> to vector<28x32xf32>
      %689 = vector.broadcast %687 : vector<1x32xf32> to vector<28x32xf32>
      %690 = arith.mulf %688, %689 : vector<28x32xf32>
      %691 = arith.addf %681, %690 : vector<28x32xf32>
      %c1_i32_652 = arith.constant 1 : i32
      %692 = arith.addi %637, %c1_i32_652 : i32
      %c0_653 = arith.constant 0 : index
      %693 = arith.index_cast %692 : i32 to index
      %c2_654 = arith.constant 2 : index
      %c0_655 = arith.constant 0 : index
      %694 = vector.load %arg1[%c0_653, %693, %c2_654, %c0_655] : memref<1x30x30x1xf32, #tpu.memory_space<vmem>>, vector<1x1x28x1xf32>
      %695 = vector.shape_cast %694 : vector<1x1x28x1xf32> to vector<28x1xf32>
      %c5_656 = arith.constant 5 : index
      %c0_657 = arith.constant 0 : index
      %c0_658 = arith.constant 0 : index
      %696 = vector.load %arg2[%c5_656, %c0_657, %c0_658] : memref<9x1x32xf32, #tpu.memory_space<vmem>>, vector<1x1x32xf32>
      %697 = vector.shape_cast %696 : vector<1x1x32xf32> to vector<1x32xf32>
      %698 = vector.broadcast %695 : vector<28x1xf32> to vector<28x32xf32>
      %699 = vector.broadcast %697 : vector<1x32xf32> to vector<28x32xf32>
      %700 = arith.mulf %698, %699 : vector<28x32xf32>
      %701 = arith.addf %691, %700 : vector<28x32xf32>
      %c2_i32_659 = arith.constant 2 : i32
      %702 = arith.addi %637, %c2_i32_659 : i32
      %c0_660 = arith.constant 0 : index
      %703 = arith.index_cast %702 : i32 to index
      %c0_661 = arith.constant 0 : index
      %c0_662 = arith.constant 0 : index
      %704 = vector.load %arg1[%c0_660, %703, %c0_661, %c0_662] : memref<1x30x30x1xf32, #tpu.memory_space<vmem>>, vector<1x1x28x1xf32>
      %705 = vector.shape_cast %704 : vector<1x1x28x1xf32> to vector<28x1xf32>
      %c6_663 = arith.constant 6 : index
      %c0_664 = arith.constant 0 : index
      %c0_665 = arith.constant 0 : index
      %706 = vector.load %arg2[%c6_663, %c0_664, %c0_665] : memref<9x1x32xf32, #tpu.memory_space<vmem>>, vector<1x1x32xf32>
      %707 = vector.shape_cast %706 : vector<1x1x32xf32> to vector<1x32xf32>
      %708 = vector.broadcast %705 : vector<28x1xf32> to vector<28x32xf32>
      %709 = vector.broadcast %707 : vector<1x32xf32> to vector<28x32xf32>
      %710 = arith.mulf %708, %709 : vector<28x32xf32>
      %711 = arith.addf %701, %710 : vector<28x32xf32>
      %c2_i32_666 = arith.constant 2 : i32
      %712 = arith.addi %637, %c2_i32_666 : i32
      %c0_667 = arith.constant 0 : index
      %713 = arith.index_cast %712 : i32 to index
      %c1_668 = arith.constant 1 : index
      %c0_669 = arith.constant 0 : index
      %714 = vector.load %arg1[%c0_667, %713, %c1_668, %c0_669] : memref<1x30x30x1xf32, #tpu.memory_space<vmem>>, vector<1x1x28x1xf32>
      %715 = vector.shape_cast %714 : vector<1x1x28x1xf32> to vector<28x1xf32>
      %c7_670 = arith.constant 7 : index
      %c0_671 = arith.constant 0 : index
      %c0_672 = arith.constant 0 : index
      %716 = vector.load %arg2[%c7_670, %c0_671, %c0_672] : memref<9x1x32xf32, #tpu.memory_space<vmem>>, vector<1x1x32xf32>
      %717 = vector.shape_cast %716 : vector<1x1x32xf32> to vector<1x32xf32>
      %718 = vector.broadcast %715 : vector<28x1xf32> to vector<28x32xf32>
      %719 = vector.broadcast %717 : vector<1x32xf32> to vector<28x32xf32>
      %720 = arith.mulf %718, %719 : vector<28x32xf32>
      %721 = arith.addf %711, %720 : vector<28x32xf32>
      %c2_i32_673 = arith.constant 2 : i32
      %722 = arith.addi %637, %c2_i32_673 : i32
      %c0_674 = arith.constant 0 : index
      %723 = arith.index_cast %722 : i32 to index
      %c2_675 = arith.constant 2 : index
      %c0_676 = arith.constant 0 : index
      %724 = vector.load %arg1[%c0_674, %723, %c2_675, %c0_676] : memref<1x30x30x1xf32, #tpu.memory_space<vmem>>, vector<1x1x28x1xf32>
      %725 = vector.shape_cast %724 : vector<1x1x28x1xf32> to vector<28x1xf32>
      %c8_677 = arith.constant 8 : index
      %c0_678 = arith.constant 0 : index
      %c0_679 = arith.constant 0 : index
      %726 = vector.load %arg2[%c8_677, %c0_678, %c0_679] : memref<9x1x32xf32, #tpu.memory_space<vmem>>, vector<1x1x32xf32>
      %727 = vector.shape_cast %726 : vector<1x1x32xf32> to vector<1x32xf32>
      %728 = vector.broadcast %725 : vector<28x1xf32> to vector<28x32xf32>
      %729 = vector.broadcast %727 : vector<1x32xf32> to vector<28x32xf32>
      %730 = arith.mulf %728, %729 : vector<28x32xf32>
      %731 = arith.addf %721, %730 : vector<28x32xf32>
      %cst_680 = arith.constant 0.000000e+00 : f32
      %732 = vector.broadcast %cst_680 : f32 to vector<28x32xf32>
      %733 = arith.cmpf oge, %731, %732 : vector<28x32xf32>
      %cst_681 = arith.constant 0.00999999977 : f32
      %734 = vector.broadcast %cst_681 : f32 to vector<28x32xf32>
      %735 = arith.mulf %734, %731 : vector<28x32xf32>
      %736 = arith.select %733, %731, %735 : vector<28x32xi1>, vector<28x32xf32>
      %c2_i32_682 = arith.constant 2 : i32
      %737 = arith.muli %c2_i32_682, %arg16 : i32
      %c1_i32_683 = arith.constant 1 : i32
      %738 = arith.addi %737, %c1_i32_683 : i32
      %cst_684 = arith.constant 0.000000e+00 : f32
      %739 = vector.broadcast %cst_684 : f32 to vector<28x32xf32>
      %c0_685 = arith.constant 0 : index
      %c0_686 = arith.constant 0 : index
      %740 = vector.load %arg3[%c0_685, %c0_686] : memref<1x32xf32, #tpu.memory_space<vmem>>, vector<1x32xf32>
      %741 = vector.broadcast %740 : vector<1x32xf32> to vector<28x32xf32>
      %742 = arith.addf %739, %741 : vector<28x32xf32>
      %c0_i32_687 = arith.constant 0 : i32
      %743 = arith.addi %738, %c0_i32_687 : i32
      %c0_688 = arith.constant 0 : index
      %744 = arith.index_cast %743 : i32 to index
      %c0_689 = arith.constant 0 : index
      %c0_690 = arith.constant 0 : index
      %745 = vector.load %arg1[%c0_688, %744, %c0_689, %c0_690] : memref<1x30x30x1xf32, #tpu.memory_space<vmem>>, vector<1x1x28x1xf32>
      %746 = vector.shape_cast %745 : vector<1x1x28x1xf32> to vector<28x1xf32>
      %c0_691 = arith.constant 0 : index
      %c0_692 = arith.constant 0 : index
      %c0_693 = arith.constant 0 : index
      %747 = vector.load %arg2[%c0_691, %c0_692, %c0_693] : memref<9x1x32xf32, #tpu.memory_space<vmem>>, vector<1x1x32xf32>
      %748 = vector.shape_cast %747 : vector<1x1x32xf32> to vector<1x32xf32>
      %749 = vector.broadcast %746 : vector<28x1xf32> to vector<28x32xf32>
      %750 = vector.broadcast %748 : vector<1x32xf32> to vector<28x32xf32>
      %751 = arith.mulf %749, %750 : vector<28x32xf32>
      %752 = arith.addf %742, %751 : vector<28x32xf32>
      %c0_i32_694 = arith.constant 0 : i32
      %753 = arith.addi %738, %c0_i32_694 : i32
      %c0_695 = arith.constant 0 : index
      %754 = arith.index_cast %753 : i32 to index
      %c1_696 = arith.constant 1 : index
      %c0_697 = arith.constant 0 : index
      %755 = vector.load %arg1[%c0_695, %754, %c1_696, %c0_697] : memref<1x30x30x1xf32, #tpu.memory_space<vmem>>, vector<1x1x28x1xf32>
      %756 = vector.shape_cast %755 : vector<1x1x28x1xf32> to vector<28x1xf32>
      %c1_698 = arith.constant 1 : index
      %c0_699 = arith.constant 0 : index
      %c0_700 = arith.constant 0 : index
      %757 = vector.load %arg2[%c1_698, %c0_699, %c0_700] : memref<9x1x32xf32, #tpu.memory_space<vmem>>, vector<1x1x32xf32>
      %758 = vector.shape_cast %757 : vector<1x1x32xf32> to vector<1x32xf32>
      %759 = vector.broadcast %756 : vector<28x1xf32> to vector<28x32xf32>
      %760 = vector.broadcast %758 : vector<1x32xf32> to vector<28x32xf32>
      %761 = arith.mulf %759, %760 : vector<28x32xf32>
      %762 = arith.addf %752, %761 : vector<28x32xf32>
      %c0_i32_701 = arith.constant 0 : i32
      %763 = arith.addi %738, %c0_i32_701 : i32
      %c0_702 = arith.constant 0 : index
      %764 = arith.index_cast %763 : i32 to index
      %c2_703 = arith.constant 2 : index
      %c0_704 = arith.constant 0 : index
      %765 = vector.load %arg1[%c0_702, %764, %c2_703, %c0_704] : memref<1x30x30x1xf32, #tpu.memory_space<vmem>>, vector<1x1x28x1xf32>
      %766 = vector.shape_cast %765 : vector<1x1x28x1xf32> to vector<28x1xf32>
      %c2_705 = arith.constant 2 : index
      %c0_706 = arith.constant 0 : index
      %c0_707 = arith.constant 0 : index
      %767 = vector.load %arg2[%c2_705, %c0_706, %c0_707] : memref<9x1x32xf32, #tpu.memory_space<vmem>>, vector<1x1x32xf32>
      %768 = vector.shape_cast %767 : vector<1x1x32xf32> to vector<1x32xf32>
      %769 = vector.broadcast %766 : vector<28x1xf32> to vector<28x32xf32>
      %770 = vector.broadcast %768 : vector<1x32xf32> to vector<28x32xf32>
      %771 = arith.mulf %769, %770 : vector<28x32xf32>
      %772 = arith.addf %762, %771 : vector<28x32xf32>
      %c1_i32_708 = arith.constant 1 : i32
      %773 = arith.addi %738, %c1_i32_708 : i32
      %c0_709 = arith.constant 0 : index
      %774 = arith.index_cast %773 : i32 to index
      %c0_710 = arith.constant 0 : index
      %c0_711 = arith.constant 0 : index
      %775 = vector.load %arg1[%c0_709, %774, %c0_710, %c0_711] : memref<1x30x30x1xf32, #tpu.memory_space<vmem>>, vector<1x1x28x1xf32>
      %776 = vector.shape_cast %775 : vector<1x1x28x1xf32> to vector<28x1xf32>
      %c3_712 = arith.constant 3 : index
      %c0_713 = arith.constant 0 : index
      %c0_714 = arith.constant 0 : index
      %777 = vector.load %arg2[%c3_712, %c0_713, %c0_714] : memref<9x1x32xf32, #tpu.memory_space<vmem>>, vector<1x1x32xf32>
      %778 = vector.shape_cast %777 : vector<1x1x32xf32> to vector<1x32xf32>
      %779 = vector.broadcast %776 : vector<28x1xf32> to vector<28x32xf32>
      %780 = vector.broadcast %778 : vector<1x32xf32> to vector<28x32xf32>
      %781 = arith.mulf %779, %780 : vector<28x32xf32>
      %782 = arith.addf %772, %781 : vector<28x32xf32>
      %c1_i32_715 = arith.constant 1 : i32
      %783 = arith.addi %738, %c1_i32_715 : i32
      %c0_716 = arith.constant 0 : index
      %784 = arith.index_cast %783 : i32 to index
      %c1_717 = arith.constant 1 : index
      %c0_718 = arith.constant 0 : index
      %785 = vector.load %arg1[%c0_716, %784, %c1_717, %c0_718] : memref<1x30x30x1xf32, #tpu.memory_space<vmem>>, vector<1x1x28x1xf32>
      %786 = vector.shape_cast %785 : vector<1x1x28x1xf32> to vector<28x1xf32>
      %c4_719 = arith.constant 4 : index
      %c0_720 = arith.constant 0 : index
      %c0_721 = arith.constant 0 : index
      %787 = vector.load %arg2[%c4_719, %c0_720, %c0_721] : memref<9x1x32xf32, #tpu.memory_space<vmem>>, vector<1x1x32xf32>
      %788 = vector.shape_cast %787 : vector<1x1x32xf32> to vector<1x32xf32>
      %789 = vector.broadcast %786 : vector<28x1xf32> to vector<28x32xf32>
      %790 = vector.broadcast %788 : vector<1x32xf32> to vector<28x32xf32>
      %791 = arith.mulf %789, %790 : vector<28x32xf32>
      %792 = arith.addf %782, %791 : vector<28x32xf32>
      %c1_i32_722 = arith.constant 1 : i32
      %793 = arith.addi %738, %c1_i32_722 : i32
      %c0_723 = arith.constant 0 : index
      %794 = arith.index_cast %793 : i32 to index
      %c2_724 = arith.constant 2 : index
      %c0_725 = arith.constant 0 : index
      %795 = vector.load %arg1[%c0_723, %794, %c2_724, %c0_725] : memref<1x30x30x1xf32, #tpu.memory_space<vmem>>, vector<1x1x28x1xf32>
      %796 = vector.shape_cast %795 : vector<1x1x28x1xf32> to vector<28x1xf32>
      %c5_726 = arith.constant 5 : index
      %c0_727 = arith.constant 0 : index
      %c0_728 = arith.constant 0 : index
      %797 = vector.load %arg2[%c5_726, %c0_727, %c0_728] : memref<9x1x32xf32, #tpu.memory_space<vmem>>, vector<1x1x32xf32>
      %798 = vector.shape_cast %797 : vector<1x1x32xf32> to vector<1x32xf32>
      %799 = vector.broadcast %796 : vector<28x1xf32> to vector<28x32xf32>
      %800 = vector.broadcast %798 : vector<1x32xf32> to vector<28x32xf32>
      %801 = arith.mulf %799, %800 : vector<28x32xf32>
      %802 = arith.addf %792, %801 : vector<28x32xf32>
      %c2_i32_729 = arith.constant 2 : i32
      %803 = arith.addi %738, %c2_i32_729 : i32
      %c0_730 = arith.constant 0 : index
      %804 = arith.index_cast %803 : i32 to index
      %c0_731 = arith.constant 0 : index
      %c0_732 = arith.constant 0 : index
      %805 = vector.load %arg1[%c0_730, %804, %c0_731, %c0_732] : memref<1x30x30x1xf32, #tpu.memory_space<vmem>>, vector<1x1x28x1xf32>
      %806 = vector.shape_cast %805 : vector<1x1x28x1xf32> to vector<28x1xf32>
      %c6_733 = arith.constant 6 : index
      %c0_734 = arith.constant 0 : index
      %c0_735 = arith.constant 0 : index
      %807 = vector.load %arg2[%c6_733, %c0_734, %c0_735] : memref<9x1x32xf32, #tpu.memory_space<vmem>>, vector<1x1x32xf32>
      %808 = vector.shape_cast %807 : vector<1x1x32xf32> to vector<1x32xf32>
      %809 = vector.broadcast %806 : vector<28x1xf32> to vector<28x32xf32>
      %810 = vector.broadcast %808 : vector<1x32xf32> to vector<28x32xf32>
      %811 = arith.mulf %809, %810 : vector<28x32xf32>
      %812 = arith.addf %802, %811 : vector<28x32xf32>
      %c2_i32_736 = arith.constant 2 : i32
      %813 = arith.addi %738, %c2_i32_736 : i32
      %c0_737 = arith.constant 0 : index
      %814 = arith.index_cast %813 : i32 to index
      %c1_738 = arith.constant 1 : index
      %c0_739 = arith.constant 0 : index
      %815 = vector.load %arg1[%c0_737, %814, %c1_738, %c0_739] : memref<1x30x30x1xf32, #tpu.memory_space<vmem>>, vector<1x1x28x1xf32>
      %816 = vector.shape_cast %815 : vector<1x1x28x1xf32> to vector<28x1xf32>
      %c7_740 = arith.constant 7 : index
      %c0_741 = arith.constant 0 : index
      %c0_742 = arith.constant 0 : index
      %817 = vector.load %arg2[%c7_740, %c0_741, %c0_742] : memref<9x1x32xf32, #tpu.memory_space<vmem>>, vector<1x1x32xf32>
      %818 = vector.shape_cast %817 : vector<1x1x32xf32> to vector<1x32xf32>
      %819 = vector.broadcast %816 : vector<28x1xf32> to vector<28x32xf32>
      %820 = vector.broadcast %818 : vector<1x32xf32> to vector<28x32xf32>
      %821 = arith.mulf %819, %820 : vector<28x32xf32>
      %822 = arith.addf %812, %821 : vector<28x32xf32>
      %c2_i32_743 = arith.constant 2 : i32
      %823 = arith.addi %738, %c2_i32_743 : i32
      %c0_744 = arith.constant 0 : index
      %824 = arith.index_cast %823 : i32 to index
      %c2_745 = arith.constant 2 : index
      %c0_746 = arith.constant 0 : index
      %825 = vector.load %arg1[%c0_744, %824, %c2_745, %c0_746] : memref<1x30x30x1xf32, #tpu.memory_space<vmem>>, vector<1x1x28x1xf32>
      %826 = vector.shape_cast %825 : vector<1x1x28x1xf32> to vector<28x1xf32>
      %c8_747 = arith.constant 8 : index
      %c0_748 = arith.constant 0 : index
      %c0_749 = arith.constant 0 : index
      %827 = vector.load %arg2[%c8_747, %c0_748, %c0_749] : memref<9x1x32xf32, #tpu.memory_space<vmem>>, vector<1x1x32xf32>
      %828 = vector.shape_cast %827 : vector<1x1x32xf32> to vector<1x32xf32>
      %829 = vector.broadcast %826 : vector<28x1xf32> to vector<28x32xf32>
      %830 = vector.broadcast %828 : vector<1x32xf32> to vector<28x32xf32>
      %831 = arith.mulf %829, %830 : vector<28x32xf32>
      %832 = arith.addf %822, %831 : vector<28x32xf32>
      %cst_750 = arith.constant 0.000000e+00 : f32
      %833 = vector.broadcast %cst_750 : f32 to vector<28x32xf32>
      %834 = arith.cmpf oge, %832, %833 : vector<28x32xf32>
      %cst_751 = arith.constant 0.00999999977 : f32
      %835 = vector.broadcast %cst_751 : f32 to vector<28x32xf32>
      %836 = arith.mulf %835, %832 : vector<28x32xf32>
      %837 = arith.select %834, %832, %836 : vector<28x32xi1>, vector<28x32xf32>
      %838 = arith.maximumf %736, %837 : vector<28x32xf32>
      %cst_752 = arith.constant dense<0.000000e+00> : vector<14x32xf32>
      %839 = tpu.matmul %10, %838, %cst_752 {dimension_numbers = #tpu.dot_dimension_numbers<[1], [0], [0], [1], [0, 0, 1, 1], [], []>} : vector<14x28xf32>, vector<28x32xf32>, vector<14x32xf32> -> vector<14x32xf32>
      %cst_753 = arith.constant dense<0.000000e+00> : vector<14x32xf32>
      %840 = tpu.matmul %19, %838, %cst_753 {dimension_numbers = #tpu.dot_dimension_numbers<[1], [0], [0], [1], [0, 0, 1, 1], [], []>} : vector<14x28xf32>, vector<28x32xf32>, vector<14x32xf32> -> vector<14x32xf32>
      %841 = arith.maximumf %839, %840 : vector<14x32xf32>
      %c1_i32_754 = arith.constant 1 : i32
      %842 = arith.addi %c1_i32_754, %arg16 : i32
      %843 = arith.index_cast %842 : i32 to index
      %c1_755 = arith.constant 1 : index
      %c0_756 = arith.constant 0 : index
      %844 = vector.load %arg13[%843, %c1_755, %c0_756] : memref<16x16x32xf32, #tpu.memory_space<vmem>>, vector<1x14x32xf32>
      %845 = vector.shape_cast %844 : vector<1x14x32xf32> to vector<14x32xf32>
      %846 = vector.shape_cast %841 : vector<14x32xf32> to vector<1x14x32xf32>
      tpu.vector_store %arg13[%843, %c1_755, %c0_756], %846 {strides = array<i32>} : memref<16x16x32xf32, #tpu.memory_space<vmem>>, vector<1x14x32xf32>,
    }
    %c14_i32_23 = arith.constant 14 : i32
    %c0_i32_24 = arith.constant 0 : i32
    %c7_i32 = arith.constant 7 : i32
    %65 = arith.addi %c0_i32_24, %c7_i32 : i32
    %c1_i32_25 = arith.constant 1 : i32
    scf.for %arg16 = %c0_i32_24 to %65 step %c1_i32_25  : i32 {
      %c2_i32_613 = arith.constant 2 : i32
      %637 = arith.muli %c2_i32_613, %arg16 : i32
      %cst_614 = arith.constant 0.000000e+00 : f32
      %638 = vector.broadcast %cst_614 : f32 to vector<14x64xf32>
      %c0_615 = arith.constant 0 : index
      %c0_616 = arith.constant 0 : index
      %639 = vector.load %arg5[%c0_615, %c0_616] : memref<1x64xf32, #tpu.memory_space<vmem>>, vector<1x64xf32>
      %640 = vector.broadcast %639 : vector<1x64xf32> to vector<14x64xf32>
      %641 = arith.addf %638, %640 : vector<14x64xf32>
      %c0_i32_617 = arith.constant 0 : i32
      %642 = arith.addi %637, %c0_i32_617 : i32
      %643 = arith.index_cast %642 : i32 to index
      %c0_618 = arith.constant 0 : index
      %c0_619 = arith.constant 0 : index
      %644 = vector.load %arg13[%643, %c0_618, %c0_619] : memref<16x16x32xf32, #tpu.memory_space<vmem>>, vector<1x14x32xf32>
      %645 = vector.shape_cast %644 : vector<1x14x32xf32> to vector<14x32xf32>
      %c0_620 = arith.constant 0 : index
      %c0_621 = arith.constant 0 : index
      %c0_622 = arith.constant 0 : index
      %646 = vector.load %arg4[%c0_620, %c0_621, %c0_622] : memref<9x32x64xf32, #tpu.memory_space<vmem>>, vector<1x32x64xf32>
      %647 = vector.shape_cast %646 : vector<1x32x64xf32> to vector<32x64xf32>
      %cst_623 = arith.constant dense<0.000000e+00> : vector<14x64xf32>
      %648 = tpu.matmul %645, %647, %cst_623 {dimension_numbers = #tpu.dot_dimension_numbers<[1], [0], [0], [1], [0, 0, 1, 1], [], []>} : vector<14x32xf32>, vector<32x64xf32>, vector<14x64xf32> -> vector<14x64xf32>
      %649 = arith.addf %641, %648 : vector<14x64xf32>
      %c0_i32_624 = arith.constant 0 : i32
      %650 = arith.addi %637, %c0_i32_624 : i32
      %651 = arith.index_cast %650 : i32 to index
      %c1_625 = arith.constant 1 : index
      %c0_626 = arith.constant 0 : index
      %652 = vector.load %arg13[%651, %c1_625, %c0_626] : memref<16x16x32xf32, #tpu.memory_space<vmem>>, vector<1x14x32xf32>
      %653 = vector.shape_cast %652 : vector<1x14x32xf32> to vector<14x32xf32>
      %c1_627 = arith.constant 1 : index
      %c0_628 = arith.constant 0 : index
      %c0_629 = arith.constant 0 : index
      %654 = vector.load %arg4[%c1_627, %c0_628, %c0_629] : memref<9x32x64xf32, #tpu.memory_space<vmem>>, vector<1x32x64xf32>
      %655 = vector.shape_cast %654 : vector<1x32x64xf32> to vector<32x64xf32>
      %cst_630 = arith.constant dense<0.000000e+00> : vector<14x64xf32>
      %656 = tpu.matmul %653, %655, %cst_630 {dimension_numbers = #tpu.dot_dimension_numbers<[1], [0], [0], [1], [0, 0, 1, 1], [], []>} : vector<14x32xf32>, vector<32x64xf32>, vector<14x64xf32> -> vector<14x64xf32>
      %657 = arith.addf %649, %656 : vector<14x64xf32>
      %c0_i32_631 = arith.constant 0 : i32
      %658 = arith.addi %637, %c0_i32_631 : i32
      %659 = arith.index_cast %658 : i32 to index
      %c2_632 = arith.constant 2 : index
      %c0_633 = arith.constant 0 : index
      %660 = vector.load %arg13[%659, %c2_632, %c0_633] : memref<16x16x32xf32, #tpu.memory_space<vmem>>, vector<1x14x32xf32>
      %661 = vector.shape_cast %660 : vector<1x14x32xf32> to vector<14x32xf32>
      %c2_634 = arith.constant 2 : index
      %c0_635 = arith.constant 0 : index
      %c0_636 = arith.constant 0 : index
      %662 = vector.load %arg4[%c2_634, %c0_635, %c0_636] : memref<9x32x64xf32, #tpu.memory_space<vmem>>, vector<1x32x64xf32>
      %663 = vector.shape_cast %662 : vector<1x32x64xf32> to vector<32x64xf32>
      %cst_637 = arith.constant dense<0.000000e+00> : vector<14x64xf32>
      %664 = tpu.matmul %661, %663, %cst_637 {dimension_numbers = #tpu.dot_dimension_numbers<[1], [0], [0], [1], [0, 0, 1, 1], [], []>} : vector<14x32xf32>, vector<32x64xf32>, vector<14x64xf32> -> vector<14x64xf32>
      %665 = arith.addf %657, %664 : vector<14x64xf32>
      %c1_i32_638 = arith.constant 1 : i32
      %666 = arith.addi %637, %c1_i32_638 : i32
      %667 = arith.index_cast %666 : i32 to index
      %c0_639 = arith.constant 0 : index
      %c0_640 = arith.constant 0 : index
      %668 = vector.load %arg13[%667, %c0_639, %c0_640] : memref<16x16x32xf32, #tpu.memory_space<vmem>>, vector<1x14x32xf32>
      %669 = vector.shape_cast %668 : vector<1x14x32xf32> to vector<14x32xf32>
      %c3_641 = arith.constant 3 : index
      %c0_642 = arith.constant 0 : index
      %c0_643 = arith.constant 0 : index
      %670 = vector.load %arg4[%c3_641, %c0_642, %c0_643] : memref<9x32x64xf32, #tpu.memory_space<vmem>>, vector<1x32x64xf32>
      %671 = vector.shape_cast %670 : vector<1x32x64xf32> to vector<32x64xf32>
      %cst_644 = arith.constant dense<0.000000e+00> : vector<14x64xf32>
      %672 = tpu.matmul %669, %671, %cst_644 {dimension_numbers = #tpu.dot_dimension_numbers<[1], [0], [0], [1], [0, 0, 1, 1], [], []>} : vector<14x32xf32>, vector<32x64xf32>, vector<14x64xf32> -> vector<14x64xf32>
      %673 = arith.addf %665, %672 : vector<14x64xf32>
      %c1_i32_645 = arith.constant 1 : i32
      %674 = arith.addi %637, %c1_i32_645 : i32
      %675 = arith.index_cast %674 : i32 to index
      %c1_646 = arith.constant 1 : index
      %c0_647 = arith.constant 0 : index
      %676 = vector.load %arg13[%675, %c1_646, %c0_647] : memref<16x16x32xf32, #tpu.memory_space<vmem>>, vector<1x14x32xf32>
      %677 = vector.shape_cast %676 : vector<1x14x32xf32> to vector<14x32xf32>
      %c4_648 = arith.constant 4 : index
      %c0_649 = arith.constant 0 : index
      %c0_650 = arith.constant 0 : index
      %678 = vector.load %arg4[%c4_648, %c0_649, %c0_650] : memref<9x32x64xf32, #tpu.memory_space<vmem>>, vector<1x32x64xf32>
      %679 = vector.shape_cast %678 : vector<1x32x64xf32> to vector<32x64xf32>
      %cst_651 = arith.constant dense<0.000000e+00> : vector<14x64xf32>
      %680 = tpu.matmul %677, %679, %cst_651 {dimension_numbers = #tpu.dot_dimension_numbers<[1], [0], [0], [1], [0, 0, 1, 1], [], []>} : vector<14x32xf32>, vector<32x64xf32>, vector<14x64xf32> -> vector<14x64xf32>
      %681 = arith.addf %673, %680 : vector<14x64xf32>
      %c1_i32_652 = arith.constant 1 : i32
      %682 = arith.addi %637, %c1_i32_652 : i32
      %683 = arith.index_cast %682 : i32 to index
      %c2_653 = arith.constant 2 : index
      %c0_654 = arith.constant 0 : index
      %684 = vector.load %arg13[%683, %c2_653, %c0_654] : memref<16x16x32xf32, #tpu.memory_space<vmem>>, vector<1x14x32xf32>
      %685 = vector.shape_cast %684 : vector<1x14x32xf32> to vector<14x32xf32>
      %c5_655 = arith.constant 5 : index
      %c0_656 = arith.constant 0 : index
      %c0_657 = arith.constant 0 : index
      %686 = vector.load %arg4[%c5_655, %c0_656, %c0_657] : memref<9x32x64xf32, #tpu.memory_space<vmem>>, vector<1x32x64xf32>
      %687 = vector.shape_cast %686 : vector<1x32x64xf32> to vector<32x64xf32>
      %cst_658 = arith.constant dense<0.000000e+00> : vector<14x64xf32>
      %688 = tpu.matmul %685, %687, %cst_658 {dimension_numbers = #tpu.dot_dimension_numbers<[1], [0], [0], [1], [0, 0, 1, 1], [], []>} : vector<14x32xf32>, vector<32x64xf32>, vector<14x64xf32> -> vector<14x64xf32>
      %689 = arith.addf %681, %688 : vector<14x64xf32>
      %c2_i32_659 = arith.constant 2 : i32
      %690 = arith.addi %637, %c2_i32_659 : i32
      %691 = arith.index_cast %690 : i32 to index
      %c0_660 = arith.constant 0 : index
      %c0_661 = arith.constant 0 : index
      %692 = vector.load %arg13[%691, %c0_660, %c0_661] : memref<16x16x32xf32, #tpu.memory_space<vmem>>, vector<1x14x32xf32>
      %693 = vector.shape_cast %692 : vector<1x14x32xf32> to vector<14x32xf32>
      %c6_662 = arith.constant 6 : index
      %c0_663 = arith.constant 0 : index
      %c0_664 = arith.constant 0 : index
      %694 = vector.load %arg4[%c6_662, %c0_663, %c0_664] : memref<9x32x64xf32, #tpu.memory_space<vmem>>, vector<1x32x64xf32>
      %695 = vector.shape_cast %694 : vector<1x32x64xf32> to vector<32x64xf32>
      %cst_665 = arith.constant dense<0.000000e+00> : vector<14x64xf32>
      %696 = tpu.matmul %693, %695, %cst_665 {dimension_numbers = #tpu.dot_dimension_numbers<[1], [0], [0], [1], [0, 0, 1, 1], [], []>} : vector<14x32xf32>, vector<32x64xf32>, vector<14x64xf32> -> vector<14x64xf32>
      %697 = arith.addf %689, %696 : vector<14x64xf32>
      %c2_i32_666 = arith.constant 2 : i32
      %698 = arith.addi %637, %c2_i32_666 : i32
      %699 = arith.index_cast %698 : i32 to index
      %c1_667 = arith.constant 1 : index
      %c0_668 = arith.constant 0 : index
      %700 = vector.load %arg13[%699, %c1_667, %c0_668] : memref<16x16x32xf32, #tpu.memory_space<vmem>>, vector<1x14x32xf32>
      %701 = vector.shape_cast %700 : vector<1x14x32xf32> to vector<14x32xf32>
      %c7_669 = arith.constant 7 : index
      %c0_670 = arith.constant 0 : index
      %c0_671 = arith.constant 0 : index
      %702 = vector.load %arg4[%c7_669, %c0_670, %c0_671] : memref<9x32x64xf32, #tpu.memory_space<vmem>>, vector<1x32x64xf32>
      %703 = vector.shape_cast %702 : vector<1x32x64xf32> to vector<32x64xf32>
      %cst_672 = arith.constant dense<0.000000e+00> : vector<14x64xf32>
      %704 = tpu.matmul %701, %703, %cst_672 {dimension_numbers = #tpu.dot_dimension_numbers<[1], [0], [0], [1], [0, 0, 1, 1], [], []>} : vector<14x32xf32>, vector<32x64xf32>, vector<14x64xf32> -> vector<14x64xf32>
      %705 = arith.addf %697, %704 : vector<14x64xf32>
      %c2_i32_673 = arith.constant 2 : i32
      %706 = arith.addi %637, %c2_i32_673 : i32
      %707 = arith.index_cast %706 : i32 to index
      %c2_674 = arith.constant 2 : index
      %c0_675 = arith.constant 0 : index
      %708 = vector.load %arg13[%707, %c2_674, %c0_675] : memref<16x16x32xf32, #tpu.memory_space<vmem>>, vector<1x14x32xf32>
      %709 = vector.shape_cast %708 : vector<1x14x32xf32> to vector<14x32xf32>
      %c8_676 = arith.constant 8 : index
      %c0_677 = arith.constant 0 : index
      %c0_678 = arith.constant 0 : index
      %710 = vector.load %arg4[%c8_676, %c0_677, %c0_678] : memref<9x32x64xf32, #tpu.memory_space<vmem>>, vector<1x32x64xf32>
      %711 = vector.shape_cast %710 : vector<1x32x64xf32> to vector<32x64xf32>
      %cst_679 = arith.constant dense<0.000000e+00> : vector<14x64xf32>
      %712 = tpu.matmul %709, %711, %cst_679 {dimension_numbers = #tpu.dot_dimension_numbers<[1], [0], [0], [1], [0, 0, 1, 1], [], []>} : vector<14x32xf32>, vector<32x64xf32>, vector<14x64xf32> -> vector<14x64xf32>
      %713 = arith.addf %705, %712 : vector<14x64xf32>
      %cst_680 = arith.constant 0.000000e+00 : f32
      %714 = vector.broadcast %cst_680 : f32 to vector<14x64xf32>
      %715 = arith.cmpf oge, %713, %714 : vector<14x64xf32>
      %cst_681 = arith.constant 0.00999999977 : f32
      %716 = vector.broadcast %cst_681 : f32 to vector<14x64xf32>
      %717 = arith.mulf %716, %713 : vector<14x64xf32>
      %718 = arith.select %715, %713, %717 : vector<14x64xi1>, vector<14x64xf32>
      %c2_i32_682 = arith.constant 2 : i32
      %719 = arith.muli %c2_i32_682, %arg16 : i32
      %c1_i32_683 = arith.constant 1 : i32
      %720 = arith.addi %719, %c1_i32_683 : i32
      %cst_684 = arith.constant 0.000000e+00 : f32
      %721 = vector.broadcast %cst_684 : f32 to vector<14x64xf32>
      %c0_685 = arith.constant 0 : index
      %c0_686 = arith.constant 0 : index
      %722 = vector.load %arg5[%c0_685, %c0_686] : memref<1x64xf32, #tpu.memory_space<vmem>>, vector<1x64xf32>
      %723 = vector.broadcast %722 : vector<1x64xf32> to vector<14x64xf32>
      %724 = arith.addf %721, %723 : vector<14x64xf32>
      %c0_i32_687 = arith.constant 0 : i32
      %725 = arith.addi %720, %c0_i32_687 : i32
      %726 = arith.index_cast %725 : i32 to index
      %c0_688 = arith.constant 0 : index
      %c0_689 = arith.constant 0 : index
      %727 = vector.load %arg13[%726, %c0_688, %c0_689] : memref<16x16x32xf32, #tpu.memory_space<vmem>>, vector<1x14x32xf32>
      %728 = vector.shape_cast %727 : vector<1x14x32xf32> to vector<14x32xf32>
      %c0_690 = arith.constant 0 : index
      %c0_691 = arith.constant 0 : index
      %c0_692 = arith.constant 0 : index
      %729 = vector.load %arg4[%c0_690, %c0_691, %c0_692] : memref<9x32x64xf32, #tpu.memory_space<vmem>>, vector<1x32x64xf32>
      %730 = vector.shape_cast %729 : vector<1x32x64xf32> to vector<32x64xf32>
      %cst_693 = arith.constant dense<0.000000e+00> : vector<14x64xf32>
      %731 = tpu.matmul %728, %730, %cst_693 {dimension_numbers = #tpu.dot_dimension_numbers<[1], [0], [0], [1], [0, 0, 1, 1], [], []>} : vector<14x32xf32>, vector<32x64xf32>, vector<14x64xf32> -> vector<14x64xf32>
      %732 = arith.addf %724, %731 : vector<14x64xf32>
      %c0_i32_694 = arith.constant 0 : i32
      %733 = arith.addi %720, %c0_i32_694 : i32
      %734 = arith.index_cast %733 : i32 to index
      %c1_695 = arith.constant 1 : index
      %c0_696 = arith.constant 0 : index
      %735 = vector.load %arg13[%734, %c1_695, %c0_696] : memref<16x16x32xf32, #tpu.memory_space<vmem>>, vector<1x14x32xf32>
      %736 = vector.shape_cast %735 : vector<1x14x32xf32> to vector<14x32xf32>
      %c1_697 = arith.constant 1 : index
      %c0_698 = arith.constant 0 : index
      %c0_699 = arith.constant 0 : index
      %737 = vector.load %arg4[%c1_697, %c0_698, %c0_699] : memref<9x32x64xf32, #tpu.memory_space<vmem>>, vector<1x32x64xf32>
      %738 = vector.shape_cast %737 : vector<1x32x64xf32> to vector<32x64xf32>
      %cst_700 = arith.constant dense<0.000000e+00> : vector<14x64xf32>
      %739 = tpu.matmul %736, %738, %cst_700 {dimension_numbers = #tpu.dot_dimension_numbers<[1], [0], [0], [1], [0, 0, 1, 1], [], []>} : vector<14x32xf32>, vector<32x64xf32>, vector<14x64xf32> -> vector<14x64xf32>
      %740 = arith.addf %732, %739 : vector<14x64xf32>
      %c0_i32_701 = arith.constant 0 : i32
      %741 = arith.addi %720, %c0_i32_701 : i32
      %742 = arith.index_cast %741 : i32 to index
      %c2_702 = arith.constant 2 : index
      %c0_703 = arith.constant 0 : index
      %743 = vector.load %arg13[%742, %c2_702, %c0_703] : memref<16x16x32xf32, #tpu.memory_space<vmem>>, vector<1x14x32xf32>
      %744 = vector.shape_cast %743 : vector<1x14x32xf32> to vector<14x32xf32>
      %c2_704 = arith.constant 2 : index
      %c0_705 = arith.constant 0 : index
      %c0_706 = arith.constant 0 : index
      %745 = vector.load %arg4[%c2_704, %c0_705, %c0_706] : memref<9x32x64xf32, #tpu.memory_space<vmem>>, vector<1x32x64xf32>
      %746 = vector.shape_cast %745 : vector<1x32x64xf32> to vector<32x64xf32>
      %cst_707 = arith.constant dense<0.000000e+00> : vector<14x64xf32>
      %747 = tpu.matmul %744, %746, %cst_707 {dimension_numbers = #tpu.dot_dimension_numbers<[1], [0], [0], [1], [0, 0, 1, 1], [], []>} : vector<14x32xf32>, vector<32x64xf32>, vector<14x64xf32> -> vector<14x64xf32>
      %748 = arith.addf %740, %747 : vector<14x64xf32>
      %c1_i32_708 = arith.constant 1 : i32
      %749 = arith.addi %720, %c1_i32_708 : i32
      %750 = arith.index_cast %749 : i32 to index
      %c0_709 = arith.constant 0 : index
      %c0_710 = arith.constant 0 : index
      %751 = vector.load %arg13[%750, %c0_709, %c0_710] : memref<16x16x32xf32, #tpu.memory_space<vmem>>, vector<1x14x32xf32>
      %752 = vector.shape_cast %751 : vector<1x14x32xf32> to vector<14x32xf32>
      %c3_711 = arith.constant 3 : index
      %c0_712 = arith.constant 0 : index
      %c0_713 = arith.constant 0 : index
      %753 = vector.load %arg4[%c3_711, %c0_712, %c0_713] : memref<9x32x64xf32, #tpu.memory_space<vmem>>, vector<1x32x64xf32>
      %754 = vector.shape_cast %753 : vector<1x32x64xf32> to vector<32x64xf32>
      %cst_714 = arith.constant dense<0.000000e+00> : vector<14x64xf32>
      %755 = tpu.matmul %752, %754, %cst_714 {dimension_numbers = #tpu.dot_dimension_numbers<[1], [0], [0], [1], [0, 0, 1, 1], [], []>} : vector<14x32xf32>, vector<32x64xf32>, vector<14x64xf32> -> vector<14x64xf32>
      %756 = arith.addf %748, %755 : vector<14x64xf32>
      %c1_i32_715 = arith.constant 1 : i32
      %757 = arith.addi %720, %c1_i32_715 : i32
      %758 = arith.index_cast %757 : i32 to index
      %c1_716 = arith.constant 1 : index
      %c0_717 = arith.constant 0 : index
      %759 = vector.load %arg13[%758, %c1_716, %c0_717] : memref<16x16x32xf32, #tpu.memory_space<vmem>>, vector<1x14x32xf32>
      %760 = vector.shape_cast %759 : vector<1x14x32xf32> to vector<14x32xf32>
      %c4_718 = arith.constant 4 : index
      %c0_719 = arith.constant 0 : index
      %c0_720 = arith.constant 0 : index
      %761 = vector.load %arg4[%c4_718, %c0_719, %c0_720] : memref<9x32x64xf32, #tpu.memory_space<vmem>>, vector<1x32x64xf32>
      %762 = vector.shape_cast %761 : vector<1x32x64xf32> to vector<32x64xf32>
      %cst_721 = arith.constant dense<0.000000e+00> : vector<14x64xf32>
      %763 = tpu.matmul %760, %762, %cst_721 {dimension_numbers = #tpu.dot_dimension_numbers<[1], [0], [0], [1], [0, 0, 1, 1], [], []>} : vector<14x32xf32>, vector<32x64xf32>, vector<14x64xf32> -> vector<14x64xf32>
      %764 = arith.addf %756, %763 : vector<14x64xf32>
      %c1_i32_722 = arith.constant 1 : i32
      %765 = arith.addi %720, %c1_i32_722 : i32
      %766 = arith.index_cast %765 : i32 to index
      %c2_723 = arith.constant 2 : index
      %c0_724 = arith.constant 0 : index
      %767 = vector.load %arg13[%766, %c2_723, %c0_724] : memref<16x16x32xf32, #tpu.memory_space<vmem>>, vector<1x14x32xf32>
      %768 = vector.shape_cast %767 : vector<1x14x32xf32> to vector<14x32xf32>
      %c5_725 = arith.constant 5 : index
      %c0_726 = arith.constant 0 : index
      %c0_727 = arith.constant 0 : index
      %769 = vector.load %arg4[%c5_725, %c0_726, %c0_727] : memref<9x32x64xf32, #tpu.memory_space<vmem>>, vector<1x32x64xf32>
      %770 = vector.shape_cast %769 : vector<1x32x64xf32> to vector<32x64xf32>
      %cst_728 = arith.constant dense<0.000000e+00> : vector<14x64xf32>
      %771 = tpu.matmul %768, %770, %cst_728 {dimension_numbers = #tpu.dot_dimension_numbers<[1], [0], [0], [1], [0, 0, 1, 1], [], []>} : vector<14x32xf32>, vector<32x64xf32>, vector<14x64xf32> -> vector<14x64xf32>
      %772 = arith.addf %764, %771 : vector<14x64xf32>
      %c2_i32_729 = arith.constant 2 : i32
      %773 = arith.addi %720, %c2_i32_729 : i32
      %774 = arith.index_cast %773 : i32 to index
      %c0_730 = arith.constant 0 : index
      %c0_731 = arith.constant 0 : index
      %775 = vector.load %arg13[%774, %c0_730, %c0_731] : memref<16x16x32xf32, #tpu.memory_space<vmem>>, vector<1x14x32xf32>
      %776 = vector.shape_cast %775 : vector<1x14x32xf32> to vector<14x32xf32>
      %c6_732 = arith.constant 6 : index
      %c0_733 = arith.constant 0 : index
      %c0_734 = arith.constant 0 : index
      %777 = vector.load %arg4[%c6_732, %c0_733, %c0_734] : memref<9x32x64xf32, #tpu.memory_space<vmem>>, vector<1x32x64xf32>
      %778 = vector.shape_cast %777 : vector<1x32x64xf32> to vector<32x64xf32>
      %cst_735 = arith.constant dense<0.000000e+00> : vector<14x64xf32>
      %779 = tpu.matmul %776, %778, %cst_735 {dimension_numbers = #tpu.dot_dimension_numbers<[1], [0], [0], [1], [0, 0, 1, 1], [], []>} : vector<14x32xf32>, vector<32x64xf32>, vector<14x64xf32> -> vector<14x64xf32>
      %780 = arith.addf %772, %779 : vector<14x64xf32>
      %c2_i32_736 = arith.constant 2 : i32
      %781 = arith.addi %720, %c2_i32_736 : i32
      %782 = arith.index_cast %781 : i32 to index
      %c1_737 = arith.constant 1 : index
      %c0_738 = arith.constant 0 : index
      %783 = vector.load %arg13[%782, %c1_737, %c0_738] : memref<16x16x32xf32, #tpu.memory_space<vmem>>, vector<1x14x32xf32>
      %784 = vector.shape_cast %783 : vector<1x14x32xf32> to vector<14x32xf32>
      %c7_739 = arith.constant 7 : index
      %c0_740 = arith.constant 0 : index
      %c0_741 = arith.constant 0 : index
      %785 = vector.load %arg4[%c7_739, %c0_740, %c0_741] : memref<9x32x64xf32, #tpu.memory_space<vmem>>, vector<1x32x64xf32>
      %786 = vector.shape_cast %785 : vector<1x32x64xf32> to vector<32x64xf32>
      %cst_742 = arith.constant dense<0.000000e+00> : vector<14x64xf32>
      %787 = tpu.matmul %784, %786, %cst_742 {dimension_numbers = #tpu.dot_dimension_numbers<[1], [0], [0], [1], [0, 0, 1, 1], [], []>} : vector<14x32xf32>, vector<32x64xf32>, vector<14x64xf32> -> vector<14x64xf32>
      %788 = arith.addf %780, %787 : vector<14x64xf32>
      %c2_i32_743 = arith.constant 2 : i32
      %789 = arith.addi %720, %c2_i32_743 : i32
      %790 = arith.index_cast %789 : i32 to index
      %c2_744 = arith.constant 2 : index
      %c0_745 = arith.constant 0 : index
      %791 = vector.load %arg13[%790, %c2_744, %c0_745] : memref<16x16x32xf32, #tpu.memory_space<vmem>>, vector<1x14x32xf32>
      %792 = vector.shape_cast %791 : vector<1x14x32xf32> to vector<14x32xf32>
      %c8_746 = arith.constant 8 : index
      %c0_747 = arith.constant 0 : index
      %c0_748 = arith.constant 0 : index
      %793 = vector.load %arg4[%c8_746, %c0_747, %c0_748] : memref<9x32x64xf32, #tpu.memory_space<vmem>>, vector<1x32x64xf32>
      %794 = vector.shape_cast %793 : vector<1x32x64xf32> to vector<32x64xf32>
      %cst_749 = arith.constant dense<0.000000e+00> : vector<14x64xf32>
      %795 = tpu.matmul %792, %794, %cst_749 {dimension_numbers = #tpu.dot_dimension_numbers<[1], [0], [0], [1], [0, 0, 1, 1], [], []>} : vector<14x32xf32>, vector<32x64xf32>, vector<14x64xf32> -> vector<14x64xf32>
      %796 = arith.addf %788, %795 : vector<14x64xf32>
      %cst_750 = arith.constant 0.000000e+00 : f32
      %797 = vector.broadcast %cst_750 : f32 to vector<14x64xf32>
      %798 = arith.cmpf oge, %796, %797 : vector<14x64xf32>
      %cst_751 = arith.constant 0.00999999977 : f32
      %799 = vector.broadcast %cst_751 : f32 to vector<14x64xf32>
      %800 = arith.mulf %799, %796 : vector<14x64xf32>
      %801 = arith.select %798, %796, %800 : vector<14x64xi1>, vector<14x64xf32>
      %802 = arith.maximumf %718, %801 : vector<14x64xf32>
      %cst_752 = arith.constant dense<0.000000e+00> : vector<7x64xf32>
      %803 = tpu.matmul %30, %802, %cst_752 {dimension_numbers = #tpu.dot_dimension_numbers<[1], [0], [0], [1], [0, 0, 1, 1], [], []>} : vector<7x14xf32>, vector<14x64xf32>, vector<7x64xf32> -> vector<7x64xf32>
      %cst_753 = arith.constant dense<0.000000e+00> : vector<7x64xf32>
      %804 = tpu.matmul %39, %802, %cst_753 {dimension_numbers = #tpu.dot_dimension_numbers<[1], [0], [0], [1], [0, 0, 1, 1], [], []>} : vector<7x14xf32>, vector<14x64xf32>, vector<7x64xf32> -> vector<7x64xf32>
      %805 = arith.maximumf %803, %804 : vector<7x64xf32>
      %c1_i32_754 = arith.constant 1 : i32
      %806 = arith.addi %c1_i32_754, %arg16 : i32
      %807 = arith.index_cast %806 : i32 to index
      %c1_755 = arith.constant 1 : index
      %c0_756 = arith.constant 0 : index
      %808 = vector.load %arg14[%807, %c1_755, %c0_756] : memref<9x9x64xf32, #tpu.memory_space<vmem>>, vector<1x7x64xf32>
      %809 = vector.shape_cast %808 : vector<1x7x64xf32> to vector<7x64xf32>
      %810 = vector.shape_cast %805 : vector<7x64xf32> to vector<1x7x64xf32>
      tpu.vector_store %arg14[%807, %c1_755, %c0_756], %810 {strides = array<i32>} : memref<9x9x64xf32, #tpu.memory_space<vmem>>, vector<1x7x64xf32>,
    }
    %c7_i32_26 = arith.constant 7 : i32
    %cst_27 = arith.constant 0.000000e+00 : f32
    %66 = vector.broadcast %cst_27 : f32 to vector<7x128xf32>
    %c0_28 = arith.constant 0 : index
    %c0_29 = arith.constant 0 : index
    %67 = vector.load %arg7[%c0_28, %c0_29] : memref<1x128xf32, #tpu.memory_space<vmem>>, vector<1x128xf32>
    %68 = vector.broadcast %67 : vector<1x128xf32> to vector<7x128xf32>
    %69 = arith.addf %66, %68 : vector<7x128xf32>
    %c0_30 = arith.constant 0 : index
    %c0_31 = arith.constant 0 : index
    %c0_32 = arith.constant 0 : index
    %70 = vector.load %arg14[%c0_30, %c0_31, %c0_32] : memref<9x9x64xf32, #tpu.memory_space<vmem>>, vector<1x7x64xf32>
    %71 = vector.shape_cast %70 : vector<1x7x64xf32> to vector<7x64xf32>
    %c0_33 = arith.constant 0 : index
    %c0_34 = arith.constant 0 : index
    %c0_35 = arith.constant 0 : index
    %72 = vector.load %arg6[%c0_33, %c0_34, %c0_35] : memref<9x64x128xf32, #tpu.memory_space<vmem>>, vector<1x64x128xf32>
    %73 = vector.shape_cast %72 : vector<1x64x128xf32> to vector<64x128xf32>
    %cst_36 = arith.constant dense<0.000000e+00> : vector<7x128xf32>
    %74 = tpu.matmul %71, %73, %cst_36 {dimension_numbers = #tpu.dot_dimension_numbers<[1], [0], [0], [1], [0, 0, 1, 1], [], []>} : vector<7x64xf32>, vector<64x128xf32>, vector<7x128xf32> -> vector<7x128xf32>
    %75 = arith.addf %69, %74 : vector<7x128xf32>
    %c0_37 = arith.constant 0 : index
    %c1 = arith.constant 1 : index
    %c0_38 = arith.constant 0 : index
    %76 = vector.load %arg14[%c0_37, %c1, %c0_38] : memref<9x9x64xf32, #tpu.memory_space<vmem>>, vector<1x7x64xf32>
    %77 = vector.shape_cast %76 : vector<1x7x64xf32> to vector<7x64xf32>
    %c1_39 = arith.constant 1 : index
    %c0_40 = arith.constant 0 : index
    %c0_41 = arith.constant 0 : index
    %78 = vector.load %arg6[%c1_39, %c0_40, %c0_41] : memref<9x64x128xf32, #tpu.memory_space<vmem>>, vector<1x64x128xf32>
    %79 = vector.shape_cast %78 : vector<1x64x128xf32> to vector<64x128xf32>
    %cst_42 = arith.constant dense<0.000000e+00> : vector<7x128xf32>
    %80 = tpu.matmul %77, %79, %cst_42 {dimension_numbers = #tpu.dot_dimension_numbers<[1], [0], [0], [1], [0, 0, 1, 1], [], []>} : vector<7x64xf32>, vector<64x128xf32>, vector<7x128xf32> -> vector<7x128xf32>
    %81 = arith.addf %75, %80 : vector<7x128xf32>
    %c0_43 = arith.constant 0 : index
    %c2 = arith.constant 2 : index
    %c0_44 = arith.constant 0 : index
    %82 = vector.load %arg14[%c0_43, %c2, %c0_44] : memref<9x9x64xf32, #tpu.memory_space<vmem>>, vector<1x7x64xf32>
    %83 = vector.shape_cast %82 : vector<1x7x64xf32> to vector<7x64xf32>
    %c2_45 = arith.constant 2 : index
    %c0_46 = arith.constant 0 : index
    %c0_47 = arith.constant 0 : index
    %84 = vector.load %arg6[%c2_45, %c0_46, %c0_47] : memref<9x64x128xf32, #tpu.memory_space<vmem>>, vector<1x64x128xf32>
    %85 = vector.shape_cast %84 : vector<1x64x128xf32> to vector<64x128xf32>
    %cst_48 = arith.constant dense<0.000000e+00> : vector<7x128xf32>
    %86 = tpu.matmul %83, %85, %cst_48 {dimension_numbers = #tpu.dot_dimension_numbers<[1], [0], [0], [1], [0, 0, 1, 1], [], []>} : vector<7x64xf32>, vector<64x128xf32>, vector<7x128xf32> -> vector<7x128xf32>
    %87 = arith.addf %81, %86 : vector<7x128xf32>
    %c1_49 = arith.constant 1 : index
    %c0_50 = arith.constant 0 : index
    %c0_51 = arith.constant 0 : index
    %88 = vector.load %arg14[%c1_49, %c0_50, %c0_51] : memref<9x9x64xf32, #tpu.memory_space<vmem>>, vector<1x7x64xf32>
    %89 = vector.shape_cast %88 : vector<1x7x64xf32> to vector<7x64xf32>
    %c3 = arith.constant 3 : index
    %c0_52 = arith.constant 0 : index
    %c0_53 = arith.constant 0 : index
    %90 = vector.load %arg6[%c3, %c0_52, %c0_53] : memref<9x64x128xf32, #tpu.memory_space<vmem>>, vector<1x64x128xf32>
    %91 = vector.shape_cast %90 : vector<1x64x128xf32> to vector<64x128xf32>
    %cst_54 = arith.constant dense<0.000000e+00> : vector<7x128xf32>
    %92 = tpu.matmul %89, %91, %cst_54 {dimension_numbers = #tpu.dot_dimension_numbers<[1], [0], [0], [1], [0, 0, 1, 1], [], []>} : vector<7x64xf32>, vector<64x128xf32>, vector<7x128xf32> -> vector<7x128xf32>
    %93 = arith.addf %87, %92 : vector<7x128xf32>
    %c1_55 = arith.constant 1 : index
    %c1_56 = arith.constant 1 : index
    %c0_57 = arith.constant 0 : index
    %94 = vector.load %arg14[%c1_55, %c1_56, %c0_57] : memref<9x9x64xf32, #tpu.memory_space<vmem>>, vector<1x7x64xf32>
    %95 = vector.shape_cast %94 : vector<1x7x64xf32> to vector<7x64xf32>
    %c4 = arith.constant 4 : index
    %c0_58 = arith.constant 0 : index
    %c0_59 = arith.constant 0 : index
    %96 = vector.load %arg6[%c4, %c0_58, %c0_59] : memref<9x64x128xf32, #tpu.memory_space<vmem>>, vector<1x64x128xf32>
    %97 = vector.shape_cast %96 : vector<1x64x128xf32> to vector<64x128xf32>
    %cst_60 = arith.constant dense<0.000000e+00> : vector<7x128xf32>
    %98 = tpu.matmul %95, %97, %cst_60 {dimension_numbers = #tpu.dot_dimension_numbers<[1], [0], [0], [1], [0, 0, 1, 1], [], []>} : vector<7x64xf32>, vector<64x128xf32>, vector<7x128xf32> -> vector<7x128xf32>
    %99 = arith.addf %93, %98 : vector<7x128xf32>
    %c1_61 = arith.constant 1 : index
    %c2_62 = arith.constant 2 : index
    %c0_63 = arith.constant 0 : index
    %100 = vector.load %arg14[%c1_61, %c2_62, %c0_63] : memref<9x9x64xf32, #tpu.memory_space<vmem>>, vector<1x7x64xf32>
    %101 = vector.shape_cast %100 : vector<1x7x64xf32> to vector<7x64xf32>
    %c5 = arith.constant 5 : index
    %c0_64 = arith.constant 0 : index
    %c0_65 = arith.constant 0 : index
    %102 = vector.load %arg6[%c5, %c0_64, %c0_65] : memref<9x64x128xf32, #tpu.memory_space<vmem>>, vector<1x64x128xf32>
    %103 = vector.shape_cast %102 : vector<1x64x128xf32> to vector<64x128xf32>
    %cst_66 = arith.constant dense<0.000000e+00> : vector<7x128xf32>
    %104 = tpu.matmul %101, %103, %cst_66 {dimension_numbers = #tpu.dot_dimension_numbers<[1], [0], [0], [1], [0, 0, 1, 1], [], []>} : vector<7x64xf32>, vector<64x128xf32>, vector<7x128xf32> -> vector<7x128xf32>
    %105 = arith.addf %99, %104 : vector<7x128xf32>
    %c2_67 = arith.constant 2 : index
    %c0_68 = arith.constant 0 : index
    %c0_69 = arith.constant 0 : index
    %106 = vector.load %arg14[%c2_67, %c0_68, %c0_69] : memref<9x9x64xf32, #tpu.memory_space<vmem>>, vector<1x7x64xf32>
    %107 = vector.shape_cast %106 : vector<1x7x64xf32> to vector<7x64xf32>
    %c6 = arith.constant 6 : index
    %c0_70 = arith.constant 0 : index
    %c0_71 = arith.constant 0 : index
    %108 = vector.load %arg6[%c6, %c0_70, %c0_71] : memref<9x64x128xf32, #tpu.memory_space<vmem>>, vector<1x64x128xf32>
    %109 = vector.shape_cast %108 : vector<1x64x128xf32> to vector<64x128xf32>
    %cst_72 = arith.constant dense<0.000000e+00> : vector<7x128xf32>
    %110 = tpu.matmul %107, %109, %cst_72 {dimension_numbers = #tpu.dot_dimension_numbers<[1], [0], [0], [1], [0, 0, 1, 1], [], []>} : vector<7x64xf32>, vector<64x128xf32>, vector<7x128xf32> -> vector<7x128xf32>
    %111 = arith.addf %105, %110 : vector<7x128xf32>
    %c2_73 = arith.constant 2 : index
    %c1_74 = arith.constant 1 : index
    %c0_75 = arith.constant 0 : index
    %112 = vector.load %arg14[%c2_73, %c1_74, %c0_75] : memref<9x9x64xf32, #tpu.memory_space<vmem>>, vector<1x7x64xf32>
    %113 = vector.shape_cast %112 : vector<1x7x64xf32> to vector<7x64xf32>
    %c7 = arith.constant 7 : index
    %c0_76 = arith.constant 0 : index
    %c0_77 = arith.constant 0 : index
    %114 = vector.load %arg6[%c7, %c0_76, %c0_77] : memref<9x64x128xf32, #tpu.memory_space<vmem>>, vector<1x64x128xf32>
    %115 = vector.shape_cast %114 : vector<1x64x128xf32> to vector<64x128xf32>
    %cst_78 = arith.constant dense<0.000000e+00> : vector<7x128xf32>
    %116 = tpu.matmul %113, %115, %cst_78 {dimension_numbers = #tpu.dot_dimension_numbers<[1], [0], [0], [1], [0, 0, 1, 1], [], []>} : vector<7x64xf32>, vector<64x128xf32>, vector<7x128xf32> -> vector<7x128xf32>
    %117 = arith.addf %111, %116 : vector<7x128xf32>
    %c2_79 = arith.constant 2 : index
    %c2_80 = arith.constant 2 : index
    %c0_81 = arith.constant 0 : index
    %118 = vector.load %arg14[%c2_79, %c2_80, %c0_81] : memref<9x9x64xf32, #tpu.memory_space<vmem>>, vector<1x7x64xf32>
    %119 = vector.shape_cast %118 : vector<1x7x64xf32> to vector<7x64xf32>
    %c8 = arith.constant 8 : index
    %c0_82 = arith.constant 0 : index
    %c0_83 = arith.constant 0 : index
    %120 = vector.load %arg6[%c8, %c0_82, %c0_83] : memref<9x64x128xf32, #tpu.memory_space<vmem>>, vector<1x64x128xf32>
    %121 = vector.shape_cast %120 : vector<1x64x128xf32> to vector<64x128xf32>
    %cst_84 = arith.constant dense<0.000000e+00> : vector<7x128xf32>
    %122 = tpu.matmul %119, %121, %cst_84 {dimension_numbers = #tpu.dot_dimension_numbers<[1], [0], [0], [1], [0, 0, 1, 1], [], []>} : vector<7x64xf32>, vector<64x128xf32>, vector<7x128xf32> -> vector<7x128xf32>
    %123 = arith.addf %117, %122 : vector<7x128xf32>
    %cst_85 = arith.constant 0.000000e+00 : f32
    %124 = vector.broadcast %cst_85 : f32 to vector<7x128xf32>
    %125 = arith.cmpf oge, %123, %124 : vector<7x128xf32>
    %cst_86 = arith.constant 0.00999999977 : f32
    %126 = vector.broadcast %cst_86 : f32 to vector<7x128xf32>
    %127 = arith.mulf %126, %123 : vector<7x128xf32>
    %128 = arith.select %125, %123, %127 : vector<7x128xi1>, vector<7x128xf32>
    %cst_87 = arith.constant dense<0.000000e+00> : vector<4x128xf32>
    %129 = tpu.matmul %50, %128, %cst_87 {dimension_numbers = #tpu.dot_dimension_numbers<[1], [0], [0], [1], [0, 0, 1, 1], [], []>} : vector<4x7xf32>, vector<7x128xf32>, vector<4x128xf32> -> vector<4x128xf32>
    %cst_88 = arith.constant dense<0.000000e+00> : vector<4x128xf32>
    %130 = tpu.matmul %59, %128, %cst_88 {dimension_numbers = #tpu.dot_dimension_numbers<[1], [0], [0], [1], [0, 0, 1, 1], [], []>} : vector<4x7xf32>, vector<7x128xf32>, vector<4x128xf32> -> vector<4x128xf32>
    %131 = arith.maximumf %129, %130 : vector<4x128xf32>
    %c0_89 = arith.constant 0 : index
    %c0_90 = arith.constant 0 : index
    %132 = vector.load %arg15[%c0_89, %c0_90] : memref<16x128xf32, #tpu.memory_space<vmem>>, vector<4x128xf32>
    tpu.vector_store %arg15[%c0_89, %c0_90], %131 {strides = array<i32>} : memref<16x128xf32, #tpu.memory_space<vmem>>, vector<4x128xf32>,
    %cst_91 = arith.constant 0.000000e+00 : f32
    %133 = vector.broadcast %cst_91 : f32 to vector<7x128xf32>
    %c0_92 = arith.constant 0 : index
    %c0_93 = arith.constant 0 : index
    %134 = vector.load %arg7[%c0_92, %c0_93] : memref<1x128xf32, #tpu.memory_space<vmem>>, vector<1x128xf32>
    %135 = vector.broadcast %134 : vector<1x128xf32> to vector<7x128xf32>
    %136 = arith.addf %133, %135 : vector<7x128xf32>
    %c1_94 = arith.constant 1 : index
    %c0_95 = arith.constant 0 : index
    %c0_96 = arith.constant 0 : index
    %137 = vector.load %arg14[%c1_94, %c0_95, %c0_96] : memref<9x9x64xf32, #tpu.memory_space<vmem>>, vector<1x7x64xf32>
    %138 = vector.shape_cast %137 : vector<1x7x64xf32> to vector<7x64xf32>
    %c0_97 = arith.constant 0 : index
    %c0_98 = arith.constant 0 : index
    %c0_99 = arith.constant 0 : index
    %139 = vector.load %arg6[%c0_97, %c0_98, %c0_99] : memref<9x64x128xf32, #tpu.memory_space<vmem>>, vector<1x64x128xf32>
    %140 = vector.shape_cast %139 : vector<1x64x128xf32> to vector<64x128xf32>
    %cst_100 = arith.constant dense<0.000000e+00> : vector<7x128xf32>
    %141 = tpu.matmul %138, %140, %cst_100 {dimension_numbers = #tpu.dot_dimension_numbers<[1], [0], [0], [1], [0, 0, 1, 1], [], []>} : vector<7x64xf32>, vector<64x128xf32>, vector<7x128xf32> -> vector<7x128xf32>
    %142 = arith.addf %136, %141 : vector<7x128xf32>
    %c1_101 = arith.constant 1 : index
    %c1_102 = arith.constant 1 : index
    %c0_103 = arith.constant 0 : index
    %143 = vector.load %arg14[%c1_101, %c1_102, %c0_103] : memref<9x9x64xf32, #tpu.memory_space<vmem>>, vector<1x7x64xf32>
    %144 = vector.shape_cast %143 : vector<1x7x64xf32> to vector<7x64xf32>
    %c1_104 = arith.constant 1 : index
    %c0_105 = arith.constant 0 : index
    %c0_106 = arith.constant 0 : index
    %145 = vector.load %arg6[%c1_104, %c0_105, %c0_106] : memref<9x64x128xf32, #tpu.memory_space<vmem>>, vector<1x64x128xf32>
    %146 = vector.shape_cast %145 : vector<1x64x128xf32> to vector<64x128xf32>
    %cst_107 = arith.constant dense<0.000000e+00> : vector<7x128xf32>
    %147 = tpu.matmul %144, %146, %cst_107 {dimension_numbers = #tpu.dot_dimension_numbers<[1], [0], [0], [1], [0, 0, 1, 1], [], []>} : vector<7x64xf32>, vector<64x128xf32>, vector<7x128xf32> -> vector<7x128xf32>
    %148 = arith.addf %142, %147 : vector<7x128xf32>
    %c1_108 = arith.constant 1 : index
    %c2_109 = arith.constant 2 : index
    %c0_110 = arith.constant 0 : index
    %149 = vector.load %arg14[%c1_108, %c2_109, %c0_110] : memref<9x9x64xf32, #tpu.memory_space<vmem>>, vector<1x7x64xf32>
    %150 = vector.shape_cast %149 : vector<1x7x64xf32> to vector<7x64xf32>
    %c2_111 = arith.constant 2 : index
    %c0_112 = arith.constant 0 : index
    %c0_113 = arith.constant 0 : index
    %151 = vector.load %arg6[%c2_111, %c0_112, %c0_113] : memref<9x64x128xf32, #tpu.memory_space<vmem>>, vector<1x64x128xf32>
    %152 = vector.shape_cast %151 : vector<1x64x128xf32> to vector<64x128xf32>
    %cst_114 = arith.constant dense<0.000000e+00> : vector<7x128xf32>
    %153 = tpu.matmul %150, %152, %cst_114 {dimension_numbers = #tpu.dot_dimension_numbers<[1], [0], [0], [1], [0, 0, 1, 1], [], []>} : vector<7x64xf32>, vector<64x128xf32>, vector<7x128xf32> -> vector<7x128xf32>
    %154 = arith.addf %148, %153 : vector<7x128xf32>
    %c2_115 = arith.constant 2 : index
    %c0_116 = arith.constant 0 : index
    %c0_117 = arith.constant 0 : index
    %155 = vector.load %arg14[%c2_115, %c0_116, %c0_117] : memref<9x9x64xf32, #tpu.memory_space<vmem>>, vector<1x7x64xf32>
    %156 = vector.shape_cast %155 : vector<1x7x64xf32> to vector<7x64xf32>
    %c3_118 = arith.constant 3 : index
    %c0_119 = arith.constant 0 : index
    %c0_120 = arith.constant 0 : index
    %157 = vector.load %arg6[%c3_118, %c0_119, %c0_120] : memref<9x64x128xf32, #tpu.memory_space<vmem>>, vector<1x64x128xf32>
    %158 = vector.shape_cast %157 : vector<1x64x128xf32> to vector<64x128xf32>
    %cst_121 = arith.constant dense<0.000000e+00> : vector<7x128xf32>
    %159 = tpu.matmul %156, %158, %cst_121 {dimension_numbers = #tpu.dot_dimension_numbers<[1], [0], [0], [1], [0, 0, 1, 1], [], []>} : vector<7x64xf32>, vector<64x128xf32>, vector<7x128xf32> -> vector<7x128xf32>
    %160 = arith.addf %154, %159 : vector<7x128xf32>
    %c2_122 = arith.constant 2 : index
    %c1_123 = arith.constant 1 : index
    %c0_124 = arith.constant 0 : index
    %161 = vector.load %arg14[%c2_122, %c1_123, %c0_124] : memref<9x9x64xf32, #tpu.memory_space<vmem>>, vector<1x7x64xf32>
    %162 = vector.shape_cast %161 : vector<1x7x64xf32> to vector<7x64xf32>
    %c4_125 = arith.constant 4 : index
    %c0_126 = arith.constant 0 : index
    %c0_127 = arith.constant 0 : index
    %163 = vector.load %arg6[%c4_125, %c0_126, %c0_127] : memref<9x64x128xf32, #tpu.memory_space<vmem>>, vector<1x64x128xf32>
    %164 = vector.shape_cast %163 : vector<1x64x128xf32> to vector<64x128xf32>
    %cst_128 = arith.constant dense<0.000000e+00> : vector<7x128xf32>
    %165 = tpu.matmul %162, %164, %cst_128 {dimension_numbers = #tpu.dot_dimension_numbers<[1], [0], [0], [1], [0, 0, 1, 1], [], []>} : vector<7x64xf32>, vector<64x128xf32>, vector<7x128xf32> -> vector<7x128xf32>
    %166 = arith.addf %160, %165 : vector<7x128xf32>
    %c2_129 = arith.constant 2 : index
    %c2_130 = arith.constant 2 : index
    %c0_131 = arith.constant 0 : index
    %167 = vector.load %arg14[%c2_129, %c2_130, %c0_131] : memref<9x9x64xf32, #tpu.memory_space<vmem>>, vector<1x7x64xf32>
    %168 = vector.shape_cast %167 : vector<1x7x64xf32> to vector<7x64xf32>
    %c5_132 = arith.constant 5 : index
    %c0_133 = arith.constant 0 : index
    %c0_134 = arith.constant 0 : index
    %169 = vector.load %arg6[%c5_132, %c0_133, %c0_134] : memref<9x64x128xf32, #tpu.memory_space<vmem>>, vector<1x64x128xf32>
    %170 = vector.shape_cast %169 : vector<1x64x128xf32> to vector<64x128xf32>
    %cst_135 = arith.constant dense<0.000000e+00> : vector<7x128xf32>
    %171 = tpu.matmul %168, %170, %cst_135 {dimension_numbers = #tpu.dot_dimension_numbers<[1], [0], [0], [1], [0, 0, 1, 1], [], []>} : vector<7x64xf32>, vector<64x128xf32>, vector<7x128xf32> -> vector<7x128xf32>
    %172 = arith.addf %166, %171 : vector<7x128xf32>
    %c3_136 = arith.constant 3 : index
    %c0_137 = arith.constant 0 : index
    %c0_138 = arith.constant 0 : index
    %173 = vector.load %arg14[%c3_136, %c0_137, %c0_138] : memref<9x9x64xf32, #tpu.memory_space<vmem>>, vector<1x7x64xf32>
    %174 = vector.shape_cast %173 : vector<1x7x64xf32> to vector<7x64xf32>
    %c6_139 = arith.constant 6 : index
    %c0_140 = arith.constant 0 : index
    %c0_141 = arith.constant 0 : index
    %175 = vector.load %arg6[%c6_139, %c0_140, %c0_141] : memref<9x64x128xf32, #tpu.memory_space<vmem>>, vector<1x64x128xf32>
    %176 = vector.shape_cast %175 : vector<1x64x128xf32> to vector<64x128xf32>
    %cst_142 = arith.constant dense<0.000000e+00> : vector<7x128xf32>
    %177 = tpu.matmul %174, %176, %cst_142 {dimension_numbers = #tpu.dot_dimension_numbers<[1], [0], [0], [1], [0, 0, 1, 1], [], []>} : vector<7x64xf32>, vector<64x128xf32>, vector<7x128xf32> -> vector<7x128xf32>
    %178 = arith.addf %172, %177 : vector<7x128xf32>
    %c3_143 = arith.constant 3 : index
    %c1_144 = arith.constant 1 : index
    %c0_145 = arith.constant 0 : index
    %179 = vector.load %arg14[%c3_143, %c1_144, %c0_145] : memref<9x9x64xf32, #tpu.memory_space<vmem>>, vector<1x7x64xf32>
    %180 = vector.shape_cast %179 : vector<1x7x64xf32> to vector<7x64xf32>
    %c7_146 = arith.constant 7 : index
    %c0_147 = arith.constant 0 : index
    %c0_148 = arith.constant 0 : index
    %181 = vector.load %arg6[%c7_146, %c0_147, %c0_148] : memref<9x64x128xf32, #tpu.memory_space<vmem>>, vector<1x64x128xf32>
    %182 = vector.shape_cast %181 : vector<1x64x128xf32> to vector<64x128xf32>
    %cst_149 = arith.constant dense<0.000000e+00> : vector<7x128xf32>
    %183 = tpu.matmul %180, %182, %cst_149 {dimension_numbers = #tpu.dot_dimension_numbers<[1], [0], [0], [1], [0, 0, 1, 1], [], []>} : vector<7x64xf32>, vector<64x128xf32>, vector<7x128xf32> -> vector<7x128xf32>
    %184 = arith.addf %178, %183 : vector<7x128xf32>
    %c3_150 = arith.constant 3 : index
    %c2_151 = arith.constant 2 : index
    %c0_152 = arith.constant 0 : index
    %185 = vector.load %arg14[%c3_150, %c2_151, %c0_152] : memref<9x9x64xf32, #tpu.memory_space<vmem>>, vector<1x7x64xf32>
    %186 = vector.shape_cast %185 : vector<1x7x64xf32> to vector<7x64xf32>
    %c8_153 = arith.constant 8 : index
    %c0_154 = arith.constant 0 : index
    %c0_155 = arith.constant 0 : index
    %187 = vector.load %arg6[%c8_153, %c0_154, %c0_155] : memref<9x64x128xf32, #tpu.memory_space<vmem>>, vector<1x64x128xf32>
    %188 = vector.shape_cast %187 : vector<1x64x128xf32> to vector<64x128xf32>
    %cst_156 = arith.constant dense<0.000000e+00> : vector<7x128xf32>
    %189 = tpu.matmul %186, %188, %cst_156 {dimension_numbers = #tpu.dot_dimension_numbers<[1], [0], [0], [1], [0, 0, 1, 1], [], []>} : vector<7x64xf32>, vector<64x128xf32>, vector<7x128xf32> -> vector<7x128xf32>
    %190 = arith.addf %184, %189 : vector<7x128xf32>
    %cst_157 = arith.constant 0.000000e+00 : f32
    %191 = vector.broadcast %cst_157 : f32 to vector<7x128xf32>
    %192 = arith.cmpf oge, %190, %191 : vector<7x128xf32>
    %cst_158 = arith.constant 0.00999999977 : f32
    %193 = vector.broadcast %cst_158 : f32 to vector<7x128xf32>
    %194 = arith.mulf %193, %190 : vector<7x128xf32>
    %195 = arith.select %192, %190, %194 : vector<7x128xi1>, vector<7x128xf32>
    %cst_159 = arith.constant 0.000000e+00 : f32
    %196 = vector.broadcast %cst_159 : f32 to vector<7x128xf32>
    %c0_160 = arith.constant 0 : index
    %c0_161 = arith.constant 0 : index
    %197 = vector.load %arg7[%c0_160, %c0_161] : memref<1x128xf32, #tpu.memory_space<vmem>>, vector<1x128xf32>
    %198 = vector.broadcast %197 : vector<1x128xf32> to vector<7x128xf32>
    %199 = arith.addf %196, %198 : vector<7x128xf32>
    %c2_162 = arith.constant 2 : index
    %c0_163 = arith.constant 0 : index
    %c0_164 = arith.constant 0 : index
    %200 = vector.load %arg14[%c2_162, %c0_163, %c0_164] : memref<9x9x64xf32, #tpu.memory_space<vmem>>, vector<1x7x64xf32>
    %201 = vector.shape_cast %200 : vector<1x7x64xf32> to vector<7x64xf32>
    %c0_165 = arith.constant 0 : index
    %c0_166 = arith.constant 0 : index
    %c0_167 = arith.constant 0 : index
    %202 = vector.load %arg6[%c0_165, %c0_166, %c0_167] : memref<9x64x128xf32, #tpu.memory_space<vmem>>, vector<1x64x128xf32>
    %203 = vector.shape_cast %202 : vector<1x64x128xf32> to vector<64x128xf32>
    %cst_168 = arith.constant dense<0.000000e+00> : vector<7x128xf32>
    %204 = tpu.matmul %201, %203, %cst_168 {dimension_numbers = #tpu.dot_dimension_numbers<[1], [0], [0], [1], [0, 0, 1, 1], [], []>} : vector<7x64xf32>, vector<64x128xf32>, vector<7x128xf32> -> vector<7x128xf32>
    %205 = arith.addf %199, %204 : vector<7x128xf32>
    %c2_169 = arith.constant 2 : index
    %c1_170 = arith.constant 1 : index
    %c0_171 = arith.constant 0 : index
    %206 = vector.load %arg14[%c2_169, %c1_170, %c0_171] : memref<9x9x64xf32, #tpu.memory_space<vmem>>, vector<1x7x64xf32>
    %207 = vector.shape_cast %206 : vector<1x7x64xf32> to vector<7x64xf32>
    %c1_172 = arith.constant 1 : index
    %c0_173 = arith.constant 0 : index
    %c0_174 = arith.constant 0 : index
    %208 = vector.load %arg6[%c1_172, %c0_173, %c0_174] : memref<9x64x128xf32, #tpu.memory_space<vmem>>, vector<1x64x128xf32>
    %209 = vector.shape_cast %208 : vector<1x64x128xf32> to vector<64x128xf32>
    %cst_175 = arith.constant dense<0.000000e+00> : vector<7x128xf32>
    %210 = tpu.matmul %207, %209, %cst_175 {dimension_numbers = #tpu.dot_dimension_numbers<[1], [0], [0], [1], [0, 0, 1, 1], [], []>} : vector<7x64xf32>, vector<64x128xf32>, vector<7x128xf32> -> vector<7x128xf32>
    %211 = arith.addf %205, %210 : vector<7x128xf32>
    %c2_176 = arith.constant 2 : index
    %c2_177 = arith.constant 2 : index
    %c0_178 = arith.constant 0 : index
    %212 = vector.load %arg14[%c2_176, %c2_177, %c0_178] : memref<9x9x64xf32, #tpu.memory_space<vmem>>, vector<1x7x64xf32>
    %213 = vector.shape_cast %212 : vector<1x7x64xf32> to vector<7x64xf32>
    %c2_179 = arith.constant 2 : index
    %c0_180 = arith.constant 0 : index
    %c0_181 = arith.constant 0 : index
    %214 = vector.load %arg6[%c2_179, %c0_180, %c0_181] : memref<9x64x128xf32, #tpu.memory_space<vmem>>, vector<1x64x128xf32>
    %215 = vector.shape_cast %214 : vector<1x64x128xf32> to vector<64x128xf32>
    %cst_182 = arith.constant dense<0.000000e+00> : vector<7x128xf32>
    %216 = tpu.matmul %213, %215, %cst_182 {dimension_numbers = #tpu.dot_dimension_numbers<[1], [0], [0], [1], [0, 0, 1, 1], [], []>} : vector<7x64xf32>, vector<64x128xf32>, vector<7x128xf32> -> vector<7x128xf32>
    %217 = arith.addf %211, %216 : vector<7x128xf32>
    %c3_183 = arith.constant 3 : index
    %c0_184 = arith.constant 0 : index
    %c0_185 = arith.constant 0 : index
    %218 = vector.load %arg14[%c3_183, %c0_184, %c0_185] : memref<9x9x64xf32, #tpu.memory_space<vmem>>, vector<1x7x64xf32>
    %219 = vector.shape_cast %218 : vector<1x7x64xf32> to vector<7x64xf32>
    %c3_186 = arith.constant 3 : index
    %c0_187 = arith.constant 0 : index
    %c0_188 = arith.constant 0 : index
    %220 = vector.load %arg6[%c3_186, %c0_187, %c0_188] : memref<9x64x128xf32, #tpu.memory_space<vmem>>, vector<1x64x128xf32>
    %221 = vector.shape_cast %220 : vector<1x64x128xf32> to vector<64x128xf32>
    %cst_189 = arith.constant dense<0.000000e+00> : vector<7x128xf32>
    %222 = tpu.matmul %219, %221, %cst_189 {dimension_numbers = #tpu.dot_dimension_numbers<[1], [0], [0], [1], [0, 0, 1, 1], [], []>} : vector<7x64xf32>, vector<64x128xf32>, vector<7x128xf32> -> vector<7x128xf32>
    %223 = arith.addf %217, %222 : vector<7x128xf32>
    %c3_190 = arith.constant 3 : index
    %c1_191 = arith.constant 1 : index
    %c0_192 = arith.constant 0 : index
    %224 = vector.load %arg14[%c3_190, %c1_191, %c0_192] : memref<9x9x64xf32, #tpu.memory_space<vmem>>, vector<1x7x64xf32>
    %225 = vector.shape_cast %224 : vector<1x7x64xf32> to vector<7x64xf32>
    %c4_193 = arith.constant 4 : index
    %c0_194 = arith.constant 0 : index
    %c0_195 = arith.constant 0 : index
    %226 = vector.load %arg6[%c4_193, %c0_194, %c0_195] : memref<9x64x128xf32, #tpu.memory_space<vmem>>, vector<1x64x128xf32>
    %227 = vector.shape_cast %226 : vector<1x64x128xf32> to vector<64x128xf32>
    %cst_196 = arith.constant dense<0.000000e+00> : vector<7x128xf32>
    %228 = tpu.matmul %225, %227, %cst_196 {dimension_numbers = #tpu.dot_dimension_numbers<[1], [0], [0], [1], [0, 0, 1, 1], [], []>} : vector<7x64xf32>, vector<64x128xf32>, vector<7x128xf32> -> vector<7x128xf32>
    %229 = arith.addf %223, %228 : vector<7x128xf32>
    %c3_197 = arith.constant 3 : index
    %c2_198 = arith.constant 2 : index
    %c0_199 = arith.constant 0 : index
    %230 = vector.load %arg14[%c3_197, %c2_198, %c0_199] : memref<9x9x64xf32, #tpu.memory_space<vmem>>, vector<1x7x64xf32>
    %231 = vector.shape_cast %230 : vector<1x7x64xf32> to vector<7x64xf32>
    %c5_200 = arith.constant 5 : index
    %c0_201 = arith.constant 0 : index
    %c0_202 = arith.constant 0 : index
    %232 = vector.load %arg6[%c5_200, %c0_201, %c0_202] : memref<9x64x128xf32, #tpu.memory_space<vmem>>, vector<1x64x128xf32>
    %233 = vector.shape_cast %232 : vector<1x64x128xf32> to vector<64x128xf32>
    %cst_203 = arith.constant dense<0.000000e+00> : vector<7x128xf32>
    %234 = tpu.matmul %231, %233, %cst_203 {dimension_numbers = #tpu.dot_dimension_numbers<[1], [0], [0], [1], [0, 0, 1, 1], [], []>} : vector<7x64xf32>, vector<64x128xf32>, vector<7x128xf32> -> vector<7x128xf32>
    %235 = arith.addf %229, %234 : vector<7x128xf32>
    %c4_204 = arith.constant 4 : index
    %c0_205 = arith.constant 0 : index
    %c0_206 = arith.constant 0 : index
    %236 = vector.load %arg14[%c4_204, %c0_205, %c0_206] : memref<9x9x64xf32, #tpu.memory_space<vmem>>, vector<1x7x64xf32>
    %237 = vector.shape_cast %236 : vector<1x7x64xf32> to vector<7x64xf32>
    %c6_207 = arith.constant 6 : index
    %c0_208 = arith.constant 0 : index
    %c0_209 = arith.constant 0 : index
    %238 = vector.load %arg6[%c6_207, %c0_208, %c0_209] : memref<9x64x128xf32, #tpu.memory_space<vmem>>, vector<1x64x128xf32>
    %239 = vector.shape_cast %238 : vector<1x64x128xf32> to vector<64x128xf32>
    %cst_210 = arith.constant dense<0.000000e+00> : vector<7x128xf32>
    %240 = tpu.matmul %237, %239, %cst_210 {dimension_numbers = #tpu.dot_dimension_numbers<[1], [0], [0], [1], [0, 0, 1, 1], [], []>} : vector<7x64xf32>, vector<64x128xf32>, vector<7x128xf32> -> vector<7x128xf32>
    %241 = arith.addf %235, %240 : vector<7x128xf32>
    %c4_211 = arith.constant 4 : index
    %c1_212 = arith.constant 1 : index
    %c0_213 = arith.constant 0 : index
    %242 = vector.load %arg14[%c4_211, %c1_212, %c0_213] : memref<9x9x64xf32, #tpu.memory_space<vmem>>, vector<1x7x64xf32>
    %243 = vector.shape_cast %242 : vector<1x7x64xf32> to vector<7x64xf32>
    %c7_214 = arith.constant 7 : index
    %c0_215 = arith.constant 0 : index
    %c0_216 = arith.constant 0 : index
    %244 = vector.load %arg6[%c7_214, %c0_215, %c0_216] : memref<9x64x128xf32, #tpu.memory_space<vmem>>, vector<1x64x128xf32>
    %245 = vector.shape_cast %244 : vector<1x64x128xf32> to vector<64x128xf32>
    %cst_217 = arith.constant dense<0.000000e+00> : vector<7x128xf32>
    %246 = tpu.matmul %243, %245, %cst_217 {dimension_numbers = #tpu.dot_dimension_numbers<[1], [0], [0], [1], [0, 0, 1, 1], [], []>} : vector<7x64xf32>, vector<64x128xf32>, vector<7x128xf32> -> vector<7x128xf32>
    %247 = arith.addf %241, %246 : vector<7x128xf32>
    %c4_218 = arith.constant 4 : index
    %c2_219 = arith.constant 2 : index
    %c0_220 = arith.constant 0 : index
    %248 = vector.load %arg14[%c4_218, %c2_219, %c0_220] : memref<9x9x64xf32, #tpu.memory_space<vmem>>, vector<1x7x64xf32>
    %249 = vector.shape_cast %248 : vector<1x7x64xf32> to vector<7x64xf32>
    %c8_221 = arith.constant 8 : index
    %c0_222 = arith.constant 0 : index
    %c0_223 = arith.constant 0 : index
    %250 = vector.load %arg6[%c8_221, %c0_222, %c0_223] : memref<9x64x128xf32, #tpu.memory_space<vmem>>, vector<1x64x128xf32>
    %251 = vector.shape_cast %250 : vector<1x64x128xf32> to vector<64x128xf32>
    %cst_224 = arith.constant dense<0.000000e+00> : vector<7x128xf32>
    %252 = tpu.matmul %249, %251, %cst_224 {dimension_numbers = #tpu.dot_dimension_numbers<[1], [0], [0], [1], [0, 0, 1, 1], [], []>} : vector<7x64xf32>, vector<64x128xf32>, vector<7x128xf32> -> vector<7x128xf32>
    %253 = arith.addf %247, %252 : vector<7x128xf32>
    %cst_225 = arith.constant 0.000000e+00 : f32
    %254 = vector.broadcast %cst_225 : f32 to vector<7x128xf32>
    %255 = arith.cmpf oge, %253, %254 : vector<7x128xf32>
    %cst_226 = arith.constant 0.00999999977 : f32
    %256 = vector.broadcast %cst_226 : f32 to vector<7x128xf32>
    %257 = arith.mulf %256, %253 : vector<7x128xf32>
    %258 = arith.select %255, %253, %257 : vector<7x128xi1>, vector<7x128xf32>
    %259 = arith.maximumf %195, %258 : vector<7x128xf32>
    %cst_227 = arith.constant dense<0.000000e+00> : vector<4x128xf32>
    %260 = tpu.matmul %50, %259, %cst_227 {dimension_numbers = #tpu.dot_dimension_numbers<[1], [0], [0], [1], [0, 0, 1, 1], [], []>} : vector<4x7xf32>, vector<7x128xf32>, vector<4x128xf32> -> vector<4x128xf32>
    %cst_228 = arith.constant dense<0.000000e+00> : vector<4x128xf32>
    %261 = tpu.matmul %59, %259, %cst_228 {dimension_numbers = #tpu.dot_dimension_numbers<[1], [0], [0], [1], [0, 0, 1, 1], [], []>} : vector<4x7xf32>, vector<7x128xf32>, vector<4x128xf32> -> vector<4x128xf32>
    %262 = arith.maximumf %260, %261 : vector<4x128xf32>
    %c4_229 = arith.constant 4 : index
    %c0_230 = arith.constant 0 : index
    %263 = vector.load %arg15[%c4_229, %c0_230] : memref<16x128xf32, #tpu.memory_space<vmem>>, vector<4x128xf32>
    tpu.vector_store %arg15[%c4_229, %c0_230], %262 {strides = array<i32>} : memref<16x128xf32, #tpu.memory_space<vmem>>, vector<4x128xf32>,
    %cst_231 = arith.constant 0.000000e+00 : f32
    %264 = vector.broadcast %cst_231 : f32 to vector<7x128xf32>
    %c0_232 = arith.constant 0 : index
    %c0_233 = arith.constant 0 : index
    %265 = vector.load %arg7[%c0_232, %c0_233] : memref<1x128xf32, #tpu.memory_space<vmem>>, vector<1x128xf32>
    %266 = vector.broadcast %265 : vector<1x128xf32> to vector<7x128xf32>
    %267 = arith.addf %264, %266 : vector<7x128xf32>
    %c3_234 = arith.constant 3 : index
    %c0_235 = arith.constant 0 : index
    %c0_236 = arith.constant 0 : index
    %268 = vector.load %arg14[%c3_234, %c0_235, %c0_236] : memref<9x9x64xf32, #tpu.memory_space<vmem>>, vector<1x7x64xf32>
    %269 = vector.shape_cast %268 : vector<1x7x64xf32> to vector<7x64xf32>
    %c0_237 = arith.constant 0 : index
    %c0_238 = arith.constant 0 : index
    %c0_239 = arith.constant 0 : index
    %270 = vector.load %arg6[%c0_237, %c0_238, %c0_239] : memref<9x64x128xf32, #tpu.memory_space<vmem>>, vector<1x64x128xf32>
    %271 = vector.shape_cast %270 : vector<1x64x128xf32> to vector<64x128xf32>
    %cst_240 = arith.constant dense<0.000000e+00> : vector<7x128xf32>
    %272 = tpu.matmul %269, %271, %cst_240 {dimension_numbers = #tpu.dot_dimension_numbers<[1], [0], [0], [1], [0, 0, 1, 1], [], []>} : vector<7x64xf32>, vector<64x128xf32>, vector<7x128xf32> -> vector<7x128xf32>
    %273 = arith.addf %267, %272 : vector<7x128xf32>
    %c3_241 = arith.constant 3 : index
    %c1_242 = arith.constant 1 : index
    %c0_243 = arith.constant 0 : index
    %274 = vector.load %arg14[%c3_241, %c1_242, %c0_243] : memref<9x9x64xf32, #tpu.memory_space<vmem>>, vector<1x7x64xf32>
    %275 = vector.shape_cast %274 : vector<1x7x64xf32> to vector<7x64xf32>
    %c1_244 = arith.constant 1 : index
    %c0_245 = arith.constant 0 : index
    %c0_246 = arith.constant 0 : index
    %276 = vector.load %arg6[%c1_244, %c0_245, %c0_246] : memref<9x64x128xf32, #tpu.memory_space<vmem>>, vector<1x64x128xf32>
    %277 = vector.shape_cast %276 : vector<1x64x128xf32> to vector<64x128xf32>
    %cst_247 = arith.constant dense<0.000000e+00> : vector<7x128xf32>
    %278 = tpu.matmul %275, %277, %cst_247 {dimension_numbers = #tpu.dot_dimension_numbers<[1], [0], [0], [1], [0, 0, 1, 1], [], []>} : vector<7x64xf32>, vector<64x128xf32>, vector<7x128xf32> -> vector<7x128xf32>
    %279 = arith.addf %273, %278 : vector<7x128xf32>
    %c3_248 = arith.constant 3 : index
    %c2_249 = arith.constant 2 : index
    %c0_250 = arith.constant 0 : index
    %280 = vector.load %arg14[%c3_248, %c2_249, %c0_250] : memref<9x9x64xf32, #tpu.memory_space<vmem>>, vector<1x7x64xf32>
    %281 = vector.shape_cast %280 : vector<1x7x64xf32> to vector<7x64xf32>
    %c2_251 = arith.constant 2 : index
    %c0_252 = arith.constant 0 : index
    %c0_253 = arith.constant 0 : index
    %282 = vector.load %arg6[%c2_251, %c0_252, %c0_253] : memref<9x64x128xf32, #tpu.memory_space<vmem>>, vector<1x64x128xf32>
    %283 = vector.shape_cast %282 : vector<1x64x128xf32> to vector<64x128xf32>
    %cst_254 = arith.constant dense<0.000000e+00> : vector<7x128xf32>
    %284 = tpu.matmul %281, %283, %cst_254 {dimension_numbers = #tpu.dot_dimension_numbers<[1], [0], [0], [1], [0, 0, 1, 1], [], []>} : vector<7x64xf32>, vector<64x128xf32>, vector<7x128xf32> -> vector<7x128xf32>
    %285 = arith.addf %279, %284 : vector<7x128xf32>
    %c4_255 = arith.constant 4 : index
    %c0_256 = arith.constant 0 : index
    %c0_257 = arith.constant 0 : index
    %286 = vector.load %arg14[%c4_255, %c0_256, %c0_257] : memref<9x9x64xf32, #tpu.memory_space<vmem>>, vector<1x7x64xf32>
    %287 = vector.shape_cast %286 : vector<1x7x64xf32> to vector<7x64xf32>
    %c3_258 = arith.constant 3 : index
    %c0_259 = arith.constant 0 : index
    %c0_260 = arith.constant 0 : index
    %288 = vector.load %arg6[%c3_258, %c0_259, %c0_260] : memref<9x64x128xf32, #tpu.memory_space<vmem>>, vector<1x64x128xf32>
    %289 = vector.shape_cast %288 : vector<1x64x128xf32> to vector<64x128xf32>
    %cst_261 = arith.constant dense<0.000000e+00> : vector<7x128xf32>
    %290 = tpu.matmul %287, %289, %cst_261 {dimension_numbers = #tpu.dot_dimension_numbers<[1], [0], [0], [1], [0, 0, 1, 1], [], []>} : vector<7x64xf32>, vector<64x128xf32>, vector<7x128xf32> -> vector<7x128xf32>
    %291 = arith.addf %285, %290 : vector<7x128xf32>
    %c4_262 = arith.constant 4 : index
    %c1_263 = arith.constant 1 : index
    %c0_264 = arith.constant 0 : index
    %292 = vector.load %arg14[%c4_262, %c1_263, %c0_264] : memref<9x9x64xf32, #tpu.memory_space<vmem>>, vector<1x7x64xf32>
    %293 = vector.shape_cast %292 : vector<1x7x64xf32> to vector<7x64xf32>
    %c4_265 = arith.constant 4 : index
    %c0_266 = arith.constant 0 : index
    %c0_267 = arith.constant 0 : index
    %294 = vector.load %arg6[%c4_265, %c0_266, %c0_267] : memref<9x64x128xf32, #tpu.memory_space<vmem>>, vector<1x64x128xf32>
    %295 = vector.shape_cast %294 : vector<1x64x128xf32> to vector<64x128xf32>
    %cst_268 = arith.constant dense<0.000000e+00> : vector<7x128xf32>
    %296 = tpu.matmul %293, %295, %cst_268 {dimension_numbers = #tpu.dot_dimension_numbers<[1], [0], [0], [1], [0, 0, 1, 1], [], []>} : vector<7x64xf32>, vector<64x128xf32>, vector<7x128xf32> -> vector<7x128xf32>
    %297 = arith.addf %291, %296 : vector<7x128xf32>
    %c4_269 = arith.constant 4 : index
    %c2_270 = arith.constant 2 : index
    %c0_271 = arith.constant 0 : index
    %298 = vector.load %arg14[%c4_269, %c2_270, %c0_271] : memref<9x9x64xf32, #tpu.memory_space<vmem>>, vector<1x7x64xf32>
    %299 = vector.shape_cast %298 : vector<1x7x64xf32> to vector<7x64xf32>
    %c5_272 = arith.constant 5 : index
    %c0_273 = arith.constant 0 : index
    %c0_274 = arith.constant 0 : index
    %300 = vector.load %arg6[%c5_272, %c0_273, %c0_274] : memref<9x64x128xf32, #tpu.memory_space<vmem>>, vector<1x64x128xf32>
    %301 = vector.shape_cast %300 : vector<1x64x128xf32> to vector<64x128xf32>
    %cst_275 = arith.constant dense<0.000000e+00> : vector<7x128xf32>
    %302 = tpu.matmul %299, %301, %cst_275 {dimension_numbers = #tpu.dot_dimension_numbers<[1], [0], [0], [1], [0, 0, 1, 1], [], []>} : vector<7x64xf32>, vector<64x128xf32>, vector<7x128xf32> -> vector<7x128xf32>
    %303 = arith.addf %297, %302 : vector<7x128xf32>
    %c5_276 = arith.constant 5 : index
    %c0_277 = arith.constant 0 : index
    %c0_278 = arith.constant 0 : index
    %304 = vector.load %arg14[%c5_276, %c0_277, %c0_278] : memref<9x9x64xf32, #tpu.memory_space<vmem>>, vector<1x7x64xf32>
    %305 = vector.shape_cast %304 : vector<1x7x64xf32> to vector<7x64xf32>
    %c6_279 = arith.constant 6 : index
    %c0_280 = arith.constant 0 : index
    %c0_281 = arith.constant 0 : index
    %306 = vector.load %arg6[%c6_279, %c0_280, %c0_281] : memref<9x64x128xf32, #tpu.memory_space<vmem>>, vector<1x64x128xf32>
    %307 = vector.shape_cast %306 : vector<1x64x128xf32> to vector<64x128xf32>
    %cst_282 = arith.constant dense<0.000000e+00> : vector<7x128xf32>
    %308 = tpu.matmul %305, %307, %cst_282 {dimension_numbers = #tpu.dot_dimension_numbers<[1], [0], [0], [1], [0, 0, 1, 1], [], []>} : vector<7x64xf32>, vector<64x128xf32>, vector<7x128xf32> -> vector<7x128xf32>
    %309 = arith.addf %303, %308 : vector<7x128xf32>
    %c5_283 = arith.constant 5 : index
    %c1_284 = arith.constant 1 : index
    %c0_285 = arith.constant 0 : index
    %310 = vector.load %arg14[%c5_283, %c1_284, %c0_285] : memref<9x9x64xf32, #tpu.memory_space<vmem>>, vector<1x7x64xf32>
    %311 = vector.shape_cast %310 : vector<1x7x64xf32> to vector<7x64xf32>
    %c7_286 = arith.constant 7 : index
    %c0_287 = arith.constant 0 : index
    %c0_288 = arith.constant 0 : index
    %312 = vector.load %arg6[%c7_286, %c0_287, %c0_288] : memref<9x64x128xf32, #tpu.memory_space<vmem>>, vector<1x64x128xf32>
    %313 = vector.shape_cast %312 : vector<1x64x128xf32> to vector<64x128xf32>
    %cst_289 = arith.constant dense<0.000000e+00> : vector<7x128xf32>
    %314 = tpu.matmul %311, %313, %cst_289 {dimension_numbers = #tpu.dot_dimension_numbers<[1], [0], [0], [1], [0, 0, 1, 1], [], []>} : vector<7x64xf32>, vector<64x128xf32>, vector<7x128xf32> -> vector<7x128xf32>
    %315 = arith.addf %309, %314 : vector<7x128xf32>
    %c5_290 = arith.constant 5 : index
    %c2_291 = arith.constant 2 : index
    %c0_292 = arith.constant 0 : index
    %316 = vector.load %arg14[%c5_290, %c2_291, %c0_292] : memref<9x9x64xf32, #tpu.memory_space<vmem>>, vector<1x7x64xf32>
    %317 = vector.shape_cast %316 : vector<1x7x64xf32> to vector<7x64xf32>
    %c8_293 = arith.constant 8 : index
    %c0_294 = arith.constant 0 : index
    %c0_295 = arith.constant 0 : index
    %318 = vector.load %arg6[%c8_293, %c0_294, %c0_295] : memref<9x64x128xf32, #tpu.memory_space<vmem>>, vector<1x64x128xf32>
    %319 = vector.shape_cast %318 : vector<1x64x128xf32> to vector<64x128xf32>
    %cst_296 = arith.constant dense<0.000000e+00> : vector<7x128xf32>
    %320 = tpu.matmul %317, %319, %cst_296 {dimension_numbers = #tpu.dot_dimension_numbers<[1], [0], [0], [1], [0, 0, 1, 1], [], []>} : vector<7x64xf32>, vector<64x128xf32>, vector<7x128xf32> -> vector<7x128xf32>
    %321 = arith.addf %315, %320 : vector<7x128xf32>
    %cst_297 = arith.constant 0.000000e+00 : f32
    %322 = vector.broadcast %cst_297 : f32 to vector<7x128xf32>
    %323 = arith.cmpf oge, %321, %322 : vector<7x128xf32>
    %cst_298 = arith.constant 0.00999999977 : f32
    %324 = vector.broadcast %cst_298 : f32 to vector<7x128xf32>
    %325 = arith.mulf %324, %321 : vector<7x128xf32>
    %326 = arith.select %323, %321, %325 : vector<7x128xi1>, vector<7x128xf32>
    %cst_299 = arith.constant 0.000000e+00 : f32
    %327 = vector.broadcast %cst_299 : f32 to vector<7x128xf32>
    %c0_300 = arith.constant 0 : index
    %c0_301 = arith.constant 0 : index
    %328 = vector.load %arg7[%c0_300, %c0_301] : memref<1x128xf32, #tpu.memory_space<vmem>>, vector<1x128xf32>
    %329 = vector.broadcast %328 : vector<1x128xf32> to vector<7x128xf32>
    %330 = arith.addf %327, %329 : vector<7x128xf32>
    %c4_302 = arith.constant 4 : index
    %c0_303 = arith.constant 0 : index
    %c0_304 = arith.constant 0 : index
    %331 = vector.load %arg14[%c4_302, %c0_303, %c0_304] : memref<9x9x64xf32, #tpu.memory_space<vmem>>, vector<1x7x64xf32>
    %332 = vector.shape_cast %331 : vector<1x7x64xf32> to vector<7x64xf32>
    %c0_305 = arith.constant 0 : index
    %c0_306 = arith.constant 0 : index
    %c0_307 = arith.constant 0 : index
    %333 = vector.load %arg6[%c0_305, %c0_306, %c0_307] : memref<9x64x128xf32, #tpu.memory_space<vmem>>, vector<1x64x128xf32>
    %334 = vector.shape_cast %333 : vector<1x64x128xf32> to vector<64x128xf32>
    %cst_308 = arith.constant dense<0.000000e+00> : vector<7x128xf32>
    %335 = tpu.matmul %332, %334, %cst_308 {dimension_numbers = #tpu.dot_dimension_numbers<[1], [0], [0], [1], [0, 0, 1, 1], [], []>} : vector<7x64xf32>, vector<64x128xf32>, vector<7x128xf32> -> vector<7x128xf32>
    %336 = arith.addf %330, %335 : vector<7x128xf32>
    %c4_309 = arith.constant 4 : index
    %c1_310 = arith.constant 1 : index
    %c0_311 = arith.constant 0 : index
    %337 = vector.load %arg14[%c4_309, %c1_310, %c0_311] : memref<9x9x64xf32, #tpu.memory_space<vmem>>, vector<1x7x64xf32>
    %338 = vector.shape_cast %337 : vector<1x7x64xf32> to vector<7x64xf32>
    %c1_312 = arith.constant 1 : index
    %c0_313 = arith.constant 0 : index
    %c0_314 = arith.constant 0 : index
    %339 = vector.load %arg6[%c1_312, %c0_313, %c0_314] : memref<9x64x128xf32, #tpu.memory_space<vmem>>, vector<1x64x128xf32>
    %340 = vector.shape_cast %339 : vector<1x64x128xf32> to vector<64x128xf32>
    %cst_315 = arith.constant dense<0.000000e+00> : vector<7x128xf32>
    %341 = tpu.matmul %338, %340, %cst_315 {dimension_numbers = #tpu.dot_dimension_numbers<[1], [0], [0], [1], [0, 0, 1, 1], [], []>} : vector<7x64xf32>, vector<64x128xf32>, vector<7x128xf32> -> vector<7x128xf32>
    %342 = arith.addf %336, %341 : vector<7x128xf32>
    %c4_316 = arith.constant 4 : index
    %c2_317 = arith.constant 2 : index
    %c0_318 = arith.constant 0 : index
    %343 = vector.load %arg14[%c4_316, %c2_317, %c0_318] : memref<9x9x64xf32, #tpu.memory_space<vmem>>, vector<1x7x64xf32>
    %344 = vector.shape_cast %343 : vector<1x7x64xf32> to vector<7x64xf32>
    %c2_319 = arith.constant 2 : index
    %c0_320 = arith.constant 0 : index
    %c0_321 = arith.constant 0 : index
    %345 = vector.load %arg6[%c2_319, %c0_320, %c0_321] : memref<9x64x128xf32, #tpu.memory_space<vmem>>, vector<1x64x128xf32>
    %346 = vector.shape_cast %345 : vector<1x64x128xf32> to vector<64x128xf32>
    %cst_322 = arith.constant dense<0.000000e+00> : vector<7x128xf32>
    %347 = tpu.matmul %344, %346, %cst_322 {dimension_numbers = #tpu.dot_dimension_numbers<[1], [0], [0], [1], [0, 0, 1, 1], [], []>} : vector<7x64xf32>, vector<64x128xf32>, vector<7x128xf32> -> vector<7x128xf32>
    %348 = arith.addf %342, %347 : vector<7x128xf32>
    %c5_323 = arith.constant 5 : index
    %c0_324 = arith.constant 0 : index
    %c0_325 = arith.constant 0 : index
    %349 = vector.load %arg14[%c5_323, %c0_324, %c0_325] : memref<9x9x64xf32, #tpu.memory_space<vmem>>, vector<1x7x64xf32>
    %350 = vector.shape_cast %349 : vector<1x7x64xf32> to vector<7x64xf32>
    %c3_326 = arith.constant 3 : index
    %c0_327 = arith.constant 0 : index
    %c0_328 = arith.constant 0 : index
    %351 = vector.load %arg6[%c3_326, %c0_327, %c0_328] : memref<9x64x128xf32, #tpu.memory_space<vmem>>, vector<1x64x128xf32>
    %352 = vector.shape_cast %351 : vector<1x64x128xf32> to vector<64x128xf32>
    %cst_329 = arith.constant dense<0.000000e+00> : vector<7x128xf32>
    %353 = tpu.matmul %350, %352, %cst_329 {dimension_numbers = #tpu.dot_dimension_numbers<[1], [0], [0], [1], [0, 0, 1, 1], [], []>} : vector<7x64xf32>, vector<64x128xf32>, vector<7x128xf32> -> vector<7x128xf32>
    %354 = arith.addf %348, %353 : vector<7x128xf32>
    %c5_330 = arith.constant 5 : index
    %c1_331 = arith.constant 1 : index
    %c0_332 = arith.constant 0 : index
    %355 = vector.load %arg14[%c5_330, %c1_331, %c0_332] : memref<9x9x64xf32, #tpu.memory_space<vmem>>, vector<1x7x64xf32>
    %356 = vector.shape_cast %355 : vector<1x7x64xf32> to vector<7x64xf32>
    %c4_333 = arith.constant 4 : index
    %c0_334 = arith.constant 0 : index
    %c0_335 = arith.constant 0 : index
    %357 = vector.load %arg6[%c4_333, %c0_334, %c0_335] : memref<9x64x128xf32, #tpu.memory_space<vmem>>, vector<1x64x128xf32>
    %358 = vector.shape_cast %357 : vector<1x64x128xf32> to vector<64x128xf32>
    %cst_336 = arith.constant dense<0.000000e+00> : vector<7x128xf32>
    %359 = tpu.matmul %356, %358, %cst_336 {dimension_numbers = #tpu.dot_dimension_numbers<[1], [0], [0], [1], [0, 0, 1, 1], [], []>} : vector<7x64xf32>, vector<64x128xf32>, vector<7x128xf32> -> vector<7x128xf32>
    %360 = arith.addf %354, %359 : vector<7x128xf32>
    %c5_337 = arith.constant 5 : index
    %c2_338 = arith.constant 2 : index
    %c0_339 = arith.constant 0 : index
    %361 = vector.load %arg14[%c5_337, %c2_338, %c0_339] : memref<9x9x64xf32, #tpu.memory_space<vmem>>, vector<1x7x64xf32>
    %362 = vector.shape_cast %361 : vector<1x7x64xf32> to vector<7x64xf32>
    %c5_340 = arith.constant 5 : index
    %c0_341 = arith.constant 0 : index
    %c0_342 = arith.constant 0 : index
    %363 = vector.load %arg6[%c5_340, %c0_341, %c0_342] : memref<9x64x128xf32, #tpu.memory_space<vmem>>, vector<1x64x128xf32>
    %364 = vector.shape_cast %363 : vector<1x64x128xf32> to vector<64x128xf32>
    %cst_343 = arith.constant dense<0.000000e+00> : vector<7x128xf32>
    %365 = tpu.matmul %362, %364, %cst_343 {dimension_numbers = #tpu.dot_dimension_numbers<[1], [0], [0], [1], [0, 0, 1, 1], [], []>} : vector<7x64xf32>, vector<64x128xf32>, vector<7x128xf32> -> vector<7x128xf32>
    %366 = arith.addf %360, %365 : vector<7x128xf32>
    %c6_344 = arith.constant 6 : index
    %c0_345 = arith.constant 0 : index
    %c0_346 = arith.constant 0 : index
    %367 = vector.load %arg14[%c6_344, %c0_345, %c0_346] : memref<9x9x64xf32, #tpu.memory_space<vmem>>, vector<1x7x64xf32>
    %368 = vector.shape_cast %367 : vector<1x7x64xf32> to vector<7x64xf32>
    %c6_347 = arith.constant 6 : index
    %c0_348 = arith.constant 0 : index
    %c0_349 = arith.constant 0 : index
    %369 = vector.load %arg6[%c6_347, %c0_348, %c0_349] : memref<9x64x128xf32, #tpu.memory_space<vmem>>, vector<1x64x128xf32>
    %370 = vector.shape_cast %369 : vector<1x64x128xf32> to vector<64x128xf32>
    %cst_350 = arith.constant dense<0.000000e+00> : vector<7x128xf32>
    %371 = tpu.matmul %368, %370, %cst_350 {dimension_numbers = #tpu.dot_dimension_numbers<[1], [0], [0], [1], [0, 0, 1, 1], [], []>} : vector<7x64xf32>, vector<64x128xf32>, vector<7x128xf32> -> vector<7x128xf32>
    %372 = arith.addf %366, %371 : vector<7x128xf32>
    %c6_351 = arith.constant 6 : index
    %c1_352 = arith.constant 1 : index
    %c0_353 = arith.constant 0 : index
    %373 = vector.load %arg14[%c6_351, %c1_352, %c0_353] : memref<9x9x64xf32, #tpu.memory_space<vmem>>, vector<1x7x64xf32>
    %374 = vector.shape_cast %373 : vector<1x7x64xf32> to vector<7x64xf32>
    %c7_354 = arith.constant 7 : index
    %c0_355 = arith.constant 0 : index
    %c0_356 = arith.constant 0 : index
    %375 = vector.load %arg6[%c7_354, %c0_355, %c0_356] : memref<9x64x128xf32, #tpu.memory_space<vmem>>, vector<1x64x128xf32>
    %376 = vector.shape_cast %375 : vector<1x64x128xf32> to vector<64x128xf32>
    %cst_357 = arith.constant dense<0.000000e+00> : vector<7x128xf32>
    %377 = tpu.matmul %374, %376, %cst_357 {dimension_numbers = #tpu.dot_dimension_numbers<[1], [0], [0], [1], [0, 0, 1, 1], [], []>} : vector<7x64xf32>, vector<64x128xf32>, vector<7x128xf32> -> vector<7x128xf32>
    %378 = arith.addf %372, %377 : vector<7x128xf32>
    %c6_358 = arith.constant 6 : index
    %c2_359 = arith.constant 2 : index
    %c0_360 = arith.constant 0 : index
    %379 = vector.load %arg14[%c6_358, %c2_359, %c0_360] : memref<9x9x64xf32, #tpu.memory_space<vmem>>, vector<1x7x64xf32>
    %380 = vector.shape_cast %379 : vector<1x7x64xf32> to vector<7x64xf32>
    %c8_361 = arith.constant 8 : index
    %c0_362 = arith.constant 0 : index
    %c0_363 = arith.constant 0 : index
    %381 = vector.load %arg6[%c8_361, %c0_362, %c0_363] : memref<9x64x128xf32, #tpu.memory_space<vmem>>, vector<1x64x128xf32>
    %382 = vector.shape_cast %381 : vector<1x64x128xf32> to vector<64x128xf32>
    %cst_364 = arith.constant dense<0.000000e+00> : vector<7x128xf32>
    %383 = tpu.matmul %380, %382, %cst_364 {dimension_numbers = #tpu.dot_dimension_numbers<[1], [0], [0], [1], [0, 0, 1, 1], [], []>} : vector<7x64xf32>, vector<64x128xf32>, vector<7x128xf32> -> vector<7x128xf32>
    %384 = arith.addf %378, %383 : vector<7x128xf32>
    %cst_365 = arith.constant 0.000000e+00 : f32
    %385 = vector.broadcast %cst_365 : f32 to vector<7x128xf32>
    %386 = arith.cmpf oge, %384, %385 : vector<7x128xf32>
    %cst_366 = arith.constant 0.00999999977 : f32
    %387 = vector.broadcast %cst_366 : f32 to vector<7x128xf32>
    %388 = arith.mulf %387, %384 : vector<7x128xf32>
    %389 = arith.select %386, %384, %388 : vector<7x128xi1>, vector<7x128xf32>
    %390 = arith.maximumf %326, %389 : vector<7x128xf32>
    %cst_367 = arith.constant dense<0.000000e+00> : vector<4x128xf32>
    %391 = tpu.matmul %50, %390, %cst_367 {dimension_numbers = #tpu.dot_dimension_numbers<[1], [0], [0], [1], [0, 0, 1, 1], [], []>} : vector<4x7xf32>, vector<7x128xf32>, vector<4x128xf32> -> vector<4x128xf32>
    %cst_368 = arith.constant dense<0.000000e+00> : vector<4x128xf32>
    %392 = tpu.matmul %59, %390, %cst_368 {dimension_numbers = #tpu.dot_dimension_numbers<[1], [0], [0], [1], [0, 0, 1, 1], [], []>} : vector<4x7xf32>, vector<7x128xf32>, vector<4x128xf32> -> vector<4x128xf32>
    %393 = arith.maximumf %391, %392 : vector<4x128xf32>
    %c8_369 = arith.constant 8 : index
    %c0_370 = arith.constant 0 : index
    %394 = vector.load %arg15[%c8_369, %c0_370] : memref<16x128xf32, #tpu.memory_space<vmem>>, vector<4x128xf32>
    tpu.vector_store %arg15[%c8_369, %c0_370], %393 {strides = array<i32>} : memref<16x128xf32, #tpu.memory_space<vmem>>, vector<4x128xf32>,
    %cst_371 = arith.constant 0.000000e+00 : f32
    %395 = vector.broadcast %cst_371 : f32 to vector<7x128xf32>
    %c0_372 = arith.constant 0 : index
    %c0_373 = arith.constant 0 : index
    %396 = vector.load %arg7[%c0_372, %c0_373] : memref<1x128xf32, #tpu.memory_space<vmem>>, vector<1x128xf32>
    %397 = vector.broadcast %396 : vector<1x128xf32> to vector<7x128xf32>
    %398 = arith.addf %395, %397 : vector<7x128xf32>
    %c5_374 = arith.constant 5 : index
    %c0_375 = arith.constant 0 : index
    %c0_376 = arith.constant 0 : index
    %399 = vector.load %arg14[%c5_374, %c0_375, %c0_376] : memref<9x9x64xf32, #tpu.memory_space<vmem>>, vector<1x7x64xf32>
    %400 = vector.shape_cast %399 : vector<1x7x64xf32> to vector<7x64xf32>
    %c0_377 = arith.constant 0 : index
    %c0_378 = arith.constant 0 : index
    %c0_379 = arith.constant 0 : index
    %401 = vector.load %arg6[%c0_377, %c0_378, %c0_379] : memref<9x64x128xf32, #tpu.memory_space<vmem>>, vector<1x64x128xf32>
    %402 = vector.shape_cast %401 : vector<1x64x128xf32> to vector<64x128xf32>
    %cst_380 = arith.constant dense<0.000000e+00> : vector<7x128xf32>
    %403 = tpu.matmul %400, %402, %cst_380 {dimension_numbers = #tpu.dot_dimension_numbers<[1], [0], [0], [1], [0, 0, 1, 1], [], []>} : vector<7x64xf32>, vector<64x128xf32>, vector<7x128xf32> -> vector<7x128xf32>
    %404 = arith.addf %398, %403 : vector<7x128xf32>
    %c5_381 = arith.constant 5 : index
    %c1_382 = arith.constant 1 : index
    %c0_383 = arith.constant 0 : index
    %405 = vector.load %arg14[%c5_381, %c1_382, %c0_383] : memref<9x9x64xf32, #tpu.memory_space<vmem>>, vector<1x7x64xf32>
    %406 = vector.shape_cast %405 : vector<1x7x64xf32> to vector<7x64xf32>
    %c1_384 = arith.constant 1 : index
    %c0_385 = arith.constant 0 : index
    %c0_386 = arith.constant 0 : index
    %407 = vector.load %arg6[%c1_384, %c0_385, %c0_386] : memref<9x64x128xf32, #tpu.memory_space<vmem>>, vector<1x64x128xf32>
    %408 = vector.shape_cast %407 : vector<1x64x128xf32> to vector<64x128xf32>
    %cst_387 = arith.constant dense<0.000000e+00> : vector<7x128xf32>
    %409 = tpu.matmul %406, %408, %cst_387 {dimension_numbers = #tpu.dot_dimension_numbers<[1], [0], [0], [1], [0, 0, 1, 1], [], []>} : vector<7x64xf32>, vector<64x128xf32>, vector<7x128xf32> -> vector<7x128xf32>
    %410 = arith.addf %404, %409 : vector<7x128xf32>
    %c5_388 = arith.constant 5 : index
    %c2_389 = arith.constant 2 : index
    %c0_390 = arith.constant 0 : index
    %411 = vector.load %arg14[%c5_388, %c2_389, %c0_390] : memref<9x9x64xf32, #tpu.memory_space<vmem>>, vector<1x7x64xf32>
    %412 = vector.shape_cast %411 : vector<1x7x64xf32> to vector<7x64xf32>
    %c2_391 = arith.constant 2 : index
    %c0_392 = arith.constant 0 : index
    %c0_393 = arith.constant 0 : index
    %413 = vector.load %arg6[%c2_391, %c0_392, %c0_393] : memref<9x64x128xf32, #tpu.memory_space<vmem>>, vector<1x64x128xf32>
    %414 = vector.shape_cast %413 : vector<1x64x128xf32> to vector<64x128xf32>
    %cst_394 = arith.constant dense<0.000000e+00> : vector<7x128xf32>
    %415 = tpu.matmul %412, %414, %cst_394 {dimension_numbers = #tpu.dot_dimension_numbers<[1], [0], [0], [1], [0, 0, 1, 1], [], []>} : vector<7x64xf32>, vector<64x128xf32>, vector<7x128xf32> -> vector<7x128xf32>
    %416 = arith.addf %410, %415 : vector<7x128xf32>
    %c6_395 = arith.constant 6 : index
    %c0_396 = arith.constant 0 : index
    %c0_397 = arith.constant 0 : index
    %417 = vector.load %arg14[%c6_395, %c0_396, %c0_397] : memref<9x9x64xf32, #tpu.memory_space<vmem>>, vector<1x7x64xf32>
    %418 = vector.shape_cast %417 : vector<1x7x64xf32> to vector<7x64xf32>
    %c3_398 = arith.constant 3 : index
    %c0_399 = arith.constant 0 : index
    %c0_400 = arith.constant 0 : index
    %419 = vector.load %arg6[%c3_398, %c0_399, %c0_400] : memref<9x64x128xf32, #tpu.memory_space<vmem>>, vector<1x64x128xf32>
    %420 = vector.shape_cast %419 : vector<1x64x128xf32> to vector<64x128xf32>
    %cst_401 = arith.constant dense<0.000000e+00> : vector<7x128xf32>
    %421 = tpu.matmul %418, %420, %cst_401 {dimension_numbers = #tpu.dot_dimension_numbers<[1], [0], [0], [1], [0, 0, 1, 1], [], []>} : vector<7x64xf32>, vector<64x128xf32>, vector<7x128xf32> -> vector<7x128xf32>
    %422 = arith.addf %416, %421 : vector<7x128xf32>
    %c6_402 = arith.constant 6 : index
    %c1_403 = arith.constant 1 : index
    %c0_404 = arith.constant 0 : index
    %423 = vector.load %arg14[%c6_402, %c1_403, %c0_404] : memref<9x9x64xf32, #tpu.memory_space<vmem>>, vector<1x7x64xf32>
    %424 = vector.shape_cast %423 : vector<1x7x64xf32> to vector<7x64xf32>
    %c4_405 = arith.constant 4 : index
    %c0_406 = arith.constant 0 : index
    %c0_407 = arith.constant 0 : index
    %425 = vector.load %arg6[%c4_405, %c0_406, %c0_407] : memref<9x64x128xf32, #tpu.memory_space<vmem>>, vector<1x64x128xf32>
    %426 = vector.shape_cast %425 : vector<1x64x128xf32> to vector<64x128xf32>
    %cst_408 = arith.constant dense<0.000000e+00> : vector<7x128xf32>
    %427 = tpu.matmul %424, %426, %cst_408 {dimension_numbers = #tpu.dot_dimension_numbers<[1], [0], [0], [1], [0, 0, 1, 1], [], []>} : vector<7x64xf32>, vector<64x128xf32>, vector<7x128xf32> -> vector<7x128xf32>
    %428 = arith.addf %422, %427 : vector<7x128xf32>
    %c6_409 = arith.constant 6 : index
    %c2_410 = arith.constant 2 : index
    %c0_411 = arith.constant 0 : index
    %429 = vector.load %arg14[%c6_409, %c2_410, %c0_411] : memref<9x9x64xf32, #tpu.memory_space<vmem>>, vector<1x7x64xf32>
    %430 = vector.shape_cast %429 : vector<1x7x64xf32> to vector<7x64xf32>
    %c5_412 = arith.constant 5 : index
    %c0_413 = arith.constant 0 : index
    %c0_414 = arith.constant 0 : index
    %431 = vector.load %arg6[%c5_412, %c0_413, %c0_414] : memref<9x64x128xf32, #tpu.memory_space<vmem>>, vector<1x64x128xf32>
    %432 = vector.shape_cast %431 : vector<1x64x128xf32> to vector<64x128xf32>
    %cst_415 = arith.constant dense<0.000000e+00> : vector<7x128xf32>
    %433 = tpu.matmul %430, %432, %cst_415 {dimension_numbers = #tpu.dot_dimension_numbers<[1], [0], [0], [1], [0, 0, 1, 1], [], []>} : vector<7x64xf32>, vector<64x128xf32>, vector<7x128xf32> -> vector<7x128xf32>
    %434 = arith.addf %428, %433 : vector<7x128xf32>
    %c7_416 = arith.constant 7 : index
    %c0_417 = arith.constant 0 : index
    %c0_418 = arith.constant 0 : index
    %435 = vector.load %arg14[%c7_416, %c0_417, %c0_418] : memref<9x9x64xf32, #tpu.memory_space<vmem>>, vector<1x7x64xf32>
    %436 = vector.shape_cast %435 : vector<1x7x64xf32> to vector<7x64xf32>
    %c6_419 = arith.constant 6 : index
    %c0_420 = arith.constant 0 : index
    %c0_421 = arith.constant 0 : index
    %437 = vector.load %arg6[%c6_419, %c0_420, %c0_421] : memref<9x64x128xf32, #tpu.memory_space<vmem>>, vector<1x64x128xf32>
    %438 = vector.shape_cast %437 : vector<1x64x128xf32> to vector<64x128xf32>
    %cst_422 = arith.constant dense<0.000000e+00> : vector<7x128xf32>
    %439 = tpu.matmul %436, %438, %cst_422 {dimension_numbers = #tpu.dot_dimension_numbers<[1], [0], [0], [1], [0, 0, 1, 1], [], []>} : vector<7x64xf32>, vector<64x128xf32>, vector<7x128xf32> -> vector<7x128xf32>
    %440 = arith.addf %434, %439 : vector<7x128xf32>
    %c7_423 = arith.constant 7 : index
    %c1_424 = arith.constant 1 : index
    %c0_425 = arith.constant 0 : index
    %441 = vector.load %arg14[%c7_423, %c1_424, %c0_425] : memref<9x9x64xf32, #tpu.memory_space<vmem>>, vector<1x7x64xf32>
    %442 = vector.shape_cast %441 : vector<1x7x64xf32> to vector<7x64xf32>
    %c7_426 = arith.constant 7 : index
    %c0_427 = arith.constant 0 : index
    %c0_428 = arith.constant 0 : index
    %443 = vector.load %arg6[%c7_426, %c0_427, %c0_428] : memref<9x64x128xf32, #tpu.memory_space<vmem>>, vector<1x64x128xf32>
    %444 = vector.shape_cast %443 : vector<1x64x128xf32> to vector<64x128xf32>
    %cst_429 = arith.constant dense<0.000000e+00> : vector<7x128xf32>
    %445 = tpu.matmul %442, %444, %cst_429 {dimension_numbers = #tpu.dot_dimension_numbers<[1], [0], [0], [1], [0, 0, 1, 1], [], []>} : vector<7x64xf32>, vector<64x128xf32>, vector<7x128xf32> -> vector<7x128xf32>
    %446 = arith.addf %440, %445 : vector<7x128xf32>
    %c7_430 = arith.constant 7 : index
    %c2_431 = arith.constant 2 : index
    %c0_432 = arith.constant 0 : index
    %447 = vector.load %arg14[%c7_430, %c2_431, %c0_432] : memref<9x9x64xf32, #tpu.memory_space<vmem>>, vector<1x7x64xf32>
    %448 = vector.shape_cast %447 : vector<1x7x64xf32> to vector<7x64xf32>
    %c8_433 = arith.constant 8 : index
    %c0_434 = arith.constant 0 : index
    %c0_435 = arith.constant 0 : index
    %449 = vector.load %arg6[%c8_433, %c0_434, %c0_435] : memref<9x64x128xf32, #tpu.memory_space<vmem>>, vector<1x64x128xf32>
    %450 = vector.shape_cast %449 : vector<1x64x128xf32> to vector<64x128xf32>
    %cst_436 = arith.constant dense<0.000000e+00> : vector<7x128xf32>
    %451 = tpu.matmul %448, %450, %cst_436 {dimension_numbers = #tpu.dot_dimension_numbers<[1], [0], [0], [1], [0, 0, 1, 1], [], []>} : vector<7x64xf32>, vector<64x128xf32>, vector<7x128xf32> -> vector<7x128xf32>
    %452 = arith.addf %446, %451 : vector<7x128xf32>
    %cst_437 = arith.constant 0.000000e+00 : f32
    %453 = vector.broadcast %cst_437 : f32 to vector<7x128xf32>
    %454 = arith.cmpf oge, %452, %453 : vector<7x128xf32>
    %cst_438 = arith.constant 0.00999999977 : f32
    %455 = vector.broadcast %cst_438 : f32 to vector<7x128xf32>
    %456 = arith.mulf %455, %452 : vector<7x128xf32>
    %457 = arith.select %454, %452, %456 : vector<7x128xi1>, vector<7x128xf32>
    %cst_439 = arith.constant 0.000000e+00 : f32
    %458 = vector.broadcast %cst_439 : f32 to vector<7x128xf32>
    %c0_440 = arith.constant 0 : index
    %c0_441 = arith.constant 0 : index
    %459 = vector.load %arg7[%c0_440, %c0_441] : memref<1x128xf32, #tpu.memory_space<vmem>>, vector<1x128xf32>
    %460 = vector.broadcast %459 : vector<1x128xf32> to vector<7x128xf32>
    %461 = arith.addf %458, %460 : vector<7x128xf32>
    %c6_442 = arith.constant 6 : index
    %c0_443 = arith.constant 0 : index
    %c0_444 = arith.constant 0 : index
    %462 = vector.load %arg14[%c6_442, %c0_443, %c0_444] : memref<9x9x64xf32, #tpu.memory_space<vmem>>, vector<1x7x64xf32>
    %463 = vector.shape_cast %462 : vector<1x7x64xf32> to vector<7x64xf32>
    %c0_445 = arith.constant 0 : index
    %c0_446 = arith.constant 0 : index
    %c0_447 = arith.constant 0 : index
    %464 = vector.load %arg6[%c0_445, %c0_446, %c0_447] : memref<9x64x128xf32, #tpu.memory_space<vmem>>, vector<1x64x128xf32>
    %465 = vector.shape_cast %464 : vector<1x64x128xf32> to vector<64x128xf32>
    %cst_448 = arith.constant dense<0.000000e+00> : vector<7x128xf32>
    %466 = tpu.matmul %463, %465, %cst_448 {dimension_numbers = #tpu.dot_dimension_numbers<[1], [0], [0], [1], [0, 0, 1, 1], [], []>} : vector<7x64xf32>, vector<64x128xf32>, vector<7x128xf32> -> vector<7x128xf32>
    %467 = arith.addf %461, %466 : vector<7x128xf32>
    %c6_449 = arith.constant 6 : index
    %c1_450 = arith.constant 1 : index
    %c0_451 = arith.constant 0 : index
    %468 = vector.load %arg14[%c6_449, %c1_450, %c0_451] : memref<9x9x64xf32, #tpu.memory_space<vmem>>, vector<1x7x64xf32>
    %469 = vector.shape_cast %468 : vector<1x7x64xf32> to vector<7x64xf32>
    %c1_452 = arith.constant 1 : index
    %c0_453 = arith.constant 0 : index
    %c0_454 = arith.constant 0 : index
    %470 = vector.load %arg6[%c1_452, %c0_453, %c0_454] : memref<9x64x128xf32, #tpu.memory_space<vmem>>, vector<1x64x128xf32>
    %471 = vector.shape_cast %470 : vector<1x64x128xf32> to vector<64x128xf32>
    %cst_455 = arith.constant dense<0.000000e+00> : vector<7x128xf32>
    %472 = tpu.matmul %469, %471, %cst_455 {dimension_numbers = #tpu.dot_dimension_numbers<[1], [0], [0], [1], [0, 0, 1, 1], [], []>} : vector<7x64xf32>, vector<64x128xf32>, vector<7x128xf32> -> vector<7x128xf32>
    %473 = arith.addf %467, %472 : vector<7x128xf32>
    %c6_456 = arith.constant 6 : index
    %c2_457 = arith.constant 2 : index
    %c0_458 = arith.constant 0 : index
    %474 = vector.load %arg14[%c6_456, %c2_457, %c0_458] : memref<9x9x64xf32, #tpu.memory_space<vmem>>, vector<1x7x64xf32>
    %475 = vector.shape_cast %474 : vector<1x7x64xf32> to vector<7x64xf32>
    %c2_459 = arith.constant 2 : index
    %c0_460 = arith.constant 0 : index
    %c0_461 = arith.constant 0 : index
    %476 = vector.load %arg6[%c2_459, %c0_460, %c0_461] : memref<9x64x128xf32, #tpu.memory_space<vmem>>, vector<1x64x128xf32>
    %477 = vector.shape_cast %476 : vector<1x64x128xf32> to vector<64x128xf32>
    %cst_462 = arith.constant dense<0.000000e+00> : vector<7x128xf32>
    %478 = tpu.matmul %475, %477, %cst_462 {dimension_numbers = #tpu.dot_dimension_numbers<[1], [0], [0], [1], [0, 0, 1, 1], [], []>} : vector<7x64xf32>, vector<64x128xf32>, vector<7x128xf32> -> vector<7x128xf32>
    %479 = arith.addf %473, %478 : vector<7x128xf32>
    %c7_463 = arith.constant 7 : index
    %c0_464 = arith.constant 0 : index
    %c0_465 = arith.constant 0 : index
    %480 = vector.load %arg14[%c7_463, %c0_464, %c0_465] : memref<9x9x64xf32, #tpu.memory_space<vmem>>, vector<1x7x64xf32>
    %481 = vector.shape_cast %480 : vector<1x7x64xf32> to vector<7x64xf32>
    %c3_466 = arith.constant 3 : index
    %c0_467 = arith.constant 0 : index
    %c0_468 = arith.constant 0 : index
    %482 = vector.load %arg6[%c3_466, %c0_467, %c0_468] : memref<9x64x128xf32, #tpu.memory_space<vmem>>, vector<1x64x128xf32>
    %483 = vector.shape_cast %482 : vector<1x64x128xf32> to vector<64x128xf32>
    %cst_469 = arith.constant dense<0.000000e+00> : vector<7x128xf32>
    %484 = tpu.matmul %481, %483, %cst_469 {dimension_numbers = #tpu.dot_dimension_numbers<[1], [0], [0], [1], [0, 0, 1, 1], [], []>} : vector<7x64xf32>, vector<64x128xf32>, vector<7x128xf32> -> vector<7x128xf32>
    %485 = arith.addf %479, %484 : vector<7x128xf32>
    %c7_470 = arith.constant 7 : index
    %c1_471 = arith.constant 1 : index
    %c0_472 = arith.constant 0 : index
    %486 = vector.load %arg14[%c7_470, %c1_471, %c0_472] : memref<9x9x64xf32, #tpu.memory_space<vmem>>, vector<1x7x64xf32>
    %487 = vector.shape_cast %486 : vector<1x7x64xf32> to vector<7x64xf32>
    %c4_473 = arith.constant 4 : index
    %c0_474 = arith.constant 0 : index
    %c0_475 = arith.constant 0 : index
    %488 = vector.load %arg6[%c4_473, %c0_474, %c0_475] : memref<9x64x128xf32, #tpu.memory_space<vmem>>, vector<1x64x128xf32>
    %489 = vector.shape_cast %488 : vector<1x64x128xf32> to vector<64x128xf32>
    %cst_476 = arith.constant dense<0.000000e+00> : vector<7x128xf32>
    %490 = tpu.matmul %487, %489, %cst_476 {dimension_numbers = #tpu.dot_dimension_numbers<[1], [0], [0], [1], [0, 0, 1, 1], [], []>} : vector<7x64xf32>, vector<64x128xf32>, vector<7x128xf32> -> vector<7x128xf32>
    %491 = arith.addf %485, %490 : vector<7x128xf32>
    %c7_477 = arith.constant 7 : index
    %c2_478 = arith.constant 2 : index
    %c0_479 = arith.constant 0 : index
    %492 = vector.load %arg14[%c7_477, %c2_478, %c0_479] : memref<9x9x64xf32, #tpu.memory_space<vmem>>, vector<1x7x64xf32>
    %493 = vector.shape_cast %492 : vector<1x7x64xf32> to vector<7x64xf32>
    %c5_480 = arith.constant 5 : index
    %c0_481 = arith.constant 0 : index
    %c0_482 = arith.constant 0 : index
    %494 = vector.load %arg6[%c5_480, %c0_481, %c0_482] : memref<9x64x128xf32, #tpu.memory_space<vmem>>, vector<1x64x128xf32>
    %495 = vector.shape_cast %494 : vector<1x64x128xf32> to vector<64x128xf32>
    %cst_483 = arith.constant dense<0.000000e+00> : vector<7x128xf32>
    %496 = tpu.matmul %493, %495, %cst_483 {dimension_numbers = #tpu.dot_dimension_numbers<[1], [0], [0], [1], [0, 0, 1, 1], [], []>} : vector<7x64xf32>, vector<64x128xf32>, vector<7x128xf32> -> vector<7x128xf32>
    %497 = arith.addf %491, %496 : vector<7x128xf32>
    %c8_484 = arith.constant 8 : index
    %c0_485 = arith.constant 0 : index
    %c0_486 = arith.constant 0 : index
    %498 = vector.load %arg14[%c8_484, %c0_485, %c0_486] : memref<9x9x64xf32, #tpu.memory_space<vmem>>, vector<1x7x64xf32>
    %499 = vector.shape_cast %498 : vector<1x7x64xf32> to vector<7x64xf32>
    %c6_487 = arith.constant 6 : index
    %c0_488 = arith.constant 0 : index
    %c0_489 = arith.constant 0 : index
    %500 = vector.load %arg6[%c6_487, %c0_488, %c0_489] : memref<9x64x128xf32, #tpu.memory_space<vmem>>, vector<1x64x128xf32>
    %501 = vector.shape_cast %500 : vector<1x64x128xf32> to vector<64x128xf32>
    %cst_490 = arith.constant dense<0.000000e+00> : vector<7x128xf32>
    %502 = tpu.matmul %499, %501, %cst_490 {dimension_numbers = #tpu.dot_dimension_numbers<[1], [0], [0], [1], [0, 0, 1, 1], [], []>} : vector<7x64xf32>, vector<64x128xf32>, vector<7x128xf32> -> vector<7x128xf32>
    %503 = arith.addf %497, %502 : vector<7x128xf32>
    %c8_491 = arith.constant 8 : index
    %c1_492 = arith.constant 1 : index
    %c0_493 = arith.constant 0 : index
    %504 = vector.load %arg14[%c8_491, %c1_492, %c0_493] : memref<9x9x64xf32, #tpu.memory_space<vmem>>, vector<1x7x64xf32>
    %505 = vector.shape_cast %504 : vector<1x7x64xf32> to vector<7x64xf32>
    %c7_494 = arith.constant 7 : index
    %c0_495 = arith.constant 0 : index
    %c0_496 = arith.constant 0 : index
    %506 = vector.load %arg6[%c7_494, %c0_495, %c0_496] : memref<9x64x128xf32, #tpu.memory_space<vmem>>, vector<1x64x128xf32>
    %507 = vector.shape_cast %506 : vector<1x64x128xf32> to vector<64x128xf32>
    %cst_497 = arith.constant dense<0.000000e+00> : vector<7x128xf32>
    %508 = tpu.matmul %505, %507, %cst_497 {dimension_numbers = #tpu.dot_dimension_numbers<[1], [0], [0], [1], [0, 0, 1, 1], [], []>} : vector<7x64xf32>, vector<64x128xf32>, vector<7x128xf32> -> vector<7x128xf32>
    %509 = arith.addf %503, %508 : vector<7x128xf32>
    %c8_498 = arith.constant 8 : index
    %c2_499 = arith.constant 2 : index
    %c0_500 = arith.constant 0 : index
    %510 = vector.load %arg14[%c8_498, %c2_499, %c0_500] : memref<9x9x64xf32, #tpu.memory_space<vmem>>, vector<1x7x64xf32>
    %511 = vector.shape_cast %510 : vector<1x7x64xf32> to vector<7x64xf32>
    %c8_501 = arith.constant 8 : index
    %c0_502 = arith.constant 0 : index
    %c0_503 = arith.constant 0 : index
    %512 = vector.load %arg6[%c8_501, %c0_502, %c0_503] : memref<9x64x128xf32, #tpu.memory_space<vmem>>, vector<1x64x128xf32>
    %513 = vector.shape_cast %512 : vector<1x64x128xf32> to vector<64x128xf32>
    %cst_504 = arith.constant dense<0.000000e+00> : vector<7x128xf32>
    %514 = tpu.matmul %511, %513, %cst_504 {dimension_numbers = #tpu.dot_dimension_numbers<[1], [0], [0], [1], [0, 0, 1, 1], [], []>} : vector<7x64xf32>, vector<64x128xf32>, vector<7x128xf32> -> vector<7x128xf32>
    %515 = arith.addf %509, %514 : vector<7x128xf32>
    %cst_505 = arith.constant 0.000000e+00 : f32
    %516 = vector.broadcast %cst_505 : f32 to vector<7x128xf32>
    %517 = arith.cmpf oge, %515, %516 : vector<7x128xf32>
    %cst_506 = arith.constant 0.00999999977 : f32
    %518 = vector.broadcast %cst_506 : f32 to vector<7x128xf32>
    %519 = arith.mulf %518, %515 : vector<7x128xf32>
    %520 = arith.select %517, %515, %519 : vector<7x128xi1>, vector<7x128xf32>
    %521 = arith.maximumf %457, %520 : vector<7x128xf32>
    %cst_507 = arith.constant dense<0.000000e+00> : vector<4x128xf32>
    %522 = tpu.matmul %50, %521, %cst_507 {dimension_numbers = #tpu.dot_dimension_numbers<[1], [0], [0], [1], [0, 0, 1, 1], [], []>} : vector<4x7xf32>, vector<7x128xf32>, vector<4x128xf32> -> vector<4x128xf32>
    %cst_508 = arith.constant dense<0.000000e+00> : vector<4x128xf32>
    %523 = tpu.matmul %59, %521, %cst_508 {dimension_numbers = #tpu.dot_dimension_numbers<[1], [0], [0], [1], [0, 0, 1, 1], [], []>} : vector<4x7xf32>, vector<7x128xf32>, vector<4x128xf32> -> vector<4x128xf32>
    %524 = arith.maximumf %522, %523 : vector<4x128xf32>
    %c12 = arith.constant 12 : index
    %c0_509 = arith.constant 0 : index
    %525 = vector.load %arg15[%c12, %c0_509] : memref<16x128xf32, #tpu.memory_space<vmem>>, vector<4x128xf32>
    tpu.vector_store %arg15[%c12, %c0_509], %524 {strides = array<i32>} : memref<16x128xf32, #tpu.memory_space<vmem>>, vector<4x128xf32>,
    %cst_510 = arith.constant 0.000000e+00 : f32
    %526 = vector.broadcast %cst_510 : f32 to vector<1x640xf32>
    %c0_511 = arith.constant 0 : index
    %c0_512 = arith.constant 0 : index
    %527 = vector.load %arg9[%c0_511, %c0_512] : memref<1x640xf32, #tpu.memory_space<vmem>>, vector<1x640xf32>
    %528 = arith.addf %526, %527 : vector<1x640xf32>
    %c0_513 = arith.constant 0 : index
    %c0_514 = arith.constant 0 : index
    %529 = vector.load %arg15[%c0_513, %c0_514] : memref<16x128xf32, #tpu.memory_space<vmem>>, vector<1x128xf32>
    %530 = arith.truncf %529 : vector<1x128xf32> to vector<1x128xbf16>
    %c0_515 = arith.constant 0 : index
    %c0_516 = arith.constant 0 : index
    %c0_517 = arith.constant 0 : index
    %531 = vector.load %arg8[%c0_515, %c0_516, %c0_517] : memref<16x128x640xbf16, #tpu.memory_space<vmem>>, vector<1x128x640xbf16>
    %532 = vector.shape_cast %531 : vector<1x128x640xbf16> to vector<128x640xbf16>
    %cst_518 = arith.constant dense<0.000000e+00> : vector<1x640xf32>
    %533 = tpu.matmul %530, %532, %cst_518 {dimension_numbers = #tpu.dot_dimension_numbers<[1], [0], [0], [1], [0, 0, 1, 1], [], []>} : vector<1x128xbf16>, vector<128x640xbf16>, vector<1x640xf32> -> vector<1x640xf32>
    %534 = arith.addf %528, %533 : vector<1x640xf32>
    %c1_519 = arith.constant 1 : index
    %c0_520 = arith.constant 0 : index
    %535 = vector.load %arg15[%c1_519, %c0_520] : memref<16x128xf32, #tpu.memory_space<vmem>>, vector<1x128xf32>
    %536 = arith.truncf %535 : vector<1x128xf32> to vector<1x128xbf16>
    %c1_521 = arith.constant 1 : index
    %c0_522 = arith.constant 0 : index
    %c0_523 = arith.constant 0 : index
    %537 = vector.load %arg8[%c1_521, %c0_522, %c0_523] : memref<16x128x640xbf16, #tpu.memory_space<vmem>>, vector<1x128x640xbf16>
    %538 = vector.shape_cast %537 : vector<1x128x640xbf16> to vector<128x640xbf16>
    %cst_524 = arith.constant dense<0.000000e+00> : vector<1x640xf32>
    %539 = tpu.matmul %536, %538, %cst_524 {dimension_numbers = #tpu.dot_dimension_numbers<[1], [0], [0], [1], [0, 0, 1, 1], [], []>} : vector<1x128xbf16>, vector<128x640xbf16>, vector<1x640xf32> -> vector<1x640xf32>
    %540 = arith.addf %534, %539 : vector<1x640xf32>
    %c2_525 = arith.constant 2 : index
    %c0_526 = arith.constant 0 : index
    %541 = vector.load %arg15[%c2_525, %c0_526] : memref<16x128xf32, #tpu.memory_space<vmem>>, vector<1x128xf32>
    %542 = arith.truncf %541 : vector<1x128xf32> to vector<1x128xbf16>
    %c2_527 = arith.constant 2 : index
    %c0_528 = arith.constant 0 : index
    %c0_529 = arith.constant 0 : index
    %543 = vector.load %arg8[%c2_527, %c0_528, %c0_529] : memref<16x128x640xbf16, #tpu.memory_space<vmem>>, vector<1x128x640xbf16>
    %544 = vector.shape_cast %543 : vector<1x128x640xbf16> to vector<128x640xbf16>
    %cst_530 = arith.constant dense<0.000000e+00> : vector<1x640xf32>
    %545 = tpu.matmul %542, %544, %cst_530 {dimension_numbers = #tpu.dot_dimension_numbers<[1], [0], [0], [1], [0, 0, 1, 1], [], []>} : vector<1x128xbf16>, vector<128x640xbf16>, vector<1x640xf32> -> vector<1x640xf32>
    %546 = arith.addf %540, %545 : vector<1x640xf32>
    %c3_531 = arith.constant 3 : index
    %c0_532 = arith.constant 0 : index
    %547 = vector.load %arg15[%c3_531, %c0_532] : memref<16x128xf32, #tpu.memory_space<vmem>>, vector<1x128xf32>
    %548 = arith.truncf %547 : vector<1x128xf32> to vector<1x128xbf16>
    %c3_533 = arith.constant 3 : index
    %c0_534 = arith.constant 0 : index
    %c0_535 = arith.constant 0 : index
    %549 = vector.load %arg8[%c3_533, %c0_534, %c0_535] : memref<16x128x640xbf16, #tpu.memory_space<vmem>>, vector<1x128x640xbf16>
    %550 = vector.shape_cast %549 : vector<1x128x640xbf16> to vector<128x640xbf16>
    %cst_536 = arith.constant dense<0.000000e+00> : vector<1x640xf32>
    %551 = tpu.matmul %548, %550, %cst_536 {dimension_numbers = #tpu.dot_dimension_numbers<[1], [0], [0], [1], [0, 0, 1, 1], [], []>} : vector<1x128xbf16>, vector<128x640xbf16>, vector<1x640xf32> -> vector<1x640xf32>
    %552 = arith.addf %546, %551 : vector<1x640xf32>
    %c4_537 = arith.constant 4 : index
    %c0_538 = arith.constant 0 : index
    %553 = vector.load %arg15[%c4_537, %c0_538] : memref<16x128xf32, #tpu.memory_space<vmem>>, vector<1x128xf32>
    %554 = arith.truncf %553 : vector<1x128xf32> to vector<1x128xbf16>
    %c4_539 = arith.constant 4 : index
    %c0_540 = arith.constant 0 : index
    %c0_541 = arith.constant 0 : index
    %555 = vector.load %arg8[%c4_539, %c0_540, %c0_541] : memref<16x128x640xbf16, #tpu.memory_space<vmem>>, vector<1x128x640xbf16>
    %556 = vector.shape_cast %555 : vector<1x128x640xbf16> to vector<128x640xbf16>
    %cst_542 = arith.constant dense<0.000000e+00> : vector<1x640xf32>
    %557 = tpu.matmul %554, %556, %cst_542 {dimension_numbers = #tpu.dot_dimension_numbers<[1], [0], [0], [1], [0, 0, 1, 1], [], []>} : vector<1x128xbf16>, vector<128x640xbf16>, vector<1x640xf32> -> vector<1x640xf32>
    %558 = arith.addf %552, %557 : vector<1x640xf32>
    %c5_543 = arith.constant 5 : index
    %c0_544 = arith.constant 0 : index
    %559 = vector.load %arg15[%c5_543, %c0_544] : memref<16x128xf32, #tpu.memory_space<vmem>>, vector<1x128xf32>
    %560 = arith.truncf %559 : vector<1x128xf32> to vector<1x128xbf16>
    %c5_545 = arith.constant 5 : index
    %c0_546 = arith.constant 0 : index
    %c0_547 = arith.constant 0 : index
    %561 = vector.load %arg8[%c5_545, %c0_546, %c0_547] : memref<16x128x640xbf16, #tpu.memory_space<vmem>>, vector<1x128x640xbf16>
    %562 = vector.shape_cast %561 : vector<1x128x640xbf16> to vector<128x640xbf16>
    %cst_548 = arith.constant dense<0.000000e+00> : vector<1x640xf32>
    %563 = tpu.matmul %560, %562, %cst_548 {dimension_numbers = #tpu.dot_dimension_numbers<[1], [0], [0], [1], [0, 0, 1, 1], [], []>} : vector<1x128xbf16>, vector<128x640xbf16>, vector<1x640xf32> -> vector<1x640xf32>
    %564 = arith.addf %558, %563 : vector<1x640xf32>
    %c6_549 = arith.constant 6 : index
    %c0_550 = arith.constant 0 : index
    %565 = vector.load %arg15[%c6_549, %c0_550] : memref<16x128xf32, #tpu.memory_space<vmem>>, vector<1x128xf32>
    %566 = arith.truncf %565 : vector<1x128xf32> to vector<1x128xbf16>
    %c6_551 = arith.constant 6 : index
    %c0_552 = arith.constant 0 : index
    %c0_553 = arith.constant 0 : index
    %567 = vector.load %arg8[%c6_551, %c0_552, %c0_553] : memref<16x128x640xbf16, #tpu.memory_space<vmem>>, vector<1x128x640xbf16>
    %568 = vector.shape_cast %567 : vector<1x128x640xbf16> to vector<128x640xbf16>
    %cst_554 = arith.constant dense<0.000000e+00> : vector<1x640xf32>
    %569 = tpu.matmul %566, %568, %cst_554 {dimension_numbers = #tpu.dot_dimension_numbers<[1], [0], [0], [1], [0, 0, 1, 1], [], []>} : vector<1x128xbf16>, vector<128x640xbf16>, vector<1x640xf32> -> vector<1x640xf32>
    %570 = arith.addf %564, %569 : vector<1x640xf32>
    %c7_555 = arith.constant 7 : index
    %c0_556 = arith.constant 0 : index
    %571 = vector.load %arg15[%c7_555, %c0_556] : memref<16x128xf32, #tpu.memory_space<vmem>>, vector<1x128xf32>
    %572 = arith.truncf %571 : vector<1x128xf32> to vector<1x128xbf16>
    %c7_557 = arith.constant 7 : index
    %c0_558 = arith.constant 0 : index
    %c0_559 = arith.constant 0 : index
    %573 = vector.load %arg8[%c7_557, %c0_558, %c0_559] : memref<16x128x640xbf16, #tpu.memory_space<vmem>>, vector<1x128x640xbf16>
    %574 = vector.shape_cast %573 : vector<1x128x640xbf16> to vector<128x640xbf16>
    %cst_560 = arith.constant dense<0.000000e+00> : vector<1x640xf32>
    %575 = tpu.matmul %572, %574, %cst_560 {dimension_numbers = #tpu.dot_dimension_numbers<[1], [0], [0], [1], [0, 0, 1, 1], [], []>} : vector<1x128xbf16>, vector<128x640xbf16>, vector<1x640xf32> -> vector<1x640xf32>
    %576 = arith.addf %570, %575 : vector<1x640xf32>
    %c8_561 = arith.constant 8 : index
    %c0_562 = arith.constant 0 : index
    %577 = vector.load %arg15[%c8_561, %c0_562] : memref<16x128xf32, #tpu.memory_space<vmem>>, vector<1x128xf32>
    %578 = arith.truncf %577 : vector<1x128xf32> to vector<1x128xbf16>
    %c8_563 = arith.constant 8 : index
    %c0_564 = arith.constant 0 : index
    %c0_565 = arith.constant 0 : index
    %579 = vector.load %arg8[%c8_563, %c0_564, %c0_565] : memref<16x128x640xbf16, #tpu.memory_space<vmem>>, vector<1x128x640xbf16>
    %580 = vector.shape_cast %579 : vector<1x128x640xbf16> to vector<128x640xbf16>
    %cst_566 = arith.constant dense<0.000000e+00> : vector<1x640xf32>
    %581 = tpu.matmul %578, %580, %cst_566 {dimension_numbers = #tpu.dot_dimension_numbers<[1], [0], [0], [1], [0, 0, 1, 1], [], []>} : vector<1x128xbf16>, vector<128x640xbf16>, vector<1x640xf32> -> vector<1x640xf32>
    %582 = arith.addf %576, %581 : vector<1x640xf32>
    %c9 = arith.constant 9 : index
    %c0_567 = arith.constant 0 : index
    %583 = vector.load %arg15[%c9, %c0_567] : memref<16x128xf32, #tpu.memory_space<vmem>>, vector<1x128xf32>
    %584 = arith.truncf %583 : vector<1x128xf32> to vector<1x128xbf16>
    %c9_568 = arith.constant 9 : index
    %c0_569 = arith.constant 0 : index
    %c0_570 = arith.constant 0 : index
    %585 = vector.load %arg8[%c9_568, %c0_569, %c0_570] : memref<16x128x640xbf16, #tpu.memory_space<vmem>>, vector<1x128x640xbf16>
    %586 = vector.shape_cast %585 : vector<1x128x640xbf16> to vector<128x640xbf16>
    %cst_571 = arith.constant dense<0.000000e+00> : vector<1x640xf32>
    %587 = tpu.matmul %584, %586, %cst_571 {dimension_numbers = #tpu.dot_dimension_numbers<[1], [0], [0], [1], [0, 0, 1, 1], [], []>} : vector<1x128xbf16>, vector<128x640xbf16>, vector<1x640xf32> -> vector<1x640xf32>
    %588 = arith.addf %582, %587 : vector<1x640xf32>
    %c10 = arith.constant 10 : index
    %c0_572 = arith.constant 0 : index
    %589 = vector.load %arg15[%c10, %c0_572] : memref<16x128xf32, #tpu.memory_space<vmem>>, vector<1x128xf32>
    %590 = arith.truncf %589 : vector<1x128xf32> to vector<1x128xbf16>
    %c10_573 = arith.constant 10 : index
    %c0_574 = arith.constant 0 : index
    %c0_575 = arith.constant 0 : index
    %591 = vector.load %arg8[%c10_573, %c0_574, %c0_575] : memref<16x128x640xbf16, #tpu.memory_space<vmem>>, vector<1x128x640xbf16>
    %592 = vector.shape_cast %591 : vector<1x128x640xbf16> to vector<128x640xbf16>
    %cst_576 = arith.constant dense<0.000000e+00> : vector<1x640xf32>
    %593 = tpu.matmul %590, %592, %cst_576 {dimension_numbers = #tpu.dot_dimension_numbers<[1], [0], [0], [1], [0, 0, 1, 1], [], []>} : vector<1x128xbf16>, vector<128x640xbf16>, vector<1x640xf32> -> vector<1x640xf32>
    %594 = arith.addf %588, %593 : vector<1x640xf32>
    %c11 = arith.constant 11 : index
    %c0_577 = arith.constant 0 : index
    %595 = vector.load %arg15[%c11, %c0_577] : memref<16x128xf32, #tpu.memory_space<vmem>>, vector<1x128xf32>
    %596 = arith.truncf %595 : vector<1x128xf32> to vector<1x128xbf16>
    %c11_578 = arith.constant 11 : index
    %c0_579 = arith.constant 0 : index
    %c0_580 = arith.constant 0 : index
    %597 = vector.load %arg8[%c11_578, %c0_579, %c0_580] : memref<16x128x640xbf16, #tpu.memory_space<vmem>>, vector<1x128x640xbf16>
    %598 = vector.shape_cast %597 : vector<1x128x640xbf16> to vector<128x640xbf16>
    %cst_581 = arith.constant dense<0.000000e+00> : vector<1x640xf32>
    %599 = tpu.matmul %596, %598, %cst_581 {dimension_numbers = #tpu.dot_dimension_numbers<[1], [0], [0], [1], [0, 0, 1, 1], [], []>} : vector<1x128xbf16>, vector<128x640xbf16>, vector<1x640xf32> -> vector<1x640xf32>
    %600 = arith.addf %594, %599 : vector<1x640xf32>
    %c12_582 = arith.constant 12 : index
    %c0_583 = arith.constant 0 : index
    %601 = vector.load %arg15[%c12_582, %c0_583] : memref<16x128xf32, #tpu.memory_space<vmem>>, vector<1x128xf32>
    %602 = arith.truncf %601 : vector<1x128xf32> to vector<1x128xbf16>
    %c12_584 = arith.constant 12 : index
    %c0_585 = arith.constant 0 : index
    %c0_586 = arith.constant 0 : index
    %603 = vector.load %arg8[%c12_584, %c0_585, %c0_586] : memref<16x128x640xbf16, #tpu.memory_space<vmem>>, vector<1x128x640xbf16>
    %604 = vector.shape_cast %603 : vector<1x128x640xbf16> to vector<128x640xbf16>
    %cst_587 = arith.constant dense<0.000000e+00> : vector<1x640xf32>
    %605 = tpu.matmul %602, %604, %cst_587 {dimension_numbers = #tpu.dot_dimension_numbers<[1], [0], [0], [1], [0, 0, 1, 1], [], []>} : vector<1x128xbf16>, vector<128x640xbf16>, vector<1x640xf32> -> vector<1x640xf32>
    %606 = arith.addf %600, %605 : vector<1x640xf32>
    %c13 = arith.constant 13 : index
    %c0_588 = arith.constant 0 : index
    %607 = vector.load %arg15[%c13, %c0_588] : memref<16x128xf32, #tpu.memory_space<vmem>>, vector<1x128xf32>
    %608 = arith.truncf %607 : vector<1x128xf32> to vector<1x128xbf16>
    %c13_589 = arith.constant 13 : index
    %c0_590 = arith.constant 0 : index
    %c0_591 = arith.constant 0 : index
    %609 = vector.load %arg8[%c13_589, %c0_590, %c0_591] : memref<16x128x640xbf16, #tpu.memory_space<vmem>>, vector<1x128x640xbf16>
    %610 = vector.shape_cast %609 : vector<1x128x640xbf16> to vector<128x640xbf16>
    %cst_592 = arith.constant dense<0.000000e+00> : vector<1x640xf32>
    %611 = tpu.matmul %608, %610, %cst_592 {dimension_numbers = #tpu.dot_dimension_numbers<[1], [0], [0], [1], [0, 0, 1, 1], [], []>} : vector<1x128xbf16>, vector<128x640xbf16>, vector<1x640xf32> -> vector<1x640xf32>
    %612 = arith.addf %606, %611 : vector<1x640xf32>
    %c14 = arith.constant 14 : index
    %c0_593 = arith.constant 0 : index
    %613 = vector.load %arg15[%c14, %c0_593] : memref<16x128xf32, #tpu.memory_space<vmem>>, vector<1x128xf32>
    %614 = arith.truncf %613 : vector<1x128xf32> to vector<1x128xbf16>
    %c14_594 = arith.constant 14 : index
    %c0_595 = arith.constant 0 : index
    %c0_596 = arith.constant 0 : index
    %615 = vector.load %arg8[%c14_594, %c0_595, %c0_596] : memref<16x128x640xbf16, #tpu.memory_space<vmem>>, vector<1x128x640xbf16>
    %616 = vector.shape_cast %615 : vector<1x128x640xbf16> to vector<128x640xbf16>
    %cst_597 = arith.constant dense<0.000000e+00> : vector<1x640xf32>
    %617 = tpu.matmul %614, %616, %cst_597 {dimension_numbers = #tpu.dot_dimension_numbers<[1], [0], [0], [1], [0, 0, 1, 1], [], []>} : vector<1x128xbf16>, vector<128x640xbf16>, vector<1x640xf32> -> vector<1x640xf32>
    %618 = arith.addf %612, %617 : vector<1x640xf32>
    %c15 = arith.constant 15 : index
    %c0_598 = arith.constant 0 : index
    %619 = vector.load %arg15[%c15, %c0_598] : memref<16x128xf32, #tpu.memory_space<vmem>>, vector<1x128xf32>
    %620 = arith.truncf %619 : vector<1x128xf32> to vector<1x128xbf16>
    %c15_599 = arith.constant 15 : index
    %c0_600 = arith.constant 0 : index
    %c0_601 = arith.constant 0 : index
    %621 = vector.load %arg8[%c15_599, %c0_600, %c0_601] : memref<16x128x640xbf16, #tpu.memory_space<vmem>>, vector<1x128x640xbf16>
    %622 = vector.shape_cast %621 : vector<1x128x640xbf16> to vector<128x640xbf16>
    %cst_602 = arith.constant dense<0.000000e+00> : vector<1x640xf32>
    %623 = tpu.matmul %620, %622, %cst_602 {dimension_numbers = #tpu.dot_dimension_numbers<[1], [0], [0], [1], [0, 0, 1, 1], [], []>} : vector<1x128xbf16>, vector<128x640xbf16>, vector<1x640xf32> -> vector<1x640xf32>
    %624 = arith.addf %618, %623 : vector<1x640xf32>
    %cst_603 = arith.constant 0.000000e+00 : f32
    %625 = vector.broadcast %cst_603 : f32 to vector<1x640xf32>
    %626 = arith.cmpf oge, %624, %625 : vector<1x640xf32>
    %cst_604 = arith.constant 0.00999999977 : f32
    %627 = vector.broadcast %cst_604 : f32 to vector<1x640xf32>
    %628 = arith.mulf %627, %624 : vector<1x640xf32>
    %629 = arith.select %626, %624, %628 : vector<1x640xi1>, vector<1x640xf32>
    %c0_605 = arith.constant 0 : index
    %c0_606 = arith.constant 0 : index
    %630 = vector.load %arg10[%c0_605, %c0_606] : memref<640x128xf32, #tpu.memory_space<vmem>>, vector<640x128xf32>
    %cst_607 = arith.constant dense<0.000000e+00> : vector<1x128xf32>
    %631 = tpu.matmul %629, %630, %cst_607 {dimension_numbers = #tpu.dot_dimension_numbers<[1], [0], [0], [1], [0, 0, 1, 1], [], []>} : vector<1x640xf32>, vector<640x128xf32>, vector<1x128xf32> -> vector<1x128xf32>
    %c0_608 = arith.constant 0 : index
    %c0_609 = arith.constant 0 : index
    %632 = vector.load %arg11[%c0_608, %c0_609] : memref<1x128xf32, #tpu.memory_space<vmem>>, vector<1x128xf32>
    %633 = arith.addf %631, %632 : vector<1x128xf32>
    %c0_610 = arith.constant 0 : index
    %c0_611 = arith.constant 0 : index
    %c0_612 = arith.constant 0 : index
    %634 = vector.load %arg12[%c0_610, %c0_611, %c0_612] : memref<1x1x128xf32, #tpu.memory_space<vmem>>, vector<1x1x128xf32>
    %635 = vector.shape_cast %634 : vector<1x1x128xf32> to vector<1x128xf32>
    %636 = vector.shape_cast %633 : vector<1x128xf32> to vector<1x1x128xf32>
    tpu.vector_store %arg12[%c0_610, %c0_611, %c0_612], %636 {strides = array<i32>} : memref<1x1x128xf32, #tpu.memory_space<vmem>>, vector<1x1x128xf32>,
    return
  }
  func.func @transform_0(%arg0: i32) -> (i32, i32, i32, i32) {
    %c0_i32 = arith.constant 0 : i32
    %c0_i32_0 = arith.constant 0 : i32
    %c0_i32_1 = arith.constant 0 : i32
    %c0_i32_2 = arith.constant 0 : i32
    return %arg0, %c0_i32, %c0_i32_0, %c0_i32_1 : i32, i32, i32, i32
  }
  func.func @transform_1(%arg0: i32) -> (i32, i32, i32) {
    %c0_i32 = arith.constant 0 : i32
    %c0_i32_0 = arith.constant 0 : i32
    %c0_i32_1 = arith.constant 0 : i32
    %c0_i32_2 = arith.constant 0 : i32
    return %c0_i32, %c0_i32_0, %c0_i32_1 : i32, i32, i32
  }
  func.func @transform_2(%arg0: i32) -> (i32, i32) {
    %c0_i32 = arith.constant 0 : i32
    %c0_i32_0 = arith.constant 0 : i32
    %c0_i32_1 = arith.constant 0 : i32
    return %c0_i32, %c0_i32_0 : i32, i32
  }
  func.func @transform_3(%arg0: i32) -> (i32, i32, i32) {
    %c0_i32 = arith.constant 0 : i32
    %c0_i32_0 = arith.constant 0 : i32
    %c0_i32_1 = arith.constant 0 : i32
    %c0_i32_2 = arith.constant 0 : i32
    return %c0_i32, %c0_i32_0, %c0_i32_1 : i32, i32, i32
  }
  func.func @transform_4(%arg0: i32) -> (i32, i32) {
    %c0_i32 = arith.constant 0 : i32
    %c0_i32_0 = arith.constant 0 : i32
    %c0_i32_1 = arith.constant 0 : i32
    return %c0_i32, %c0_i32_0 : i32, i32
  }
  func.func @transform_5(%arg0: i32) -> (i32, i32, i32) {
    %c0_i32 = arith.constant 0 : i32
    %c0_i32_0 = arith.constant 0 : i32
    %c0_i32_1 = arith.constant 0 : i32
    %c0_i32_2 = arith.constant 0 : i32
    return %c0_i32, %c0_i32_0, %c0_i32_1 : i32, i32, i32
  }
  func.func @transform_6(%arg0: i32) -> (i32, i32) {
    %c0_i32 = arith.constant 0 : i32
    %c0_i32_0 = arith.constant 0 : i32
    %c0_i32_1 = arith.constant 0 : i32
    return %c0_i32, %c0_i32_0 : i32, i32
  }
  func.func @transform_7(%arg0: i32) -> (i32, i32, i32) {
    %c0_i32 = arith.constant 0 : i32
    %c0_i32_0 = arith.constant 0 : i32
    %c0_i32_1 = arith.constant 0 : i32
    %c0_i32_2 = arith.constant 0 : i32
    return %c0_i32, %c0_i32_0, %c0_i32_1 : i32, i32, i32
  }
  func.func @transform_8(%arg0: i32) -> (i32, i32) {
    %c0_i32 = arith.constant 0 : i32
    %c0_i32_0 = arith.constant 0 : i32
    %c0_i32_1 = arith.constant 0 : i32
    return %c0_i32, %c0_i32_0 : i32, i32
  }
  func.func @transform_9(%arg0: i32) -> (i32, i32) {
    %c0_i32 = arith.constant 0 : i32
    %c0_i32_0 = arith.constant 0 : i32
    %c0_i32_1 = arith.constant 0 : i32
    return %c0_i32, %c0_i32_0 : i32, i32
  }
  func.func @transform_10(%arg0: i32) -> (i32, i32) {
    %c0_i32 = arith.constant 0 : i32
    %c0_i32_0 = arith.constant 0 : i32
    %c0_i32_1 = arith.constant 0 : i32
    return %c0_i32, %c0_i32_0 : i32, i32
  }
  func.func @transform_11(%arg0: i32) -> (i32, i32, i32) {
    %c0_i32 = arith.constant 0 : i32
    %c0_i32_0 = arith.constant 0 : i32
    %c0_i32_1 = arith.constant 0 : i32
    return %arg0, %c0_i32, %c0_i32_0 : i32, i32, i32
  }
}

</mosaic_0001>

<bundles_post_ra>
// kernel: cnn2_forward.1
= control target key start
LH: loop header
LB: loop body
LE: loop exit
PB: predicated region body
PF: predicated region fallthrough
CT: control target
= control target key end

     0   :  { %s27666_s0 = inlined_call_operand.vmem [shape: f32[2,30,30,1], index: 0, kind: input, shape index: {}]   ;;  %s27667_s1 = inlined_call_operand.vmem [shape: f32[9,1,32], index: 1, kind: input, shape index: {}]   ;;  %s27668_s2 = inlined_call_operand.vmem [shape: f32[1,32], index: 2, kind: input, shape index: {}]   ;;  %s27669_s3 = inlined_call_operand.hbm [shape: f32[9,32,64], index: 3, kind: input, shape index: {}]   ;;  %s27670_s4 = inlined_call_operand.vmem [shape: f32[1,64], index: 4, kind: input, shape index: {}]   ;;  %s27671_s5 = inlined_call_operand.vmem [shape: f32[9,64,128], index: 5, kind: input, shape index: {}]   ;;  %s27672_s6 = inlined_call_operand.hbm [shape: f32[1,128], index: 6, kind: input, shape index: {}]   ;;  %s27673_s7 = inlined_call_operand.vmem [shape: bf16[16,128,640], index: 7, kind: input, shape index: {}]   ;;  %s27674_s8 = inlined_call_operand.hbm [shape: f32[1,640], index: 8, kind: input, shape index: {}]   ;;  %s27675_s9 = inlined_call_operand.hbm [shape: f32[640,128], index: 9, kind: input, shape index: {}]   ;;  %s27676_s10 = inlined_call_operand.hbm [shape: f32[1,128], index: 10, kind: input, shape index: {}]   ;;  %s27677_s11 = inlined_call_operand.hbm [shape: f32[2,1,128], index: 11, kind: output, shape index: {}]  }
   0x1   :  { %27693 = sst [smem:[#allocation25_spill]] %s27672_s6 }
   0x2   :  { %27694 = sst [smem:[#allocation26_spill]] %s27675_s9 }
   0x3   :  { %16 = vsyncpa [#allocation6], 0 }
   0x4   :  { %17 = vsyncpa [#allocation9], 0 }
   0x5   :  { %18 = vsyncpa [#allocation12], 0 }
   0x6   :  { %19 = vsyncpa [#allocation7], 0 }
   0x7   :  { %21 = vsyncpa [#allocation7 + $0x1], 0  ;;  %s23058_s17 = smov 0   ;;  %s23060_s18 = smov 0  }
   0x8   :  { %s23062_s19 = smov 0   ;;  %s23064_s20 = smov 0  }
   0x9 LB: > { %27695 = sst [smem:[#allocation19_spill]] %s22957_s17  ;;  %s23079_s21 = sadd.s32 4294967295, %s22969_s20   ;;  %s22969_s20 = sphi %s23064_s20, %s27728_s20   ;;  %s22965_s19 = sphi %s23062_s19, %s27733_s19   ;;  %s22961_s18 = sphi %s23060_s18, %s27732_s18   ;;  %s22957_s17 = sphi %s23058_s17, %s27731_s17  }
   0xa   : > { %27696 = sst [smem:[#allocation20_spill]] %s22965_s19  ;;  %s15911_s22 = sadd.s32 4294967294, %s22969_s20  }
   0xb   : > { %27697 = sst [smem:[#allocation21_spill]] %s22969_s20  ;;  %s23083_s23 = sadd.s32 1, %s22969_s20  }
   0xc   : > { %27698 = sst [smem:[#allocation22_spill]] %s23083_s23  ;;  %s270_s24 = sadd.s32 1, %s22965_s19 }
   0xd   : > { %s267_s25 = ssub.s32 %s22969_s20, %s23083_s23  ;;  %p280_p0 = scmp.ne.s32.totalorder %s22965_s19, %s22961_s18 }
   0xe   : > { %p268_p1 = scmp.eq.s32.totalorder %s267_s25, 0  ;;  %p281_p2 = scmp.eq.s32.totalorder %s23079_s21, 1 }
   0xf   : > { %p286_p3 = scmp.ne.s32.totalorder %s22961_s18, %s22957_s17  ;;  %p287_p4 = scmp.eq.s32.totalorder %s15911_s22, 1 }
  0x10   : > { %s23094_s26 = scalar_select %p268_p1, %s22965_s19, %s270_s24  }
  0x11   : > { %p23096_p5 = por %p281_p2, %p280_p0  ;;  %p23100_p6 = por %p287_p4, %p286_p3 }
  0x12   : > { %27699 = sst [smem:[#allocation23_spill]] %s23094_s26  ;;  %p15912_p7 = scmp.ge.s32.totalorder %s22969_s20, 1 }
  0x13   : > { %s27700_s27 = scalar_select %p23096_p5, 1, 0 }
  0x14   : > { %s27701_s28 = scalar_select %p23100_p6, 1, 0 }
  0x15   : > { %p294_p8 = scmp.lt.s32.totalorder %s22969_s20, 3  ;;  %p27681_p9 = scmp.eq.s32.totalorder %s23079_s21, 0 }
  0x16   : > { %27702 = sst [smem:[#allocation24_spill]] %s27701_s28  ;;  %s22979_s30 = smov [#allocation8]  }
  0x17   : > { %p23107_p10 = pnand %p15912_p7, %p294_p8  ;;  %s332_s12 = sshll.u32 %s22979_s30, 4  ;;  %s333_s12 = int_to_ptr.vmem [resolvable:$true] %s332_s12 }
  0x18   : > { %s22980_s14 = smov [#allocation11]   ;;  %s22981_s16 = smov [#allocation5]  }
  0x19   : > { %s27703_s29 = scalar_select %p23107_p10, 1, 0 }
  0x1a   : > { %p21742_p11 = pneg %p23107_p10  ;;  %s356_s15 = sshll.u32 %s22980_s14, 4  ;;  %s23119_s15 = int_to_ptr.vmem [resolvable:$true] %s356_s15 }
  0x1b   : > { %s23121_s22 = sshll.u32 %s22981_s16, 4  ;;  %s27705_s6 = sld [smem:[#allocation25_spill]]  ;;  %s313_s22 = int_to_ptr.vmem [resolvable:$true] %s23121_s22 }
  0x1c   : > { %p23115_p12 = pnand %p27681_p9, %p21742_p11 }
  0x1e   : > { %p23131_p0 = pneg %p23115_p12 }
  0x21   : > { %s22747_s30 = scalar_lea.hbm %s27705_s6, 16 }
  0x22   : > { %p22748_p13 = scmp.ne.s32.totalorder %s27705_s6, %s22747_s30  ;;  %p22754_p3 = scmp.lt.u32.totalorder %s22747_s30, %s27705_s6 }
  0x24   : > { %p22750_p1 = pnand %p23131_p0, %p22748_p13 }
  0x26   : > { %p22751_p2 = pneg %p22750_p1 }
  0x28   : > { %p22756_p4 = pnand %p22754_p3, %p22751_p2 }
  0x2a   : > { %22759 = shalt.err (!%p22756_p4)
}
  0x2b   : > { %s22760_s24 = scalar_lea.vmem %s333_s12, 16  ;;  %s22767_s19 = scalar_lea.vmem %s333_s12, 32 }
  0x2c   : > { %p22761_p7 = scmp.ne.s32.totalorder %s333_s12, %s22760_s24  ;;  %p22768_p9 = scmp.lt.s32.totalorder %s333_s12, %s333_s12 }
  0x2d   : > { %p22769_p6 = scmp.lt.s32.totalorder %s22767_s19, %s22760_s24 }
  0x2e   : > { %p22763_p8 = pnand %p22761_p7, %p23131_p0 }
  0x2f   : > { %p22770_p5 = por %p22769_p6, %p22768_p9 }
  0x30   : > { %p22764_p11 = pneg %p22763_p8 }
  0x32   : > { %p22771_p10 = pnand %p22770_p5, %p22764_p11 }
  0x34   : > { %22774 = shalt.err (!%p22771_p10)
}
  0x35   : > { %21748 = dma.hbm_to_vmem [thread:$0]  (!%p23115_p12), %s27705_s6, 16, %s333_s12, [#allocation9]  }
  0x36   : > { %s27707_s9 = sld [smem:[#allocation26_spill]] }
  0x3c   : > { %s22775_s16 = scalar_lea.hbm %s27707_s9, 10240 }
  0x3d   : > { %p22776_p13 = scmp.ne.s32.totalorder %s27707_s9, %s22775_s16  ;;  %p22782_p5 = scmp.lt.u32.totalorder %s22775_s16, %s27707_s9 }
  0x3f   : > { %p22778_p1 = pnand %p22776_p13, %p23131_p0 }
  0x41   : > { %p22779_p6 = pneg %p22778_p1 }
  0x43   : > { %p22784_p9 = pnand %p22782_p5, %p22779_p6 }
  0x45   : > { %22787 = shalt.err (!%p22784_p9)
}
  0x46   : > { %s22788_s12 = scalar_lea.vmem %s23119_s15, 10240  ;;  %p22796_p4 = scmp.lt.s32.totalorder %s23119_s15, %s23119_s15 }
  0x47   : > { %p22789_p10 = scmp.ne.s32.totalorder %s23119_s15, %s22788_s12  ;;  %p22797_p7 = scmp.lt.s32.totalorder %s22788_s12, %s22788_s12 }
  0x49   : > { %p22791_p2 = pnand %p22789_p10, %p23131_p0  ;;  %p22798_p8 = por %p22797_p7, %p22796_p4 }
  0x4b   : > { %p22792_p3 = pneg %p22791_p2 }
  0x4d   : > { %p22799_p11 = pnand %p22798_p8, %p22792_p3 }
  0x4f   : > { %22802 = shalt.err (!%p22799_p11)
}
  0x50   : > { %s22982_s17 = smov 128   ;;  %s22983_s28 = smov 8  }
  0x51   : > { %21754 = dma.hbm_to_vmem [thread:$0]  (!%p23115_p12), %s27707_s9, 10240, %s23119_s15, [#allocation12], %s22982_s17, %s22982_s17, %s22983_s28  }
  0x52   : > { %s22803_s16 = scalar_lea.hbm %s27669_s3, 4608 }
  0x53   : > { %p22804_p13 = scmp.ne.s32.totalorder %s27669_s3, %s22803_s16  ;;  %p22810_p5 = scmp.lt.u32.totalorder %s22803_s16, %s27669_s3 }
  0x55   : > { %p22806_p1 = pnand %p22804_p13, %p23131_p0 }
  0x57   : > { %p22807_p6 = pneg %p22806_p1 }
  0x59   : > { %p22812_p9 = pnand %p22810_p5, %p22807_p6 }
  0x5b   : > { %22815 = shalt.err (!%p22812_p9)
}
  0x5c   : > { %s22816_s26 = scalar_lea.vmem %s313_s22, 4608  ;;  %p22824_p4 = scmp.lt.s32.totalorder %s313_s22, %s313_s22 }
  0x5d   : > { %p22817_p10 = scmp.ne.s32.totalorder %s313_s22, %s22816_s26  ;;  %p22825_p7 = scmp.lt.s32.totalorder %s22816_s26, %s22816_s26 }
  0x5f   : > { %p22819_p2 = pnand %p22817_p10, %p23131_p0  ;;  %p22826_p8 = por %p22825_p7, %p22824_p4 }
  0x61   : > { %p22820_p3 = pneg %p22819_p2 }
  0x63   : > { %p22827_p11 = pnand %p22826_p8, %p22820_p3 }
  0x65   : > { %22830 = shalt.err (!%p22827_p11)
}
  0x66   : > { %21745 = dma.hbm_to_vmem [thread:$0]  (!%p23115_p12), %s27669_s3, 4608, %s313_s22, [#allocation6], %s22982_s17, %s22982_s17, %s22983_s28  }
  0x67   : > { %s22984_s6 = smov [#allocation10]   ;;  %s22985_s14 = smov [#allocation13]  }
  0x68   : > { %s346_s30 = sshll.u32 %s22984_s6, 4  ;;  %s370_s16 = sshll.u32 %s22985_s14, 4  ;;  %s347_s30 = int_to_ptr.vmem [resolvable:$true] %s346_s30  ;;  %s371_s16 = int_to_ptr.vmem [resolvable:$true] %s370_s16 }
  0x69   : > { %s22831_s12 = scalar_lea.hbm %s27674_s8, 80 }
  0x6a   : > { %p22832_p13 = scmp.ne.s32.totalorder %s27674_s8, %s22831_s12  ;;  %p22838_p5 = scmp.lt.u32.totalorder %s22831_s12, %s27674_s8 }
  0x6c   : > { %p22834_p1 = pnand %p22832_p13, %p23131_p0 }
  0x6e   : > { %p22835_p6 = pneg %p22834_p1 }
  0x70   : > { %p22840_p9 = pnand %p22838_p5, %p22835_p6 }
  0x72   : > { %22843 = shalt.err (!%p22840_p9)
}
  0x73   : > { %s22844_s22 = scalar_lea.vmem %s347_s30, 80  ;;  %s22851_s17 = scalar_lea.vmem %s347_s30, 96 }
  0x74   : > { %p22845_p10 = scmp.ne.s32.totalorder %s347_s30, %s22844_s22  ;;  %p22852_p4 = scmp.lt.s32.totalorder %s347_s30, %s347_s30 }
  0x75   : > { %p22853_p7 = scmp.lt.s32.totalorder %s22851_s17, %s22844_s22 }
  0x76   : > { %p22847_p2 = pnand %p22845_p10, %p23131_p0 }
  0x77   : > { %p22854_p8 = por %p22853_p7, %p22852_p4 }
  0x78   : > { %p22848_p3 = pneg %p22847_p2 }
  0x7a   : > { %p22855_p11 = pnand %p22854_p8, %p22848_p3 }
  0x7c   : > { %22858 = shalt.err (!%p22855_p11)
}
  0x7d   : > { %21751 = dma.hbm_to_vmem [thread:$0]  (!%p23115_p12), %s27674_s8, 80, %s347_s30, [#allocation9]  }
  0x7e   : > { %s22859_s6 = scalar_lea.hbm %s27676_s10, 16 }
  0x7f   : > { %p22860_p13 = scmp.ne.s32.totalorder %s27676_s10, %s22859_s6  ;;  %p22866_p5 = scmp.lt.u32.totalorder %s22859_s6, %s27676_s10 }
  0x81   : > { %p22862_p1 = pnand %p22860_p13, %p23131_p0 }
  0x83   : > { %p22863_p6 = pneg %p22862_p1 }
  0x85   : > { %p22868_p9 = pnand %p22866_p5, %p22863_p6 }
  0x87   : > { %22871 = shalt.err (!%p22868_p9)
}
  0x88   : > { %s22872_s26 = scalar_lea.vmem %s371_s16, 16  ;;  %s22879_s30 = scalar_lea.vmem %s371_s16, 32 }
  0x89   : > { %p22873_p10 = scmp.ne.s32.totalorder %s371_s16, %s22872_s26  ;;  %p22880_p4 = scmp.lt.s32.totalorder %s371_s16, %s371_s16 }
  0x8a   : > { %p22881_p7 = scmp.lt.s32.totalorder %s22879_s30, %s22872_s26 }
  0x8b   : > { %p22875_p2 = pnand %p22873_p10, %p23131_p0 }
  0x8c   : > { %p22882_p8 = por %p22881_p7, %p22880_p4 }
  0x8d   : > { %p22876_p3 = pneg %p22875_p2 }
  0x8f   : > { %p22883_p11 = pnand %p22882_p8, %p22876_p3 }
  0x91   : > { %22886 = shalt.err (!%p22883_p11)
}
  0x92   : > { %21757 = dma.hbm_to_vmem [thread:$0]  (!%p23115_p12), %s27676_s10, 16, %s371_s16, [#allocation12]  }
  0x93   : > { %p27708_p13 = scmp.ne.s32.totalorder %s27703_s29, 0 }
  0x94   : > { %p27709_p1 = scmp.eq.s32.totalorder (!%p27708_p13), %s23079_s21, 0 }
  0x95   : > { %391 = sbr.rel (%p27708_p13) target bundleno = 3924 (0xf54), region = 64 }
  0x9c   : > { %22940 = dma.done.wait (%p27709_p1), [#allocation6], 4608   ;;  %p27710_p0 = pmov %p27709_p1 }
  0x9e   : > { %22942 = vsyncadd (%p27710_p0), [#allocation6], 4294962688  ;;  %p27711_p6 = pmov %p27710_p0 }
  0x9f   : > { %p27712_p5 = pmov %p27710_p0 }
  0xa0   : > { %22944 = dma.done.wait (%p27711_p6), [#allocation9], 96  }
  0xa1   : > { %22946 = vsyncadd (%p27712_p5), [#allocation9], 4294967200  ;;  %p27713_p9 = pmov %p27710_p0 }
  0xa2   : > { %p27714_p12 = pmov %p27710_p0 }
  0xa3   : > { %22948 = dma.done.wait (%p27713_p9), [#allocation12], 10256  }
  0xa4   : > { %22950 = vsyncadd (%p27714_p12), [#allocation12], 4294957040  ;;  %s444_s23 = sand.u32 1, %s22961_s18   ;;  %p446_p10 = scmp.lt.s32.totalorder %s23079_s21, 1  ;;  %v452_v0 = vlaneseq  ;;  %vm486_vm0 = vcmask 261120   ;;  %v27691_v1 = vmov 0.0  }
  0xa5   : > { %487 = vst.msk [vmem:[#allocation2] sm:$0xff] %vm486_vm0, %v27691_v1  ;;  %488 = vst.msk [vmem:[#allocation2 + $0x8] sm:$0xff] %vm486_vm0, %v27691_v1  ;;  %vm519_vm1 = vcmask 523264   ;;  %vm521_vm2 = vcmask 516096   ;;  %s23373_s28 = scalar_lea.vmem [#allocation14], %s444_s23  ;;  %s23375_s20 = smov 0  }
  0xa6   : > { %489 = vst.msk [vmem:[#allocation2 + $0x10] sm:$0xff] %vm486_vm0, %v27691_v1  ;;  %490 = vst.msk [vmem:[#allocation2 + $0x18] sm:$0xff] %vm486_vm0, %v27691_v1  ;;  %s447_s29 = scalar_select %p446_p10, %s23079_s21, 1  ;;  %v23308_v2 = vshrl.u32 %v452_v0, 7  ;;  %v456_v3 = vand.u32 127, %v452_v0 }
  0xa7   : > { %491 = vst.msk [vmem:[#allocation2 + $0x20] sm:$0xff] %vm486_vm0, %v27691_v1  ;;  %492 = vst.msk [vmem:[#allocation2 + $0x28] sm:$0xff] %vm486_vm0, %v27691_v1 }
  0xa8   : > { %493 = vst.msk [vmem:[#allocation2 + $0x30] sm:$0xff] %vm486_vm0, %v27691_v1  ;;  %494 = vst.msk [vmem:[#allocation2 + $0x38] sm:$0xff] %vm486_vm0, %v27691_v1  ;;  %s21719_s13 = smul.u32 960, %s447_s29  ;;  %v454_v4 = vadd.s32 8, %v23308_v2  ;;  %v457_v5 = vmul.u32 2, %v23308_v2 }
  0xa9   : > { %495 = vst.msk [vmem:[#allocation2 + $0x40] sm:$0xff] %vm486_vm0, %v27691_v1  ;;  %496 = vst.msk [vmem:[#allocation2 + $0x48] sm:$0xff] %vm486_vm0, %v27691_v1 }
  0xaa   : > { %497 = vst.msk [vmem:[#allocation2 + $0x50] sm:$0xff] %vm486_vm0, %v27691_v1  ;;  %498 = vst.msk [vmem:[#allocation2 + $0x58] sm:$0xff] %vm486_vm0, %v27691_v1  ;;  %s23351_s9 = scalar_lea.vmem %s27666_s0, %s21719_s13  ;;  %v458_v6 = vmul.u32 2, %v454_v4  ;;  %vm459_vm3 = vcmp.gt.s32.totalorder %v457_v5, 0  ;;  %v469_v7 = vadd.s32 1, %v457_v5  ;;  %v15930_v8 = vadd.s32 4294967295, %v457_v5 }
  0xab   : > { %499 = vst.msk [vmem:[#allocation2 + $0x60] sm:$0xff] %vm486_vm0, %v27691_v1  ;;  %500 = vst.msk [vmem:[#allocation2 + $0x68] sm:$0xff] %vm486_vm0, %v27691_v1  ;;  %v460_v9 = vsel %vm459_vm3, %v457_v5, 0  ;;  %vm483_vm4 = vcmp.eq.s32.totalorder %v456_v3, %v457_v5 }
  0xac   : > { %501 = vst.msk [vmem:[#allocation2 + $0x70] sm:$0xff] %vm486_vm0, %v27691_v1  ;;  %502 = vst.msk [vmem:[#allocation2 + $0x78] sm:$0xff] %vm486_vm0, %v27691_v1  ;;  %vm461_vm5 = vcmp.gt.s32.totalorder %v458_v6, 0  ;;  %vm463_vm6 = vcmp.eq.s32.totalorder %v456_v3, %v460_v9  ;;  %v470_v10 = vadd.s32 1, %v458_v6  ;;  %vm471_vm7 = vcmp.eq.s32.totalorder %v456_v3, %v469_v7 }
  0xad   : > { %503 = vst.msk [vmem:[#allocation2 + $0x80] sm:$0xff] %vm486_vm0, %v27691_v1  ;;  %504 = vst.msk [vmem:[#allocation2 + $0x88] sm:$0xff] %vm486_vm0, %v27691_v1  ;;  %v462_v11 = vsel %vm461_vm5, %v458_v6, 0  ;;  %v23354_v12 = vsel %vm463_vm6, 1.0, %v27691_v1  ;;  %v23357_v13 = vsel %vm471_vm7, 1.0, %v27691_v1  ;;  %vm478_vm8 = vcmp.gt.s32.totalorder %v15930_v8, 0 }
  0xae   : > { %505 = vst.msk [vmem:[#allocation2 + $0x90] sm:$0xff] %vm486_vm0, %v27691_v1  ;;  %506 = vst.msk [vmem:[#allocation2 + $0x98] sm:$0xff] %vm486_vm0, %v27691_v1  ;;  %vm464_vm9 = vcmp.eq.s32.totalorder %v456_v3, %v462_v11  ;;  %vm472_vm10 = vcmp.eq.s32.totalorder %v456_v3, %v470_v10  ;;  %v479_v14 = vsel %vm478_vm8, %v15930_v8, 0  ;;  %v23360_v15 = vsel %vm483_vm4, 1.0, %v27691_v1 }
  0xaf   : > { %507 = vst.msk [vmem:[#allocation2 + $0xa0] sm:$0xff] %vm486_vm0, %v27691_v1  ;;  %508 = vst.msk [vmem:[#allocation2 + $0xa8] sm:$0xff] %vm486_vm0, %v27691_v1  ;;  %v23363_v16 = vsel %vm464_vm9, 1.0, %v27691_v1  ;;  %v23366_v17 = vsel %vm472_vm10, 1.0, %v27691_v1  ;;  %vm480_vm11 = vcmp.eq.s32.totalorder %v456_v3, %v479_v14 }
  0xb0   : > { %509 = vst.msk [vmem:[#allocation2 + $0xb0] sm:$0xff] %vm486_vm0, %v27691_v1  ;;  %510 = vst.msk [vmem:[#allocation2 + $0xb8] sm:$0xff] %vm486_vm0, %v27691_v1  ;;  %v23369_v18 = vsel %vm480_vm11, 1.0, %v27691_v1 }
  0xb1   : > { %511 = vst.msk [vmem:[#allocation2 + $0xc0] sm:$0xff] %vm486_vm0, %v27691_v1  ;;  %512 = vst.msk [vmem:[#allocation2 + $0xc8] sm:$0xff] %vm486_vm0, %v27691_v1 }
  0xb2   : > { %513 = vst.msk [vmem:[#allocation2 + $0xd0] sm:$0xff] %vm486_vm0, %v27691_v1  ;;  %514 = vst.msk [vmem:[#allocation2 + $0xd8] sm:$0xff] %vm486_vm0, %v27691_v1 }
  0xb3   : > { %515 = vst.msk [vmem:[#allocation2 + $0xe0] sm:$0xff] %vm486_vm0, %v27691_v1  ;;  %516 = vst.msk [vmem:[#allocation2 + $0xe8] sm:$0xff] %vm486_vm0, %v27691_v1 }
  0xb4   : > { %517 = vst.msk [vmem:[#allocation2 + $0xf0] sm:$0xff] %vm486_vm0, %v27691_v1  ;;  %518 = vst.msk [vmem:[#allocation2 + $0xf8] sm:$0xff] %vm486_vm0, %v27691_v1 }
  0xb5   : > { %520 = vst.msk [vmem:[#allocation3] sm:$0xff] %vm519_vm1, %v27691_v1  ;;  %523 = vst.msk [vmem:[#allocation3 + $0x10] sm:$0xff] %vm519_vm1, %v27691_v1 }
  0xb6   : > { %525 = vst.msk [vmem:[#allocation3 + $0x20] sm:$0xff] %vm519_vm1, %v27691_v1  ;;  %527 = vst.msk [vmem:[#allocation3 + $0x30] sm:$0xff] %vm519_vm1, %v27691_v1 }
  0xb7   : > { %529 = vst.msk [vmem:[#allocation3 + $0x40] sm:$0xff] %vm519_vm1, %v27691_v1  ;;  %531 = vst.msk [vmem:[#allocation3 + $0x50] sm:$0xff] %vm519_vm1, %v27691_v1 }
  0xb8   : > { %533 = vst.msk [vmem:[#allocation3 + $0x60] sm:$0xff] %vm519_vm1, %v27691_v1  ;;  %535 = vst.msk [vmem:[#allocation3 + $0x70] sm:$0xff] %vm519_vm1, %v27691_v1 }
  0xb9   : > { %537 = vst.msk [vmem:[#allocation3 + $0x80] sm:$0xff] %vm519_vm1, %v27691_v1 }
  0xba   : > { %522 = vst.msk [vmem:[#allocation3 + $0x8] sm:$0x1] %vm521_vm2, %v27691_v1  ;;  %524 = vst.msk [vmem:[#allocation3 + $0x18] sm:$0x1] %vm521_vm2, %v27691_v1 }
  0xbb   : > { %526 = vst.msk [vmem:[#allocation3 + $0x28] sm:$0x1] %vm521_vm2, %v27691_v1  ;;  %528 = vst.msk [vmem:[#allocation3 + $0x38] sm:$0x1] %vm521_vm2, %v27691_v1 }
  0xbc   : > { %530 = vst.msk [vmem:[#allocation3 + $0x48] sm:$0x1] %vm521_vm2, %v27691_v1  ;;  %532 = vst.msk [vmem:[#allocation3 + $0x58] sm:$0x1] %vm521_vm2, %v27691_v1 }
  0xbd   : > { %534 = vst.msk [vmem:[#allocation3 + $0x68] sm:$0x1] %vm521_vm2, %v27691_v1  ;;  %536 = vst.msk [vmem:[#allocation3 + $0x78] sm:$0x1] %vm521_vm2, %v27691_v1 }
  0xbe   : > { %538 = vst.msk [vmem:[#allocation3 + $0x88] sm:$0x1] %vm521_vm2, %v27691_v1 }
  0xbf LB: >> { %v22987_v19 = vmov 0   ;;  %s17775_s25 = sshll.u32 %s22973_s20, 6  ;;  %vm1096_vm12 = vcmask 228352   ;;  %v23439_v14 = vld [vmem:[%s27667_s1] ss:$0 sm:$0xff]  ;;  %vm1103_vm7 = vcmask 1043456   ;;  %s22973_s20 = sphi %s23375_s20, %s544_s20  }
  0xc0   : >> { %21840 = vset.pattern.permute.xlu1 %v22987_v19  ;;  %21839 = vset.pattern.permute.xlu0 %v22987_v19  ;;  %s23382_s6 = scalar_lea.vmem %s23351_s9, %s17775_s25  ;;  %vm22988_vm8 = vmmov 1   ;;  %s16001_s15 = sshll.u32 %s22973_s20, 4  ;;  %vm1269_vm10 = vcmask 259072  }
  0xc1   : >> { %v15943_v20 = vld [vmem:[%s23382_s6 + $0x20] sm:$0xff]  ;;  %v15944_v22 = vld [vmem:[%s23382_s6 + $0x28] sm:$0xff]  ;;  %v559_v28 = vld [vmem:[%s23382_s6 + $0x18] sm:$0xf]  ;;  %18731 = vmatprep.mubr.msk.f32.mxu0 %vm1096_vm12, %v23354_v12  ;;  %18742 = vmatprep.mubr.msk.f32.mxu1 %vm1096_vm12, %v23357_v13  ;;  %s15810_s22 = scalar_lea.vmem [#allocation2], %s16001_s15  ;;  %s544_s20 = sadd.s32 1, %s22973_s20  }
  0xc2   : >> { %v556_v21 = vld [vmem:[%s23382_s6] sm:$0xff]  ;;  %686 = vperm.xlu1 %21840, %v15943_v20   ;;  %v557_v23 = vld [vmem:[%s23382_s6 + $0x8] sm:$0xff]  ;;  %v558_v29 = vld [vmem:[%s23382_s6 + $0x10] sm:$0xff]  ;;  %p541_p2 = scmp.ge.s32.totalorder %s544_s20, 14  }
  0xc3   : >> { %563 = vperm.xlu0 %21839, %v556_v21   ;;  %v596_v24 = vld [vmem:[%s23382_s6 + $0x9] sm:$0xff]  ;;  %v595_v25 = vld [vmem:[%s23382_s6 + $0x1] sm:$0xff]  ;;  %v15946_v32 = vld [vmem:[%s23382_s6 + $0x38] sm:$0xf]  ;;  %s23626_s29 = smov (%p541_p2), 0  }
  0xc4   : >> { %v15950_v26 = vld [vmem:[%s23382_s6 + $0x29] sm:$0xff]  ;;  %v15949_v27 = vld [vmem:[%s23382_s6 + $0x21] sm:$0xff]  ;;  %v598_v36 = vld [vmem:[%s23382_s6 + $0x19] sm:$0xf] }
  0xc5   : >> { %v636_v30 = vld [vmem:[%s23382_s6 + $0xa] sm:$0xff]  ;;  %v635_v31 = vld [vmem:[%s23382_s6 + $0x2] sm:$0xff]  ;;  %v15952_v38 = vld [vmem:[%s23382_s6 + $0x39] sm:$0xf] }
  0xc6   : >> { %691 = vperm.xlu1 %21840, %v15944_v22   ;;  %v15945_v33 = vld [vmem:[%s23382_s6 + $0x30] sm:$0xff]  ;;  %v15955_v35 = vld [vmem:[%s23382_s6 + $0x22] sm:$0xff]  ;;  %v638_v42 = vld [vmem:[%s23382_s6 + $0x1a] sm:$0xf] }
  0xc7   : >> { %568 = vperm.xlu0 %21839, %v557_v23   ;;  %v15956_v34 = vld [vmem:[%s23382_s6 + $0x2a] sm:$0xff]  ;;  %v15963_v41 = vld [vmem:[%s23382_s6 + $0x40] sm:$0xff]  ;;  %v637_v43 = vld [vmem:[%s23382_s6 + $0x12] sm:$0xff] }
  0xc8   : >> { %v597_v37 = vld [vmem:[%s23382_s6 + $0x11] sm:$0xff]  ;;  %v15964_v40 = vld [vmem:[%s23382_s6 + $0x48] sm:$0xff]  ;;  %v15958_v44 = vld [vmem:[%s23382_s6 + $0x3a] sm:$0xf] }
  0xc9   : >> { %v15951_v39 = vld [vmem:[%s23382_s6 + $0x31] sm:$0xff]  ;;  %v15970_v46 = vld [vmem:[%s23382_s6 + $0x49] sm:$0xff]  ;;  %v15969_v47 = vld [vmem:[%s23382_s6 + $0x41] sm:$0xff] }
  0xca   : >> { %608 = vperm.xlu1 %21840, %v596_v24   ;;  %v15957_v45 = vld [vmem:[%s23382_s6 + $0x32] sm:$0xff]  ;;  %v15976_v50 = vld [vmem:[%s23382_s6 + $0x4a] sm:$0xff]  ;;  %v15975_v51 = vld [vmem:[%s23382_s6 + $0x42] sm:$0xff] }
  0xcb   : >> { %603 = vperm.xlu0 %21839, %v595_v25   ;;  %v15966_v48 = vld [vmem:[%s23382_s6 + $0x58] sm:$0xf]  ;;  %v15965_v49 = vld [vmem:[%s23382_s6 + $0x50] sm:$0xff]  ;;  %v15984_v54 = vld [vmem:[%s23382_s6 + $0x68] sm:$0xff] }
  0xcc   : >> { %v15972_v52 = vld [vmem:[%s23382_s6 + $0x59] sm:$0xf]  ;;  %v15971_v53 = vld [vmem:[%s23382_s6 + $0x51] sm:$0xff]  ;;  %v15983_v55 = vld [vmem:[%s23382_s6 + $0x60] sm:$0xff] }
  0xcd   : >> { %v15978_v56 = vld [vmem:[%s23382_s6 + $0x5a] sm:$0xf]  ;;  %v15977_v57 = vld [vmem:[%s23382_s6 + $0x52] sm:$0xff]  ;;  %v15988_v58 = vld [vmem:[%s23382_s6 + $0x69] sm:$0xff] }
  0xce   : >> { %731 = vperm.xlu1 %21840, %v15950_v26   ;;  %v15987_v59 = vld [vmem:[%s23382_s6 + $0x61] sm:$0xff]  ;;  %v15986_v60 = vld [vmem:[%s23382_s6 + $0x78] sm:$0xf]  ;;  %v15985_v61 = vld [vmem:[%s23382_s6 + $0x70] sm:$0xff] }
  0xcf   : >> { %726 = vperm.xlu0 %21839, %v15949_v27   ;;  %v15992_v62 = vld [vmem:[%s23382_s6 + $0x6a] sm:$0xff]  ;;  %v15991_v63 = vld [vmem:[%s23382_s6 + $0x62] sm:$0xff]  ;;  %v15990_v0 = vld [vmem:[%s23382_s6 + $0x79] sm:$0xf] }
  0xd0   : >> { %v15989_v3 = vld [vmem:[%s23382_s6 + $0x71] sm:$0xff]  ;;  %v15994_v4 = vld [vmem:[%s23382_s6 + $0x7a] sm:$0xf]  ;;  %v23444_v21 = vld [vmem:[%s27667_s1 + $0x1] ss:$0 sm:$0xff] }
  0xd1   : >> { %v15993_v5 = vld [vmem:[%s23382_s6 + $0x72] sm:$0xff]  ;;  %v23451_v24 = vld [vmem:[%s27668_s2] ss:$0 sm:$0xff]  ;;  %vm20554_vm9 = vmpackc.low %vm1103_vm7, %vm22988_vm8 }
  0xd2   : >> { %578 = vperm.xlu1 %21840, %v559_v28  }
  0xd3   : >> { %573 = vperm.xlu0 %21839, %v558_v29   ;;  %v23458_v29 = vld [vmem:[%s27667_s1 + $0x2] ss:$0 sm:$0xff] }
  0xd6   : >> { %648 = vperm.xlu1 %21840, %v636_v30  }
  0xd7   : >> { %643 = vperm.xlu0 %21839, %v635_v31  }
  0xda   : >> { %701 = vperm.xlu1 %21840, %v15946_v32   ;;  %v23465_v32 = vld [vmem:[%s27667_s1 + $0x3] ss:$0 sm:$0xff] }
  0xdb   : >> { %696 = vperm.xlu0 %21839, %v15945_v33  }
  0xde   : >> { %771 = vperm.xlu1 %21840, %v15956_v34  }
  0xdf   : >> { %766 = vperm.xlu0 %21839, %v15955_v35  }
  0xe2   : >> { %618 = vperm.xlu1 %21840, %v598_v36  }
  0xe3   : >> { %613 = vperm.xlu0 %21839, %v597_v37  }
  0xe6   : >> { %741 = vperm.xlu1 %21840, %v15952_v38  }
  0xe7   : >> { %736 = vperm.xlu0 %21839, %v15951_v39   ;;  %v23472_v39 = vld [vmem:[%s27667_s1 + $0x4] ss:$0 sm:$0xff] }
  0xea   : >> { %814 = vperm.xlu1 %21840, %v15964_v40  }
  0xeb   : >> { %809 = vperm.xlu0 %21839, %v15963_v41  }
  0xee   : >> { %658 = vperm.xlu1 %21840, %v638_v42  }
  0xef   : >> { %653 = vperm.xlu0 %21839, %v637_v43  }
  0xf2   : >> { %781 = vperm.xlu1 %21840, %v15958_v44  }
  0xf3   : >> { %776 = vperm.xlu0 %21839, %v15957_v45  }
  0xf6   : >> { %854 = vperm.xlu1 %21840, %v15970_v46  }
  0xf7   : >> { %849 = vperm.xlu0 %21839, %v15969_v47  }
  0xfa   : >> { %824 = vperm.xlu1 %21840, %v15966_v48  }
  0xfb   : >> { %819 = vperm.xlu0 %21839, %v15965_v49  }
  0xfe   : >> { %894 = vperm.xlu1 %21840, %v15976_v50  }
  0xff   : >> { %889 = vperm.xlu0 %21839, %v15975_v51  }
 0x102   : >> { %864 = vperm.xlu1 %21840, %v15972_v52  }
 0x103   : >> { %859 = vperm.xlu0 %21839, %v15971_v53  }
 0x106   : >> { %995 = vperm.xlu1 %21840, %v15984_v54  }
 0x107   : >> { %990 = vperm.xlu0 %21839, %v15983_v55  }
 0x10a   : >> { %904 = vperm.xlu1 %21840, %v15978_v56  }
 0x10b   : >> { %899 = vperm.xlu0 %21839, %v15977_v57  }
 0x10e   : >> { %1027 = vperm.xlu1 %21840, %v15988_v58  }
 0x10f   : >> { %1022 = vperm.xlu0 %21839, %v15987_v59  }
 0x112   : >> { %1005 = vperm.xlu1 %21840, %v15986_v60  }
 0x113   : >> { %1000 = vperm.xlu0 %21839, %v15985_v61  }
 0x116   : >> { %1059 = vperm.xlu1 %21840, %v15992_v62  }
 0x117   : >> { %1054 = vperm.xlu0 %21839, %v15991_v63  }
 0x11a   : >> { %1037 = vperm.xlu1 %21840, %v15990_v0  }
 0x11b   : >> { %1032 = vperm.xlu0 %21839, %v15989_v3  }
 0x11e   : >> { %1069 = vperm.xlu1 %21840, %v15994_v4  }
 0x11f   : >> { %1064 = vperm.xlu0 %21839, %v15993_v5  }
 0x141   : >> { %v687_v6 = vpop.permute.xlu1 %686 }
 0x142   : >> { %v564_v7 = vpop.permute.xlu0 %563  ;;  %v710_v40 = vmul.f32 %v23465_v32, %v687_v6 }
 0x143   : >> { %v587_v22 = vmul.f32 %v23439_v14, %v564_v7 }
 0x145   : >> { %v692_v8 = vpop.permute.xlu1 %691  ;;  %v591_v30 = vadd.f32 %v23451_v24, %v587_v22 }
 0x146   : >> { %v569_v9 = vpop.permute.xlu0 %568  ;;  %v711_v41 = vmul.f32 %v23465_v32, %v692_v8 }
 0x147   : >> { %v588_v23 = vmul.f32 %v23439_v14, %v569_v9 }
 0x149   : >> { %v609_v10 = vpop.permute.xlu1 %608  ;;  %v592_v31 = vadd.f32 %v23451_v24, %v588_v23 }
 0x14a   : >> { %v604_v11 = vpop.permute.xlu0 %603  ;;  %v628_v27 = vmul.f32 %v23444_v21, %v609_v10  ;;  %v933_v10 = vmul.f32 %v23439_v14, %v687_v6  ;;  %v23513_v6 = vld [vmem:[%s27667_s1 + $0x5] ss:$0 sm:$0xff] }
 0x14b   : >> { %v627_v28 = vmul.f32 %v23444_v21, %v604_v11  ;;  %v934_v11 = vmul.f32 %v23439_v14, %v692_v8 }
 0x14c   : >> { %v632_v35 = vadd.f32 %v628_v27, %v592_v31 }
 0x14d   : >> { %v732_v19 = vpop.permute.xlu1 %731  ;;  %v631_v36 = vadd.f32 %v627_v28, %v591_v30 }
 0x14e   : >> { %v727_v20 = vpop.permute.xlu0 %726  ;;  %v751_v46 = vmul.f32 %v23472_v39, %v732_v19  ;;  %v942_v27 = vmul.f32 %v23444_v21, %v732_v19  ;;  %v937_v19 = vadd.f32 %v23451_v24, %v933_v10 }
 0x14f   : >> { %v750_v47 = vmul.f32 %v23472_v39, %v727_v20  ;;  %v941_v28 = vmul.f32 %v23444_v21, %v727_v20  ;;  %v938_v20 = vadd.f32 %v23451_v24, %v934_v11 }
 0x151   : >> { %v579_v25 = vpop.permute.xlu1 %578 }
 0x152   : >> { %v574_v26 = vpop.permute.xlu0 %573  ;;  %v590_v7 = vmul.f32 %v23439_v14, %v579_v25 }
 0x153   : >> { %v589_v9 = vmul.f32 %v23439_v14, %v574_v26 }
 0x154   : >> { %v594_v25 = vadd.f32 %v23451_v24, %v590_v7 }
 0x155   : >> { %v649_v33 = vpop.permute.xlu1 %648  ;;  %v593_v26 = vadd.f32 %v23451_v24, %v589_v9 }
 0x156   : >> { %v644_v34 = vpop.permute.xlu0 %643  ;;  %v668_v37 = vmul.f32 %v23458_v29, %v649_v33 }
 0x157   : >> { %v667_v38 = vmul.f32 %v23458_v29, %v644_v34 }
 0x158   : >> { %v672_v42 = vadd.f32 %v668_v37, %v632_v35 }
 0x159   : >> { %v671_v43 = vadd.f32 %v667_v38, %v631_v36  ;;  %v702_v44 = vpop.permute.xlu1 %701  ;;  %v946_v38 = vadd.f32 %v942_v27, %v938_v20 }
 0x15a   : >> { %v697_v45 = vpop.permute.xlu0 %696  ;;  %v715_v48 = vadd.f32 %v711_v41, %v672_v42  ;;  %v936_v34 = vmul.f32 %v23439_v14, %v702_v44 }
 0x15b   : >> { %v714_v49 = vadd.f32 %v710_v40, %v671_v43  ;;  %v935_v35 = vmul.f32 %v23439_v14, %v697_v45  ;;  %v945_v40 = vadd.f32 %v941_v28, %v937_v19  ;;  %v23526_v43 = vld [vmem:[%s27667_s1 + $0x6] ss:$0 sm:$0xff] }
 0x15c   : >> { %v755_v50 = vadd.f32 %v751_v46, %v715_v48 }
 0x15d   : >> { %v23478_v51 = vadd.f32 %v750_v47, %v714_v49  ;;  %v772_v52 = vpop.permute.xlu1 %771 }
 0x15e   : >> { %v767_v53 = vpop.permute.xlu0 %766  ;;  %v791_v41 = vmul.f32 %v23513_v6, %v772_v52  ;;  %v950_v42 = vmul.f32 %v23458_v29, %v772_v52  ;;  %v712_v52 = vmul.f32 %v23465_v32, %v697_v45 }
 0x15f   : >> { %v790_v48 = vmul.f32 %v23513_v6, %v767_v53  ;;  %v949_v14 = vmul.f32 %v23458_v29, %v767_v53 }
 0x160   : >> { %v795_v11 = vadd.f32 %v791_v41, %v755_v50 }
 0x161   : >> { %v619_v54 = vpop.permute.xlu1 %618  ;;  %v794_v28 = vadd.f32 %v790_v48, %v23478_v51 }
 0x162   : >> { %v614_v55 = vpop.permute.xlu0 %613  ;;  %v630_v22 = vmul.f32 %v23444_v21, %v619_v54 }
 0x163   : >> { %v629_v23 = vmul.f32 %v23444_v21, %v614_v55  ;;  %v713_v55 = vmul.f32 %v23465_v32, %v702_v44  ;;  %v23547_v44 = vld [vmem:[%s27667_s1 + $0x7] ss:$0 sm:$0xff] }
 0x164   : >> { %v634_v36 = vadd.f32 %v630_v22, %v594_v25  ;;  %v954_v22 = vadd.f32 %v950_v42, %v946_v38 }
 0x165   : >> { %v23480_v56 = vpop.permute.xlu1 %741  ;;  %v633_v37 = vadd.f32 %v629_v23, %v593_v26 }
 0x166   : >> { %v23482_v57 = vpop.permute.xlu0 %736  ;;  %v944_v7 = vmul.f32 %v23444_v21, %v23480_v56  ;;  %v753_v50 = vmul.f32 %v23472_v39, %v23480_v56 }
 0x167   : >> { %v943_v9 = vmul.f32 %v23444_v21, %v23482_v57  ;;  %v953_v21 = vadd.f32 %v949_v14, %v945_v40 }
 0x169   : >> { %v815_v58 = vpop.permute.xlu1 %814 }
 0x16a   : >> { %v810_v59 = vpop.permute.xlu0 %809  ;;  %v834_v10 = vmul.f32 %v23526_v43, %v815_v58  ;;  %v958_v53 = vmul.f32 %v23465_v32, %v815_v58  ;;  %v23555_v58 = vld [vmem:[%s27667_s1 + $0x8] ss:$0 sm:$0xff] }
 0x16b   : >> { %v833_v45 = vmul.f32 %v23526_v43, %v810_v59 }
 0x16c   : >> { %v838_v20 = vadd.f32 %v834_v10, %v795_v11 }
 0x16d   : >> { %v659_v60 = vpop.permute.xlu1 %658 }
 0x16e   : >> { %v654_v61 = vpop.permute.xlu0 %653  ;;  %v670_v8 = vmul.f32 %v23458_v29, %v659_v60  ;;  %v940_v60 = vadd.f32 %v23451_v24, %v936_v34  ;;  %v962_v34 = vadd.f32 %v958_v53, %v954_v22 }
 0x16f   : >> { %v669_v33 = vmul.f32 %v23458_v29, %v654_v61  ;;  %v939_v61 = vadd.f32 %v23451_v24, %v935_v35  ;;  %v957_v24 = vmul.f32 %v23465_v32, %v810_v59  ;;  %v837_v35 = vadd.f32 %v833_v45, %v794_v28 }
 0x170   : >> { %v674_v49 = vadd.f32 %v670_v8, %v634_v36  ;;  %v752_v8 = vmul.f32 %v23472_v39, %v23482_v57 }
 0x171   : >> { %v23484_v62 = vpop.permute.xlu1 %781  ;;  %v673_v54 = vadd.f32 %v669_v33, %v633_v37  ;;  %v948_v33 = vadd.f32 %v944_v7, %v940_v60  ;;  %v947_v19 = vadd.f32 %v943_v9, %v939_v61  ;;  %v961_v36 = vadd.f32 %v957_v24, %v953_v21 }
 0x172   : >> { %v23486_v63 = vpop.permute.xlu0 %776  ;;  %v717_v25 = vadd.f32 %v713_v55, %v674_v49  ;;  %v952_v41 = vmul.f32 %v23458_v29, %v23484_v62  ;;  %v793_v60 = vmul.f32 %v23513_v6, %v23484_v62 }
 0x173   : >> { %v716_v26 = vadd.f32 %v712_v52, %v673_v54  ;;  %v951_v48 = vmul.f32 %v23458_v29, %v23486_v63  ;;  %v792_v52 = vmul.f32 %v23513_v6, %v23486_v63 }
 0x174   : >> { %v757_v40 = vadd.f32 %v753_v50, %v717_v25  ;;  %v956_v11 = vadd.f32 %v952_v41, %v948_v33 }
 0x175   : >> { %v23488_v0 = vpop.permute.xlu1 %854  ;;  %v756_v42 = vadd.f32 %v752_v8, %v716_v26  ;;  %v955_v63 = vadd.f32 %v951_v48, %v947_v19 }
 0x176   : >> { %v23490_v3 = vpop.permute.xlu0 %849  ;;  %v874_v59 = vmul.f32 %v23547_v44, %v23488_v0  ;;  %v966_v49 = vmul.f32 %v23472_v39, %v23488_v0  ;;  %v797_v62 = vadd.f32 %v793_v60, %v757_v40 }
 0x177   : >> { %v873_v51 = vmul.f32 %v23547_v44, %v23490_v3  ;;  %v965_v55 = vmul.f32 %v23472_v39, %v23490_v3  ;;  %v796_v22 = vadd.f32 %v792_v52, %v756_v42 }
 0x178   : >> { %v878_v14 = vadd.f32 %v874_v59, %v838_v20  ;;  %v970_v45 = vadd.f32 %v966_v49, %v962_v34 }
 0x179   : >> { %v23492_v4 = vpop.permute.xlu1 %824  ;;  %v877_v54 = vadd.f32 %v873_v51, %v837_v35  ;;  %v969_v24 = vadd.f32 %v965_v55, %v961_v36 }
 0x17a   : >> { %v23494_v5 = vpop.permute.xlu0 %819  ;;  %v836_v61 = vmul.f32 %v23526_v43, %v23492_v4  ;;  %v960_v29 = vmul.f32 %v23465_v32, %v23492_v4 }
 0x17b   : >> { %v835_v28 = vmul.f32 %v23526_v43, %v23494_v5  ;;  %v959_v4 = vmul.f32 %v23465_v32, %v23494_v5 }
 0x17c   : >> { %v840_v21 = vadd.f32 %v836_v61, %v797_v62 }
 0x17d   : >> { %v23504_v30 = vpop.permute.xlu1 %894  ;;  %v839_v34 = vadd.f32 %v835_v28, %v796_v22  ;;  %v963_v32 = vadd.f32 %v959_v4, %v955_v63 }
 0x17e   : >> { %v23506_v31 = vpop.permute.xlu0 %889  ;;  %v914_v37 = vmul.f32 %v23555_v58, %v23504_v30  ;;  %v974_v0 = vmul.f32 %v23513_v6, %v23504_v30  ;;  %v964_v30 = vadd.f32 %v960_v29, %v956_v11 }
 0x17f   : >> { %v913_v56 = vmul.f32 %v23555_v58, %v23506_v31  ;;  %v973_v3 = vmul.f32 %v23513_v6, %v23506_v31 }
 0x180   : >> { %v918_v7 = vadd.f32 %v914_v37, %v878_v14  ;;  %v978_v50 = vadd.f32 %v974_v0, %v970_v45 }
 0x181   : >> { %v23528_v46 = vpop.permute.xlu1 %864  ;;  %v917_v9 = vadd.f32 %v913_v56, %v877_v54  ;;  %v977_v59 = vadd.f32 %v973_v3, %v969_v24 }
 0x182   : >> { %v23530_v47 = vpop.permute.xlu0 %859  ;;  %v926_v26 = vmul.f32 0.01, %v918_v7  ;;  %vm922_vm13 = vcmp.ge.f32.partialorder %v918_v7, 0.0  ;;  %v968_v5 = vmul.f32 %v23472_v39, %v23528_v46 }
 0x183   : >> { %v925_v8 = vmul.f32 0.01, %v917_v9  ;;  %vm921_vm14 = vcmp.ge.f32.partialorder %v917_v9, 0.0  ;;  %v875_v35 = vmul.f32 %v23547_v44, %v23530_v47 }
 0x184   : >> { %v930_v56 = vsel %vm922_vm13, %v918_v7, %v926_v26 }
 0x185   : >> { %v996_v23 = vpop.permute.xlu1 %995  ;;  %v929_v40 = vsel %vm921_vm14, %v917_v9, %v925_v8  ;;  %v879_v9 = vadd.f32 %v875_v35, %v839_v34 }
 0x186   : >> { %v991_v27 = vpop.permute.xlu0 %990  ;;  %v1009_v25 = vmul.f32 %v23526_v43, %v996_v23  ;;  %v967_v23 = vmul.f32 %v23472_v39, %v23530_v47 }
 0x187   : >> { %v1008_v31 = vmul.f32 %v23526_v43, %v991_v27  ;;  %v876_v27 = vmul.f32 %v23547_v44, %v23528_v46  ;;  %v972_v46 = vadd.f32 %v968_v5, %v964_v30 }
 0x188   : >> { %v1013_v36 = vadd.f32 %v1009_v25, %v978_v50  ;;  %v971_v60 = vadd.f32 %v967_v23, %v963_v32 }
 0x189   : >> { %v905_v38 = vpop.permute.xlu1 %904  ;;  %v1012_v37 = vadd.f32 %v1008_v31, %v977_v59  ;;  %v880_v0 = vadd.f32 %v876_v27, %v840_v21 }
 0x18a   : >> { %v900_v57 = vpop.permute.xlu0 %899  ;;  %v976_v41 = vmul.f32 %v23513_v6, %v905_v38  ;;  %v916_v47 = vmul.f32 %v23555_v58, %v905_v38 }
 0x18b   : >> { %v975_v42 = vmul.f32 %v23513_v6, %v900_v57  ;;  %v915_v52 = vmul.f32 %v23555_v58, %v900_v57 }
 0x18c   : >> { %v980_v3 = vadd.f32 %v976_v41, %v972_v46  ;;  %v920_v63 = vadd.f32 %v916_v47, %v880_v0 }
 0x18d   : >> { %v1028_v10 = vpop.permute.xlu1 %1027  ;;  %v919_v38 = vadd.f32 %v915_v52, %v879_v9 }
 0x18e   : >> { %v1023_v53 = vpop.permute.xlu0 %1022  ;;  %v1041_v19 = vmul.f32 %v23547_v44, %v1028_v10  ;;  %v979_v10 = vadd.f32 %v975_v42, %v971_v60  ;;  %vm924_vm3 = vcmp.ge.f32.partialorder %v920_v63, 0.0 }
 0x18f   : >> { %v1040_v20 = vmul.f32 %v23547_v44, %v1023_v53  ;;  %vm923_vm4 = vcmp.ge.f32.partialorder %v919_v38, 0.0 }
 0x190   : >> { %v1045_v49 = vadd.f32 %v1041_v19, %v1013_v36  ;;  %v927_v19 = vmul.f32 0.01, %v919_v38 }
 0x191   : >> { %v1006_v51 = vpop.permute.xlu1 %1005  ;;  %v1044_v54 = vadd.f32 %v1040_v20, %v1012_v37 }
 0x192   : >> { %v1001_v33 = vpop.permute.xlu0 %1000  ;;  %v1011_v61 = vmul.f32 %v23526_v43, %v1006_v51  ;;  %v931_v23 = vsel %vm923_vm4, %v919_v38, %v927_v19 }
 0x193   : >> { %v1010_v29 = vmul.f32 %v23526_v43, %v1001_v33  ;;  %v928_v33 = vmul.f32 0.01, %v920_v63 }
 0x194   : >> { %v1015_v24 = vadd.f32 %v1011_v61, %v980_v3 }
 0x195   : >> { %v1060_v48 = vpop.permute.xlu1 %1059  ;;  %v1014_v43 = vadd.f32 %v1010_v29, %v979_v10  ;;  %v932_v5 = vsel %vm924_vm3, %v920_v63, %v928_v33 }
 0x196   : >> { %v1055_v14 = vpop.permute.xlu0 %1054  ;;  %v1073_v39 = vmul.f32 %v23555_v58, %v1060_v48 }
 0x197   : >> { %v1072_v55 = vmul.f32 %v23555_v58, %v1055_v14 }
 0x198   : >> { %v1077_v7 = vadd.f32 %v1073_v39, %v1045_v49 }
 0x199   : >> { %v1076_v6 = vadd.f32 %v1072_v55, %v1044_v54  ;;  %v1038_v53 = vpop.permute.xlu1 %1037 }
 0x19a   : >> { %v1033_v62 = vpop.permute.xlu0 %1032  ;;  %vm1081_vm15 = vcmp.ge.f32.partialorder %v1077_v7, 0.0  ;;  %v1085_v11 = vmul.f32 0.01, %v1077_v7  ;;  %v1043_v57 = vmul.f32 %v23547_v44, %v1038_v53 }
 0x19b   : >> { %vm1080_vm2 = vcmp.ge.f32.partialorder %v1076_v6, 0.0  ;;  %v1084_v22 = vmul.f32 0.01, %v1076_v6  ;;  %v1042_v45 = vmul.f32 %v23547_v44, %v1033_v62 }
 0x19c   : >> { %v1089_v28 = vsel %vm1081_vm15, %v1077_v7, %v1085_v11  ;;  %v1047_v26 = vadd.f32 %v1043_v57, %v1015_v24 }
 0x19d   : >> { %v1088_v4 = vsel %vm1080_vm2, %v1076_v6, %v1084_v22  ;;  %v1093_v21 = vmax.f32 %v930_v56, %v1089_v28  ;;  %v1070_v25 = vpop.permute.xlu1 %1069  ;;  %v1046_v50 = vadd.f32 %v1042_v45, %v1014_v43 }
 0x19e   : >> { %v1092_v30 = vmax.f32 %v929_v40, %v1088_v4  ;;  %v1065_v31 = vpop.permute.xlu0 %1064  ;;  %v1075_v8 = vmul.f32 %v23555_v58, %v1070_v25 }
 0x19f   : >> { %v1074_v59 = vmul.f32 %v23555_v58, %v1065_v31 }
 0x1a0   : >> { %v20549_v51 = vpack.c.bf16 %v1093_v21, %v1092_v30  ;;  %v1079_v20 = vadd.f32 %v1075_v8, %v1047_v26 }
 0x1a1   : >> { %v1078_v34 = vadd.f32 %v1074_v59, %v1046_v50 }
 0x1a2   : >> { %20550 = vmatprep.subr.bf16.mxu0 %v20549_v51  ;;  %20560 = vmatprep.subr.bf16.mxu1 %v20549_v51  ;;  %vm1083_vm5 = vcmp.ge.f32.partialorder %v1079_v20, 0.0  ;;  %v1087_v44 = vmul.f32 0.01, %v1079_v20 }
 0x1a3   : >> { %vm1082_vm6 = vcmp.ge.f32.partialorder %v1078_v34, 0.0  ;;  %v1086_v32 = vmul.f32 0.01, %v1078_v34  ;;  %20552 = vmatpush3.bf16.msra.mxu0 %v20549_v51  ;;  %20562 = vmatpush3.bf16.msra.mxu1 %v20549_v51 }
 0x1a4   : >> { %v1091_v58 = vsel %vm1083_vm5, %v1079_v20, %v1087_v44 }
 0x1a5   : >> { %v1090_v27 = vsel %vm1082_vm6, %v1078_v34, %v1086_v32  ;;  %v1095_v35 = vmax.f32 %v932_v5, %v1091_v58 }
 0x1a6   : >> { %v1094_v36 = vmax.f32 %v931_v23, %v1090_v27 }
 0x1a8   : >> { %v20553_v37 = vpack.c.bf16 %v1095_v35, %v1094_v36 }
 0x1aa   : >> { %20555 = vmatprep.subr.msk.bf16.mxu0 %vm20554_vm9, %v20553_v37  ;;  %20565 = vmatprep.subr.msk.bf16.mxu1 %vm20554_vm9, %v20553_v37 }
 0x1ab   : >> { %20558 = vmatpush3.bf16.msk.msra.mxu0 %vm20554_vm9, %v20553_v37  ;;  %20568 = vmatpush3.bf16.msk.msra.mxu1 %vm20554_vm9, %v20553_v37 }
 0x1ae   : >> { %18732 = vmatmul.mubr.msk.f32.vlgmr.msra.gmra.mrb[0].mxu0 %vm1096_vm12, %v23363_v16  ;;  %18743 = vmatmul.mubr.msk.f32.vlgmr.msra.gmra.mrb[0].mxu1 %vm1096_vm12, %v23366_v17 }
 0x27f   : > { %543 = sbr.rel (!%p541_p2) target bundleno = 191 (0xbf), region = 191 }
 0x281   : >> { %v18733_v56 = vpop.f32.mrb[0].mxu0  ;;  %v18744_v40 = vpop.f32.mrb[0].mxu1 }
 0x282   : >> { %v1264_v41 = vmax.f32 %v18733_v56, %v18744_v40  ;;  %v1173_v42 = vpop.f32.mrb[1].mxu0  ;;  %v1254_v48 = vpop.f32.mrb[1].mxu1 }
 0x283   : >> { %v1263_v14 = vmax.f32 %v1173_v42, %v1254_v48 }
 0x284   : >> { %16003 = vst.msk [vmem:[%s15810_s22 + $0x19] sm:$0x3f] %vm1269_vm10, %v1264_v41 }
 0x285   : >> { %16002 = vst.msk [vmem:[%s15810_s22 + $0x11] sm:$0xff] %vm486_vm0, %v1263_v14 }
 0x286 LB: >> { %v1290_v49 = vld [vmem:[#allocation5] sm:$0xff]  ;;  %v1291_v54 = vld [vmem:[#allocation5 + $0x8] sm:$0xff]  ;;  %v1292_v39 = vld [vmem:[#allocation5 + $0x10] sm:$0xff]  ;;  %s17779_s13 = sshll.u32 %s22977_s29, 5  ;;  %vm22990_vm11 = vmmov 0   ;;  %vm2841_vm2 = vcmask 1045504   ;;  %s22977_s29 = sphi %s23626_s29, %s1276_s29  }
 0x287   : >> { %v20569_v55 = vpack.c.bf16 %v1291_v54, %v1290_v49  ;;  %v1293_v46 = vld [vmem:[#allocation5 + $0x18] sm:$0xff]  ;;  %v1380_v47 = vld [vmem:[#allocation5 + $0x20] sm:$0xff]  ;;  %v1381_v52 = vld [vmem:[#allocation5 + $0x28] sm:$0xff]  ;;  %s23632_s9 = scalar_lea.vmem [#allocation2], %s17779_s13  ;;  %vm22992_vm3 = vmmov 1   ;;  %vm2837_vm5 = vcmask 113664  }
 0x288   : >> { %v20573_v60 = vpack.c.bf16 %v1293_v46, %v1292_v39  ;;  %v20577_v61 = vpack.c.bf16 %v1381_v52, %v1380_v47  ;;  %v1382_v29 = vld [vmem:[#allocation5 + $0x30] sm:$0xff]  ;;  %v1383_v7 = vld [vmem:[#allocation5 + $0x38] sm:$0xff]  ;;  %v1470_v3 = vld [vmem:[#allocation5 + $0x40] sm:$0xff]  ;;  %s16071_s17 = sshll.u32 %s22977_s29, 4  ;;  %vm2992_vm6 = vcmask 522240   ;;  %s1276_s29 = sadd.s32 1, %s22977_s29  }
 0x289   : >> { %20570 = vmatprep.subr.bf16.mxu0 %v20569_v55  ;;  %20642 = vmatprep.subr.bf16.mxu1 %v20569_v55  ;;  %v20581_v9 = vpack.c.bf16 %v1383_v7, %v1382_v29  ;;  %v1471_v10 = vld [vmem:[#allocation5 + $0x48] sm:$0xff]  ;;  %v1472_v22 = vld [vmem:[#allocation5 + $0x50] sm:$0xff]  ;;  %v1473_v63 = vld [vmem:[#allocation5 + $0x58] sm:$0xff]  ;;  %s15827_s25 = scalar_lea.vmem [#allocation3], %s16071_s17  ;;  %p1273_p3 = scmp.ge.s32.totalorder %s1276_s29, 7  }
 0x28a   : >> { %20572 = vmatpush3.bf16.msra.mxu0 %v20569_v55  ;;  %20644 = vmatpush3.bf16.msra.mxu1 %v20569_v55  ;;  %v20585_v11 = vpack.c.bf16 %v1471_v10, %v1470_v3  ;;  %v20589_v45 = vpack.c.bf16 %v1473_v63, %v1472_v22  ;;  %v1563_v24 = vld [vmem:[#allocation5 + $0x60] sm:$0xff]  ;;  %v1564_v43 = vld [vmem:[#allocation5 + $0x68] sm:$0xff]  ;;  %v1565_v30 = vld [vmem:[#allocation5 + $0x70] sm:$0xff]  ;;  %v22991_v22 = vmov 0.0   ;;  %vm3766_vm8 = vcmask (%p1273_p3), 1046528   ;;  %s17772_s6 = sshll.u32 (%p1273_p3), %s23079_s21, 4 }
 0x28b   : >> { %20574 = vmatprep.subr.bf16.mxu0 %v20573_v60  ;;  %20646 = vmatprep.subr.bf16.mxu1 %v20573_v60  ;;  %v20593_v21 = vpack.c.bf16 %v1564_v43, %v1563_v24  ;;  %v1566_v25 = vld [vmem:[#allocation5 + $0x78] sm:$0xff]  ;;  %v1653_v8 = vld [vmem:[#allocation5 + $0x80] sm:$0xff]  ;;  %v1654_v59 = vld [vmem:[#allocation5 + $0x88] sm:$0xff]  ;;  %vm3762_vm9 = vcmask (%p1273_p3), 56320   ;;  %s15762_s14 = sshll.u32 (%p1273_p3), %s23373_s28, 4  ;;  %s27621_s12 = scalar_lea.hbm (%p1273_p3), %s27677_s11, %s17772_s6  ;;  %s27623_s14 = int_to_ptr.vmem [resolvable:$true] %s15762_s14 }
 0x28c   : >> { %v1288_v16 = vld [vmem:[%s23632_s9] sm:$0xff]  ;;  %v23636_v17 = vld [vmem:[%s23632_s9 + $0x10] sm:$0xff]  ;;  %v1289_v6 = vld [vmem:[%s23632_s9 + $0x8] sm:$0x3f]  ;;  %v20597_v50 = vpack.c.bf16 %v1566_v25, %v1565_v30  ;;  %v20601_v33 = vpack.c.bf16 %v1654_v59, %v1653_v8  ;;  %s15750_s26 = scalar_lea.sflag (%p1273_p3), [#allocation7], %s444_s23  ;;  %s22887_s30 = scalar_lea.vmem (%p1273_p3), %s27623_s14, 16 }
 0x28d   : >> { %18753 = vmatprep.mubr.msk.f32.mxu0 %vm486_vm0, %v1288_v16  ;;  %18852 = vmatprep.mubr.msk.f32.mxu1 %vm486_vm0, %v23636_v17  ;;  %v23643_v0 = vld [vmem:[%s23632_s9 + $0x18] sm:$0x3f]  ;;  %v1377_v53 = vld [vmem:[%s23632_s9 + $0x1] sm:$0xff]  ;;  %v1378_v38 = vld [vmem:[%s23632_s9 + $0x9] sm:$0x3f]  ;;  %p22888_p4 = scmp.ne.s32.totalorder (%p1273_p3), %s27623_s14, %s22887_s30  ;;  %p27723_p7 = scmp.ne.s32.totalorder (%p1273_p3), %s27700_s27, 0 }
 0x28e   : >> { %20576 = vmatpush3.bf16.msra.mxu0 %v20573_v60  ;;  %20648 = vmatpush3.bf16.msra.mxu1 %v20573_v60  ;;  %v23650_v62 = vld [vmem:[%s23632_s9 + $0x11] sm:$0xff]  ;;  %v23657_v57 = vld [vmem:[%s23632_s9 + $0x19] sm:$0x3f]  ;;  %v1467_v28 = vld [vmem:[%s23632_s9 + $0x2] sm:$0xff]  ;;  %s22997_s21 = smov (%p1273_p3), [#allocation14]  }
 0x28f   : >> { %20578 = vmatprep.subr.bf16.mxu0 %v20577_v61  ;;  %20650 = vmatprep.subr.bf16.mxu1 %v20577_v61  ;;  %v23664_v4 = vld [vmem:[%s23632_s9 + $0x12] sm:$0xff]  ;;  %v1468_v31 = vld [vmem:[%s23632_s9 + $0xa] sm:$0x3f]  ;;  %v23671_v26 = vld [vmem:[%s23632_s9 + $0x1a] sm:$0x3f]  ;;  %p22889_p8 = pnand (%p1273_p3), %p22888_p4, %p27723_p7  ;;  %s22891_s15 = sshll.u32 (%p1273_p3), %s22997_s21, 4  ;;  %s22892_s15 = int_to_ptr.vmem [resolvable:$false] %s22891_s15 }
 0x290   : >> { %v23677_v51 = vld [vmem:[%s23632_s9 + $0x20] sm:$0xff]  ;;  %v1655_v19 = vld [vmem:[#allocation5 + $0x90] sm:$0xff]  ;;  %v1656_v20 = vld [vmem:[#allocation5 + $0x98] sm:$0xff]  ;;  %s22893_s22 = scalar_lea.vmem (%p1273_p3), %s22892_s15, 32  ;;  %p22894_p13 = scmp.lt.s32.totalorder (%p1273_p3), %s27623_s14, %s22892_s15 }
 0x291   : >> { %18754 = vmatmul.mubr.msk.f32.vlgmr.msra.gmra.mrb[0].mxu0 %vm486_vm0, %v1289_v6  ;;  %18853 = vmatmul.mubr.msk.f32.vlgmr.msra.gmra.mrb[0].mxu1 %vm486_vm0, %v23643_v0  ;;  %v23684_v34 = vld [vmem:[%s23632_s9 + $0x28] sm:$0x3f]  ;;  %v20605_v44 = vpack.c.bf16 %v1656_v20, %v1655_v19  ;;  %v1743_v32 = vld [vmem:[#allocation5 + $0xa0] sm:$0xff]  ;;  %v1745_v27 = vld [vmem:[#allocation5 + $0xb0] sm:$0xff]  ;;  %p22890_p11 = pneg (%p1273_p3), %p22889_p8  ;;  %p22895_p1 = scmp.lt.s32.totalorder (%p1273_p3), %s22893_s22, %s22887_s30 }
 0x292   : >> { %20580 = vmatpush3.bf16.msra.mxu0 %v20577_v61  ;;  %20652 = vmatpush3.bf16.msra.mxu1 %v20577_v61  ;;  %v1744_v5 = vld [vmem:[#allocation5 + $0xa8] sm:$0xff]  ;;  %v1746_v35 = vld [vmem:[#allocation5 + $0xb8] sm:$0xff]  ;;  %v1836_v56 = vld [vmem:[#allocation5 + $0xc0] sm:$0xff] }
 0x293   : >> { %20582 = vmatprep.subr.bf16.mxu0 %v20581_v9  ;;  %20654 = vmatprep.subr.bf16.mxu1 %v20581_v9  ;;  %v23691_v23 = vld [vmem:[%s23632_s9 + $0x21] sm:$0xff]  ;;  %v20609_v58 = vpack.c.bf16 %v1744_v5, %v1743_v32  ;;  %v23698_v36 = vld [vmem:[%s23632_s9 + $0x29] sm:$0x3f]  ;;  %v20613_v37 = vpack.c.bf16 %v1746_v35, %v1745_v27  ;;  %v1838_v48 = vld [vmem:[#allocation5 + $0xd0] sm:$0xff]  ;;  %p22896_p0 = por (%p1273_p3), %p22895_p1, %p22894_p13 }
 0x294   : >> { %18764 = vmatprep.mubr.msk.f32.mxu0 %vm486_vm0, %v1377_v53  ;;  %18863 = vmatprep.mubr.msk.f32.mxu1 %vm486_vm0, %v23650_v62  ;;  %v1837_v40 = vld [vmem:[#allocation5 + $0xc8] sm:$0xff]  ;;  %v1839_v14 = vld [vmem:[#allocation5 + $0xd8] sm:$0xff]  ;;  %v1926_v39 = vld [vmem:[#allocation5 + $0xe0] sm:$0xff] }
 0x295   : >> { %v23705_v41 = vld [vmem:[%s23632_s9 + $0x22] sm:$0xff]  ;;  %v20617_v42 = vpack.c.bf16 %v1837_v40, %v1836_v56  ;;  %v16038_v49 = vld [vmem:[%s23632_s9 + $0x2a] sm:$0x3f]  ;;  %v20621_v54 = vpack.c.bf16 %v1839_v14, %v1838_v48  ;;  %v16055_v46 = vld [vmem:[%s23632_s9 + $0x30] sm:$0xff]  ;;  %p22897_p6 = pnand (%p1273_p3), %p22896_p0, %p22890_p11 }
 0x296   : >> { %20584 = vmatpush3.bf16.msra.mxu0 %v20581_v9  ;;  %20656 = vmatpush3.bf16.msra.mxu1 %v20581_v9  ;;  %v1927_v55 = vld [vmem:[#allocation5 + $0xe8] sm:$0xff]  ;;  %v1928_v47 = vld [vmem:[#allocation5 + $0xf0] sm:$0xff]  ;;  %v1929_v52 = vld [vmem:[#allocation5 + $0xf8] sm:$0xff] }
 0x297   : >> { %20586 = vmatprep.subr.bf16.mxu0 %v20585_v11  ;;  %20658 = vmatprep.subr.bf16.mxu1 %v20585_v11  ;;  %v20625_v60 = vpack.c.bf16 %v1927_v55, %v1926_v39  ;;  %v16056_v16 = vld [vmem:[%s23632_s9 + $0x38] sm:$0x3f]  ;;  %v2016_v61 = vld [vmem:[#allocation5 + $0x100] sm:$0xff]  ;;  %v2017_v29 = vld [vmem:[#allocation5 + $0x108] sm:$0xff] }
 0x298   : >> { %v16059_v7 = vld [vmem:[%s23632_s9 + $0x31] sm:$0xff]  ;;  %v20633_v6 = vpack.c.bf16 %v2017_v29, %v2016_v61  ;;  %v16060_v3 = vld [vmem:[%s23632_s9 + $0x39] sm:$0x3f]  ;;  %v16005_v63 = vld [vmem:[%s27670_s4] ss:$0 sm:$0xff] }
 0x299   : >> { %18765 = vmatmul.mubr.msk.f32.vlgmr.msra.gmra.mrb[0].mxu0 %vm486_vm0, %v1378_v38  ;;  %18864 = vmatmul.mubr.msk.f32.vlgmr.msra.gmra.mrb[0].mxu1 %vm486_vm0, %v23657_v57  ;;  %v2019_v9 = vld [vmem:[#allocation5 + $0x118] sm:$0xff]  ;;  %vm20715_vm4 = vmpackc.low %vm2841_vm2, %vm22992_vm3  ;;  %v3004_v27 = vld [vmem:[%s27671_s5 + $0x8] sm:$0xff] (%p1273_p3) }
 0x29a   : >> { %20588 = vmatpush3.bf16.msra.mxu0 %v20585_v11  ;;  %20660 = vmatpush3.bf16.msra.mxu1 %v20585_v11  ;;  %v16063_v53 = vld [vmem:[%s23632_s9 + $0x32] sm:$0xff]  ;;  %v22989_v11 = vmov 0.0|0.0   ;;  %v3007_v56 = vld [vmem:[%s27671_s5 + $0x20] sm:$0xff] (%p1273_p3)  ;;  %v3008_v40 = vld [vmem:[%s27671_s5 + $0x28] sm:$0xff] (%p1273_p3) }
 0x29b   : >> { %20590 = vmatprep.subr.bf16.mxu0 %v20589_v45  ;;  %20662 = vmatprep.subr.bf16.mxu1 %v20589_v45  ;;  %v3005_v35 = vld [vmem:[%s27671_s5 + $0x10] sm:$0xff] (%p1273_p3)  ;;  %v3010_v48 = vld [vmem:[%s27671_s5 + $0x38] sm:$0xff] (%p1273_p3) }
 0x29c   : >> { %18775 = vmatprep.mubr.msk.f32.mxu0 %vm486_vm0, %v1467_v28  ;;  %18874 = vmatprep.mubr.msk.f32.mxu1 %vm486_vm0, %v23664_v4  ;;  %v16081_v61 = vld [vmem:[%s27671_s5 + $0x70] sm:$0xff] (%p1273_p3)  ;;  %v16082_v29 = vld [vmem:[%s27671_s5 + $0x78] sm:$0xff] (%p1273_p3) }
 0x29e   : >> { %20592 = vmatpush3.bf16.msra.mxu0 %v20589_v45  ;;  %20664 = vmatpush3.bf16.msra.mxu1 %v20589_v45 }
 0x29f   : >> { %20594 = vmatprep.subr.bf16.mxu0 %v20593_v21  ;;  %20666 = vmatprep.subr.bf16.mxu1 %v20593_v21 }
 0x2a1   : >> { %18776 = vmatmul.mubr.msk.f32.vlgmr.msra.gmra.mrb[0].mxu0 %vm486_vm0, %v1468_v31  ;;  %18875 = vmatmul.mubr.msk.f32.vlgmr.msra.gmra.mrb[0].mxu1 %vm486_vm0, %v23671_v26 }
 0x2a2   : >> { %20596 = vmatpush3.bf16.msra.mxu0 %v20593_v21  ;;  %20668 = vmatpush3.bf16.msra.mxu1 %v20593_v21 }
 0x2a3   : >> { %20598 = vmatprep.subr.bf16.mxu0 %v20597_v50  ;;  %20670 = vmatprep.subr.bf16.mxu1 %v20597_v50 }
 0x2a4   : >> { %18786 = vmatprep.mubr.msk.f32.mxu0 %vm486_vm0, %v23636_v17  ;;  %18885 = vmatprep.mubr.msk.f32.mxu1 %vm486_vm0, %v23677_v51  ;;  %v20629_v17 = vpack.c.bf16 %v1929_v52, %v1928_v47  ;;  %v16079_v52 = vld [vmem:[%s27671_s5 + $0x60] sm:$0xff] (%p1273_p3) }
 0x2a6   : >> { %20600 = vmatpush3.bf16.msra.mxu0 %v20597_v50  ;;  %20672 = vmatpush3.bf16.msra.mxu1 %v20597_v50 }
 0x2a7   : >> { %20602 = vmatprep.subr.bf16.mxu0 %v20601_v33  ;;  %20674 = vmatprep.subr.bf16.mxu1 %v20601_v33 }
 0x2a9   : >> { %18787 = vmatmul.mubr.msk.f32.vlgmr.msra.gmra.mrb[0].mxu0 %vm486_vm0, %v23643_v0  ;;  %18886 = vmatmul.mubr.msk.f32.vlgmr.msra.gmra.mrb[0].mxu1 %vm486_vm0, %v23684_v34  ;;  %v2018_v0 = vld [vmem:[#allocation5 + $0x110] sm:$0xff] }
 0x2aa   : >> { %20604 = vmatpush3.bf16.msra.mxu0 %v20601_v33  ;;  %20676 = vmatpush3.bf16.msra.mxu1 %v20601_v33  ;;  %v20637_v10 = vpack.c.bf16 %v2019_v9, %v2018_v0  ;;  %v16084_v0 = vld [vmem:[%s27671_s5 + $0x80] sm:$0xff] (%p1273_p3)  ;;  %v16085_v9 = vld [vmem:[%s27671_s5 + $0x88] sm:$0xff] (%p1273_p3) }
 0x2ab   : >> { %20606 = vmatprep.subr.bf16.mxu0 %v20605_v44  ;;  %20678 = vmatprep.subr.bf16.mxu1 %v20605_v44 }
 0x2ac   : >> { %18797 = vmatprep.mubr.msk.f32.mxu0 %vm486_vm0, %v23650_v62  ;;  %18896 = vmatprep.mubr.msk.f32.mxu1 %vm486_vm0, %v23691_v23  ;;  %v16064_v62 = vld [vmem:[%s23632_s9 + $0x3a] sm:$0x3f] }
 0x2ae   : >> { %20608 = vmatpush3.bf16.msra.mxu0 %v20605_v44  ;;  %20680 = vmatpush3.bf16.msra.mxu1 %v20605_v44 }
 0x2af   : >> { %20610 = vmatprep.subr.bf16.mxu0 %v20609_v58  ;;  %20682 = vmatprep.subr.bf16.mxu1 %v20609_v58 }
 0x2b1   : >> { %18798 = vmatmul.mubr.msk.f32.vlgmr.msra.gmra.mrb[0].mxu0 %vm486_vm0, %v23657_v57  ;;  %18897 = vmatmul.mubr.msk.f32.vlgmr.msra.gmra.mrb[0].mxu1 %vm486_vm0, %v23698_v36 }
 0x2b2   : >> { %20612 = vmatpush3.bf16.msra.mxu0 %v20609_v58  ;;  %20684 = vmatpush3.bf16.msra.mxu1 %v20609_v58  ;;  %v3003_v58 = vld [vmem:[%s27671_s5] sm:$0xff] (%p1273_p3) }
 0x2b3   : >> { %20614 = vmatprep.subr.bf16.mxu0 %v20613_v37  ;;  %20686 = vmatprep.subr.bf16.mxu1 %v20613_v37 }
 0x2b4   : >> { %18808 = vmatprep.mubr.msk.f32.mxu0 %vm486_vm0, %v23664_v4  ;;  %18907 = vmatprep.mubr.msk.f32.mxu1 %vm486_vm0, %v23705_v41 }
 0x2b6   : >> { %20616 = vmatpush3.bf16.msra.mxu0 %v20613_v37  ;;  %20688 = vmatpush3.bf16.msra.mxu1 %v20613_v37  ;;  %v23757_v37 = vpack.c.bf16 (%p1273_p3), %v3004_v27, %v3003_v58  ;;  %v16106_v27 = vld [vmem:[%s27671_s5 + $0x120] sm:$0xff] (%p1273_p3) }
 0x2b7   : >> { %20618 = vmatprep.subr.bf16.mxu0 %v20617_v42  ;;  %20690 = vmatprep.subr.bf16.mxu1 %v20617_v42 }
 0x2b9   : >> { %18809 = vmatmul.mubr.msk.f32.vlgmr.msra.gmra.mrb[0].mxu0 %vm486_vm0, %v23671_v26  ;;  %18908 = vmatmul.mubr.msk.f32.vlgmr.msra.gmra.mrb[0].mxu1 %vm486_vm0, %v16038_v49 }
 0x2ba   : >> { %20620 = vmatpush3.bf16.msra.mxu0 %v20617_v42  ;;  %20692 = vmatpush3.bf16.msra.mxu1 %v20617_v42  ;;  %v3009_v42 = vld [vmem:[%s27671_s5 + $0x30] sm:$0xff] (%p1273_p3) }
 0x2bb   : >> { %20622 = vmatprep.subr.bf16.mxu0 %v20621_v54  ;;  %20694 = vmatprep.subr.bf16.mxu1 %v20621_v54  ;;  %v23792_v14 = vpack.c.bf16 (%p1273_p3), %v3010_v48, %v3009_v42 }
 0x2bc   : >> { %18819 = vmatprep.mubr.msk.f32.mxu0 %vm486_vm0, %v23677_v51  ;;  %18918 = vmatprep.mubr.msk.f32.mxu1 %vm486_vm0, %v16055_v46  ;;  %v16077_v46 = vld [vmem:[%s27671_s5 + $0x50] sm:$0xff] (%p1273_p3) }
 0x2be   : >> { %20624 = vmatpush3.bf16.msra.mxu0 %v20621_v54  ;;  %20696 = vmatpush3.bf16.msra.mxu1 %v20621_v54  ;;  %v16076_v54 = vld [vmem:[%s27671_s5 + $0x48] sm:$0xff] (%p1273_p3) }
 0x2bf   : >> { %20626 = vmatprep.subr.bf16.mxu0 %v20625_v60  ;;  %20698 = vmatprep.subr.bf16.mxu1 %v20625_v60 }
 0x2c1   : >> { %18820 = vmatmul.mubr.msk.f32.vlgmr.msra.gmra.mrb[0].mxu0 %vm486_vm0, %v23684_v34  ;;  %18919 = vmatmul.mubr.msk.f32.vlgmr.msra.gmra.mrb[0].mxu1 %vm486_vm0, %v16056_v16  ;;  %v16080_v16 = vld [vmem:[%s27671_s5 + $0x68] sm:$0xff] (%p1273_p3) }
 0x2c2   : >> { %20628 = vmatpush3.bf16.msra.mxu0 %v20625_v60  ;;  %20700 = vmatpush3.bf16.msra.mxu1 %v20625_v60  ;;  %v16078_v60 = vld [vmem:[%s27671_s5 + $0x58] sm:$0xff] (%p1273_p3) }
 0x2c3   : >> { %20630 = vmatprep.subr.bf16.mxu0 %v20629_v17  ;;  %20702 = vmatprep.subr.bf16.mxu1 %v20629_v17  ;;  %v23817_v47 = vpack.c.bf16 (%p1273_p3), %v16078_v60, %v16077_v46  ;;  %v16113_v60 = vld [vmem:[%s27671_s5 + $0x150] sm:$0xff] (%p1273_p3) }
 0x2c4   : >> { %18830 = vmatprep.mubr.msk.f32.mxu0 %vm486_vm0, %v23691_v23  ;;  %18929 = vmatprep.mubr.msk.f32.mxu1 %vm486_vm0, %v16059_v7  ;;  %v23839_v7 = vpack.c.bf16 (%p1273_p3), %v16082_v29, %v16081_v61  ;;  %v16115_v61 = vld [vmem:[%s27671_s5 + $0x160] sm:$0xff] (%p1273_p3)  ;;  %v16116_v29 = vld [vmem:[%s27671_s5 + $0x168] sm:$0xff] (%p1273_p3) }
 0x2c6   : >> { %20632 = vmatpush3.bf16.msra.mxu0 %v20629_v17  ;;  %20704 = vmatpush3.bf16.msra.mxu1 %v20629_v17  ;;  %v23829_v17 = vpack.c.bf16 (%p1273_p3), %v16080_v16, %v16079_v52  ;;  %v16114_v52 = vld [vmem:[%s27671_s5 + $0x158] sm:$0xff] (%p1273_p3) }
 0x2c7   : >> { %20634 = vmatprep.subr.bf16.mxu0 %v20633_v6  ;;  %20706 = vmatprep.subr.bf16.mxu1 %v20633_v6 }
 0x2c9   : >> { %18831 = vmatmul.mubr.msk.f32.vlgmr.msra.gmra.mrb[0].mxu0 %vm486_vm0, %v23698_v36  ;;  %18930 = vmatmul.mubr.msk.f32.vlgmr.msra.gmra.mrb[0].mxu1 %vm486_vm0, %v16060_v3  ;;  %v27689_v36 = vmov (%p1273_p3), 0.0|0.0  }
 0x2ca   : >> { %20636 = vmatpush3.bf16.msra.mxu0 %v20633_v6  ;;  %20708 = vmatpush3.bf16.msra.mxu1 %v20633_v6 }
 0x2cb   : >> { %20638 = vmatprep.subr.bf16.mxu0 %v20637_v10  ;;  %20710 = vmatprep.subr.bf16.mxu1 %v20637_v10 }
 0x2cc   : >> { %18841 = vmatprep.mubr.msk.f32.mxu0 %vm486_vm0, %v23705_v41  ;;  %18940 = vmatprep.mubr.msk.f32.mxu1 %vm486_vm0, %v16063_v53  ;;  %v23780_v41 = vpack.c.bf16 (%p1273_p3), %v3008_v40, %v3007_v56  ;;  %v16087_v53 = vld [vmem:[%s27671_s5 + $0x98] sm:$0xff] (%p1273_p3)  ;;  %v16108_v56 = vld [vmem:[%s27671_s5 + $0x130] sm:$0xff] (%p1273_p3) }
 0x2cd   : > { %v16109_v40 = vld [vmem:[%s27671_s5 + $0x138] sm:$0xff] (%p1273_p3) }
 0x2ce   : >> { %20640 = vmatpush3.bf16.msra.mxu0 %v20637_v10  ;;  %20712 = vmatpush3.bf16.msra.mxu1 %v20637_v10  ;;  %v16086_v10 = vld [vmem:[%s27671_s5 + $0x90] sm:$0xff] (%p1273_p3) }
 0x2cf   : >> { %20713 = vmatprep.subr.bf16.mxu0 %v22989_v11  ;;  %20717 = vmatprep.subr.bf16.mxu1 %v22989_v11  ;;  %v16088_v11 = vld [vmem:[%s27671_s5 + $0xa0] sm:$0xff] (%p1273_p3) }
 0x2d1   : >> { %18842 = vmatmul.mubr.msk.f32.vlgmr.msra.gmra.mrb[0].mxu0 %vm486_vm0, %v16038_v49  ;;  %18941 = vmatmul.mubr.msk.f32.vlgmr.msra.gmra.mrb[0].mxu1 %vm486_vm0, %v16064_v62  ;;  %vm22994_vm0 = vmmov (%p1273_p3), 0   ;;  %v16075_v49 = vld [vmem:[%s27671_s5 + $0x40] sm:$0xff] (%p1273_p3)  ;;  %v23860_v62 = vpack.c.bf16 (%p1273_p3), %v16085_v9, %v16084_v0  ;;  %v16117_v0 = vld [vmem:[%s27671_s5 + $0x170] sm:$0xff] (%p1273_p3)  ;;  %v16118_v9 = vld [vmem:[%s27671_s5 + $0x178] sm:$0xff] (%p1273_p3) }
 0x2d2   : >> { %18947 = vmatprep.mubr.msk.f32.mxu0 %vm22990_vm11, %v22991_v22  ;;  %18954 = vmatprep.mubr.msk.f32.mxu1 %vm22990_vm11, %v22991_v22  ;;  %v23804_v55 = vpack.c.bf16 (%p1273_p3), %v16076_v54, %v16075_v49  ;;  %v16089_v22 = vld [vmem:[%s27671_s5 + $0xa8] sm:$0xff] (%p1273_p3)  ;;  %v16111_v49 = vld [vmem:[%s27671_s5 + $0x140] sm:$0xff] (%p1273_p3) }
 0x2d3   : > { %v16112_v54 = vld [vmem:[%s27671_s5 + $0x148] sm:$0xff] (%p1273_p3) }
 0x2d4   : > { %v24025_v16 = vpack.c.bf16 (%p1273_p3), %v16112_v54, %v16111_v49  ;;  %v16136_v49 = vld [vmem:[%s27671_s5 + $0x1f8] sm:$0xff] (%p1273_p3) }
 0x3a4   : >> { %v18843_v38 = vpop.f32.mrb[0].mxu0  ;;  %v18942_v57 = vpop.f32.mrb[0].mxu1 }
 0x3a5   : >> { %v21565_v45 = vadd.f32 %v18843_v38, %v16005_v63  ;;  %v21567_v24 = vadd.f32 %v18942_v57, %v16005_v63  ;;  %v2092_v43 = vpop.f32.mrb[1].mxu0  ;;  %v2818_v28 = vpop.f32.mrb[1].mxu1  ;;  %v16090_v38 = vld [vmem:[%s27671_s5 + $0xb0] sm:$0xff] (%p1273_p3)  ;;  %v16091_v57 = vld [vmem:[%s27671_s5 + $0xb8] sm:$0xff] (%p1273_p3) }
 0x3a6   : >> { %v21566_v4 = vadd.f32 %v16005_v63, %v2092_v43  ;;  %v21568_v21 = vadd.f32 %v16005_v63, %v2818_v28  ;;  %v23873_v63 = vpack.c.bf16 (%p1273_p3), %v16087_v53, %v16086_v10  ;;  %v16093_v43 = vld [vmem:[%s27671_s5 + $0xc0] sm:$0xff] (%p1273_p3)  ;;  %v16094_v28 = vld [vmem:[%s27671_s5 + $0xc8] sm:$0xff] (%p1273_p3) }
 0x3a7   : >> { %vm2104_vm12 = vcmp.ge.f32.partialorder %v21565_v45, 0.0  ;;  %v2106_v30 = vmul.f32 0.01, %v21565_v45  ;;  %vm2830_vm13 = vcmp.ge.f32.partialorder %v21567_v24, 0.0  ;;  %v2832_v25 = vmul.f32 0.01, %v21567_v24 }
 0x3a8   : >> { %vm2103_vm14 = vcmp.ge.f32.partialorder %v21566_v4, 0.0  ;;  %v2105_v31 = vmul.f32 0.01, %v21566_v4  ;;  %vm2829_vm15 = vcmp.ge.f32.partialorder %v21568_v21, 0.0  ;;  %v2831_v26 = vmul.f32 0.01, %v21568_v21 }
 0x3a9   : >> { %v2108_v50 = vsel %vm2104_vm12, %v21565_v45, %v2106_v30  ;;  %v2834_v8 = vsel %vm2830_vm13, %v21567_v24, %v2832_v25  ;;  %v23887_v45 = vpack.c.bf16 (%p1273_p3), %v16089_v22, %v16088_v11  ;;  %v16095_v30 = vld [vmem:[%s27671_s5 + $0xd0] sm:$0xff] (%p1273_p3)  ;;  %v16096_v25 = vld [vmem:[%s27671_s5 + $0xd8] sm:$0xff] (%p1273_p3)  ;;  %v16120_v53 = vld [vmem:[%s27671_s5 + $0x180] sm:$0xff] (%p1273_p3)  ;;  %v24064_v22 = vpack.c.bf16 (%p1273_p3), %v16118_v9, %v16117_v0 }
 0x3aa   : >> { %v2836_v59 = vmax.f32 %v2108_v50, %v2834_v8  ;;  %v2107_v51 = vsel %vm2103_vm14, %v21566_v4, %v2105_v31  ;;  %v2833_v33 = vsel %vm2829_vm15, %v21568_v21, %v2831_v26  ;;  %v23899_v4 = vpack.c.bf16 (%p1273_p3), %v16091_v57, %v16090_v38  ;;  %v16097_v26 = vld [vmem:[%s27671_s5 + $0xe0] sm:$0xff] (%p1273_p3)  ;;  %v16098_v50 = vld [vmem:[%s27671_s5 + $0xe8] sm:$0xff] (%p1273_p3)  ;;  %v16122_v57 = vld [vmem:[%s27671_s5 + $0x190] sm:$0xff] (%p1273_p3) }
 0x3ab   : >> { %v2835_v19 = vmax.f32 %v2107_v51, %v2833_v33  ;;  %v23914_v31 = vpack.c.bf16 (%p1273_p3), %v16094_v28, %v16093_v43  ;;  %v23927_v8 = vpack.c.bf16 (%p1273_p3), %v16096_v25, %v16095_v30  ;;  %v16100_v51 = vld [vmem:[%s27671_s5 + $0xf8] sm:$0xff] (%p1273_p3)  ;;  %v23941_v33 = vpack.c.bf16 (%p1273_p3), %v16098_v50, %v16097_v26  ;;  %v16121_v11 = vld [vmem:[%s27671_s5 + $0x188] sm:$0xff] (%p1273_p3)  ;;  %v16124_v28 = vld [vmem:[%s27671_s5 + $0x1a0] sm:$0xff] (%p1273_p3) }
 0x3ac   : > { %v24079_v43 = vpack.c.bf16 (%p1273_p3), %v16121_v11, %v16120_v53  ;;  %v16126_v25 = vld [vmem:[%s27671_s5 + $0x1b0] sm:$0xff] (%p1273_p3)  ;;  %v16127_v26 = vld [vmem:[%s27671_s5 + $0x1b8] sm:$0xff] (%p1273_p3)  ;;  %v16142_v53 = vld [vmem:[%s27671_s5 + $0x220] sm:$0xff] (%p1273_p3) }
 0x3ad   : >> { %v20714_v20 = vpack.c.bf16 %v2836_v59, %v2835_v19  ;;  %v16099_v59 = vld [vmem:[%s27671_s5 + $0xf0] sm:$0xff] (%p1273_p3)  ;;  %v16141_v9 = vld [vmem:[%s27671_s5 + $0x218] sm:$0xff] (%p1273_p3)  ;;  %v16143_v11 = vld [vmem:[%s27671_s5 + $0x228] sm:$0xff] (%p1273_p3) }
 0x3ae   : > { %v16140_v0 = vld [vmem:[%s27671_s5 + $0x210] sm:$0xff] (%p1273_p3) }
 0x3af   : >> { %20716 = vmatpush3.bf16.msk.msra.mxu0 %vm20715_vm4, %v20714_v20  ;;  %20720 = vmatpush3.bf16.msk.msra.mxu1 %vm20715_vm4, %v20714_v20  ;;  %v16102_v20 = vld [vmem:[%s27671_s5 + $0x100] sm:$0xff] (%p1273_p3) }
 0x3b0   : > { %20721 = vmatprep.subr.bf16.mxu0 (%p1273_p3), %v27689_v36  ;;  %20829 = vmatprep.subr.bf16.mxu1 (%p1273_p3), %v27689_v36 }
 0x3b2   : >> { %18948 = vmatmul.mubr.msk.f32.vlgmr.msra.gmra.mrb[2].mxu0 %vm2837_vm5, %v23354_v12  ;;  %18955 = vmatmul.mubr.msk.f32.vlgmr.msra.gmra.mrb[2].mxu1 %vm2837_vm5, %v23357_v13  ;;  %v3006_v12 = vld [vmem:[%s27671_s5 + $0x18] sm:$0xff] (%p1273_p3) }
 0x3b3   : > { %18973 = vmatprep.mubr.msk.f32.mxu0 (%p1273_p3), %vm22994_vm0, %v27691_v1  ;;  %19154 = vmatprep.mubr.msk.f32.mxu1 (%p1273_p3), %vm22994_vm0, %v27691_v1  ;;  %v23768_v13 = vpack.c.bf16 (%p1273_p3), %v3006_v12, %v3005_v35  ;;  %v16107_v35 = vld [vmem:[%s27671_s5 + $0x128] sm:$0xff] (%p1273_p3) }
 0x3b4   : > { %20723 = vmatpush3.bf16.msra.mxu0 (%p1273_p3), %v23757_v37  ;;  %20831 = vmatpush3.bf16.msra.mxu1 (%p1273_p3), %v23757_v37  ;;  %v23995_v42 = vpack.c.bf16 (%p1273_p3), %v16107_v35, %v16106_v27  ;;  %v16133_v27 = vld [vmem:[%s27671_s5 + $0x1e0] sm:$0xff] (%p1273_p3)  ;;  %v16134_v35 = vld [vmem:[%s27671_s5 + $0x1e8] sm:$0xff] (%p1273_p3) }
 0x3b5   : > { %20724 = vmatprep.subr.bf16.mxu0 (%p1273_p3), %v27689_v36  ;;  %20832 = vmatprep.subr.bf16.mxu1 (%p1273_p3), %v27689_v36  ;;  %v24160_v54 = vpack.c.bf16 (%p1273_p3), %v16134_v35, %v16133_v27  ;;  %v16245_v27 = vld [vmem:[%s27671_s5 + $0x68] sm:$0xff] (%p1273_p3) }
 0x3b8   : > { %20726 = vmatpush3.bf16.msra.mxu0 (%p1273_p3), %v23768_v13  ;;  %20834 = vmatpush3.bf16.msra.mxu1 (%p1273_p3), %v23768_v13 }
 0x3b9   : > { %20727 = vmatprep.subr.bf16.mxu0 (%p1273_p3), %v27689_v36  ;;  %20835 = vmatprep.subr.bf16.mxu1 (%p1273_p3), %v27689_v36 }
 0x3bc   : > { %20729 = vmatpush3.bf16.msra.mxu0 (%p1273_p3), %v23780_v41  ;;  %20837 = vmatpush3.bf16.msra.mxu1 (%p1273_p3), %v23780_v41 }
 0x3bd   : > { %20730 = vmatprep.subr.bf16.mxu0 (%p1273_p3), %v27689_v36  ;;  %20838 = vmatprep.subr.bf16.mxu1 (%p1273_p3), %v27689_v36 }
 0x3c0   : > { %20732 = vmatpush3.bf16.msra.mxu0 (%p1273_p3), %v23792_v14  ;;  %20840 = vmatpush3.bf16.msra.mxu1 (%p1273_p3), %v23792_v14 }
 0x3c1   : > { %20733 = vmatprep.subr.bf16.mxu0 (%p1273_p3), %v27689_v36  ;;  %20841 = vmatprep.subr.bf16.mxu1 (%p1273_p3), %v27689_v36 }
 0x482   : > { %1275 = sbr.rel (!%p1273_p3) target bundleno = 646 (0x286), region = 202 }
 0x485   : >> { %v2911_v34 = vpop.f32.mrb[2].mxu0  ;;  %v2984_v44 = vpop.f32.mrb[2].mxu1 }
 0x486   : >> { %v2988_v32 = vmax.f32 %v2911_v34, %v2984_v44  ;;  %v18949_v5 = vpop.f32.mrb[3].mxu0  ;;  %v18956_v23 = vpop.f32.mrb[3].mxu1  ;;  %v16103_v34 = vld [vmem:[%s27671_s5 + $0x108] sm:$0xff] (%p1273_p3)  ;;  %v23953_v44 = vpack.c.bf16 (%p1273_p3), %v16100_v51, %v16099_v59  ;;  %v16129_v51 = vld [vmem:[%s27671_s5 + $0x1c0] sm:$0xff] (%p1273_p3) }
 0x487   : > { %v16104_v5 = vld [vmem:[%s27671_s5 + $0x110] sm:$0xff] (%p1273_p3)  ;;  %v16105_v23 = vld [vmem:[%s27671_s5 + $0x118] sm:$0xff] (%p1273_p3)  ;;  %v23968_v58 = vpack.c.bf16 (%p1273_p3), %v16103_v34, %v16102_v20  ;;  %v24118_v20 = vpack.c.bf16 (%p1273_p3), %v16127_v26, %v16126_v25 }
 0x488   : >> { %16072 = vst.msk [vmem:[%s15827_s25 + $0x11] sm:$0x7f] %vm2992_vm6, %v2988_v32  ;;  %v23981_v12 = vpack.c.bf16 (%p1273_p3), %v16105_v23, %v16104_v5  ;;  %v16132_v5 = vld [vmem:[%s27671_s5 + $0x1d8] sm:$0xff] (%p1273_p3) }
 0x48f   : > { %v3002_v39 = vld [vmem:[#allocation3] sm:$0x7f]  ;;  %v3923_v6 = vld [vmem:[#allocation3 + $0x10] sm:$0x7f] }
 0x490   : > { %18974 = vmatmul.mubr.msk.f32.vlgmr.msra.gmra.mrb[0].mxu0 %vm519_vm1, %v3002_v39  ;;  %19155 = vmatmul.mubr.msk.f32.vlgmr.msra.gmra.mrb[0].mxu1 %vm519_vm1, %v3923_v6  ;;  %v3085_v3 = vld [vmem:[#allocation3 + $0x1] sm:$0x7f]  ;;  %v4006_v24 = vld [vmem:[#allocation3 + $0x11] sm:$0x7f]  ;;  %v24009_v39 = vpack.c.bf16 %v16109_v40, %v16108_v56  ;;  %v24038_v6 = vpack.c.bf16 %v16114_v52, %v16113_v60  ;;  %v16139_v52 = vld [vmem:[%s27671_s5 + $0x208] sm:$0xff] }
 0x491   : > { %20735 = vmatpush3.bf16.msra.mxu0 %v23804_v55  ;;  %18992 = vmatprep.mubr.msk.f32.mxu0 %vm22994_vm0, %v27691_v1  ;;  %v3169_v21 = vld [vmem:[#allocation3 + $0x2] sm:$0x7f]  ;;  %v4089_v19 = vld [vmem:[#allocation3 + $0x12] sm:$0x7f] }
 0x492   : > { %20736 = vmatprep.subr.bf16.mxu0 %v27689_v36  ;;  %20843 = vmatpush3.bf16.msra.mxu1 %v23804_v55  ;;  %v3254_v32 = vld [vmem:[#allocation3 + $0x10] sm:$0x7f]  ;;  %v23997_v48 = vld [vmem:[#allocation3 + $0x20] sm:$0x7f] }
 0x493   : > { %19173 = vmatprep.mubr.msk.f32.mxu1 %vm22994_vm0, %v27691_v1  ;;  %20844 = vmatprep.subr.bf16.mxu1 %v27689_v36  ;;  %v3338_v46 = vld [vmem:[#allocation3 + $0x11] sm:$0x7f]  ;;  %v4255_v10 = vld [vmem:[#allocation3 + $0x21] sm:$0x7f] }
 0x494   : > { %v3422_v38 = vld [vmem:[#allocation3 + $0x12] sm:$0x7f]  ;;  %v4338_v59 = vld [vmem:[#allocation3 + $0x22] sm:$0x7f] }
 0x495   : > { %20738 = vmatpush3.bf16.msra.mxu0 %v23817_v47  ;;  %v3507_v34 = vld [vmem:[#allocation3 + $0x20] sm:$0x7f]  ;;  %v16135_v40 = vld [vmem:[%s27671_s5 + $0x1f0] sm:$0xff] }
 0x496   : > { %20739 = vmatprep.subr.bf16.mxu0 %v27689_v36  ;;  %20846 = vmatpush3.bf16.msra.mxu1 %v23817_v47  ;;  %v16138_v60 = vld [vmem:[%s27671_s5 + $0x200] sm:$0xff] }
 0x497   : > { %20847 = vmatprep.subr.bf16.mxu1 %v27689_v36  ;;  %v3675_v26 = vld [vmem:[#allocation3 + $0x22] sm:$0x7f] }
 0x499   : > { %20741 = vmatpush3.bf16.msra.mxu0 %v23829_v17 }
 0x49a   : > { %20742 = vmatprep.subr.bf16.mxu0 %v27689_v36  ;;  %20849 = vmatpush3.bf16.msra.mxu1 %v23829_v17 }
 0x49b   : > { %20850 = vmatprep.subr.bf16.mxu1 %v27689_v36 }
 0x49d   : > { %20744 = vmatpush3.bf16.msra.mxu0 %v23839_v7 }
 0x49e   : > { %20745 = vmatprep.subr.bf16.mxu0 %v27689_v36  ;;  %20852 = vmatpush3.bf16.msra.mxu1 %v23839_v7 }
 0x49f   : > { %20853 = vmatprep.subr.bf16.mxu1 %v27689_v36 }
 0x4a0   : > { %18993 = vmatmul.mubr.msk.f32.vlgmr.msra.gmra.mrb[0].mxu0 %vm519_vm1, %v3085_v3  ;;  %v24052_v3 = vpack.c.bf16 %v16116_v29, %v16115_v61  ;;  %v24172_v61 = vpack.c.bf16 %v16136_v49, %v16135_v40  ;;  %v3591_v29 = vld [vmem:[#allocation3 + $0x21] sm:$0x7f]  ;;  %v16247_v40 = vld [vmem:[%s27671_s5 + $0x78] sm:$0xff] }
 0x4a1   : > { %20747 = vmatpush3.bf16.msra.mxu0 %v23860_v62  ;;  %19011 = vmatprep.mubr.msk.f32.mxu0 %vm22994_vm0, %v27691_v1 }
 0x4a2   : > { %20748 = vmatprep.subr.bf16.mxu0 %v27689_v36  ;;  %19174 = vmatmul.mubr.msk.f32.vlgmr.msra.gmra.mrb[0].mxu1 %vm519_vm1, %v4006_v24  ;;  %v16123_v24 = vld [vmem:[%s27671_s5 + $0x198] sm:$0xff] }
 0x4a3   : > { %20855 = vmatpush3.bf16.msra.mxu1 %v23860_v62  ;;  %19192 = vmatprep.mubr.msk.f32.mxu1 %vm22994_vm0, %v27691_v1  ;;  %v24092_v30 = vpack.c.bf16 %v16123_v24, %v16122_v57  ;;  %v16144_v57 = vld [vmem:[%s27671_s5 + $0x230] sm:$0xff]  ;;  %v16145_v24 = vld [vmem:[%s27671_s5 + $0x238] sm:$0xff] }
 0x4a4   : > { %20856 = vmatprep.subr.bf16.mxu1 %v27689_v36  ;;  %v24220_v25 = vpack.c.bf16 %v16145_v24, %v16144_v57  ;;  %v16258_v24 = vld [vmem:[%s27671_s5 + $0xc0] sm:$0xff] }
 0x4a5   : > { %20750 = vmatpush3.bf16.msra.mxu0 %v23873_v63 }
 0x4a6   : > { %20751 = vmatprep.subr.bf16.mxu0 %v27689_v36 }
 0x4a7   : > { %20858 = vmatpush3.bf16.msra.mxu1 %v23873_v63 }
 0x4a8   : > { %20859 = vmatprep.subr.bf16.mxu1 %v27689_v36 }
 0x4a9   : > { %20753 = vmatpush3.bf16.msra.mxu0 %v23887_v45 }
 0x4aa   : > { %20754 = vmatprep.subr.bf16.mxu0 %v27689_v36 }
 0x4ab   : > { %20861 = vmatpush3.bf16.msra.mxu1 %v23887_v45 }
 0x4ac   : > { %20862 = vmatprep.subr.bf16.mxu1 %v27689_v36 }
 0x4ad   : > { %20756 = vmatpush3.bf16.msra.mxu0 %v23899_v4 }
 0x4ae   : > { %20757 = vmatprep.subr.bf16.mxu0 %v27689_v36 }
 0x4af   : > { %20864 = vmatpush3.bf16.msra.mxu1 %v23899_v4 }
 0x4b0   : > { %19012 = vmatmul.mubr.msk.f32.vlgmr.msra.gmra.mrb[0].mxu0 %vm519_vm1, %v3169_v21  ;;  %20865 = vmatprep.subr.bf16.mxu1 %v27689_v36  ;;  %v16125_v21 = vld [vmem:[%s27671_s5 + $0x1a8] sm:$0xff] }
 0x4b1   : > { %20759 = vmatpush3.bf16.msra.mxu0 %v23914_v31  ;;  %19030 = vmatprep.mubr.msk.f32.mxu0 %vm22994_vm0, %v27691_v1  ;;  %v24106_v50 = vpack.c.bf16 %v16125_v21, %v16124_v28  ;;  %v24214_v28 = vpack.c.bf16 %v16143_v11, %v16142_v53  ;;  %v4505_v21 = vld [vmem:[#allocation3 + $0x31] sm:$0x7f] }
 0x4b2   : > { %20760 = vmatprep.subr.bf16.mxu0 %v27689_v36  ;;  %19193 = vmatmul.mubr.msk.f32.vlgmr.msra.gmra.mrb[0].mxu1 %vm519_vm1, %v4089_v19  ;;  %v16130_v19 = vld [vmem:[%s27671_s5 + $0x1c8] sm:$0xff]  ;;  %v16255_v11 = vld [vmem:[%s27671_s5 + $0xb0] sm:$0xff] }
 0x4b3   : > { %20867 = vmatpush3.bf16.msra.mxu1 %v23914_v31  ;;  %19211 = vmatprep.mubr.msk.f32.mxu1 %vm22994_vm0, %v27691_v1  ;;  %v24133_v23 = vpack.c.bf16 %v16130_v19, %v16129_v51 }
 0x4b4   : > { %20868 = vmatprep.subr.bf16.mxu1 %v27689_v36 }
 0x4b5   : > { %20762 = vmatpush3.bf16.msra.mxu0 %v23927_v8 }
 0x4b6   : > { %20763 = vmatprep.subr.bf16.mxu0 %v27689_v36 }
 0x4b7   : > { %20870 = vmatpush3.bf16.msra.mxu1 %v23927_v8 }
 0x4b8   : > { %20871 = vmatprep.subr.bf16.mxu1 %v27689_v36 }
 0x4b9   : > { %20765 = vmatpush3.bf16.msra.mxu0 %v23941_v33 }
 0x4ba   : > { %20766 = vmatprep.subr.bf16.mxu0 %v27689_v36 }
 0x4bb   : > { %20873 = vmatpush3.bf16.msra.mxu1 %v23941_v33 }
 0x4bc   : > { %20874 = vmatprep.subr.bf16.mxu1 %v27689_v36 }
 0x4bd   : > { %20768 = vmatpush3.bf16.msra.mxu0 %v23953_v44 }
 0x4be   : > { %20769 = vmatprep.subr.bf16.mxu0 %v27689_v36 }
 0x4bf   : > { %20876 = vmatpush3.bf16.msra.mxu1 %v23953_v44 }
 0x4c0   : > { %19031 = vmatmul.mubr.msk.f32.vlgmr.msra.gmra.mrb[0].mxu0 %vm519_vm1, %v3254_v32  ;;  %20877 = vmatprep.subr.bf16.mxu1 %v27689_v36  ;;  %v16131_v32 = vld [vmem:[%s27671_s5 + $0x1d0] sm:$0xff] }
 0x4c1   : > { %20771 = vmatpush3.bf16.msra.mxu0 %v23968_v58  ;;  %19049 = vmatprep.mubr.msk.f32.mxu0 %vm22994_vm0, %v27691_v1  ;;  %v24146_v56 = vpack.c.bf16 %v16132_v5, %v16131_v32  ;;  %v16243_v32 = vld [vmem:[%s27671_s5 + $0x58] sm:$0xff] }
 0x4c2   : > { %20772 = vmatprep.subr.bf16.mxu0 %v27689_v36  ;;  %19212 = vmatmul.mubr.msk.f32.vlgmr.msra.gmra.mrb[0].mxu1 %vm519_vm1, %v23997_v48 }
 0x4c3   : > { %20879 = vmatpush3.bf16.msra.mxu1 %v23968_v58  ;;  %19230 = vmatprep.mubr.msk.f32.mxu1 %vm22994_vm0, %v27691_v1 }
 0x4c4   : > { %20880 = vmatprep.subr.bf16.mxu1 %v27689_v36 }
 0x4c5   : > { %20774 = vmatpush3.bf16.msra.mxu0 %v23981_v12 }
 0x4c6   : > { %20775 = vmatprep.subr.bf16.mxu0 %v27689_v36 }
 0x4c7   : > { %20882 = vmatpush3.bf16.msra.mxu1 %v23981_v12 }
 0x4c8   : > { %20883 = vmatprep.subr.bf16.mxu1 %v27689_v36 }
 0x4c9   : > { %20777 = vmatpush3.bf16.msra.mxu0 %v23995_v42 }
 0x4ca   : > { %20778 = vmatprep.subr.bf16.mxu0 %v27689_v36 }
 0x4cb   : > { %20885 = vmatpush3.bf16.msra.mxu1 %v23995_v42 }
 0x4cc   : > { %20886 = vmatprep.subr.bf16.mxu1 %v27689_v36 }
 0x4cd   : > { %20780 = vmatpush3.bf16.msra.mxu0 %v24009_v39 }
 0x4ce   : > { %20781 = vmatprep.subr.bf16.mxu0 %v27689_v36 }
 0x4cf   : > { %20888 = vmatpush3.bf16.msra.mxu1 %v24009_v39 }
 0x4d0   : > { %19050 = vmatmul.mubr.msk.f32.vlgmr.msra.gmra.mrb[0].mxu0 %vm519_vm1, %v3338_v46  ;;  %20889 = vmatprep.subr.bf16.mxu1 %v27689_v36  ;;  %v4422_v46 = vld [vmem:[#allocation3 + $0x30] sm:$0x7f] }
 0x4d1   : > { %20783 = vmatpush3.bf16.msra.mxu0 %v24025_v16  ;;  %19068 = vmatprep.mubr.msk.f32.mxu0 %vm22994_vm0, %v27691_v1 }
 0x4d2   : > { %20784 = vmatprep.subr.bf16.mxu0 %v27689_v36  ;;  %19231 = vmatmul.mubr.msk.f32.vlgmr.msra.gmra.mrb[0].mxu1 %vm519_vm1, %v4255_v10  ;;  %v24187_v10 = vpack.c.bf16 %v16139_v52, %v16138_v60  ;;  %v24454_v60 = vld [vmem:[#allocation3 + $0x41] sm:$0x7f] }
 0x4d3   : > { %20891 = vmatpush3.bf16.msra.mxu1 %v24025_v16  ;;  %19249 = vmatprep.mubr.msk.f32.mxu1 %vm22994_vm0, %v27691_v1 }
 0x4d4   : > { %20892 = vmatprep.subr.bf16.mxu1 %v27689_v36 }
 0x4d5   : > { %20786 = vmatpush3.bf16.msra.mxu0 %v24038_v6 }
 0x4d6   : > { %20787 = vmatprep.subr.bf16.mxu0 %v27689_v36 }
 0x4d7   : > { %20894 = vmatpush3.bf16.msra.mxu1 %v24038_v6 }
 0x4d8   : > { %20895 = vmatprep.subr.bf16.mxu1 %v27689_v36 }
 0x4d9   : > { %20789 = vmatpush3.bf16.msra.mxu0 %v24052_v3 }
 0x4da   : > { %20790 = vmatprep.subr.bf16.mxu0 %v27689_v36 }
 0x4db   : > { %20897 = vmatpush3.bf16.msra.mxu1 %v24052_v3 }
 0x4dc   : > { %20898 = vmatprep.subr.bf16.mxu1 %v27689_v36 }
 0x4dd   : > { %20792 = vmatpush3.bf16.msra.mxu0 %v24064_v22 }
 0x4de   : > { %20793 = vmatprep.subr.bf16.mxu0 %v27689_v36 }
 0x4df   : > { %20900 = vmatpush3.bf16.msra.mxu1 %v24064_v22 }
 0x4e0   : > { %19069 = vmatmul.mubr.msk.f32.vlgmr.msra.gmra.mrb[0].mxu0 %vm519_vm1, %v3422_v38  ;;  %20901 = vmatprep.subr.bf16.mxu1 %v27689_v36  ;;  %v24200_v38 = vpack.c.bf16 %v16141_v9, %v16140_v0  ;;  %v16253_v9 = vld [vmem:[%s27671_s5 + $0xa0] sm:$0xff] }
 0x4e1   : > { %20795 = vmatpush3.bf16.msra.mxu0 %v24079_v43  ;;  %19087 = vmatprep.mubr.msk.f32.mxu0 %vm22994_vm0, %v27691_v1 }
 0x4e2   : > { %20796 = vmatprep.subr.bf16.mxu0 %v27689_v36  ;;  %19250 = vmatmul.mubr.msk.f32.vlgmr.msra.gmra.mrb[0].mxu1 %vm519_vm1, %v4338_v59  ;;  %v24237_v59 = vld [vmem:[#allocation3 + $0x32] sm:$0x7f] }
 0x4e3   : > { %20903 = vmatpush3.bf16.msra.mxu1 %v24079_v43  ;;  %19268 = vmatprep.mubr.msk.f32.mxu1 %vm22994_vm0, %v27691_v1 }
 0x4e4   : > { %20904 = vmatprep.subr.bf16.mxu1 %v27689_v36 }
 0x4e5   : > { %20798 = vmatpush3.bf16.msra.mxu0 %v24092_v30 }
 0x4e6   : > { %20799 = vmatprep.subr.bf16.mxu0 %v27689_v36 }
 0x4e7   : > { %20906 = vmatpush3.bf16.msra.mxu1 %v24092_v30 }
 0x4e8   : > { %20907 = vmatprep.subr.bf16.mxu1 %v27689_v36 }
 0x4e9   : > { %20801 = vmatpush3.bf16.msra.mxu0 %v24106_v50 }
 0x4ea   : > { %20802 = vmatprep.subr.bf16.mxu0 %v27689_v36 }
 0x4eb   : > { %20909 = vmatpush3.bf16.msra.mxu1 %v24106_v50 }
 0x4ec   : > { %20910 = vmatprep.subr.bf16.mxu1 %v27689_v36 }
 0x4ed   : > { %20804 = vmatpush3.bf16.msra.mxu0 %v24118_v20 }
 0x4ee   : > { %20805 = vmatprep.subr.bf16.mxu0 %v27689_v36 }
 0x4ef   : > { %20912 = vmatpush3.bf16.msra.mxu1 %v24118_v20 }
 0x4f0   : > { %19088 = vmatmul.mubr.msk.f32.vlgmr.msra.gmra.mrb[0].mxu0 %vm519_vm1, %v3507_v34  ;;  %20913 = vmatprep.subr.bf16.mxu1 %v27689_v36 }
 0x4f1   : > { %20807 = vmatpush3.bf16.msra.mxu0 %v24133_v23  ;;  %19106 = vmatprep.mubr.msk.f32.mxu0 %vm22994_vm0, %v27691_v1 }
 0x4f2   : > { %20808 = vmatprep.subr.bf16.mxu0 %v27689_v36  ;;  %19269 = vmatmul.mubr.msk.f32.vlgmr.msra.gmra.mrb[0].mxu1 %vm519_vm1, %v4422_v46  ;;  %v16250_v46 = vld [vmem:[%s27671_s5 + $0x88] sm:$0xff] }
 0x4f3   : > { %20915 = vmatpush3.bf16.msra.mxu1 %v24133_v23  ;;  %19287 = vmatprep.mubr.msk.f32.mxu1 %vm22994_vm0, %v27691_v1 }
 0x4f4   : > { %20916 = vmatprep.subr.bf16.mxu1 %v27689_v36 }
 0x4f5   : > { %20810 = vmatpush3.bf16.msra.mxu0 %v24146_v56 }
 0x4f6   : > { %20811 = vmatprep.subr.bf16.mxu0 %v27689_v36 }
 0x4f7   : > { %20918 = vmatpush3.bf16.msra.mxu1 %v24146_v56 }
 0x4f8   : > { %20919 = vmatprep.subr.bf16.mxu1 %v27689_v36 }
 0x4f9   : > { %20813 = vmatpush3.bf16.msra.mxu0 %v24160_v54 }
 0x4fa   : > { %20814 = vmatprep.subr.bf16.mxu0 %v27689_v36 }
 0x4fb   : > { %20921 = vmatpush3.bf16.msra.mxu1 %v24160_v54 }
 0x4fc   : > { %20922 = vmatprep.subr.bf16.mxu1 %v27689_v36 }
 0x4fd   : > { %20816 = vmatpush3.bf16.msra.mxu0 %v24172_v61 }
 0x4fe   : > { %20817 = vmatprep.subr.bf16.mxu0 %v27689_v36 }
 0x4ff   : > { %20924 = vmatpush3.bf16.msra.mxu1 %v24172_v61 }
 0x500   : > { %19107 = vmatmul.mubr.msk.f32.vlgmr.msra.gmra.mrb[0].mxu0 %vm519_vm1, %v3591_v29  ;;  %20925 = vmatprep.subr.bf16.mxu1 %v27689_v36  ;;  %v16252_v29 = vld [vmem:[%s27671_s5 + $0x98] sm:$0xff] }
 0x501   : > { %20819 = vmatpush3.bf16.msra.mxu0 %v24187_v10  ;;  %19125 = vmatprep.mubr.msk.f32.mxu0 %vm22994_vm0, %v27691_v1 }
 0x502   : > { %20820 = vmatprep.subr.bf16.mxu0 %v27689_v36  ;;  %19288 = vmatmul.mubr.msk.f32.vlgmr.msra.gmra.mrb[0].mxu1 %vm519_vm1, %v4505_v21  ;;  %v24500_v21 = vld [vmem:[#allocation3 + $0x42] sm:$0x7f] }
 0x503   : > { %20927 = vmatpush3.bf16.msra.mxu1 %v24187_v10  ;;  %19306 = vmatprep.mubr.msk.f32.mxu1 %vm22994_vm0, %v27691_v1 }
 0x504   : > { %20928 = vmatprep.subr.bf16.mxu1 %v27689_v36 }
 0x505   : > { %20822 = vmatpush3.bf16.msra.mxu0 %v24200_v38 }
 0x506   : > { %20823 = vmatprep.subr.bf16.mxu0 %v27689_v36 }
 0x507   : > { %20930 = vmatpush3.bf16.msra.mxu1 %v24200_v38 }
 0x508   : > { %20931 = vmatprep.subr.bf16.mxu1 %v27689_v36 }
 0x509   : > { %20825 = vmatpush3.bf16.msra.mxu0 %v24214_v28 }
 0x50a   : > { %20826 = vmatprep.subr.bf16.mxu0 %v27689_v36 }
 0x50b   : > { %20933 = vmatpush3.bf16.msra.mxu1 %v24214_v28 }
 0x50c   : > { %20934 = vmatprep.subr.bf16.mxu1 %v27689_v36 }
 0x50d   : > { %20828 = vmatpush3.bf16.msra.mxu0 %v24220_v25 }
 0x50e   : > { %19128 = vmatprep.subr.mxu0 %v27691_v1 }
 0x50f   : > { %20936 = vmatpush3.bf16.msra.mxu1 %v24220_v25 }
 0x510   : > { %19126 = vmatmul.mubr.msk.f32.vlgmr.msra.gmra.mrb[0].mxu0 %vm519_vm1, %v3675_v26  ;;  %20937 = vmatprep.subr.bf16.mxu1 %v27689_v36  ;;  %v16260_v26 = vld [vmem:[%s27671_s5 + $0xd0] sm:$0xff] }
 0x511   : > { %19130 = vmatprep.mubr.msk.f32.mxu0 %vm22994_vm0, %v27691_v1 }
 0x512   : > { %19307 = vmatmul.mubr.msk.f32.vlgmr.msra.gmra.mrb[0].mxu1 %vm519_vm1, %v24237_v59 }
 0x513   : > { %20939 = vmatpush3.bf16.msra.mxu1 %v23757_v37  ;;  %19325 = vmatprep.mubr.msk.f32.mxu1 %vm22994_vm0, %v27691_v1  ;;  %v24257_v37 = vld [vmem:[#allocation8] ss:$0 sm:$0xff] }
 0x514   : > { %20940 = vmatprep.subr.bf16.mxu1 %v27689_v36 }
 0x517   : > { %20942 = vmatpush3.bf16.msra.mxu1 %v23768_v13 }
 0x518   : > { %20943 = vmatprep.subr.bf16.mxu1 %v27689_v36 }
 0x51b   : > { %20945 = vmatpush3.bf16.msra.mxu1 %v23780_v41 }
 0x51c   : > { %20946 = vmatprep.subr.bf16.mxu1 %v27689_v36 }
 0x51f   : > { %20948 = vmatpush3.bf16.msra.mxu1 %v23792_v14  ;;  %v22737_v14 = vld [vmem:[#allocation3 + $0x21] sm:$0x7f] }
 0x520   : > { %19480 = vmatprep.subr.mxu1 %v27691_v1 }
 0x522   : > { %19326 = vmatmul.mubr.msk.f32.vlgmr.msra.gmra.mrb[2].mxu1 %vm519_vm1, %v23997_v48  ;;  %v5489_v48 = vld [vmem:[%s27671_s5 + $0x28] sm:$0xff] }
 0x523   : > { %19482 = vmatprep.mubr.msk.f32.mxu1 %vm22994_vm0, %v27691_v1 }
 0x5e3   : > { %v3754_v51 = vpop.f32.mrb[0].mxu0 }
 0x5e4   : > { %v21601_v13 = vadd.f32 %v24257_v37, %v3754_v51  ;;  %v19127_v19 = vpop.f32.mrb[1].mxu0 }
 0x5e5   : > { %v16263_v19 = vld [vmem:[%s27671_s5 + $0xe8] sm:$0xff] }
 0x5e6   : > { %vm3759_vm7 = vcmp.ge.f32.partialorder %v21601_v13, 0.0  ;;  %v3760_v41 = vmul.f32 0.01, %v21601_v13 }
 0x5e8   : > { %v3761_v34 = vsel %vm3759_vm7, %v21601_v13, %v3760_v41  ;;  %v16262_v13 = vld [vmem:[%s27671_s5 + $0xe0] sm:$0xff] }
 0x5e9   : > { %19129 = vmatpush3.msk.msra.mxu0 %vm3766_vm8, %v3761_v34  ;;  %v24526_v41 = vpack.c.bf16 %v16263_v19, %v16262_v13  ;;  %v16286_v13 = vld [vmem:[%s27671_s5 + $0x188] sm:$0xff]  ;;  %v24640_v19 = vld [vmem:[#allocation3 + $0x52] sm:$0x7f] }
 0x5ea   : > { %19131 = vmatmul.mubr.msk.f32.vlgmr.msra.gmra.mrb[2].mxu0 %vm3762_vm9, %v23369_v18  ;;  %19133 = vmatprep.subr.mxu0 %v27691_v1 }
 0x5eb   : > { %19134 = vmatpush3.msk.msra.mxu0 %vm3766_vm8, %v3761_v34  ;;  %19135 = vmatprep.mubr.msk.f32.mxu0 %vm22994_vm0, %v27691_v1  ;;  %v16264_v34 = vld [vmem:[%s27671_s5 + $0xf0] sm:$0xff] }
 0x5ec   : > { %20949 = vmatprep.subr.bf16.mxu0 %v27689_v36 }
 0x5ee   : > { %19136 = vmatmul.mubr.msk.f32.vlgmr.msra.gmra.mrb[4].mxu0 %vm3762_vm9, %v23360_v15 }
 0x5ef   : > { %20951 = vmatpush3.bf16.msra.mxu0 %v23804_v55  ;;  %19344 = vmatprep.mubr.msk.f32.mxu0 %vm22994_vm0, %v27691_v1  ;;  %v22738_v55 = vld [vmem:[#allocation3 + $0x22] sm:$0x7f] }
 0x5f0   : > { %20952 = vmatprep.subr.bf16.mxu0 %v27689_v36 }
 0x5f3   : > { %20954 = vmatpush3.bf16.msra.mxu0 %v23817_v47  ;;  %v22739_v47 = vld [vmem:[#allocation3 + $0x30] sm:$0x7f] }
 0x5f4   : > { %20955 = vmatprep.subr.bf16.mxu0 %v27689_v36 }
 0x5f7   : > { %20957 = vmatpush3.bf16.msra.mxu0 %v23829_v17  ;;  %v24312_v17 = vpop.f32.mrb[0].mxu1 }
 0x5f8   : > { %20958 = vmatprep.subr.bf16.mxu0 %v27689_v36 }
 0x5fb   : > { %20960 = vmatpush3.bf16.msra.mxu0 %v23839_v7  ;;  %v19308_v7 = vpop.f32.mrb[1].mxu1 }
 0x5fc   : > { %20961 = vmatprep.subr.bf16.mxu0 %v27689_v36  ;;  %v16268_v7 = vld [vmem:[%s27671_s5 + $0x108] sm:$0xff] }
 0x5fe   : > { %19345 = vmatmul.mubr.msk.f32.vlgmr.msra.gmra.mrb[6].mxu0 %vm519_vm1, %v22737_v14  ;;  %v16265_v14 = vld [vmem:[%s27671_s5 + $0xf8] sm:$0xff] }
 0x5ff   : > { %20963 = vmatpush3.bf16.msra.mxu0 %v23860_v62  ;;  %19363 = vmatprep.mubr.msk.f32.mxu0 %vm22994_vm0, %v27691_v1  ;;  %v22740_v62 = vld [vmem:[#allocation3 + $0x31] sm:$0x7f] }
 0x600   : > { %20964 = vmatprep.subr.bf16.mxu0 %v27689_v36 }
 0x603   : > { %20966 = vmatpush3.bf16.msra.mxu0 %v23873_v63  ;;  %v5101_v63 = vld [vmem:[#allocation3 + $0x40] sm:$0x7f] }
 0x604   : > { %20967 = vmatprep.subr.bf16.mxu0 %v27689_v36 }
 0x607   : > { %20969 = vmatpush3.bf16.msra.mxu0 %v23887_v45  ;;  %v5176_v45 = vld [vmem:[#allocation3 + $0x41] sm:$0x7f] }
 0x608   : > { %20970 = vmatprep.subr.bf16.mxu0 %v27689_v36 }
 0x60b   : > { %20972 = vmatpush3.bf16.msra.mxu0 %v23899_v4  ;;  %v5484_v4 = vld [vmem:[%s27671_s5] sm:$0xff] }
 0x60c   : > { %20973 = vmatprep.subr.bf16.mxu0 %v27689_v36 }
 0x60e   : > { %19364 = vmatmul.mubr.msk.f32.vlgmr.msra.gmra.mrb[6].mxu0 %vm519_vm1, %v22738_v55  ;;  %v24536_v55 = vpack.c.bf16 %v16265_v14, %v16264_v34  ;;  %v16287_v14 = vld [vmem:[%s27671_s5 + $0x190] sm:$0xff] }
 0x60f   : > { %20975 = vmatpush3.bf16.msra.mxu0 %v23914_v31  ;;  %19382 = vmatprep.mubr.msk.f32.mxu0 %vm22994_vm0, %v27691_v1  ;;  %v5485_v31 = vld [vmem:[%s27671_s5 + $0x8] sm:$0xff] }
 0x610   : > { %20976 = vmatprep.subr.bf16.mxu0 %v27689_v36 }
 0x613   : > { %20978 = vmatpush3.bf16.msra.mxu0 %v23927_v8  ;;  %v5251_v8 = vld [vmem:[#allocation3 + $0x42] sm:$0x7f] }
 0x614   : > { %20979 = vmatprep.subr.bf16.mxu0 %v27689_v36 }
 0x617   : > { %20981 = vmatpush3.bf16.msra.mxu0 %v23941_v33  ;;  %v24365_v33 = vpack.c.bf16 %v5485_v31, %v5484_v4  ;;  %v16270_v4 = vld [vmem:[%s27671_s5 + $0x118] sm:$0xff] }
 0x618   : > { %20982 = vmatprep.subr.bf16.mxu0 %v27689_v36 }
 0x61b   : > { %20984 = vmatpush3.bf16.msra.mxu0 %v23953_v44  ;;  %v5486_v44 = vld [vmem:[%s27671_s5 + $0x10] sm:$0xff] }
 0x61c   : > { %20985 = vmatprep.subr.bf16.mxu0 %v27689_v36 }
 0x61e   : > { %19383 = vmatmul.mubr.msk.f32.vlgmr.msra.gmra.mrb[6].mxu0 %vm519_vm1, %v22739_v47  ;;  %v16267_v47 = vld [vmem:[%s27671_s5 + $0x100] sm:$0xff] }
 0x61f   : > { %20987 = vmatpush3.bf16.msra.mxu0 %v23968_v58  ;;  %19401 = vmatprep.mubr.msk.f32.mxu0 %vm22994_vm0, %v27691_v1  ;;  %v5487_v58 = vld [vmem:[%s27671_s5 + $0x18] sm:$0xff] }
 0x620   : > { %20988 = vmatprep.subr.bf16.mxu0 %v27689_v36 }
 0x623   : > { %20990 = vmatpush3.bf16.msra.mxu0 %v23981_v12  ;;  %v24376_v12 = vpack.c.bf16 %v5487_v58, %v5486_v44  ;;  %v16272_v44 = vld [vmem:[%s27671_s5 + $0x128] sm:$0xff] }
 0x624   : > { %20991 = vmatprep.subr.bf16.mxu0 %v27689_v36 }
 0x627   : > { %20993 = vmatpush3.bf16.msra.mxu0 %v23995_v42  ;;  %v5488_v42 = vld [vmem:[%s27671_s5 + $0x20] sm:$0xff] }
 0x628   : > { %20994 = vmatprep.subr.bf16.mxu0 %v27689_v36 }
 0x62b   : > { %20996 = vmatpush3.bf16.msra.mxu0 %v24009_v39  ;;  %v24388_v39 = vpack.c.bf16 %v5489_v48, %v5488_v42  ;;  %v16273_v42 = vld [vmem:[%s27671_s5 + $0x130] sm:$0xff]  ;;  %v16274_v48 = vld [vmem:[%s27671_s5 + $0x138] sm:$0xff] }
 0x62c   : > { %20997 = vmatprep.subr.bf16.mxu0 %v27689_v36 }
 0x62e   : > { %19402 = vmatmul.mubr.msk.f32.vlgmr.msra.gmra.mrb[6].mxu0 %vm519_vm1, %v22740_v62  ;;  %v24546_v62 = vld [vmem:[#allocation3 + $0x50] sm:$0x7f] }
 0x62f   : > { %20999 = vmatpush3.bf16.msra.mxu0 %v24025_v16  ;;  %19420 = vmatprep.mubr.msk.f32.mxu0 %vm22994_vm0, %v27691_v1  ;;  %v5490_v16 = vld [vmem:[%s27671_s5 + $0x30] sm:$0xff] }
 0x630   : > { %21000 = vmatprep.subr.bf16.mxu0 %v27689_v36 }
 0x633   : > { %21002 = vmatpush3.bf16.msra.mxu0 %v24038_v6  ;;  %v5491_v6 = vld [vmem:[%s27671_s5 + $0x38] sm:$0xff] }
 0x634   : > { %21003 = vmatprep.subr.bf16.mxu0 %v27689_v36 }
 0x637   : > { %21005 = vmatpush3.bf16.msra.mxu0 %v24052_v3  ;;  %v24398_v3 = vpack.c.bf16 %v5491_v6, %v5490_v16  ;;  %v24582_v16 = vpack.c.bf16 %v16274_v48, %v16273_v42  ;;  %v16276_v6 = vld [vmem:[%s27671_s5 + $0x140] sm:$0xff]  ;;  %v16292_v42 = vld [vmem:[%s27671_s5 + $0x1b8] sm:$0xff] }
 0x638   : > { %21006 = vmatprep.subr.bf16.mxu0 %v27689_v36 }
 0x63b   : > { %21008 = vmatpush3.bf16.msra.mxu0 %v24064_v22  ;;  %v16240_v22 = vld [vmem:[%s27671_s5 + $0x40] sm:$0xff] }
 0x63c   : > { %21009 = vmatprep.subr.bf16.mxu0 %v27689_v36 }
 0x63e   : > { %19421 = vmatmul.mubr.msk.f32.vlgmr.msra.gmra.mrb[6].mxu0 %vm519_vm1, %v24237_v59  ;;  %v16261_v59 = vld [vmem:[%s27671_s5 + $0xd8] sm:$0xff] }
 0x63f   : > { %21011 = vmatpush3.bf16.msra.mxu0 %v24079_v43  ;;  %19439 = vmatprep.mubr.msk.f32.mxu0 %vm22994_vm0, %v27691_v1  ;;  %v16241_v43 = vld [vmem:[%s27671_s5 + $0x48] sm:$0xff]  ;;  %v24514_v51 = vpack.c.bf16 %v16261_v59, %v16260_v26  ;;  %v16285_v59 = vld [vmem:[%s27671_s5 + $0x180] sm:$0xff] }
 0x640   : > { %21012 = vmatprep.subr.bf16.mxu0 %v27689_v36  ;;  %v24642_v34 = vpack.c.bf16 %v16286_v13, %v16285_v59  ;;  %v16304_v59 = vld [vmem:[%s27671_s5 + $0x208] sm:$0xff]  ;;  %v6736_v13 = vld [vmem:[#allocation3 + $0x61] sm:$0x7f] }
 0x643   : > { %21014 = vmatpush3.bf16.msra.mxu0 %v24092_v30  ;;  %v24408_v30 = vld [vmem:[#allocation3 + $0x40] sm:$0x7f] }
 0x644   : > { %21015 = vmatprep.subr.bf16.mxu0 %v27689_v36 }
 0x647   : > { %21017 = vmatpush3.bf16.msra.mxu0 %v24106_v50  ;;  %v24410_v50 = vpack.c.bf16 %v16241_v43, %v16240_v22  ;;  %v16277_v22 = vld [vmem:[%s27671_s5 + $0x148] sm:$0xff]  ;;  %v24592_v43 = vld [vmem:[#allocation3 + $0x51] sm:$0x7f] }
 0x648   : > { %21018 = vmatprep.subr.bf16.mxu0 %v27689_v36 }
 0x64b   : > { %21020 = vmatpush3.bf16.msra.mxu0 %v24118_v20  ;;  %v16242_v20 = vld [vmem:[%s27671_s5 + $0x50] sm:$0xff] }
 0x64c   : > { %21021 = vmatprep.subr.bf16.mxu0 %v27689_v36  ;;  %v24422_v5 = vpack.c.bf16 %v16243_v32, %v16242_v20  ;;  %v24594_v20 = vpack.c.bf16 %v16277_v22, %v16276_v6  ;;  %v24596_v32 = vpop.f32.mrb[2].mxu1  ;;  %v16294_v6 = vld [vmem:[%s27671_s5 + $0x1c0] sm:$0xff]  ;;  %v16295_v22 = vld [vmem:[%s27671_s5 + $0x1c8] sm:$0xff] }
 0x64e   : > { %19440 = vmatmul.mubr.msk.f32.vlgmr.msra.gmra.mrb[6].mxu0 %vm519_vm1, %v5101_v63  ;;  %v24548_v63 = vpack.c.bf16 %v16268_v7, %v16267_v47  ;;  %v16288_v47 = vld [vmem:[%s27671_s5 + $0x198] sm:$0xff] }
 0x64f   : > { %21023 = vmatpush3.bf16.msra.mxu0 %v24133_v23  ;;  %19458 = vmatprep.mubr.msk.f32.mxu0 %vm22994_vm0, %v27691_v1  ;;  %v16244_v23 = vld [vmem:[%s27671_s5 + $0x60] sm:$0xff]  ;;  %v24654_v7 = vpack.c.bf16 %v16288_v47, %v16287_v14  ;;  %v16305_v47 = vld [vmem:[%s27671_s5 + $0x210] sm:$0xff] }
 0x650   : > { %21024 = vmatprep.subr.bf16.mxu0 %v27689_v36  ;;  %v24434_v35 = vpack.c.bf16 %v16245_v27, %v16244_v23  ;;  %v16278_v23 = vld [vmem:[%s27671_s5 + $0x150] sm:$0xff]  ;;  %v16279_v27 = vld [vmem:[%s27671_s5 + $0x158] sm:$0xff] }
 0x653   : > { %21026 = vmatpush3.bf16.msra.mxu0 %v24146_v56  ;;  %v16246_v56 = vld [vmem:[%s27671_s5 + $0x70] sm:$0xff] }
 0x654   : > { %21027 = vmatprep.subr.bf16.mxu0 %v27689_v36  ;;  %v24444_v49 = vpack.c.bf16 %v16247_v40, %v16246_v56  ;;  %v19327_v56 = vpop.f32.mrb[3].mxu1 }
 0x655   : > { %v16296_v56 = vld [vmem:[%s27671_s5 + $0x1d0] sm:$0xff] }
 0x657   : > { %21029 = vmatpush3.bf16.msra.mxu0 %v24160_v54  ;;  %v16249_v54 = vld [vmem:[%s27671_s5 + $0x80] sm:$0xff] }
 0x658   : > { %21030 = vmatprep.subr.bf16.mxu0 %v27689_v36  ;;  %v24456_v52 = vpack.c.bf16 %v16250_v46, %v16249_v54  ;;  %v24608_v46 = vpack.c.bf16 %v16279_v27, %v16278_v23  ;;  %v6661_v23 = vld [vmem:[#allocation3 + $0x60] sm:$0x7f]  ;;  %v24686_v27 = vpack.c.bf16 %v16295_v22, %v16294_v6  ;;  %v16309_v22 = vld [vmem:[%s27671_s5 + $0x230] sm:$0xff] }
 0x65b   : > { %21032 = vmatpush3.bf16.msra.mxu0 %v24172_v61  ;;  %v16251_v61 = vld [vmem:[%s27671_s5 + $0x90] sm:$0xff] }
 0x65c   : > { %21033 = vmatprep.subr.bf16.mxu0 %v27689_v36  ;;  %v24468_v0 = vpack.c.bf16 %v16252_v29, %v16251_v61  ;;  %v16280_v61 = vld [vmem:[%s27671_s5 + $0x160] sm:$0xff]  ;;  %v16281_v29 = vld [vmem:[%s27671_s5 + $0x168] sm:$0xff] }
 0x65e   : > { %19459 = vmatmul.mubr.msk.f32.vlgmr.msra.gmra.mrb[6].mxu0 %vm519_vm1, %v5176_v45  ;;  %v16269_v45 = vld [vmem:[%s27671_s5 + $0x110] sm:$0xff] }
 0x65f   : > { %21035 = vmatpush3.bf16.msra.mxu0 %v24187_v10  ;;  %19477 = vmatprep.mubr.msk.f32.mxu0 %vm22994_vm0, %v27691_v1  ;;  %v16254_v10 = vld [vmem:[%s27671_s5 + $0xa8] sm:$0xff]  ;;  %v24560_v31 = vpack.c.bf16 %v16270_v4, %v16269_v45  ;;  %v16289_v45 = vld [vmem:[%s27671_s5 + $0x1a0] sm:$0xff] }
 0x660   : > { %21036 = vmatprep.subr.bf16.mxu0 %v27689_v36  ;;  %v24480_v53 = vpack.c.bf16 %v16254_v10, %v16253_v9  ;;  %v16290_v4 = vld [vmem:[%s27671_s5 + $0x1a8] sm:$0xff] }
 0x663   : > { %21038 = vmatpush3.bf16.msra.mxu0 %v24200_v38  ;;  %v16256_v38 = vld [vmem:[%s27671_s5 + $0xb8] sm:$0xff] }
 0x664   : > { %21039 = vmatprep.subr.bf16.mxu0 %v27689_v36  ;;  %v24490_v57 = vpack.c.bf16 %v16256_v38, %v16255_v11  ;;  %v24620_v38 = vpack.c.bf16 %v16281_v29, %v16280_v61  ;;  %v16298_v61 = vld [vmem:[%s27671_s5 + $0x1e0] sm:$0xff]  ;;  %v16299_v29 = vld [vmem:[%s27671_s5 + $0x1e8] sm:$0xff] }
 0x667   : > { %21041 = vmatpush3.bf16.msra.mxu0 %v24214_v28  ;;  %v16259_v28 = vld [vmem:[%s27671_s5 + $0xc8] sm:$0xff] }
 0x668   : > { %21042 = vmatprep.subr.bf16.mxu0 %v27689_v36 }
 0x66b   : > { %21044 = vmatpush3.bf16.msra.mxu0 %v24220_v25  ;;  %v24502_v25 = vpack.c.bf16 %v16259_v28, %v16258_v24  ;;  %v16282_v24 = vld [vmem:[%s27671_s5 + $0x170] sm:$0xff]  ;;  %v16283_v28 = vld [vmem:[%s27671_s5 + $0x178] sm:$0xff] }
 0x66c   : > { %21153 = vmatprep.subr.bf16.mxu0 %v27689_v36  ;;  %v24630_v26 = vpack.c.bf16 %v16283_v28, %v16282_v24  ;;  %v16303_v28 = vld [vmem:[%s27671_s5 + $0x200] sm:$0xff] }
 0x66d   : > { %v24729_v14 = vpack.c.bf16 %v16304_v59, %v16303_v28  ;;  %v21602_v28 = vadd.f32 %v24257_v37, %v24312_v17  ;;  %v4744_v59 = vadd.f32 %v24257_v37, %v24596_v32 }
 0x66e   : > { %19478 = vmatmul.mubr.msk.f32.vlgmr.msra.gmra.mrb[6].mxu0 %vm519_vm1, %v5251_v8  ;;  %v16271_v8 = vld [vmem:[%s27671_s5 + $0x120] sm:$0xff] }
 0x66f   : > { %21155 = vmatpush3.bf16.msra.mxu0 %v24365_v33  ;;  %19677 = vmatprep.mubr.msk.f32.mxu0 %vm22994_vm0, %v27691_v1  ;;  %v24572_v58 = vpack.c.bf16 %v16272_v44, %v16271_v8  ;;  %v24666_v8 = vpack.c.bf16 %v16290_v4, %v16289_v45  ;;  %v16291_v44 = vld [vmem:[%s27671_s5 + $0x1b0] sm:$0xff]  ;;  %v16306_v45 = vld [vmem:[%s27671_s5 + $0x218] sm:$0xff]  ;;  %vm4671_vm10 = vcmp.ge.f32.partialorder %v21602_v28, 0.0 }
 0x670   : > { %21156 = vmatprep.subr.bf16.mxu0 %v27689_v36  ;;  %v24676_v48 = vpack.c.bf16 %v16292_v42, %v16291_v44  ;;  %v24740_v4 = vpack.c.bf16 %v16306_v45, %v16305_v47  ;;  %v16307_v44 = vld [vmem:[%s27671_s5 + $0x220] sm:$0xff]  ;;  %v16308_v42 = vld [vmem:[%s27671_s5 + $0x228] sm:$0xff]  ;;  %v4672_v47 = vmul.f32 0.01, %v21602_v28 }
 0x671   : > { %v24752_v6 = vpack.c.bf16 %v16308_v42, %v16307_v44 }
 0x672   : > { %v4673_v37 = vsel %vm4671_vm10, %v21602_v28, %v4672_v47  ;;  %v21843_v28 = vld [vmem:[%s27673_s7 + $0x14c] ss:$20 sps:$4 sm:$0xff]   ;;  %v21846_v47 = vld [vmem:[%s27673_s7 + $0x174] ss:$20 sps:$4 sm:$0xff]  }
 0x673   : > { %21158 = vmatpush3.bf16.msra.mxu0 %v24376_v12 }
 0x674   : > { %21159 = vmatprep.subr.bf16.mxu0 %v27689_v36 }
 0x677   : > { %21161 = vmatpush3.bf16.msra.mxu0 %v24388_v39 }
 0x678   : > { %21162 = vmatprep.subr.bf16.mxu0 %v27689_v36 }
 0x67b   : > { %21164 = vmatpush3.bf16.msra.mxu0 %v24398_v3 }
 0x67c   : > { %21165 = vmatprep.subr.bf16.mxu0 %v27689_v36 }
 0x67e   : > { %19678 = vmatmul.mubr.msk.f32.vlgmr.msra.gmra.mrb[8].mxu0 %vm519_vm1, %v24408_v30 }
 0x67f   : > { %21167 = vmatpush3.bf16.msra.mxu0 %v24410_v50  ;;  %19696 = vmatprep.mubr.msk.f32.mxu0 %vm22994_vm0, %v27691_v1 }
 0x680   : > { %21168 = vmatprep.subr.bf16.mxu0 %v27689_v36 }
 0x683   : > { %21170 = vmatpush3.bf16.msra.mxu0 %v24422_v5 }
 0x684   : > { %21171 = vmatprep.subr.bf16.mxu0 %v27689_v36 }
 0x687   : > { %21173 = vmatpush3.bf16.msra.mxu0 %v24434_v35 }
 0x688   : > { %21174 = vmatprep.subr.bf16.mxu0 %v27689_v36 }
 0x68b   : > { %21176 = vmatpush3.bf16.msra.mxu0 %v24444_v49 }
 0x68c   : > { %21177 = vmatprep.subr.bf16.mxu0 %v27689_v36 }
 0x68e   : > { %19697 = vmatmul.mubr.msk.f32.vlgmr.msra.gmra.mrb[8].mxu0 %vm519_vm1, %v24454_v60 }
 0x68f   : > { %21179 = vmatpush3.bf16.msra.mxu0 %v24456_v52  ;;  %19715 = vmatprep.mubr.msk.f32.mxu0 %vm22994_vm0, %v27691_v1 }
 0x690   : > { %21180 = vmatprep.subr.bf16.mxu0 %v27689_v36 }
 0x693   : > { %21182 = vmatpush3.bf16.msra.mxu0 %v24468_v0 }
 0x694   : > { %21183 = vmatprep.subr.bf16.mxu0 %v27689_v36 }
 0x697   : > { %21185 = vmatpush3.bf16.msra.mxu0 %v24480_v53 }
 0x698   : > { %21186 = vmatprep.subr.bf16.mxu0 %v27689_v36 }
 0x69b   : > { %21188 = vmatpush3.bf16.msra.mxu0 %v24490_v57 }
 0x69c   : > { %21189 = vmatprep.subr.bf16.mxu0 %v27689_v36 }
 0x69e   : > { %19716 = vmatmul.mubr.msk.f32.vlgmr.msra.gmra.mrb[8].mxu0 %vm519_vm1, %v24500_v21 }
 0x69f   : > { %21191 = vmatpush3.bf16.msra.mxu0 %v24502_v25  ;;  %19734 = vmatprep.mubr.msk.f32.mxu0 %vm22994_vm0, %v27691_v1 }
 0x6a0   : > { %21192 = vmatprep.subr.bf16.mxu0 %v27689_v36 }
 0x6a3   : > { %21194 = vmatpush3.bf16.msra.mxu0 %v24514_v51 }
 0x6a4   : > { %21195 = vmatprep.subr.bf16.mxu0 %v27689_v36 }
 0x6a7   : > { %21197 = vmatpush3.bf16.msra.mxu0 %v24526_v41 }
 0x6a8   : > { %21198 = vmatprep.subr.bf16.mxu0 %v27689_v36 }
 0x6ab   : > { %21200 = vmatpush3.bf16.msra.mxu0 %v24536_v55 }
 0x6ac   : > { %21201 = vmatprep.subr.bf16.mxu0 %v27689_v36 }
 0x6ae   : > { %19735 = vmatmul.mubr.msk.f32.vlgmr.msra.gmra.mrb[8].mxu0 %vm519_vm1, %v24546_v62 }
 0x6af   : > { %21203 = vmatpush3.bf16.msra.mxu0 %v24548_v63  ;;  %19753 = vmatprep.mubr.msk.f32.mxu0 %vm22994_vm0, %v27691_v1 }
 0x6b0   : > { %21204 = vmatprep.subr.bf16.mxu0 %v27689_v36 }
 0x6b3   : > { %21206 = vmatpush3.bf16.msra.mxu0 %v24560_v31 }
 0x6b4   : > { %21207 = vmatprep.subr.bf16.mxu0 %v27689_v36 }
 0x6b7   : > { %21209 = vmatpush3.bf16.msra.mxu0 %v24572_v58 }
 0x6b8   : > { %21210 = vmatprep.subr.bf16.mxu0 %v27689_v36 }
 0x6bb   : > { %21212 = vmatpush3.bf16.msra.mxu0 %v24582_v16 }
 0x6bc   : > { %21213 = vmatprep.subr.bf16.mxu0 %v27689_v36 }
 0x6bd   : > { %v3836_v40 = vpop.f32.mrb[2].mxu0 }
 0x6be   : > { %v19132_v54 = vpop.f32.mrb[3].mxu0  ;;  %19754 = vmatmul.mubr.msk.f32.vlgmr.msra.gmra.mrb[8].mxu0 %vm519_vm1, %v24592_v43 }
 0x6bf   : > { %21215 = vmatpush3.bf16.msra.mxu0 %v24594_v20  ;;  %19772 = vmatprep.mubr.msk.f32.mxu0 %vm22994_vm0, %v27691_v1 }
 0x6c0   : > { %21216 = vmatprep.subr.bf16.mxu0 %v27689_v36 }
 0x6c1   : > { %v3909_v9 = vpop.f32.mrb[4].mxu0 }
 0x6c2   : > { %v3913_v10 = vmax.f32 %v3836_v40, %v3909_v9  ;;  %v19137_v11 = vpop.f32.mrb[5].mxu0  ;;  %v16297_v40 = vld [vmem:[%s27671_s5 + $0x1d8] sm:$0xff]  ;;  %v24709_v9 = vpack.c.bf16 %v16299_v29, %v16298_v61  ;;  %v7292_v61 = vld [vmem:[#allocation3 + $0x60] sm:$0x7f] }
 0x6c3   : > { %21218 = vmatpush3.bf16.msra.mxu0 %v24608_v46  ;;  %v24697_v54 = vpack.c.bf16 %v16297_v40, %v16296_v56  ;;  %v16301_v11 = vld [vmem:[%s27671_s5 + $0x1f8] sm:$0xff]  ;;  %v6811_v40 = vld [vmem:[#allocation3 + $0x62] sm:$0x7f] }
 0x6c4   : > { %3914 = vst [vmem:[#allocation4] sm:$0xf] %v3913_v10  ;;  %21219 = vmatprep.subr.bf16.mxu0 %v27689_v36  ;;  %v16300_v10 = vld [vmem:[%s27671_s5 + $0x1f0] sm:$0xff]  ;;  %v7375_v29 = vld [vmem:[#allocation3 + $0x61] sm:$0x7f] }
 0x6c5   : > { %v24719_v24 = vpack.c.bf16 %v16301_v11, %v16300_v10  ;;  %v7458_v10 = vld [vmem:[#allocation3 + $0x62] sm:$0x7f]  ;;  %v7542_v11 = vld [vmem:[#allocation3 + $0x70] sm:$0x7f] }
 0x6c7   : > { %21221 = vmatpush3.bf16.msra.mxu0 %v24620_v38 }
 0x6c8   : > { %21222 = vmatprep.subr.bf16.mxu0 %v27689_v36 }
 0x6cb   : > { %21224 = vmatpush3.bf16.msra.mxu0 %v24630_v26 }
 0x6cc   : > { %21225 = vmatprep.subr.bf16.mxu0 %v27689_v36 }
 0x6ce   : > { %19773 = vmatmul.mubr.msk.f32.vlgmr.msra.gmra.mrb[8].mxu0 %vm519_vm1, %v24640_v19 }
 0x6cf   : > { %21227 = vmatpush3.bf16.msra.mxu0 %v24642_v34  ;;  %19791 = vmatprep.mubr.msk.f32.mxu0 %vm22994_vm0, %v27691_v1 }
 0x6d0   : > { %21228 = vmatprep.subr.bf16.mxu0 %v27689_v36 }
 0x6d3   : > { %21230 = vmatpush3.bf16.msra.mxu0 %v24654_v7 }
 0x6d4   : > { %21231 = vmatprep.subr.bf16.mxu0 %v27689_v36 }
 0x6d7   : > { %21233 = vmatpush3.bf16.msra.mxu0 %v24666_v8 }
 0x6d8   : > { %21234 = vmatprep.subr.bf16.mxu0 %v27689_v36 }
 0x6db   : > { %21236 = vmatpush3.bf16.msra.mxu0 %v24676_v48 }
 0x6dc   : > { %21237 = vmatprep.subr.bf16.mxu0 %v27689_v36 }
 0x6de   : > { %19792 = vmatmul.mubr.msk.f32.vlgmr.msra.gmra.mrb[8].mxu0 %vm519_vm1, %v6661_v23  ;;  %v16310_v23 = vld [vmem:[%s27671_s5 + $0x238] sm:$0xff] }
 0x6df   : > { %21239 = vmatpush3.bf16.msra.mxu0 %v24686_v27  ;;  %19810 = vmatprep.mubr.msk.f32.mxu0 %vm22994_vm0, %v27691_v1  ;;  %v24762_v56 = vpack.c.bf16 %v16310_v23, %v16309_v22  ;;  %v7625_v22 = vld [vmem:[#allocation3 + $0x71] sm:$0x7f] }
 0x6e0   : > { %21240 = vmatprep.subr.bf16.mxu0 %v27689_v36  ;;  %v5483_v23 = vld [vmem:[#allocation3 + $0x30] sm:$0x7f] }
 0x6e3   : > { %21242 = vmatpush3.bf16.msra.mxu0 %v24697_v54 }
 0x6e4   : > { %21243 = vmatprep.subr.bf16.mxu0 %v27689_v36 }
 0x6e7   : > { %21245 = vmatpush3.bf16.msra.mxu0 %v24709_v9 }
 0x6e8   : > { %21246 = vmatprep.subr.bf16.mxu0 %v27689_v36 }
 0x6eb   : > { %21248 = vmatpush3.bf16.msra.mxu0 %v24719_v24 }
 0x6ec   : > { %21249 = vmatprep.subr.bf16.mxu0 %v27689_v36 }
 0x6ee   : > { %19811 = vmatmul.mubr.msk.f32.vlgmr.msra.gmra.mrb[8].mxu0 %vm519_vm1, %v6736_v13 }
 0x6ef   : > { %21251 = vmatpush3.bf16.msra.mxu0 %v24729_v14  ;;  %19829 = vmatprep.mubr.msk.f32.mxu0 %vm22994_vm0, %v27691_v1 }
 0x6f0   : > { %21252 = vmatprep.subr.bf16.mxu0 %v27689_v36 }
 0x6f3   : > { %21254 = vmatpush3.bf16.msra.mxu0 %v24740_v4 }
 0x6f4   : > { %21255 = vmatprep.subr.bf16.mxu0 %v27689_v36 }
 0x6f7   : > { %21257 = vmatpush3.bf16.msra.mxu0 %v24752_v6 }
 0x6f8   : > { %21258 = vmatprep.subr.bf16.mxu0 %v27689_v36 }
 0x6fb   : > { %21260 = vmatpush3.bf16.msra.mxu0 %v24762_v56 }
 0x6fc   : > { %21369 = vmatprep.subr.bf16.mxu0 %v27689_v36 }
 0x6fe   : > { %19830 = vmatmul.mubr.msk.f32.vlgmr.msra.gmra.mrb[8].mxu0 %vm519_vm1, %v6811_v40  ;;  %v7708_v40 = vld [vmem:[#allocation3 + $0x72] sm:$0x7f] }
 0x6ff   : > { %21371 = vmatpush3.bf16.msra.mxu0 %v24365_v33  ;;  %20029 = vmatprep.mubr.msk.f32.mxu0 %vm22994_vm0, %v27691_v1 }
 0x700   : > { %21372 = vmatprep.subr.bf16.mxu0 %v27689_v36 }
 0x703   : > { %21374 = vmatpush3.bf16.msra.mxu0 %v24376_v12 }
 0x704   : > { %21375 = vmatprep.subr.bf16.mxu0 %v27689_v36 }
 0x707   : > { %21377 = vmatpush3.bf16.msra.mxu0 %v24388_v39 }
 0x708   : > { %21378 = vmatprep.subr.bf16.mxu0 %v27689_v36 }
 0x70b   : > { %21380 = vmatpush3.bf16.msra.mxu0 %v24398_v3 }
 0x70c   : > { %21381 = vmatprep.subr.bf16.mxu0 %v27689_v36 }
 0x70e   : > { %20030 = vmatmul.mubr.msk.f32.vlgmr.msra.gmra.mrb[10].mxu0 %vm519_vm1, %v7292_v61  ;;  %v5566_v61 = vld [vmem:[#allocation3 + $0x31] sm:$0x7f] }
 0x70f   : > { %21383 = vmatpush3.bf16.msra.mxu0 %v24410_v50  ;;  %20048 = vmatprep.mubr.msk.f32.mxu0 %vm22994_vm0, %v27691_v1 }
 0x710   : > { %21384 = vmatprep.subr.bf16.mxu0 %v27689_v36 }
 0x713   : > { %21386 = vmatpush3.bf16.msra.mxu0 %v24422_v5 }
 0x714   : > { %21387 = vmatprep.subr.bf16.mxu0 %v27689_v36 }
 0x717   : > { %21389 = vmatpush3.bf16.msra.mxu0 %v24434_v35 }
 0x718   : > { %21390 = vmatprep.subr.bf16.mxu0 %v27689_v36 }
 0x71b   : > { %21392 = vmatpush3.bf16.msra.mxu0 %v24444_v49 }
 0x71c   : > { %21393 = vmatprep.subr.bf16.mxu0 %v27689_v36 }
 0x71e   : > { %20049 = vmatmul.mubr.msk.f32.vlgmr.msra.gmra.mrb[10].mxu0 %vm519_vm1, %v7375_v29  ;;  %v8221_v29 = vld [vmem:[#allocation3 + $0x80] sm:$0x7f] }
 0x71f   : > { %21395 = vmatpush3.bf16.msra.mxu0 %v24456_v52  ;;  %20067 = vmatprep.mubr.msk.f32.mxu0 %vm22994_vm0, %v27691_v1 }
 0x720   : > { %21396 = vmatprep.subr.bf16.mxu0 %v27689_v36 }
 0x723   : > { %21398 = vmatpush3.bf16.msra.mxu0 %v24468_v0 }
 0x724   : > { %21399 = vmatprep.subr.bf16.mxu0 %v27689_v36 }
 0x727   : > { %21401 = vmatpush3.bf16.msra.mxu0 %v24480_v53 }
 0x728   : > { %21402 = vmatprep.subr.bf16.mxu0 %v27689_v36 }
 0x72b   : > { %21404 = vmatpush3.bf16.msra.mxu0 %v24490_v57 }
 0x72c   : > { %21405 = vmatprep.subr.bf16.mxu0 %v27689_v36 }
 0x72e   : > { %20068 = vmatmul.mubr.msk.f32.vlgmr.msra.gmra.mrb[10].mxu0 %vm519_vm1, %v7458_v10  ;;  %v5649_v10 = vld [vmem:[#allocation3 + $0x32] sm:$0x7f] }
 0x72f   : > { %21407 = vmatpush3.bf16.msra.mxu0 %v24502_v25  ;;  %20086 = vmatprep.mubr.msk.f32.mxu0 %vm22994_vm0, %v27691_v1 }
 0x730   : > { %21408 = vmatprep.subr.bf16.mxu0 %v27689_v36 }
 0x733   : > { %21410 = vmatpush3.bf16.msra.mxu0 %v24514_v51 }
 0x734   : > { %21411 = vmatprep.subr.bf16.mxu0 %v27689_v36 }
 0x737   : > { %21413 = vmatpush3.bf16.msra.mxu0 %v24526_v41 }
 0x738   : > { %21414 = vmatprep.subr.bf16.mxu0 %v27689_v36 }
 0x73b   : > { %21416 = vmatpush3.bf16.msra.mxu0 %v24536_v55 }
 0x73c   : > { %21417 = vmatprep.subr.bf16.mxu0 %v27689_v36 }
 0x73e   : > { %20087 = vmatmul.mubr.msk.f32.vlgmr.msra.gmra.mrb[10].mxu0 %vm519_vm1, %v7542_v11  ;;  %v8296_v11 = vld [vmem:[#allocation3 + $0x81] sm:$0x7f] }
 0x73f   : > { %21419 = vmatpush3.bf16.msra.mxu0 %v24548_v63  ;;  %20105 = vmatprep.mubr.msk.f32.mxu0 %vm22994_vm0, %v27691_v1 }
 0x740   : > { %21420 = vmatprep.subr.bf16.mxu0 %v27689_v36 }
 0x741   : > { %v5321_v13 = vpop.f32.mrb[6].mxu0 }
 0x742   : > { %v21604_v45 = vadd.f32 %v5321_v13, %v4744_v59  ;;  %v19479_v44 = vpop.f32.mrb[7].mxu0  ;;  %v21841_v59 = vld [vmem:[%s27673_s7 + $0x148] ss:$20 sps:$4 sm:$0xff]  }
 0x743   : > { %21422 = vmatpush3.bf16.msra.mxu0 %v24560_v31  ;;  %v8371_v13 = vld [vmem:[#allocation3 + $0x82] sm:$0x7f]  ;;  %v21849_v44 = vld [vmem:[%s27673_s7 + $0x19c] ss:$20 sps:$4 sm:$0xff]  }
 0x744   : > { %vm5326_vm11 = vcmp.ge.f32.partialorder %v21604_v45, 0.0  ;;  %v5327_v17 = vmul.f32 0.01, %v21604_v45  ;;  %21423 = vmatprep.subr.bf16.mxu0 %v27689_v36 }
 0x746   : > { %v5328_v32 = vsel %vm5326_vm11, %v21604_v45, %v5327_v17  ;;  %v21844_v45 = vld [vmem:[%s27673_s7 + $0x170] ss:$20 sps:$4 sm:$0xff]   ;;  %v21847_v17 = vld [vmem:[%s27673_s7 + $0x198] ss:$20 sps:$4 sm:$0xff]  }
 0x747   : > { %v5329_v42 = vmax.f32 %v4673_v37, %v5328_v32  ;;  %21425 = vmatpush3.bf16.msra.mxu0 %v24572_v58  ;;  %v21852_v37 = vld [vmem:[%s27673_s7 + $0x1c4] ss:$20 sps:$4 sm:$0xff]   ;;  %v21850_v32 = vld [vmem:[%s27673_s7 + $0x1c0] ss:$20 sps:$4 sm:$0xff]  }
 0x748   : > { %21426 = vmatprep.subr.bf16.mxu0 %v27689_v36 }
 0x749   : > { %19481 = vmatpush3.msk.msra.mxu1 %vm3766_vm8, %v5329_v42 }
 0x74a   : > { %19483 = vmatmul.mubr.msk.f32.vlgmr.msra.gmra.mrb[4].mxu1 %vm3762_vm9, %v23369_v18  ;;  %19485 = vmatprep.subr.mxu1 %v27691_v1 }
 0x74b   : > { %19486 = vmatpush3.msk.msra.mxu1 %vm3766_vm8, %v5329_v42  ;;  %21428 = vmatpush3.bf16.msra.mxu0 %v24582_v16  ;;  %v21855_v42 = vld [vmem:[%s27673_s7 + $0x1ec] ss:$20 sps:$4 sm:$0xff]  }
 0x74c   : > { %19487 = vmatprep.mubr.msk.f32.mxu1 %vm22994_vm0, %v27691_v1  ;;  %21045 = vmatprep.subr.bf16.mxu1 %v27689_v36 }
 0x74d   : > { %21429 = vmatprep.subr.bf16.mxu0 %v27689_v36 }
 0x74e   : > { %19488 = vmatmul.mubr.msk.f32.vlgmr.msra.gmra.mrb[6].mxu1 %vm3762_vm9, %v23360_v15  ;;  %20106 = vmatmul.mubr.msk.f32.vlgmr.msra.gmra.mrb[10].mxu0 %vm519_vm1, %v7625_v22  ;;  %v21853_v22 = vld [vmem:[%s27673_s7 + $0x1e8] ss:$20 sps:$4 sm:$0xff]  }
 0x74f   : > { %21047 = vmatpush3.bf16.msra.mxu1 %v24365_v33  ;;  %21431 = vmatpush3.bf16.msra.mxu0 %v24594_v20 }
 0x750   : > { %21048 = vmatprep.subr.bf16.mxu1 %v27689_v36  ;;  %21432 = vmatprep.subr.bf16.mxu0 %v27689_v36 }
 0x751   : > { %19506 = vmatprep.mubr.msk.f32.mxu1 %vm22994_vm0, %v27691_v1  ;;  %20124 = vmatprep.mubr.msk.f32.mxu0 %vm22994_vm0, %v27691_v1 }
 0x753   : > { %21050 = vmatpush3.bf16.msra.mxu1 %v24376_v12  ;;  %21434 = vmatpush3.bf16.msra.mxu0 %v24608_v46 }
 0x754   : > { %21051 = vmatprep.subr.bf16.mxu1 %v27689_v36  ;;  %21435 = vmatprep.subr.bf16.mxu0 %v27689_v36 }
 0x757   : > { %21053 = vmatpush3.bf16.msra.mxu1 %v24388_v39  ;;  %21437 = vmatpush3.bf16.msra.mxu0 %v24620_v38 }
 0x758   : > { %21054 = vmatprep.subr.bf16.mxu1 %v27689_v36  ;;  %21438 = vmatprep.subr.bf16.mxu0 %v27689_v36 }
 0x75b   : > { %21056 = vmatpush3.bf16.msra.mxu1 %v24398_v3  ;;  %21440 = vmatpush3.bf16.msra.mxu0 %v24630_v26 }
 0x75c   : > { %21057 = vmatprep.subr.bf16.mxu1 %v27689_v36  ;;  %21441 = vmatprep.subr.bf16.mxu0 %v27689_v36 }
 0x75e   : > { %19507 = vmatmul.mubr.msk.f32.vlgmr.msra.gmra.mrb[8].mxu1 %vm519_vm1, %v5483_v23  ;;  %20125 = vmatmul.mubr.msk.f32.vlgmr.msra.gmra.mrb[10].mxu0 %vm519_vm1, %v7708_v40  ;;  %v21858_v23 = vld [vmem:[%s27673_s7 + $0x214] ss:$20 sps:$4 sm:$0xff]   ;;  %v21856_v40 = vld [vmem:[%s27673_s7 + $0x210] ss:$20 sps:$4 sm:$0xff]  }
 0x75f   : > { %21059 = vmatpush3.bf16.msra.mxu1 %v24410_v50  ;;  %21443 = vmatpush3.bf16.msra.mxu0 %v24642_v34 }
 0x760   : > { %21060 = vmatprep.subr.bf16.mxu1 %v27689_v36  ;;  %21444 = vmatprep.subr.bf16.mxu0 %v27689_v36 }
 0x761   : > { %19525 = vmatprep.mubr.msk.f32.mxu1 %vm22994_vm0, %v27691_v1  ;;  %20143 = vmatprep.mubr.msk.f32.mxu0 %vm22994_vm0, %v27691_v1 }
 0x763   : > { %21062 = vmatpush3.bf16.msra.mxu1 %v24422_v5  ;;  %21446 = vmatpush3.bf16.msra.mxu0 %v24654_v7 }
 0x764   : > { %21063 = vmatprep.subr.bf16.mxu1 %v27689_v36  ;;  %21447 = vmatprep.subr.bf16.mxu0 %v27689_v36 }
 0x767   : > { %21065 = vmatpush3.bf16.msra.mxu1 %v24434_v35  ;;  %21449 = vmatpush3.bf16.msra.mxu0 %v24666_v8 }
 0x768   : > { %21066 = vmatprep.subr.bf16.mxu1 %v27689_v36  ;;  %21450 = vmatprep.subr.bf16.mxu0 %v27689_v36 }
 0x76b   : > { %21068 = vmatpush3.bf16.msra.mxu1 %v24444_v49  ;;  %21452 = vmatpush3.bf16.msra.mxu0 %v24676_v48 }
 0x76c   : > { %21069 = vmatprep.subr.bf16.mxu1 %v27689_v36  ;;  %21453 = vmatprep.subr.bf16.mxu0 %v27689_v36 }
 0x76e   : > { %19526 = vmatmul.mubr.msk.f32.vlgmr.msra.gmra.mrb[8].mxu1 %vm519_vm1, %v5566_v61  ;;  %20144 = vmatmul.mubr.msk.f32.vlgmr.msra.gmra.mrb[10].mxu0 %vm519_vm1, %v8221_v29  ;;  %v21861_v61 = vld [vmem:[%s27673_s7 + $0x23c] ss:$20 sps:$4 sm:$0xff]   ;;  %v21864_v29 = vld [vmem:[%s27673_s7 + $0x264] ss:$20 sps:$4 sm:$0xff]  }
 0x76f   : > { %21071 = vmatpush3.bf16.msra.mxu1 %v24456_v52  ;;  %21455 = vmatpush3.bf16.msra.mxu0 %v24686_v27 }
 0x770   : > { %21072 = vmatprep.subr.bf16.mxu1 %v27689_v36  ;;  %21456 = vmatprep.subr.bf16.mxu0 %v27689_v36 }
 0x771   : > { %19544 = vmatprep.mubr.msk.f32.mxu1 %vm22994_vm0, %v27691_v1  ;;  %20162 = vmatprep.mubr.msk.f32.mxu0 %vm22994_vm0, %v27691_v1 }
 0x773   : > { %21074 = vmatpush3.bf16.msra.mxu1 %v24468_v0  ;;  %21458 = vmatpush3.bf16.msra.mxu0 %v24697_v54 }
 0x774   : > { %21075 = vmatprep.subr.bf16.mxu1 %v27689_v36  ;;  %21459 = vmatprep.subr.bf16.mxu0 %v27689_v36 }
 0x777   : > { %21077 = vmatpush3.bf16.msra.mxu1 %v24480_v53  ;;  %21461 = vmatpush3.bf16.msra.mxu0 %v24709_v9 }
 0x778   : > { %21078 = vmatprep.subr.bf16.mxu1 %v27689_v36  ;;  %21462 = vmatprep.subr.bf16.mxu0 %v27689_v36 }
 0x77b   : > { %21080 = vmatpush3.bf16.msra.mxu1 %v24490_v57  ;;  %21464 = vmatpush3.bf16.msra.mxu0 %v24719_v24 }
 0x77c   : > { %21081 = vmatprep.subr.bf16.mxu1 %v27689_v36  ;;  %21465 = vmatprep.subr.bf16.mxu0 %v27689_v36 }
 0x77e   : > { %19545 = vmatmul.mubr.msk.f32.vlgmr.msra.gmra.mrb[8].mxu1 %vm519_vm1, %v5649_v10  ;;  %20163 = vmatmul.mubr.msk.f32.vlgmr.msra.gmra.mrb[10].mxu0 %vm519_vm1, %v8296_v11  ;;  %v21862_v10 = vld [vmem:[%s27673_s7 + $0x260] ss:$20 sps:$4 sm:$0xff]   ;;  %v21867_v11 = vld [vmem:[%s27673_s7 + $0x284] ss:$20 sps:$4 sm:$0xff]  }
 0x77f   : > { %21083 = vmatpush3.bf16.msra.mxu1 %v24502_v25  ;;  %21467 = vmatpush3.bf16.msra.mxu0 %v24729_v14 }
 0x780   : > { %21084 = vmatprep.subr.bf16.mxu1 %v27689_v36  ;;  %21468 = vmatprep.subr.bf16.mxu0 %v27689_v36 }
 0x781   : > { %19563 = vmatprep.mubr.msk.f32.mxu1 %vm22994_vm0, %v27691_v1  ;;  %20181 = vmatprep.mubr.msk.f32.mxu0 %vm22994_vm0, %v27691_v1 }
 0x783   : > { %21086 = vmatpush3.bf16.msra.mxu1 %v24514_v51  ;;  %21470 = vmatpush3.bf16.msra.mxu0 %v24740_v4 }
 0x784   : > { %21087 = vmatprep.subr.bf16.mxu1 %v27689_v36  ;;  %21471 = vmatprep.subr.bf16.mxu0 %v27689_v36 }
 0x787   : > { %21089 = vmatpush3.bf16.msra.mxu1 %v24526_v41  ;;  %21473 = vmatpush3.bf16.msra.mxu0 %v24752_v6 }
 0x788   : > { %21090 = vmatprep.subr.bf16.mxu1 %v27689_v36  ;;  %21474 = vmatprep.subr.bf16.mxu0 %v27689_v36 }
 0x78b   : > { %21092 = vmatpush3.bf16.msra.mxu1 %v24536_v55  ;;  %21476 = vmatpush3.bf16.msra.mxu0 %v24762_v56 }
 0x78c   : > { %21093 = vmatprep.subr.bf16.mxu1 %v27689_v36  ;;  %9323 = vmatprep.subr.bf16.mxu0 %v21843_v28  ;;  %v9023_v28 = vld [vmem:[#allocation4 + $0x1] sm:$0x1] }
 0x78e   : > { %19564 = vmatmul.mubr.msk.f32.vlgmr.msra.gmra.mrb[8].mxu1 %vm519_vm1, %v24408_v30  ;;  %20182 = vmatmul.mubr.msk.f32.vlgmr.msra.gmra.mrb[10].mxu0 %vm519_vm1, %v8371_v13  ;;  %v27687_v30 = vmov 0   ;;  %v25002_v13 = vpack.c.bf16 %v9023_v28, %v9023_v28  ;;  %v21890_v28 = vld [vmem:[%s27673_s7 + $0x2b8] ss:$20 sps:$4 sm:$0xff]  }
 0x78f   : > { %21095 = vmatpush3.bf16.msra.mxu1 %v24548_v63  ;;  %9324 = vmatpush1.bf16.msra.mxu0 %v21841_v59  ;;  %v21865_v59 = vld [vmem:[%s27673_s7 + $0x280] ss:$20 sps:$4 sm:$0xff]  }
 0x790   : > { %21096 = vmatprep.subr.bf16.mxu1 %v27689_v36  ;;  %9325 = vmatprep.subr.bf16.mxu0 %v21846_v47  ;;  %v21870_v47 = vld [vmem:[%s27673_s7 + $0x2ac] ss:$20 sps:$4 sm:$0xff]  }
 0x791   : > { %19582 = vmatprep.mubr.msk.f32.mxu1 %vm22994_vm0, %v27691_v1  ;;  %9355 = vmatprep.mubr.bf16.mxu0 %v27687_v30 }
 0x793   : > { %21098 = vmatpush3.bf16.msra.mxu1 %v24560_v31  ;;  %9326 = vmatpush1.bf16.msra.mxu0 %v21844_v45  ;;  %v21868_v45 = vld [vmem:[%s27673_s7 + $0x2a8] ss:$20 sps:$4 sm:$0xff]  }
 0x794   : > { %21099 = vmatprep.subr.bf16.mxu1 %v27689_v36  ;;  %9327 = vmatprep.subr.bf16.mxu0 %v21849_v44  ;;  %v21873_v44 = vld [vmem:[%s27673_s7 + $0x2d4] ss:$20 sps:$4 sm:$0xff]  }
 0x797   : > { %21101 = vmatpush3.bf16.msra.mxu1 %v24572_v58  ;;  %9328 = vmatpush1.bf16.msra.mxu0 %v21847_v17  ;;  %v21876_v17 = vld [vmem:[%s27673_s7 + $0x2fc] ss:$20 sps:$4 sm:$0xff]  }
 0x798   : > { %21102 = vmatprep.subr.bf16.mxu1 %v27689_v36  ;;  %9329 = vmatprep.subr.bf16.mxu0 %v21852_v37  ;;  %v21874_v37 = vld [vmem:[%s27673_s7 + $0x2f8] ss:$20 sps:$4 sm:$0xff]  }
 0x79b   : > { %21104 = vmatpush3.bf16.msra.mxu1 %v24582_v16  ;;  %9330 = vmatpush1.bf16.msra.mxu0 %v21850_v32  ;;  %v21879_v32 = vld [vmem:[%s27673_s7 + $0x324] ss:$20 sps:$4 sm:$0xff]  }
 0x79c   : > { %21105 = vmatprep.subr.bf16.mxu1 %v27689_v36  ;;  %9331 = vmatprep.subr.bf16.mxu0 %v21855_v42  ;;  %v21877_v42 = vld [vmem:[%s27673_s7 + $0x320] ss:$20 sps:$4 sm:$0xff]  }
 0x79e   : > { %19583 = vmatmul.mubr.msk.f32.vlgmr.msra.gmra.mrb[8].mxu1 %vm519_vm1, %v24454_v60  ;;  %v21859_v60 = vld [vmem:[%s27673_s7 + $0x238] ss:$20 sps:$4 sm:$0xff]  }
 0x79f   : > { %21107 = vmatpush3.bf16.msra.mxu1 %v24594_v20  ;;  %9332 = vmatpush1.bf16.msra.mxu0 %v21853_v22  ;;  %v21882_v22 = vld [vmem:[%s27673_s7 + $0x34c] ss:$20 sps:$4 sm:$0xff]  }
 0x7a0   : > { %21108 = vmatprep.subr.bf16.mxu1 %v27689_v36  ;;  %9333 = vmatprep.subr.bf16.mxu0 %v21858_v23  ;;  %v21880_v23 = vld [vmem:[%s27673_s7 + $0x348] ss:$20 sps:$4 sm:$0xff]  }
 0x7a1   : > { %19601 = vmatprep.mubr.msk.f32.mxu1 %vm22994_vm0, %v27691_v1 }
 0x7a3   : > { %21110 = vmatpush3.bf16.msra.mxu1 %v24608_v46  ;;  %9334 = vmatpush1.bf16.msra.mxu0 %v21856_v40  ;;  %v21885_v40 = vld [vmem:[%s27673_s7 + $0x374] ss:$20 sps:$4 sm:$0xff]  }
 0x7a4   : > { %21111 = vmatprep.subr.bf16.mxu1 %v27689_v36  ;;  %9335 = vmatprep.subr.bf16.mxu0 %v21861_v61  ;;  %v21888_v61 = vld [vmem:[%s27673_s7 + $0x39c] ss:$20 sps:$4 sm:$0xff]  }
 0x7a7   : > { %21113 = vmatpush3.bf16.msra.mxu1 %v24620_v38  ;;  %9336 = vmatpush1.bf16.msra.mxu0 %v21859_v60  ;;  %v21886_v60 = vld [vmem:[%s27673_s7 + $0x398] ss:$20 sps:$4 sm:$0xff]  }
 0x7a8   : > { %21114 = vmatprep.subr.bf16.mxu1 %v27689_v36  ;;  %9337 = vmatprep.subr.bf16.mxu0 %v21864_v29  ;;  %v9450_v29 = vld [vmem:[#allocation4 + $0x2] sm:$0x1] }
 0x7ab   : > { %21116 = vmatpush3.bf16.msra.mxu1 %v24630_v26  ;;  %9338 = vmatpush1.bf16.msra.mxu0 %v21862_v10  ;;  %v21889_v10 = vld [vmem:[%s27673_s7 + $0x290] ss:$20 sps:$4 sm:$0xff]  }
 0x7ac   : > { %21117 = vmatprep.subr.bf16.mxu1 %v27689_v36  ;;  %9709 = vmatprep.subr.bf16.mxu0 %v21867_v11  ;;  %v25075_v11 = vpack.c.bf16 %v9450_v29, %v9450_v29  ;;  %v21909_v29 = vld [vmem:[%s27673_s7 + $0x468] ss:$20 sps:$4 sm:$0xff]  }
 0x7ae   : > { %19602 = vmatmul.mubr.msk.f32.vlgmr.msra.gmra.mrb[8].mxu1 %vm519_vm1, %v24500_v21  ;;  %9356 = vmatmul.mubr.bf16.vlgmr.msra.gmra.mrb[12].mxu0 %v25002_v13  ;;  %v21871_v21 = vld [vmem:[%s27673_s7 + $0x2d0] ss:$20 sps:$4 sm:$0xff]  }
 0x7af   : > { %21119 = vmatpush3.bf16.msra.mxu1 %v24642_v34  ;;  %9710 = vmatpush1.bf16.msra.mxu0 %v21865_v59 }
 0x7b0   : > { %21120 = vmatprep.subr.bf16.mxu1 %v27689_v36  ;;  %9711 = vmatprep.subr.bf16.mxu0 %v21870_v47  ;;  %v21891_v47 = vld [vmem:[%s27673_s7 + $0x2e0] ss:$20 sps:$4 sm:$0xff]  }
 0x7b1   : > { %19620 = vmatprep.mubr.msk.f32.mxu1 %vm22994_vm0, %v27691_v1  ;;  %9741 = vmatprep.mubr.bf16.mxu0 %v27687_v30 }
 0x7b3   : > { %21122 = vmatpush3.bf16.msra.mxu1 %v24654_v7  ;;  %9712 = vmatpush1.bf16.msra.mxu0 %v21868_v45  ;;  %v21892_v45 = vld [vmem:[%s27673_s7 + $0x308] ss:$20 sps:$4 sm:$0xff]  }
 0x7b4   : > { %21123 = vmatprep.subr.bf16.mxu1 %v27689_v36  ;;  %9713 = vmatprep.subr.bf16.mxu0 %v21873_v44  ;;  %v21893_v44 = vld [vmem:[%s27673_s7 + $0x330] ss:$20 sps:$4 sm:$0xff]  }
 0x7b7   : > { %21125 = vmatpush3.bf16.msra.mxu1 %v24666_v8  ;;  %9714 = vmatpush1.bf16.msra.mxu0 %v21871_v21  ;;  %v21894_v21 = vld [vmem:[%s27673_s7 + $0x358] ss:$20 sps:$4 sm:$0xff]  }
 0x7b8   : > { %21126 = vmatprep.subr.bf16.mxu1 %v27689_v36  ;;  %9715 = vmatprep.subr.bf16.mxu0 %v21876_v17  ;;  %v21895_v17 = vld [vmem:[%s27673_s7 + $0x380] ss:$20 sps:$4 sm:$0xff]  }
 0x7bb   : > { %21128 = vmatpush3.bf16.msra.mxu1 %v24676_v48  ;;  %9716 = vmatpush1.bf16.msra.mxu0 %v21874_v37  ;;  %v21899_v37 = vld [vmem:[%s27673_s7 + $0x3cc] ss:$20 sps:$4 sm:$0xff]  }
 0x7bc   : > { %21129 = vmatprep.subr.bf16.mxu1 %v27689_v36  ;;  %9717 = vmatprep.subr.bf16.mxu0 %v21879_v32  ;;  %v21897_v32 = vld [vmem:[%s27673_s7 + $0x3c8] ss:$20 sps:$4 sm:$0xff]  }
 0x7be   : > { %19621 = vmatmul.mubr.msk.f32.vlgmr.msra.gmra.mrb[8].mxu1 %vm519_vm1, %v24546_v62  ;;  %v21883_v62 = vld [vmem:[%s27673_s7 + $0x370] ss:$20 sps:$4 sm:$0xff]  }
 0x7bf   : > { %21131 = vmatpush3.bf16.msra.mxu1 %v24686_v27  ;;  %9718 = vmatpush1.bf16.msra.mxu0 %v21877_v42  ;;  %v21902_v42 = vld [vmem:[%s27673_s7 + $0x3f4] ss:$20 sps:$4 sm:$0xff]  }
 0x7c0   : > { %21132 = vmatprep.subr.bf16.mxu1 %v27689_v36  ;;  %9719 = vmatprep.subr.bf16.mxu0 %v21882_v22  ;;  %v21900_v22 = vld [vmem:[%s27673_s7 + $0x3f0] ss:$20 sps:$4 sm:$0xff]  }
 0x7c1   : > { %19639 = vmatprep.mubr.msk.f32.mxu1 %vm22994_vm0, %v27691_v1 }
 0x7c3   : > { %21134 = vmatpush3.bf16.msra.mxu1 %v24697_v54  ;;  %9720 = vmatpush1.bf16.msra.mxu0 %v21880_v23  ;;  %v21905_v23 = vld [vmem:[%s27673_s7 + $0x41c] ss:$20 sps:$4 sm:$0xff]  }
 0x7c4   : > { %21135 = vmatprep.subr.bf16.mxu1 %v27689_v36  ;;  %9721 = vmatprep.subr.bf16.mxu0 %v21885_v40  ;;  %v21903_v40 = vld [vmem:[%s27673_s7 + $0x418] ss:$20 sps:$4 sm:$0xff]  }
 0x7c7   : > { %21137 = vmatpush3.bf16.msra.mxu1 %v24709_v9  ;;  %9722 = vmatpush1.bf16.msra.mxu0 %v21883_v62  ;;  %v21908_v62 = vld [vmem:[%s27673_s7 + $0x444] ss:$20 sps:$4 sm:$0xff]  }
 0x7c8   : > { %21138 = vmatprep.subr.bf16.mxu1 %v27689_v36  ;;  %9723 = vmatprep.subr.bf16.mxu0 %v21888_v61  ;;  %v21906_v61 = vld [vmem:[%s27673_s7 + $0x440] ss:$20 sps:$4 sm:$0xff]  }
 0x7cb   : > { %21140 = vmatpush3.bf16.msra.mxu1 %v24719_v24  ;;  %9724 = vmatpush1.bf16.msra.mxu0 %v21886_v60  ;;  %v21911_v60 = vld [vmem:[%s27673_s7 + $0x46c] ss:$20 sps:$4 sm:$0xff]  }
 0x7cc   : > { %21141 = vmatprep.subr.bf16.mxu1 %v27689_v36  ;;  %20234 = vmatprep.subr.bf16.mxu0 %v27691_v1 }
 0x7ce   : > { %19640 = vmatmul.mubr.msk.f32.vlgmr.msra.gmra.mrb[8].mxu1 %vm519_vm1, %v24592_v43  ;;  %9742 = vmatmul.mubr.bf16.vlgmr.msra.gmra.mrb[16].mxu0 %v25075_v11 }
 0x7cf   : > { %21143 = vmatpush3.bf16.msra.mxu1 %v24729_v14  ;;  %20235 = vmatpush3.bf16.msra.mxu0 %v21889_v10  ;;  %v21914_v10 = vld [vmem:[%s27673_s7 + $0x494] ss:$20 sps:$4 sm:$0xff]  }
 0x7d0   : > { %21144 = vmatprep.subr.bf16.mxu1 %v27689_v36  ;;  %20236 = vmatprep.subr.bf16.mxu0 %v27691_v1 }
 0x7d1   : > { %19658 = vmatprep.mubr.msk.f32.mxu1 %vm22994_vm0, %v27691_v1  ;;  %20250 = vmatprep.mubr.msk.bf16.mxu0 %vm22994_vm0, %v27691_v1  ;;  %v25091_v43 = vpop.f32.mrb[8].mxu0 }
 0x7d2   : > { %v19831_v59 = vpop.f32.mrb[9].mxu0 }
 0x7d3   : > { %21146 = vmatpush3.bf16.msra.mxu1 %v24740_v4  ;;  %20237 = vmatpush3.bf16.msra.mxu0 %v21890_v28  ;;  %v21912_v28 = vld [vmem:[%s27673_s7 + $0x490] ss:$20 sps:$4 sm:$0xff]  }
 0x7d4   : > { %21147 = vmatprep.subr.bf16.mxu1 %v27689_v36  ;;  %20238 = vmatprep.subr.bf16.mxu0 %v27691_v1  ;;  %v21917_v59 = vld [vmem:[%s27673_s7 + $0x4bc] ss:$20 sps:$4 sm:$0xff]  }
 0x7d7   : > { %21149 = vmatpush3.bf16.msra.mxu1 %v24752_v6  ;;  %20239 = vmatpush3.bf16.msra.mxu0 %v21891_v47  ;;  %v21915_v47 = vld [vmem:[%s27673_s7 + $0x4b8] ss:$20 sps:$4 sm:$0xff]  }
 0x7d8   : > { %21150 = vmatprep.subr.bf16.mxu1 %v27689_v36  ;;  %20240 = vmatprep.subr.bf16.mxu0 %v27691_v1 }
 0x7db   : > { %21152 = vmatpush3.bf16.msra.mxu1 %v24762_v56  ;;  %20241 = vmatpush3.bf16.msra.mxu0 %v21892_v45  ;;  %v21920_v45 = vld [vmem:[%s27673_s7 + $0x4e4] ss:$20 sps:$4 sm:$0xff]  }
 0x7dc   : > { %20242 = vmatprep.subr.bf16.mxu0 %v27691_v1  ;;  %19832 = vmatprep.subr.mxu1 %v27691_v1 }
 0x7de   : > { %19659 = vmatmul.mubr.msk.f32.vlgmr.msra.gmra.mrb[8].mxu1 %vm519_vm1, %v24640_v19  ;;  %v21896_v19 = vld [vmem:[%s27673_s7 + $0x3a8] ss:$20 sps:$4 sm:$0xff]  }
 0x7df   : > { %20243 = vmatpush3.bf16.msra.mxu0 %v21893_v44  ;;  %19834 = vmatprep.mubr.msk.f32.mxu1 %vm22994_vm0, %v27691_v1  ;;  %v21918_v44 = vld [vmem:[%s27673_s7 + $0x4e0] ss:$20 sps:$4 sm:$0xff]  }
 0x7e0   : > { %20244 = vmatprep.subr.bf16.mxu0 %v27691_v1 }
 0x7e3   : > { %20245 = vmatpush3.bf16.msra.mxu0 %v21894_v21  ;;  %v21923_v21 = vld [vmem:[%s27673_s7 + $0x504] ss:$20 sps:$4 sm:$0xff]  }
 0x7e4   : > { %20246 = vmatprep.subr.bf16.mxu0 %v27691_v1 }
 0x7e7   : > { %20247 = vmatpush3.bf16.msra.mxu0 %v21895_v17  ;;  %v9877_v17 = vld [vmem:[#allocation4 + $0x3] sm:$0x1] }
 0x7e8   : > { %20248 = vmatprep.subr.bf16.mxu0 %v27691_v1 }
 0x7eb   : > { %20249 = vmatpush3.bf16.msra.mxu0 %v21896_v19  ;;  %v21921_v19 = vld [vmem:[%s27673_s7 + $0x500] ss:$20 sps:$4 sm:$0xff]  }
 0x7ec   : > { %10177 = vmatprep.subr.bf16.mxu0 %v21899_v37  ;;  %v25183_v37 = vpack.c.bf16 %v9877_v17, %v9877_v17  ;;  %v21939_v17 = vld [vmem:[%s27673_s7 + $0x5f0] ss:$20 sps:$4 sm:$0xff]  }
 0x7ee   : > { %20251 = vmatmul.mubr.bf16.vlgmr.msra.gmra.mrb[20].mxu0 %v25075_v11 }
 0x7ef   : > { %10178 = vmatpush1.bf16.msra.mxu0 %v21897_v32  ;;  %10209 = vmatprep.mubr.bf16.mxu0 %v27687_v30  ;;  %v21926_v32 = vld [vmem:[%s27673_s7 + $0x52c] ss:$20 sps:$4 sm:$0xff]  }
 0x7f0   : > { %10179 = vmatprep.subr.bf16.mxu0 %v21902_v42  ;;  %v21924_v42 = vld [vmem:[%s27673_s7 + $0x528] ss:$20 sps:$4 sm:$0xff]  }
 0x7f3   : > { %10180 = vmatpush1.bf16.msra.mxu0 %v21900_v22  ;;  %v21929_v22 = vld [vmem:[%s27673_s7 + $0x554] ss:$20 sps:$4 sm:$0xff]  }
 0x7f4   : > { %10181 = vmatprep.subr.bf16.mxu0 %v21905_v23  ;;  %v21927_v23 = vld [vmem:[%s27673_s7 + $0x550] ss:$20 sps:$4 sm:$0xff]  }
 0x7f7   : > { %10182 = vmatpush1.bf16.msra.mxu0 %v21903_v40  ;;  %v21932_v40 = vld [vmem:[%s27673_s7 + $0x57c] ss:$20 sps:$4 sm:$0xff]  }
 0x7f8   : > { %10183 = vmatprep.subr.bf16.mxu0 %v21908_v62  ;;  %v21930_v62 = vld [vmem:[%s27673_s7 + $0x578] ss:$20 sps:$4 sm:$0xff]  }
 0x7fb   : > { %10184 = vmatpush1.bf16.msra.mxu0 %v21906_v61  ;;  %v21935_v61 = vld [vmem:[%s27673_s7 + $0x5a4] ss:$20 sps:$4 sm:$0xff]  }
 0x7fc   : > { %10185 = vmatprep.subr.bf16.mxu0 %v21911_v60  ;;  %v21933_v60 = vld [vmem:[%s27673_s7 + $0x5a0] ss:$20 sps:$4 sm:$0xff]  }
 0x7ff   : > { %10186 = vmatpush1.bf16.msra.mxu0 %v21909_v29  ;;  %v21938_v29 = vld [vmem:[%s27673_s7 + $0x5cc] ss:$20 sps:$4 sm:$0xff]  }
 0x800   : > { %10187 = vmatprep.subr.bf16.mxu0 %v21914_v10 }
 0x803   : > { %10188 = vmatpush1.bf16.msra.mxu0 %v21912_v28 }
 0x804   : > { %10189 = vmatprep.subr.bf16.mxu0 %v21917_v59  ;;  %v21936_v59 = vld [vmem:[%s27673_s7 + $0x5c8] ss:$20 sps:$4 sm:$0xff]  }
 0x807   : > { %10190 = vmatpush1.bf16.msra.mxu0 %v21915_v47  ;;  %v21941_v47 = vld [vmem:[%s27673_s7 + $0x5f4] ss:$20 sps:$4 sm:$0xff]  }
 0x808   : > { %10191 = vmatprep.subr.bf16.mxu0 %v21920_v45 }
 0x80b   : > { %10192 = vmatpush1.bf16.msra.mxu0 %v21918_v44 }
 0x80c   : > { %10563 = vmatprep.subr.bf16.mxu0 %v21923_v21 }
 0x80e   : > { %10210 = vmatmul.mubr.bf16.vlgmr.msra.gmra.mrb[24].mxu0 %v25183_v37 }
 0x80f   : > { %10564 = vmatpush1.bf16.msra.mxu0 %v21921_v19  ;;  %10595 = vmatprep.mubr.bf16.mxu0 %v27687_v30  ;;  %v21944_v19 = vld [vmem:[%s27673_s7 + $0x61c] ss:$20 sps:$4 sm:$0xff]  }
 0x810   : > { %10565 = vmatprep.subr.bf16.mxu0 %v21926_v32  ;;  %v21942_v32 = vld [vmem:[%s27673_s7 + $0x618] ss:$20 sps:$4 sm:$0xff]  }
 0x813   : > { %10566 = vmatpush1.bf16.msra.mxu0 %v21924_v42 }
 0x814   : > { %10567 = vmatprep.subr.bf16.mxu0 %v21929_v22  ;;  %v21945_v22 = vld [vmem:[%s27673_s7 + $0x510] ss:$20 sps:$4 sm:$0xff]  }
 0x817   : > { %10568 = vmatpush1.bf16.msra.mxu0 %v21927_v23 }
 0x818   : > { %10569 = vmatprep.subr.bf16.mxu0 %v21932_v40  ;;  %v21946_v40 = vld [vmem:[%s27673_s7 + $0x538] ss:$20 sps:$4 sm:$0xff]  }
 0x81b   : > { %10570 = vmatpush1.bf16.msra.mxu0 %v21930_v62  ;;  %v21947_v62 = vld [vmem:[%s27673_s7 + $0x560] ss:$20 sps:$4 sm:$0xff]  }
 0x81c   : > { %10571 = vmatprep.subr.bf16.mxu0 %v21935_v61  ;;  %v21948_v61 = vld [vmem:[%s27673_s7 + $0x588] ss:$20 sps:$4 sm:$0xff]  }
 0x81d   : > { %v5399_v10 = vpop.f32.mrb[4].mxu1 }
 0x81e   : > { %v19484_v28 = vpop.f32.mrb[5].mxu1 }
 0x81f   : > { %10572 = vmatpush1.bf16.msra.mxu0 %v21933_v60  ;;  %v21949_v60 = vld [vmem:[%s27673_s7 + $0x5b0] ss:$20 sps:$4 sm:$0xff]   ;;  %v21952_v28 = vld [vmem:[%s27673_s7 + $0x628] ss:$20 sps:$4 sm:$0xff]  }
 0x820   : > { %10573 = vmatprep.subr.bf16.mxu0 %v21938_v29  ;;  %v21950_v29 = vld [vmem:[%s27673_s7 + $0x5d8] ss:$20 sps:$4 sm:$0xff]  }
 0x821   : > { %v5469_v45 = vpop.f32.mrb[6].mxu1 }
 0x822   : > { %v5473_v44 = vmax.f32 %v5399_v10, %v5469_v45  ;;  %v19489_v21 = vpop.f32.mrb[7].mxu1  ;;  %v21951_v10 = vld [vmem:[%s27673_s7 + $0x600] ss:$20 sps:$4 sm:$0xff]  }
 0x823   : > { %10574 = vmatpush1.bf16.msra.mxu0 %v21936_v59  ;;  %v21955_v59 = vld [vmem:[%s27673_s7 + $0x64c] ss:$20 sps:$4 sm:$0xff]   ;;  %v21958_v45 = vld [vmem:[%s27673_s7 + $0x674] ss:$20 sps:$4 sm:$0xff]   ;;  %v21961_v21 = vld [vmem:[%s27673_s7 + $0x69c] ss:$20 sps:$4 sm:$0xff]  }
 0x824   : > { %5474 = vst [vmem:[#allocation4 + $0x4] sm:$0xf] %v5473_v44  ;;  %10575 = vmatprep.subr.bf16.mxu0 %v21941_v47  ;;  %v21953_v47 = vld [vmem:[%s27673_s7 + $0x648] ss:$20 sps:$4 sm:$0xff]   ;;  %v21956_v44 = vld [vmem:[%s27673_s7 + $0x670] ss:$20 sps:$4 sm:$0xff]  }
 0x827   : > { %10576 = vmatpush1.bf16.msra.mxu0 %v21939_v17  ;;  %v21959_v17 = vld [vmem:[%s27673_s7 + $0x698] ss:$20 sps:$4 sm:$0xff]  }
 0x828   : > { %10577 = vmatprep.subr.bf16.mxu0 %v21944_v19  ;;  %v21964_v19 = vld [vmem:[%s27673_s7 + $0x6c4] ss:$20 sps:$4 sm:$0xff]  }
 0x82b   : > { %10578 = vmatpush1.bf16.msra.mxu0 %v21942_v32  ;;  %v10304_v42 = vld [vmem:[#allocation4 + $0x4] sm:$0x1] }
 0x82c   : > { %v25232_v23 = vpack.c.bf16 %v10304_v42, %v10304_v42  ;;  %20274 = vmatprep.subr.bf16.mxu0 %v27691_v1  ;;  %v21962_v32 = vld [vmem:[%s27673_s7 + $0x6c0] ss:$20 sps:$4 sm:$0xff]  }
 0x82d   : > { %v21967_v42 = vld [vmem:[%s27673_s7 + $0x6ec] ss:$20 sps:$4 sm:$0xff]  }
 0x82e   : > { %10596 = vmatmul.mubr.bf16.vlgmr.msra.gmra.mrb[28].mxu0 %v25232_v23 }
 0x82f   : > { %20275 = vmatpush3.bf16.msra.mxu0 %v21945_v22  ;;  %20290 = vmatprep.mubr.msk.bf16.mxu0 %vm22994_vm0, %v27691_v1  ;;  %v21965_v22 = vld [vmem:[%s27673_s7 + $0x6e8] ss:$20 sps:$4 sm:$0xff]  }
 0x830   : > { %20276 = vmatprep.subr.bf16.mxu0 %v27691_v1 }
 0x833   : > { %20277 = vmatpush3.bf16.msra.mxu0 %v21946_v40  ;;  %v21970_v40 = vld [vmem:[%s27673_s7 + $0x714] ss:$20 sps:$4 sm:$0xff]  }
 0x834   : > { %20278 = vmatprep.subr.bf16.mxu0 %v27691_v1 }
 0x837   : > { %20279 = vmatpush3.bf16.msra.mxu0 %v21947_v62  ;;  %v21968_v62 = vld [vmem:[%s27673_s7 + $0x710] ss:$20 sps:$4 sm:$0xff]  }
 0x838   : > { %20280 = vmatprep.subr.bf16.mxu0 %v27691_v1 }
 0x83b   : > { %20281 = vmatpush3.bf16.msra.mxu0 %v21948_v61  ;;  %v21973_v61 = vld [vmem:[%s27673_s7 + $0x73c] ss:$20 sps:$4 sm:$0xff]  }
 0x83c   : > { %20282 = vmatprep.subr.bf16.mxu0 %v27691_v1 }
 0x83f   : > { %20283 = vmatpush3.bf16.msra.mxu0 %v21949_v60 }
 0x840   : > { %20284 = vmatprep.subr.bf16.mxu0 %v27691_v1 }
 0x843   : > { %20285 = vmatpush3.bf16.msra.mxu0 %v21950_v29 }
 0x844   : > { %20286 = vmatprep.subr.bf16.mxu0 %v27691_v1 }
 0x847   : > { %20287 = vmatpush3.bf16.msra.mxu0 %v21951_v10  ;;  %v21971_v10 = vld [vmem:[%s27673_s7 + $0x738] ss:$20 sps:$4 sm:$0xff]  }
 0x848   : > { %20288 = vmatprep.subr.bf16.mxu0 %v27691_v1 }
 0x84b   : > { %20289 = vmatpush3.bf16.msra.mxu0 %v21952_v28  ;;  %v21976_v28 = vld [vmem:[%s27673_s7 + $0x764] ss:$20 sps:$4 sm:$0xff]  }
 0x84c   : > { %11031 = vmatprep.subr.bf16.mxu0 %v21955_v59  ;;  %v21974_v59 = vld [vmem:[%s27673_s7 + $0x760] ss:$20 sps:$4 sm:$0xff]  }
 0x84e   : > { %20291 = vmatmul.mubr.bf16.vlgmr.msra.gmra.mrb[32].mxu0 %v25232_v23 }
 0x84f   : > { %11032 = vmatpush1.bf16.msra.mxu0 %v21953_v47  ;;  %11063 = vmatprep.mubr.bf16.mxu0 %v27687_v30  ;;  %v21979_v47 = vld [vmem:[%s27673_s7 + $0x784] ss:$20 sps:$4 sm:$0xff]  }
 0x850   : > { %11033 = vmatprep.subr.bf16.mxu0 %v21958_v45  ;;  %v10731_v45 = vld [vmem:[#allocation4 + $0x5] sm:$0x1] }
 0x853   : > { %11034 = vmatpush1.bf16.msra.mxu0 %v21956_v44  ;;  %v21977_v44 = vld [vmem:[%s27673_s7 + $0x780] ss:$20 sps:$4 sm:$0xff]  }
 0x854   : > { %11035 = vmatprep.subr.bf16.mxu0 %v21961_v21  ;;  %v25324_v21 = vpack.c.bf16 %v10731_v45, %v10731_v45 }
 0x857   : > { %11036 = vmatpush1.bf16.msra.mxu0 %v21959_v17  ;;  %v21982_v17 = vld [vmem:[%s27673_s7 + $0x7ac] ss:$20 sps:$4 sm:$0xff]  }
 0x858   : > { %11037 = vmatprep.subr.bf16.mxu0 %v21964_v19  ;;  %v21980_v19 = vld [vmem:[%s27673_s7 + $0x7a8] ss:$20 sps:$4 sm:$0xff]  }
 0x85b   : > { %11038 = vmatpush1.bf16.msra.mxu0 %v21962_v32  ;;  %v21985_v32 = vld [vmem:[%s27673_s7 + $0x7d4] ss:$20 sps:$4 sm:$0xff]  }
 0x85c   : > { %11039 = vmatprep.subr.bf16.mxu0 %v21967_v42  ;;  %v21983_v42 = vld [vmem:[%s27673_s7 + $0x7d0] ss:$20 sps:$4 sm:$0xff]  }
 0x85f   : > { %11040 = vmatpush1.bf16.msra.mxu0 %v21965_v22  ;;  %v21988_v22 = vld [vmem:[%s27673_s7 + $0x7fc] ss:$20 sps:$4 sm:$0xff]  }
 0x860   : > { %11041 = vmatprep.subr.bf16.mxu0 %v21970_v40  ;;  %v21986_v40 = vld [vmem:[%s27673_s7 + $0x7f8] ss:$20 sps:$4 sm:$0xff]  }
 0x861   : > { %v25307_v60 = vpop.f32.mrb[10].mxu0 }
 0x862   : > { %v20183_v29 = vpop.f32.mrb[11].mxu0 }
 0x863   : > { %11042 = vmatpush1.bf16.msra.mxu0 %v21968_v62  ;;  %v21991_v62 = vld [vmem:[%s27673_s7 + $0x824] ss:$20 sps:$4 sm:$0xff]   ;;  %v21994_v29 = vld [vmem:[%s27673_s7 + $0x84c] ss:$20 sps:$4 sm:$0xff]  }
 0x864   : > { %11043 = vmatprep.subr.bf16.mxu0 %v21973_v61  ;;  %v21989_v61 = vld [vmem:[%s27673_s7 + $0x820] ss:$20 sps:$4 sm:$0xff]  }
 0x867   : > { %11044 = vmatpush1.bf16.msra.mxu0 %v21971_v10  ;;  %v21992_v10 = vld [vmem:[%s27673_s7 + $0x848] ss:$20 sps:$4 sm:$0xff]  }
 0x868   : > { %11045 = vmatprep.subr.bf16.mxu0 %v21976_v28  ;;  %v21997_v28 = vld [vmem:[%s27673_s7 + $0x874] ss:$20 sps:$4 sm:$0xff]  }
 0x86b   : > { %11046 = vmatpush1.bf16.msra.mxu0 %v21974_v59 }
 0x86c   : > { %11417 = vmatprep.subr.bf16.mxu0 %v21979_v47 }
 0x86e   : > { %11064 = vmatmul.mubr.bf16.vlgmr.msra.gmra.mrb[36].mxu0 %v25324_v21 }
 0x86f   : > { %11418 = vmatpush1.bf16.msra.mxu0 %v21977_v44  ;;  %11449 = vmatprep.mubr.bf16.mxu0 %v27687_v30 }
 0x870   : > { %11419 = vmatprep.subr.bf16.mxu0 %v21982_v17  ;;  %v21995_v17 = vld [vmem:[%s27673_s7 + $0x870] ss:$20 sps:$4 sm:$0xff]  }
 0x873   : > { %11420 = vmatpush1.bf16.msra.mxu0 %v21980_v19 }
 0x874   : > { %11421 = vmatprep.subr.bf16.mxu0 %v21985_v32  ;;  %v22000_v32 = vld [vmem:[%s27673_s7 + $0x89c] ss:$20 sps:$4 sm:$0xff]  }
 0x877   : > { %11422 = vmatpush1.bf16.msra.mxu0 %v21983_v42  ;;  %v21998_v42 = vld [vmem:[%s27673_s7 + $0x898] ss:$20 sps:$4 sm:$0xff]  }
 0x878   : > { %11423 = vmatprep.subr.bf16.mxu0 %v21988_v22  ;;  %v11158_v22 = vld [vmem:[#allocation4 + $0x6] sm:$0x1] }
 0x87b   : > { %11424 = vmatpush1.bf16.msra.mxu0 %v21986_v40  ;;  %v22001_v40 = vld [vmem:[%s27673_s7 + $0x790] ss:$20 sps:$4 sm:$0xff]  }
 0x87c   : > { %11425 = vmatprep.subr.bf16.mxu0 %v21991_v62  ;;  %v25379_v62 = vpack.c.bf16 %v11158_v22, %v11158_v22  ;;  %v22007_v22 = vld [vmem:[%s27673_s7 + $0x880] ss:$20 sps:$4 sm:$0xff]  }
 0x87f   : > { %11426 = vmatpush1.bf16.msra.mxu0 %v21989_v61  ;;  %v22002_v61 = vld [vmem:[%s27673_s7 + $0x7b8] ss:$20 sps:$4 sm:$0xff]  }
 0x880   : > { %11427 = vmatprep.subr.bf16.mxu0 %v21994_v29  ;;  %v22003_v29 = vld [vmem:[%s27673_s7 + $0x7e0] ss:$20 sps:$4 sm:$0xff]  }
 0x881   : > { %v25361_v59 = vpop.f32.mrb[12].mxu0 }
 0x882   : > { %v25363_v47 = vpop.f32.mrb[13].mxu0 }
 0x883   : > { %v9361_v44 = vpop.f32.mrb[14].mxu0  ;;  %11428 = vmatpush1.bf16.msra.mxu0 %v21992_v10  ;;  %v22004_v10 = vld [vmem:[%s27673_s7 + $0x808] ss:$20 sps:$4 sm:$0xff]  }
 0x884   : > { %v9362_v19 = vpop.f32.mrb[15].mxu0  ;;  %11429 = vmatprep.subr.bf16.mxu0 %v21997_v28  ;;  %v22005_v28 = vld [vmem:[%s27673_s7 + $0x830] ss:$20 sps:$4 sm:$0xff]   ;;  %v22006_v44 = vld [vmem:[%s27673_s7 + $0x858] ss:$20 sps:$4 sm:$0xff]  }
 0x887   : > { %11430 = vmatpush1.bf16.msra.mxu0 %v21995_v17 }
 0x888   : > { %11431 = vmatprep.subr.bf16.mxu0 %v22000_v32 }
 0x88b   : > { %11432 = vmatpush1.bf16.msra.mxu0 %v21998_v42 }
 0x88c   : > { %20314 = vmatprep.subr.bf16.mxu0 %v27691_v1 }
 0x88e   : > { %11450 = vmatmul.mubr.bf16.vlgmr.msra.gmra.mrb[40].mxu0 %v25379_v62 }
 0x88f   : > { %20315 = vmatpush3.bf16.msra.mxu0 %v22001_v40  ;;  %20330 = vmatprep.mubr.msk.bf16.mxu0 %vm22994_vm0, %v27691_v1 }
 0x890   : > { %20316 = vmatprep.subr.bf16.mxu0 %v27691_v1 }
 0x893   : > { %20317 = vmatpush3.bf16.msra.mxu0 %v22002_v61  ;;  %v22008_v61 = vld [vmem:[%s27673_s7 + $0x8a8] ss:$20 sps:$4 sm:$0xff]  }
 0x894   : > { %20318 = vmatprep.subr.bf16.mxu0 %v27691_v1 }
 0x897   : > { %20319 = vmatpush3.bf16.msra.mxu0 %v22003_v29  ;;  %v22011_v29 = vld [vmem:[%s27673_s7 + $0x8cc] ss:$20 sps:$4 sm:$0xff]  }
 0x898   : > { %20320 = vmatprep.subr.bf16.mxu0 %v27691_v1 }
 0x89b   : > { %20321 = vmatpush3.bf16.msra.mxu0 %v22004_v10  ;;  %v25422_v10 = vld [vmem:[#allocation8] ss:$0 sm:$0xff] }
 0x89c   : > { %20322 = vmatprep.subr.bf16.mxu0 %v27691_v1 }
 0x89f   : > { %20323 = vmatpush3.bf16.msra.mxu0 %v22005_v28  ;;  %v22009_v28 = vld [vmem:[%s27673_s7 + $0x8c8] ss:$20 sps:$4 sm:$0xff]  }
 0x8a0   : > { %20324 = vmatprep.subr.bf16.mxu0 %v27691_v1 }
 0x8a1   : > { %v25405_v17 = vpop.f32.mrb[16].mxu0 }
 0x8a2   : > { %v25407_v19 = vpop.f32.mrb[17].mxu0 }
 0x8a3   : > { %v9747_v42 = vpop.f32.mrb[18].mxu0  ;;  %20325 = vmatpush3.bf16.msra.mxu0 %v22006_v44  ;;  %v22014_v44 = vld [vmem:[%s27673_s7 + $0x8f4] ss:$20 sps:$4 sm:$0xff]  }
 0x8a4   : > { %v9748_v40 = vpop.f32.mrb[19].mxu0  ;;  %20326 = vmatprep.subr.bf16.mxu0 %v27691_v1  ;;  %v21606_v42 = vadd.f32 %v25422_v10, %v25091_v43  ;;  %v22015_v43 = vld [vmem:[%s27673_s7 + $0x918] ss:$20 sps:$4 sm:$0xff]  }
 0x8a5   : > { %v22017_v40 = vld [vmem:[%s27673_s7 + $0x91c] ss:$20 sps:$4 sm:$0xff]  }
 0x8a6   : > { %vm6886_vm12 = vcmp.ge.f32.partialorder %v21606_v42, 0.0 }
 0x8a7   : > { %20327 = vmatpush3.bf16.msra.mxu0 %v22007_v22  ;;  %v22012_v22 = vld [vmem:[%s27673_s7 + $0x8f0] ss:$20 sps:$4 sm:$0xff]  }
 0x8a8   : > { %20328 = vmatprep.subr.bf16.mxu0 %v27691_v1 }
 0x8ab   : > { %20329 = vmatpush3.bf16.msra.mxu0 %v22008_v61 }
 0x8ac   : > { %11885 = vmatprep.subr.bf16.mxu0 %v22011_v29  ;;  %v6887_v29 = vmul.f32 0.01, %v21606_v42 }
 0x8ae   : > { %20331 = vmatmul.mubr.bf16.vlgmr.msra.gmra.mrb[44].mxu0 %v25379_v62 }
 0x8af   : > { %11886 = vmatpush1.bf16.msra.mxu0 %v22009_v28  ;;  %11917 = vmatprep.mubr.bf16.mxu0 %v27687_v30  ;;  %v6888_v30 = vsel %vm6886_vm12, %v21606_v42, %v6887_v29  ;;  %v22029_v42 = vld [vmem:[%s27673_s7 + $0x9bc] ss:$20 sps:$4 sm:$0xff]  }
 0x8b0   : > { %11887 = vmatprep.subr.bf16.mxu0 %v22014_v44  ;;  %v22020_v44 = vld [vmem:[%s27673_s7 + $0x944] ss:$20 sps:$4 sm:$0xff]  }
 0x8b1   : > { %v6226_v61 = vpop.f32.mrb[8].mxu1 }
 0x8b2   : > { %v21605_v32 = vadd.f32 %v25422_v10, %v6226_v61  ;;  %v19660_v45 = vpop.f32.mrb[9].mxu1 }
 0x8b3   : > { %11888 = vmatpush1.bf16.msra.mxu0 %v22012_v22  ;;  %v22018_v45 = vld [vmem:[%s27673_s7 + $0x940] ss:$20 sps:$4 sm:$0xff]  }
 0x8b4   : > { %vm6231_vm13 = vcmp.ge.f32.partialorder %v21605_v32, 0.0  ;;  %v6232_v28 = vmul.f32 0.01, %v21605_v32  ;;  %11889 = vmatprep.subr.bf16.mxu0 %v22017_v40  ;;  %v22023_v22 = vld [vmem:[%s27673_s7 + $0x96c] ss:$20 sps:$4 sm:$0xff]   ;;  %v27715_v40 = vmov 0.0  }
 0x8b6   : > { %v6233_v36 = vsel %vm6231_vm13, %v21605_v32, %v6232_v28  ;;  %v22026_v32 = vld [vmem:[%s27673_s7 + $0x994] ss:$20 sps:$4 sm:$0xff]  }
 0x8b7   : > { %v6889_v1 = vmax.f32 %v6233_v36, %v6888_v30  ;;  %11890 = vmatpush1.bf16.msra.mxu0 %v22015_v43  ;;  %v22021_v36 = vld [vmem:[%s27673_s7 + $0x968] ss:$20 sps:$4 sm:$0xff]   ;;  %v27716_v30 = vmov 0.0|0.0   ;;  %v22027_v43 = vld [vmem:[%s27673_s7 + $0x9b8] ss:$20 sps:$4 sm:$0xff]  }
 0x8b8   : > { %11891 = vmatprep.subr.bf16.mxu0 %v22020_v44  ;;  %v22032_v44 = vld [vmem:[%s27673_s7 + $0x9e4] ss:$20 sps:$4 sm:$0xff]  }
 0x8b9   : > { %19833 = vmatpush3.msk.msra.mxu1 %vm3766_vm8, %v6889_v1 }
 0x8ba   : > { %19835 = vmatmul.mubr.msk.f32.vlgmr.msra.gmra.mrb[10].mxu1 %vm3762_vm9, %v23369_v18  ;;  %19837 = vmatprep.subr.mxu1 %v27715_v40 }
 0x8bb   : > { %19838 = vmatpush3.msk.msra.mxu1 %vm3766_vm8, %v6889_v1  ;;  %11892 = vmatpush1.bf16.msra.mxu0 %v22018_v45  ;;  %v22024_v1 = vld [vmem:[%s27673_s7 + $0x990] ss:$20 sps:$4 sm:$0xff]   ;;  %v11585_v45 = vld [vmem:[#allocation4 + $0x7] sm:$0x1] }
 0x8bc   : > { %19839 = vmatprep.mubr.msk.f32.mxu1 %vm22994_vm0, %v27715_v40  ;;  %21261 = vmatprep.subr.bf16.mxu1 %v27716_v30 }
 0x8bd   : > { %11893 = vmatprep.subr.bf16.mxu0 %v22023_v22  ;;  %v7043_v22 = vld [vmem:[#allocation3 + $0x50] sm:$0x7f] }
 0x8be   : > { %19840 = vmatmul.mubr.msk.f32.vlgmr.msra.gmra.mrb[12].mxu1 %vm3762_vm9, %v23360_v15 }
 0x8bf   : > { %21263 = vmatpush3.bf16.msra.mxu1 %v24365_v33  ;;  %11894 = vmatpush1.bf16.msra.mxu0 %v22021_v36  ;;  %v25496_v36 = vpack.c.bf16 %v11585_v45, %v11585_v45  ;;  %v22053_v45 = vld [vmem:[%s27673_s7 + $0xaf4] ss:$20 sps:$4 sm:$0xff]  }
 0x8c0   : > { %21264 = vmatprep.subr.bf16.mxu1 %v27716_v30  ;;  %11895 = vmatprep.subr.bf16.mxu0 %v22026_v32 }
 0x8c1   : > { %v25477_v61 = vpop.f32.mrb[20].mxu0  ;;  %19858 = vmatprep.mubr.msk.f32.mxu1 %vm22994_vm0, %v27715_v40 }
 0x8c2   : > { %v20252_v29 = vpop.f32.mrb[21].mxu0 }
 0x8c3   : > { %21266 = vmatpush3.bf16.msra.mxu1 %v24376_v12  ;;  %v9828_v33 = vpop.f32.mrb[22].mxu0  ;;  %11896 = vmatpush1.bf16.msra.mxu0 %v22024_v1  ;;  %v22030_v12 = vld [vmem:[%s27673_s7 + $0x9e0] ss:$20 sps:$4 sm:$0xff]   ;;  %v22035_v1 = vld [vmem:[%s27673_s7 + $0xa04] ss:$20 sps:$4 sm:$0xff]  }
 0x8c4   : > { %21267 = vmatprep.subr.bf16.mxu1 %v27716_v30  ;;  %v20253_v28 = vpop.f32.mrb[23].mxu0  ;;  %11897 = vmatprep.subr.bf16.mxu0 %v22029_v42  ;;  %v22038_v42 = vld [vmem:[%s27673_s7 + $0xa2c] ss:$20 sps:$4 sm:$0xff]   ;;  %v7209_v29 = vld [vmem:[#allocation3 + $0x52] sm:$0x7f] }
 0x8c5   : > { %v22041_v33 = vld [vmem:[%s27673_s7 + $0xa54] ss:$20 sps:$4 sm:$0xff]   ;;  %v22047_v28 = vld [vmem:[%s27673_s7 + $0xaa4] ss:$20 sps:$4 sm:$0xff]  }
 0x8c7   : > { %21269 = vmatpush3.bf16.msra.mxu1 %v24388_v39  ;;  %11898 = vmatpush1.bf16.msra.mxu0 %v22027_v43  ;;  %v27717_v39 = vmov 0   ;;  %v22044_v43 = vld [vmem:[%s27673_s7 + $0xa7c] ss:$20 sps:$4 sm:$0xff]  }
 0x8c8   : > { %21270 = vmatprep.subr.bf16.mxu1 %v27716_v30  ;;  %11899 = vmatprep.subr.bf16.mxu0 %v22032_v44  ;;  %v22742_v44 = vld [vmem:[#allocation3 + $0x61] sm:$0x7f] }
 0x8cb   : > { %21272 = vmatpush3.bf16.msra.mxu1 %v24398_v3  ;;  %11900 = vmatpush1.bf16.msra.mxu0 %v22030_v12  ;;  %v7126_v3 = vld [vmem:[#allocation3 + $0x51] sm:$0x7f]  ;;  %v22048_v12 = vld [vmem:[%s27673_s7 + $0xac8] ss:$20 sps:$4 sm:$0xff]  }
 0x8cc   : > { %21273 = vmatprep.subr.bf16.mxu1 %v27716_v30  ;;  %12271 = vmatprep.subr.bf16.mxu0 %v22035_v1 }
 0x8ce   : > { %19859 = vmatmul.mubr.msk.f32.vlgmr.msra.gmra.mrb[14].mxu1 %vm519_vm1, %v7043_v22  ;;  %11918 = vmatmul.mubr.bf16.vlgmr.msra.gmra.mrb[48].mxu0 %v25496_v36  ;;  %v22056_v22 = vld [vmem:[%s27673_s7 + $0xb1c] ss:$20 sps:$4 sm:$0xff]  }
 0x8cf   : > { %21275 = vmatpush3.bf16.msra.mxu1 %v24410_v50  ;;  %19877 = vmatprep.mubr.msk.f32.mxu1 %vm22994_vm0, %v27715_v40 }
 0x8d0   : > { %21276 = vmatprep.subr.bf16.mxu1 %v27716_v30  ;;  %12303 = vmatprep.mubr.bf16.mxu0 %v27717_v39 }
 0x8d3   : > { %21278 = vmatpush3.bf16.msra.mxu1 %v24422_v5 }
 0x8d4   : > { %21279 = vmatprep.subr.bf16.mxu1 %v27716_v30 }
 0x8d7   : > { %21281 = vmatpush3.bf16.msra.mxu1 %v24434_v35 }
 0x8d8   : > { %21282 = vmatprep.subr.bf16.mxu1 %v27716_v30 }
 0x8db   : > { %21284 = vmatpush3.bf16.msra.mxu1 %v24444_v49 }
 0x8dc   : > { %21285 = vmatprep.subr.bf16.mxu1 %v27716_v30 }
 0x8de   : > { %19878 = vmatmul.mubr.msk.f32.vlgmr.msra.gmra.mrb[14].mxu1 %vm519_vm1, %v7126_v3  ;;  %v22743_v3 = vld [vmem:[#allocation3 + $0x62] sm:$0x7f] }
 0x8df   : > { %21287 = vmatpush3.bf16.msra.mxu1 %v24456_v52  ;;  %19896 = vmatprep.mubr.msk.f32.mxu1 %vm22994_vm0, %v27715_v40  ;;  %v22033_v52 = vld [vmem:[%s27673_s7 + $0xa00] ss:$20 sps:$4 sm:$0xff]  }
 0x8e0   : > { %21288 = vmatprep.subr.bf16.mxu1 %v27716_v30  ;;  %12272 = vmatpush1.bf16.msra.mxu0 %v22033_v52 }
 0x8e1   : > { %v25516_v50 = vpop.f32.mrb[24].mxu0  ;;  %12273 = vmatprep.subr.bf16.mxu0 %v22038_v42 }
 0x8e2   : > { %v25518_v5 = vpop.f32.mrb[25].mxu0 }
 0x8e3   : > { %21290 = vmatpush3.bf16.msra.mxu1 %v24468_v0  ;;  %v10264_v35 = vcombine.low %v25516_v50, %v25518_v5  ;;  %v10215_v49 = vpop.f32.mrb[26].mxu0  ;;  %v22036_v0 = vld [vmem:[%s27673_s7 + $0xa28] ss:$20 sps:$4 sm:$0xff]  }
 0x8e4   : > { %21291 = vmatprep.subr.bf16.mxu1 %v27716_v30  ;;  %v10216_v32 = vpop.f32.mrb[27].mxu0  ;;  %12274 = vmatpush1.bf16.msra.mxu0 %v22036_v0  ;;  %v22513_v50 = vld [vmem:[%s27673_s7 + $0xa08] ss:$20 sps:$4 sm:$0xff]  }
 0x8e5   : > { %12275 = vmatprep.subr.bf16.mxu0 %v22041_v33  ;;  %v22518_v5 = vld [vmem:[%s27673_s7 + $0xa34] ss:$20 sps:$4 sm:$0xff]  }
 0x8e7   : > { %21293 = vmatpush3.bf16.msra.mxu1 %v24480_v53  ;;  %v22741_v53 = vld [vmem:[#allocation3 + $0x60] sm:$0x7f] }
 0x8e8   : > { %21294 = vmatprep.subr.bf16.mxu1 %v27716_v30 }
 0x8eb   : > { %21296 = vmatpush3.bf16.msra.mxu1 %v24490_v57 }
 0x8ec   : > { %21297 = vmatprep.subr.bf16.mxu1 %v27716_v30 }
 0x8ee   : > { %19897 = vmatmul.mubr.msk.f32.vlgmr.msra.gmra.mrb[14].mxu1 %vm519_vm1, %v7209_v29 }
 0x8ef   : > { %21299 = vmatpush3.bf16.msra.mxu1 %v24502_v25  ;;  %19915 = vmatprep.mubr.msk.f32.mxu1 %vm22994_vm0, %v27715_v40 }
 0x8f0   : > { %21300 = vmatprep.subr.bf16.mxu1 %v27716_v30 }
 0x8f3   : > { %21302 = vmatpush3.bf16.msra.mxu1 %v24514_v51 }
 0x8f4   : > { %21303 = vmatprep.subr.bf16.mxu1 %v27716_v30 }
 0x8f7   : > { %21305 = vmatpush3.bf16.msra.mxu1 %v24526_v41 }
 0x8f8   : > { %21306 = vmatprep.subr.bf16.mxu1 %v27716_v30 }
 0x8fb   : > { %21308 = vmatpush3.bf16.msra.mxu1 %v24536_v55 }
 0x8fc   : > { %21309 = vmatprep.subr.bf16.mxu1 %v27716_v30 }
 0x8fe   : > { %19916 = vmatmul.mubr.msk.f32.vlgmr.msra.gmra.mrb[14].mxu1 %vm519_vm1, %v22741_v53 }
 0x8ff   : > { %21311 = vmatpush3.bf16.msra.mxu1 %v24548_v63  ;;  %19934 = vmatprep.mubr.msk.f32.mxu1 %vm22994_vm0, %v27715_v40  ;;  %v22039_v63 = vld [vmem:[%s27673_s7 + $0xa50] ss:$20 sps:$4 sm:$0xff]  }
 0x900   : > { %21312 = vmatprep.subr.bf16.mxu1 %v27716_v30  ;;  %12276 = vmatpush1.bf16.msra.mxu0 %v22039_v63 }
 0x901   : > { %v25556_v57 = vpop.f32.mrb[28].mxu0  ;;  %12277 = vmatprep.subr.bf16.mxu0 %v22044_v43 }
 0x902   : > { %v25558_v25 = vpop.f32.mrb[29].mxu0 }
 0x903   : > { %21314 = vmatpush3.bf16.msra.mxu1 %v24560_v31  ;;  %v10690_v51 = vcombine.low %v25556_v57, %v25558_v25  ;;  %v10601_v41 = vpop.f32.mrb[30].mxu0  ;;  %v22042_v31 = vld [vmem:[%s27673_s7 + $0xa78] ss:$20 sps:$4 sm:$0xff]   ;;  %v22561_v57 = vld [vmem:[%s27673_s7 + $0xb50] ss:$20 sps:$4 sm:$0xff]  }
 0x904   : > { %21315 = vmatprep.subr.bf16.mxu1 %v27716_v30  ;;  %v10602_v55 = vpop.f32.mrb[31].mxu0  ;;  %12278 = vmatpush1.bf16.msra.mxu0 %v22042_v31  ;;  %v22057_v31 = vld [vmem:[%s27673_s7 + $0xa10] ss:$20 sps:$4 sm:$0xff]  }
 0x905   : > { %12279 = vmatprep.subr.bf16.mxu0 %v22047_v28 }
 0x907   : > { %21317 = vmatpush3.bf16.msra.mxu1 %v24572_v58  ;;  %v22045_v58 = vld [vmem:[%s27673_s7 + $0xaa0] ss:$20 sps:$4 sm:$0xff]  }
 0x908   : > { %21318 = vmatprep.subr.bf16.mxu1 %v27716_v30  ;;  %12280 = vmatpush1.bf16.msra.mxu0 %v22045_v58  ;;  %v22058_v58 = vld [vmem:[%s27673_s7 + $0xa38] ss:$20 sps:$4 sm:$0xff]  }
 0x90b   : > { %21320 = vmatpush3.bf16.msra.mxu1 %v24582_v16  ;;  %v22050_v16 = vld [vmem:[%s27673_s7 + $0xacc] ss:$20 sps:$4 sm:$0xff]  }
 0x90c   : > { %21321 = vmatprep.subr.bf16.mxu1 %v27716_v30  ;;  %12281 = vmatprep.subr.bf16.mxu0 %v22050_v16 }
 0x90d   : > { %12282 = vmatpush1.bf16.msra.mxu0 %v22048_v12 }
 0x90e   : > { %19935 = vmatmul.mubr.msk.f32.vlgmr.msra.gmra.mrb[14].mxu1 %vm519_vm1, %v22742_v44  ;;  %12283 = vmatprep.subr.bf16.mxu0 %v22053_v45  ;;  %v22059_v45 = vld [vmem:[%s27673_s7 + $0xa60] ss:$20 sps:$4 sm:$0xff]  }
 0x90f   : > { %21323 = vmatpush3.bf16.msra.mxu1 %v24594_v20  ;;  %19953 = vmatprep.mubr.msk.f32.mxu1 %vm22994_vm0, %v27715_v40  ;;  %v22051_v20 = vld [vmem:[%s27673_s7 + $0xaf0] ss:$20 sps:$4 sm:$0xff]  }
 0x910   : > { %21324 = vmatprep.subr.bf16.mxu1 %v27716_v30 }
 0x911   : > { %12284 = vmatpush1.bf16.msra.mxu0 %v22051_v20 }
 0x912   : > { %12285 = vmatprep.subr.bf16.mxu0 %v22056_v22 }
 0x913   : > { %21326 = vmatpush3.bf16.msra.mxu1 %v24608_v46  ;;  %v22054_v46 = vld [vmem:[%s27673_s7 + $0xb18] ss:$20 sps:$4 sm:$0xff]  }
 0x914   : > { %21327 = vmatprep.subr.bf16.mxu1 %v27716_v30 }
 0x915   : > { %12286 = vmatpush1.bf16.msra.mxu0 %v22054_v46  ;;  %v22060_v46 = vld [vmem:[%s27673_s7 + $0xa88] ss:$20 sps:$4 sm:$0xff]  }
 0x916   : > { %20354 = vmatprep.subr.bf16.mxu0 %v27715_v40 }
 0x917   : > { %21329 = vmatpush3.bf16.msra.mxu1 %v24620_v38 }
 0x918   : > { %21330 = vmatprep.subr.bf16.mxu1 %v27716_v30 }
 0x91b   : > { %21332 = vmatpush3.bf16.msra.mxu1 %v24630_v26 }
 0x91c   : > { %21333 = vmatprep.subr.bf16.mxu1 %v27716_v30 }
 0x91e   : > { %19954 = vmatmul.mubr.msk.f32.vlgmr.msra.gmra.mrb[14].mxu1 %vm519_vm1, %v22743_v3  ;;  %v22061_v3 = vld [vmem:[%s27673_s7 + $0xab0] ss:$20 sps:$4 sm:$0xff]  }
 0x91f   : > { %21335 = vmatpush3.bf16.msra.mxu1 %v24642_v34  ;;  %19972 = vmatprep.mubr.msk.f32.mxu1 %vm22994_vm0, %v27715_v40  ;;  %v22744_v34 = vld [vmem:[#allocation3 + $0x70] sm:$0x7f] }
 0x920   : > { %21336 = vmatprep.subr.bf16.mxu1 %v27716_v30 }
 0x921   : > { %v25621_v38 = vpop.f32.mrb[32].mxu0 }
 0x922   : > { %v20292_v49 = vpop.f32.mrb[33].mxu0 }
 0x923   : > { %21338 = vmatpush3.bf16.msra.mxu1 %v24654_v7  ;;  %v10682_v26 = vpop.f32.mrb[34].mxu0  ;;  %v22745_v7 = vld [vmem:[#allocation3 + $0x71] sm:$0x7f]  ;;  %v22062_v49 = vld [vmem:[%s27673_s7 + $0xad8] ss:$20 sps:$4 sm:$0xff]  }
 0x924   : > { %21339 = vmatprep.subr.bf16.mxu1 %v27716_v30  ;;  %v20293_v32 = vpop.f32.mrb[35].mxu0  ;;  %v22063_v26 = vld [vmem:[%s27673_s7 + $0xb00] ss:$20 sps:$4 sm:$0xff]  }
 0x925   : > { %v22064_v32 = vld [vmem:[%s27673_s7 + $0xb28] ss:$20 sps:$4 sm:$0xff]  }
 0x927   : > { %21341 = vmatpush3.bf16.msra.mxu1 %v24666_v8 }
 0x928   : > { %21342 = vmatprep.subr.bf16.mxu1 %v27716_v30 }
 0x92b   : > { %21344 = vmatpush3.bf16.msra.mxu1 %v24676_v48 }
 0x92c   : > { %21345 = vmatprep.subr.bf16.mxu1 %v27716_v30 }
 0x92e   : > { %19973 = vmatmul.mubr.msk.f32.vlgmr.msra.gmra.mrb[14].mxu1 %vm519_vm1, %v22744_v34  ;;  %v22067_v34 = vld [vmem:[%s27673_s7 + $0xb4c] ss:$20 sps:$4 sm:$0xff]  }
 0x92f   : > { %21347 = vmatpush3.bf16.msra.mxu1 %v24686_v27  ;;  %19991 = vmatprep.mubr.msk.f32.mxu1 %vm22994_vm0, %v27715_v40 }
 0x930   : > { %21348 = vmatprep.subr.bf16.mxu1 %v27716_v30 }
 0x933   : > { %21350 = vmatpush3.bf16.msra.mxu1 %v24697_v54 }
 0x934   : > { %21351 = vmatprep.subr.bf16.mxu1 %v27716_v30 }
 0x937   : > { %21353 = vmatpush3.bf16.msra.mxu1 %v24709_v9 }
 0x938   : > { %21354 = vmatprep.subr.bf16.mxu1 %v27716_v30 }
 0x93b   : > { %21356 = vmatpush3.bf16.msra.mxu1 %v24719_v24  ;;  %v22746_v24 = vld [vmem:[#allocation3 + $0x72] sm:$0x7f] }
 0x93c   : > { %21357 = vmatprep.subr.bf16.mxu1 %v27716_v30 }
 0x93e   : > { %19992 = vmatmul.mubr.msk.f32.vlgmr.msra.gmra.mrb[14].mxu1 %vm519_vm1, %v22745_v7  ;;  %v22065_v7 = vld [vmem:[%s27673_s7 + $0xb48] ss:$20 sps:$4 sm:$0xff]  }
 0x93f   : > { %21359 = vmatpush3.bf16.msra.mxu1 %v24729_v14  ;;  %20010 = vmatprep.mubr.msk.f32.mxu1 %vm22994_vm0, %v27715_v40 }
 0x940   : > { %21360 = vmatprep.subr.bf16.mxu1 %v27716_v30 }
 0x941   : > { %v25645_v8 = vpop.f32.mrb[36].mxu0 }
 0x942   : > { %v25647_v48 = vpop.f32.mrb[37].mxu0 }
 0x943   : > { %21362 = vmatpush3.bf16.msra.mxu1 %v24740_v4  ;;  %v11118_v27 = vcombine.low %v25645_v8, %v25647_v48  ;;  %v11069_v54 = vpop.f32.mrb[38].mxu0  ;;  %v22569_v8 = vld [vmem:[%s27673_s7 + $0xc88] ss:$20 sps:$4 sm:$0xff]  }
 0x944   : > { %21363 = vmatprep.subr.bf16.mxu1 %v27716_v30  ;;  %v11070_v9 = vpop.f32.mrb[39].mxu0  ;;  %v22070_v54 = vld [vmem:[%s27673_s7 + $0xb74] ss:$20 sps:$4 sm:$0xff]  }
 0x945   : > { %v22068_v9 = vld [vmem:[%s27673_s7 + $0xb70] ss:$20 sps:$4 sm:$0xff]   ;;  %v22574_v48 = vld [vmem:[%s27673_s7 + $0xcb4] ss:$20 sps:$4 sm:$0xff]  }
 0x947   : > { %21365 = vmatpush3.bf16.msra.mxu1 %v24752_v6 }
 0x948   : > { %21366 = vmatprep.subr.bf16.mxu1 %v27716_v30 }
 0x94b   : > { %21368 = vmatpush3.bf16.msra.mxu1 %v24762_v56 }
 0x94c   : > { %20184 = vmatprep.subr.mxu1 %v27715_v40 }
 0x94e   : > { %20011 = vmatmul.mubr.msk.f32.vlgmr.msra.gmra.mrb[14].mxu1 %vm519_vm1, %v22746_v24  ;;  %v22073_v24 = vld [vmem:[%s27673_s7 + $0xb9c] ss:$20 sps:$4 sm:$0xff]  }
 0x94f   : > { %20186 = vmatprep.mubr.msk.f32.mxu1 %vm22994_vm0, %v27715_v40 }
 0x961   : > { %v25660_v14 = vpop.f32.mrb[40].mxu0 }
 0x962   : > { %v25662_v4 = vpop.f32.mrb[41].mxu0 }
 0x963   : > { %v11544_v52 = vcombine.low %v25660_v14, %v25662_v4  ;;  %v11455_v6 = vpop.f32.mrb[42].mxu0  ;;  %v22617_v14 = vld [vmem:[%s27673_s7 + $0xdd0] ss:$20 sps:$4 sm:$0xff]  }
 0x964   : > { %v11456_v1 = vpop.f32.mrb[43].mxu0  ;;  %v22071_v6 = vld [vmem:[%s27673_s7 + $0xb98] ss:$20 sps:$4 sm:$0xff]  }
 0x965   : > { %v22076_v1 = vld [vmem:[%s27673_s7 + $0xbc4] ss:$20 sps:$4 sm:$0xff]  }
 0x981   : > { %v25666_v42 = vpop.f32.mrb[44].mxu0 }
 0x982   : > { %v20332_v56 = vpop.f32.mrb[45].mxu0 }
 0x983   : > { %v11536_v0 = vpop.f32.mrb[46].mxu0  ;;  %v22074_v56 = vld [vmem:[%s27673_s7 + $0xbc0] ss:$20 sps:$4 sm:$0xff]  }
 0x984   : > { %v20333_v29 = vpop.f32.mrb[47].mxu0  ;;  %v22079_v0 = vld [vmem:[%s27673_s7 + $0xbec] ss:$20 sps:$4 sm:$0xff]  }
 0x985   : > { %v22077_v29 = vld [vmem:[%s27673_s7 + $0xbe8] ss:$20 sps:$4 sm:$0xff]  }
 0x98d   : > { %v6959_v53 = vpop.f32.mrb[10].mxu1 }
 0x98e   : > { %v19836_v41 = vpop.f32.mrb[11].mxu1 }
 0x98f   : > { %v22080_v41 = vld [vmem:[%s27673_s7 + $0xc10] ss:$20 sps:$4 sm:$0xff]  }
 0x991   : > { %v7029_v55 = vpop.f32.mrb[12].mxu1 }
 0x992   : > { %v7033_v63 = vmax.f32 %v6959_v53, %v7029_v55  ;;  %v19841_v33 = vpop.f32.mrb[13].mxu1  ;;  %v22082_v53 = vld [vmem:[%s27673_s7 + $0xc14] ss:$20 sps:$4 sm:$0xff]   ;;  %v22085_v55 = vld [vmem:[%s27673_s7 + $0xc3c] ss:$20 sps:$4 sm:$0xff]  }
 0x993   : > { %v22088_v33 = vld [vmem:[%s27673_s7 + $0xc64] ss:$20 sps:$4 sm:$0xff]  }
 0x994   : > { %7034 = vst [vmem:[#allocation4 + $0x8] sm:$0xf] %v7033_v63  ;;  %v22083_v63 = vld [vmem:[%s27673_s7 + $0xc38] ss:$20 sps:$4 sm:$0xff]  }
 0x99b   : > { %v12012_v43 = vld [vmem:[#allocation4 + $0x8] sm:$0x1] }
 0x99c   : > { %v25671_v28 = vpack.c.bf16 %v12012_v43, %v12012_v43  ;;  %v22086_v43 = vld [vmem:[%s27673_s7 + $0xc60] ss:$20 sps:$4 sm:$0xff]  }
 0x99e   : > { %12304 = vmatmul.mubr.bf16.vlgmr.msra.gmra.mrb[52].mxu0 %v25671_v28 }
 0x99f   : > { %20355 = vmatpush3.bf16.msra.mxu0 %v22057_v31  ;;  %20370 = vmatprep.mubr.msk.bf16.mxu0 %vm22994_vm0, %v27715_v40  ;;  %v22091_v31 = vld [vmem:[%s27673_s7 + $0xc84] ss:$20 sps:$4 sm:$0xff]  }
 0x9a0   : > { %20356 = vmatprep.subr.bf16.mxu0 %v27715_v40 }
 0x9a1   : > { %v25680_v44 = vpop.f32.mrb[48].mxu0 }
 0x9a2   : > { %v25682_v16 = vpop.f32.mrb[49].mxu0 }
 0x9a3   : > { %20357 = vmatpush3.bf16.msra.mxu0 %v22058_v58  ;;  %v11972_v12 = vcombine.low %v25680_v44, %v25682_v16  ;;  %v11923_v20 = vpop.f32.mrb[50].mxu0  ;;  %v12439_v58 = vld [vmem:[#allocation4 + $0x9] sm:$0x1]  ;;  %v22625_v44 = vld [vmem:[%s27673_s7 + $0xf08] ss:$20 sps:$4 sm:$0xff]  }
 0x9a4   : > { %v11924_v22 = vpop.f32.mrb[51].mxu0  ;;  %20358 = vmatprep.subr.bf16.mxu0 %v27715_v40  ;;  %v22089_v20 = vld [vmem:[%s27673_s7 + $0xc80] ss:$20 sps:$4 sm:$0xff]  }
 0x9a5   : > { %v22094_v22 = vld [vmem:[%s27673_s7 + $0xcac] ss:$20 sps:$4 sm:$0xff]   ;;  %v22630_v16 = vld [vmem:[%s27673_s7 + $0xf34] ss:$20 sps:$4 sm:$0xff]  }
 0x9a7   : > { %20359 = vmatpush3.bf16.msra.mxu0 %v22059_v45  ;;  %v25766_v45 = vpack.c.bf16 %v12439_v58, %v12439_v58  ;;  %v22120_v58 = vld [vmem:[%s27673_s7 + $0xda8] ss:$20 sps:$4 sm:$0xff]  }
 0x9a8   : > { %20360 = vmatprep.subr.bf16.mxu0 %v27715_v40 }
 0x9ab   : > { %20361 = vmatpush3.bf16.msra.mxu0 %v22060_v46  ;;  %v22092_v46 = vld [vmem:[%s27673_s7 + $0xca8] ss:$20 sps:$4 sm:$0xff]  }
 0x9ac   : > { %20362 = vmatprep.subr.bf16.mxu0 %v27715_v40 }
 0x9af   : > { %20363 = vmatpush3.bf16.msra.mxu0 %v22061_v3  ;;  %v22097_v3 = vld [vmem:[%s27673_s7 + $0xcd4] ss:$20 sps:$4 sm:$0xff]  }
 0x9b0   : > { %20364 = vmatprep.subr.bf16.mxu0 %v27715_v40 }
 0x9b3   : > { %20365 = vmatpush3.bf16.msra.mxu0 %v22062_v49  ;;  %v22095_v49 = vld [vmem:[%s27673_s7 + $0xcd0] ss:$20 sps:$4 sm:$0xff]  }
 0x9b4   : > { %20366 = vmatprep.subr.bf16.mxu0 %v27715_v40 }
 0x9b7   : > { %20367 = vmatpush3.bf16.msra.mxu0 %v22063_v26  ;;  %v22100_v26 = vld [vmem:[%s27673_s7 + $0xcfc] ss:$20 sps:$4 sm:$0xff]  }
 0x9b8   : > { %20368 = vmatprep.subr.bf16.mxu0 %v27715_v40 }
 0x9bb   : > { %20369 = vmatpush3.bf16.msra.mxu0 %v22064_v32  ;;  %v22098_v32 = vld [vmem:[%s27673_s7 + $0xcf8] ss:$20 sps:$4 sm:$0xff]  }
 0x9bc   : > { %12739 = vmatprep.subr.bf16.mxu0 %v22067_v34  ;;  %v22103_v34 = vld [vmem:[%s27673_s7 + $0xd24] ss:$20 sps:$4 sm:$0xff]  }
 0x9be   : > { %20371 = vmatmul.mubr.bf16.vlgmr.msra.gmra.mrb[56].mxu0 %v25671_v28 }
 0x9bf   : > { %12740 = vmatpush1.bf16.msra.mxu0 %v22065_v7  ;;  %12771 = vmatprep.mubr.bf16.mxu0 %v27717_v39  ;;  %v22101_v7 = vld [vmem:[%s27673_s7 + $0xd20] ss:$20 sps:$4 sm:$0xff]  }
 0x9c0   : > { %12741 = vmatprep.subr.bf16.mxu0 %v22070_v54  ;;  %v22106_v54 = vld [vmem:[%s27673_s7 + $0xd4c] ss:$20 sps:$4 sm:$0xff]  }
 0x9c3   : > { %12742 = vmatpush1.bf16.msra.mxu0 %v22068_v9  ;;  %v22104_v9 = vld [vmem:[%s27673_s7 + $0xd48] ss:$20 sps:$4 sm:$0xff]  }
 0x9c4   : > { %12743 = vmatprep.subr.bf16.mxu0 %v22073_v24  ;;  %v22109_v24 = vld [vmem:[%s27673_s7 + $0xd74] ss:$20 sps:$4 sm:$0xff]  }
 0x9c7   : > { %12744 = vmatpush1.bf16.msra.mxu0 %v22071_v6  ;;  %v22107_v6 = vld [vmem:[%s27673_s7 + $0xd70] ss:$20 sps:$4 sm:$0xff]  }
 0x9c8   : > { %12745 = vmatprep.subr.bf16.mxu0 %v22076_v1  ;;  %v22112_v1 = vld [vmem:[%s27673_s7 + $0xd9c] ss:$20 sps:$4 sm:$0xff]  }
 0x9cb   : > { %12746 = vmatpush1.bf16.msra.mxu0 %v22074_v56  ;;  %v22110_v56 = vld [vmem:[%s27673_s7 + $0xd98] ss:$20 sps:$4 sm:$0xff]  }
 0x9cc   : > { %12747 = vmatprep.subr.bf16.mxu0 %v22079_v0  ;;  %v12866_v0 = vld [vmem:[#allocation4 + $0xa] sm:$0x1] }
 0x9cf   : > { %12748 = vmatpush1.bf16.msra.mxu0 %v22077_v29  ;;  %v22113_v29 = vld [vmem:[%s27673_s7 + $0xc90] ss:$20 sps:$4 sm:$0xff]  }
 0x9d0   : > { %12749 = vmatprep.subr.bf16.mxu0 %v22082_v53  ;;  %v25815_v53 = vpack.c.bf16 %v12866_v0, %v12866_v0  ;;  %v22135_v0 = vld [vmem:[%s27673_s7 + $0x4] ss:$20 sps:$4 sm:$0xff]  }
 0x9d3   : > { %12750 = vmatpush1.bf16.msra.mxu0 %v22080_v41  ;;  %v22114_v41 = vld [vmem:[%s27673_s7 + $0xcb8] ss:$20 sps:$4 sm:$0xff]  }
 0x9d4   : > { %12751 = vmatprep.subr.bf16.mxu0 %v22085_v55  ;;  %v22115_v55 = vld [vmem:[%s27673_s7 + $0xce0] ss:$20 sps:$4 sm:$0xff]  }
 0x9d7   : > { %12752 = vmatpush1.bf16.msra.mxu0 %v22083_v63  ;;  %v22116_v63 = vld [vmem:[%s27673_s7 + $0xd08] ss:$20 sps:$4 sm:$0xff]  }
 0x9d8   : > { %12753 = vmatprep.subr.bf16.mxu0 %v22088_v33  ;;  %v22117_v33 = vld [vmem:[%s27673_s7 + $0xd30] ss:$20 sps:$4 sm:$0xff]  }
 0x9db   : > { %12754 = vmatpush1.bf16.msra.mxu0 %v22086_v43  ;;  %v22118_v43 = vld [vmem:[%s27673_s7 + $0xd58] ss:$20 sps:$4 sm:$0xff]  }
 0x9dc   : > { %13125 = vmatprep.subr.bf16.mxu0 %v22091_v31  ;;  %v22119_v31 = vld [vmem:[%s27673_s7 + $0xd80] ss:$20 sps:$4 sm:$0xff]  }
 0x9de   : > { %12772 = vmatmul.mubr.bf16.vlgmr.msra.gmra.mrb[60].mxu0 %v25766_v45 }
 0x9df   : > { %13126 = vmatpush1.bf16.msra.mxu0 %v22089_v20  ;;  %13157 = vmatprep.mubr.bf16.mxu0 %v27717_v39  ;;  %v22123_v20 = vld [vmem:[%s27673_s7 + $0xdcc] ss:$20 sps:$4 sm:$0xff]  }
 0x9e0   : > { %13127 = vmatprep.subr.bf16.mxu0 %v22094_v22  ;;  %v22121_v22 = vld [vmem:[%s27673_s7 + $0xdc8] ss:$20 sps:$4 sm:$0xff]  }
 0x9e3   : > { %13128 = vmatpush1.bf16.msra.mxu0 %v22092_v46  ;;  %v22126_v46 = vld [vmem:[%s27673_s7 + $0xdf4] ss:$20 sps:$4 sm:$0xff]  }
 0x9e4   : > { %13129 = vmatprep.subr.bf16.mxu0 %v22097_v3  ;;  %v21608_v3 = vadd.f32 %v25422_v10, %v25307_v60  ;;  %v22127_v60 = vld [vmem:[%s27673_s7 + $0xe18] ss:$20 sps:$4 sm:$0xff]  }
 0x9e6   : > { %vm8446_vm1 = vcmp.ge.f32.partialorder %v21608_v3, 0.0 }
 0x9e7   : > { %13130 = vmatpush1.bf16.msra.mxu0 %v22095_v49  ;;  %v22124_v49 = vld [vmem:[%s27673_s7 + $0xdf0] ss:$20 sps:$4 sm:$0xff]  }
 0x9e8   : > { %13131 = vmatprep.subr.bf16.mxu0 %v22100_v26  ;;  %v22129_v26 = vld [vmem:[%s27673_s7 + $0xe1c] ss:$20 sps:$4 sm:$0xff]  }
 0x9eb   : > { %13132 = vmatpush1.bf16.msra.mxu0 %v22098_v32 }
 0x9ec   : > { %13133 = vmatprep.subr.bf16.mxu0 %v22103_v34  ;;  %v8447_v34 = vmul.f32 0.01, %v21608_v3 }
 0x9ef   : > { %13134 = vmatpush1.bf16.msra.mxu0 %v22101_v7 }
 0x9f0   : > { %13135 = vmatprep.subr.bf16.mxu0 %v22106_v54 }
 0x9f3   : > { %13136 = vmatpush1.bf16.msra.mxu0 %v22104_v9 }
 0x9f4   : > { %13137 = vmatprep.subr.bf16.mxu0 %v22109_v24  ;;  %v22132_v24 = vld [vmem:[%s27673_s7 + $0xe44] ss:$20 sps:$4 sm:$0xff]  }
 0x9f7   : > { %13138 = vmatpush1.bf16.msra.mxu0 %v22107_v6  ;;  %v8448_v6 = vsel %vm8446_vm1, %v21608_v3, %v8447_v34  ;;  %v22151_v3 = vld [vmem:[%s27673_s7 + $0x78] ss:$20 sps:$4 sm:$0xff]   ;;  %v22157_v34 = vld [vmem:[%s27673_s7 + $0xa0] ss:$20 sps:$4 sm:$0xff]  }
 0x9f8   : > { %13139 = vmatprep.subr.bf16.mxu0 %v22112_v1 }
 0x9fb   : > { %13140 = vmatpush1.bf16.msra.mxu0 %v22110_v56 }
 0x9fc   : > { %20394 = vmatprep.subr.bf16.mxu0 %v27715_v40 }
 0x9fe   : > { %13158 = vmatmul.mubr.bf16.vlgmr.msra.gmra.mrb[64].mxu0 %v25815_v53 }
 0x9ff   : > { %20395 = vmatpush3.bf16.msra.mxu0 %v22113_v29  ;;  %20410 = vmatprep.mubr.msk.bf16.mxu0 %vm22994_vm0, %v27715_v40  ;;  %v22138_v29 = vld [vmem:[%s27673_s7 + $0xe6c] ss:$20 sps:$4 sm:$0xff]  }
 0xa00   : > { %20396 = vmatprep.subr.bf16.mxu0 %v27715_v40 }
 0xa03   : > { %20397 = vmatpush3.bf16.msra.mxu0 %v22114_v41  ;;  %v22133_v41 = vld [vmem:[%s27673_s7] ss:$20 sps:$4 sm:$0xff]  }
 0xa04   : > { %20398 = vmatprep.subr.bf16.mxu0 %v27715_v40 }
 0xa07   : > { %20399 = vmatpush3.bf16.msra.mxu0 %v22115_v55  ;;  %v22136_v55 = vld [vmem:[%s27673_s7 + $0xe68] ss:$20 sps:$4 sm:$0xff]  }
 0xa08   : > { %20400 = vmatprep.subr.bf16.mxu0 %v27715_v40 }
 0xa0b   : > { %20401 = vmatpush3.bf16.msra.mxu0 %v22116_v63  ;;  %v22144_v63 = vld [vmem:[%s27673_s7 + $0xe94] ss:$20 sps:$4 sm:$0xff]  }
 0xa0c   : > { %20402 = vmatprep.subr.bf16.mxu0 %v27715_v40 }
 0xa0f   : > { %20403 = vmatpush3.bf16.msra.mxu0 %v22117_v33  ;;  %v22139_v33 = vld [vmem:[%s27673_s7 + $0x28] ss:$20 sps:$4 sm:$0xff]  }
 0xa10   : > { %20404 = vmatprep.subr.bf16.mxu0 %v27715_v40 }
 0xa13   : > { %20405 = vmatpush3.bf16.msra.mxu0 %v22118_v43  ;;  %v22142_v43 = vld [vmem:[%s27673_s7 + $0xe90] ss:$20 sps:$4 sm:$0xff]  }
 0xa14   : > { %20406 = vmatprep.subr.bf16.mxu0 %v27715_v40 }
 0xa17   : > { %20407 = vmatpush3.bf16.msra.mxu0 %v22119_v31  ;;  %v22147_v31 = vld [vmem:[%s27673_s7 + $0x54] ss:$20 sps:$4 sm:$0xff]  }
 0xa18   : > { %20408 = vmatprep.subr.bf16.mxu0 %v27715_v40 }
 0xa1b   : > { %20409 = vmatpush3.bf16.msra.mxu0 %v22120_v58  ;;  %v22145_v58 = vld [vmem:[%s27673_s7 + $0x50] ss:$20 sps:$4 sm:$0xff]  }
 0xa1c   : > { %13593 = vmatprep.subr.bf16.mxu0 %v22123_v20  ;;  %v22148_v20 = vld [vmem:[%s27673_s7 + $0xeb8] ss:$20 sps:$4 sm:$0xff]  }
 0xa1e   : > { %20411 = vmatmul.mubr.bf16.vlgmr.msra.gmra.mrb[68].mxu0 %v25815_v53 }
 0xa1f   : > { %13594 = vmatpush1.bf16.msra.mxu0 %v22121_v22  ;;  %13625 = vmatprep.mubr.bf16.mxu0 %v27717_v39  ;;  %v22153_v22 = vld [vmem:[%s27673_s7 + $0x7c] ss:$20 sps:$4 sm:$0xff]  }
 0xa20   : > { %13595 = vmatprep.subr.bf16.mxu0 %v22126_v46  ;;  %v22156_v46 = vld [vmem:[%s27673_s7 + $0xee4] ss:$20 sps:$4 sm:$0xff]  }
 0xa21   : > { %v7786_v32 = vpop.f32.mrb[14].mxu1 }
 0xa22   : > { %v21607_v7 = vadd.f32 %v25422_v10, %v7786_v32  ;;  %v20012_v54 = vpop.f32.mrb[15].mxu1  ;;  %v22130_v10 = vld [vmem:[%s27673_s7 + $0xe40] ss:$20 sps:$4 sm:$0xff]   ;;  %v13293_v32 = vld [vmem:[#allocation4 + $0xb] sm:$0x1] }
 0xa23   : > { %13596 = vmatpush1.bf16.msra.mxu0 %v22124_v49  ;;  %v22154_v49 = vld [vmem:[%s27673_s7 + $0xee0] ss:$20 sps:$4 sm:$0xff]  }
 0xa24   : > { %vm7791_vm14 = vcmp.ge.f32.partialorder %v21607_v7, 0.0  ;;  %v7792_v9 = vmul.f32 0.01, %v21607_v7  ;;  %13597 = vmatprep.subr.bf16.mxu0 %v22129_v26  ;;  %v22159_v26 = vld [vmem:[%s27673_s7 + $0xa4] ss:$20 sps:$4 sm:$0xff]  }
 0xa25   : > { %v22162_v54 = vld [vmem:[%s27673_s7 + $0xcc] ss:$20 sps:$4 sm:$0xff]  }
 0xa26   : > { %v7793_v1 = vsel %vm7791_vm14, %v21607_v7, %v7792_v9  ;;  %v25942_v7 = vpack.c.bf16 %v13293_v32, %v13293_v32  ;;  %v22165_v9 = vld [vmem:[%s27673_s7 + $0xf4] ss:$20 sps:$4 sm:$0xff]   ;;  %v22262_v32 = vld [vmem:[%s27673_s7 + $0xf04] ss:$20 sps:$4 sm:$0xff]  }
 0xa27   : > { %v8449_v56 = vmax.f32 %v7793_v1, %v8448_v6  ;;  %13598 = vmatpush1.bf16.msra.mxu0 %v22127_v60  ;;  %v22160_v60 = vld [vmem:[%s27673_s7 + $0xc8] ss:$20 sps:$4 sm:$0xff]   ;;  %v22166_v1 = vld [vmem:[%s27673_s7 + $0x118] ss:$20 sps:$4 sm:$0xff]  }
 0xa28   : > { %13599 = vmatprep.subr.bf16.mxu0 %v22132_v24  ;;  %v22163_v24 = vld [vmem:[%s27673_s7 + $0xf0] ss:$20 sps:$4 sm:$0xff]  }
 0xa29   : > { %20185 = vmatpush3.msk.msra.mxu1 %vm3766_vm8, %v8449_v56  ;;  %v22168_v6 = vld [vmem:[%s27673_s7 + $0x11c] ss:$20 sps:$4 sm:$0xff]  }
 0xa2a   : > { %20187 = vmatmul.mubr.msk.f32.vlgmr.msra.gmra.mrb[16].mxu1 %vm3762_vm9, %v23369_v18  ;;  %20189 = vmatprep.subr.mxu1 %v27715_v40  ;;  %v22141_v18 = vld [vmem:[%s27673_s7 + $0x2c] ss:$20 sps:$4 sm:$0xff]  }
 0xa2b   : > { %20190 = vmatpush3.msk.msra.mxu1 %vm3766_vm8, %v8449_v56  ;;  %13600 = vmatpush1.bf16.msra.mxu0 %v22130_v10  ;;  %v22171_v56 = vld [vmem:[%s27673_s7 + $0xc] ss:$20 sps:$4 sm:$0xff]   ;;  %v8597_v10 = vld [vmem:[#allocation4] sm:$0x1] }
 0xa2c   : > { %20191 = vmatprep.mubr.msk.f32.mxu1 %vm22994_vm0, %v27715_v40  ;;  %8855 = vmatprep.subr.bf16.mxu1 %v22135_v0  ;;  %v22169_v0 = vld [vmem:[%s27673_s7 + $0x8] ss:$20 sps:$4 sm:$0xff]  }
 0xa2d   : > { %13601 = vmatprep.subr.bf16.mxu0 %v22138_v29  ;;  %v25970_v29 = vpack.c.bf16 %v8597_v10, %v8597_v10  ;;  %v22195_v10 = vld [vmem:[%s27673_s7 + $0x60] ss:$20 sps:$4 sm:$0xff]  }
 0xa2e   : > { %20192 = vmatmul.mubr.msk.f32.vlgmr.msra.gmra.mrb[18].mxu1 %vm3762_vm9, %v23360_v15  ;;  %v22150_v15 = vld [vmem:[%s27673_s7 + $0xebc] ss:$20 sps:$4 sm:$0xff]  }
 0xa2f   : > { %8856 = vmatpush1.bf16.msra.mxu1 %v22133_v41  ;;  %13602 = vmatpush1.bf16.msra.mxu0 %v22136_v55  ;;  %v22174_v41 = vld [vmem:[%s27673_s7 + $0x34] ss:$20 sps:$4 sm:$0xff]   ;;  %v22172_v55 = vld [vmem:[%s27673_s7 + $0x30] ss:$20 sps:$4 sm:$0xff]  }
 0xa30   : > { %8857 = vmatprep.subr.bf16.mxu1 %v22141_v18  ;;  %13603 = vmatprep.subr.bf16.mxu0 %v22144_v63  ;;  %v22177_v18 = vld [vmem:[%s27673_s7 + $0x5c] ss:$20 sps:$4 sm:$0xff]   ;;  %v22175_v63 = vld [vmem:[%s27673_s7 + $0x58] ss:$20 sps:$4 sm:$0xff]  }
 0xa31   : > { %8887 = vmatprep.mubr.bf16.mxu1 %v27717_v39 }
 0xa33   : > { %8858 = vmatpush1.bf16.msra.mxu1 %v22139_v33  ;;  %13604 = vmatpush1.bf16.msra.mxu0 %v22142_v43  ;;  %v22180_v33 = vld [vmem:[%s27673_s7 + $0x84] ss:$20 sps:$4 sm:$0xff]   ;;  %v22178_v43 = vld [vmem:[%s27673_s7 + $0x80] ss:$20 sps:$4 sm:$0xff]  }
 0xa34   : > { %8859 = vmatprep.subr.bf16.mxu1 %v22147_v31  ;;  %13605 = vmatprep.subr.bf16.mxu0 %v22150_v15  ;;  %v22183_v31 = vld [vmem:[%s27673_s7 + $0xac] ss:$20 sps:$4 sm:$0xff]   ;;  %v22181_v15 = vld [vmem:[%s27673_s7 + $0xa8] ss:$20 sps:$4 sm:$0xff]  }
 0xa37   : > { %8860 = vmatpush1.bf16.msra.mxu1 %v22145_v58  ;;  %13606 = vmatpush1.bf16.msra.mxu0 %v22148_v20  ;;  %v22186_v58 = vld [vmem:[%s27673_s7 + $0xd4] ss:$20 sps:$4 sm:$0xff]   ;;  %v22184_v20 = vld [vmem:[%s27673_s7 + $0xd0] ss:$20 sps:$4 sm:$0xff]  }
 0xa38   : > { %8861 = vmatprep.subr.bf16.mxu1 %v22153_v22  ;;  %13607 = vmatprep.subr.bf16.mxu0 %v22156_v46  ;;  %v22189_v22 = vld [vmem:[%s27673_s7 + $0xfc] ss:$20 sps:$4 sm:$0xff]   ;;  %v22187_v46 = vld [vmem:[%s27673_s7 + $0xf8] ss:$20 sps:$4 sm:$0xff]  }
 0xa3b   : > { %8862 = vmatpush1.bf16.msra.mxu1 %v22151_v3  ;;  %13608 = vmatpush1.bf16.msra.mxu0 %v22154_v49  ;;  %v22192_v3 = vld [vmem:[%s27673_s7 + $0x124] ss:$20 sps:$4 sm:$0xff]   ;;  %v22190_v49 = vld [vmem:[%s27673_s7 + $0x120] ss:$20 sps:$4 sm:$0xff]  }
 0xa3c   : > { %8863 = vmatprep.subr.bf16.mxu1 %v22159_v26  ;;  %v22193_v26 = vld [vmem:[%s27673_s7 + $0x10] ss:$20 sps:$4 sm:$0xff]   ;;  %13979 = vmatprep.subr.bf16.mxu0 %v22262_v32 }
 0xa3d   : > { %v22203_v32 = vld [vmem:[%s27673_s7 + $0x144] ss:$20 sps:$4 sm:$0xff]  }
 0xa3e   : > { %13626 = vmatmul.mubr.bf16.vlgmr.msra.gmra.mrb[72].mxu0 %v25942_v7 }
 0xa3f   : > { %8864 = vmatpush1.bf16.msra.mxu1 %v22157_v34  ;;  %14011 = vmatprep.mubr.bf16.mxu0 %v27717_v39  ;;  %v22260_v34 = vld [vmem:[%s27673_s7 + $0xf00] ss:$20 sps:$4 sm:$0xff]  }
 0xa40   : > { %8865 = vmatprep.subr.bf16.mxu1 %v22162_v54  ;;  %v22194_v54 = vld [vmem:[%s27673_s7 + $0x38] ss:$20 sps:$4 sm:$0xff]   ;;  %13980 = vmatpush1.bf16.msra.mxu0 %v22260_v34 }
 0xa41   : > { %v22302_v34 = vld [vmem:[%s27673_s7 + $0x1018] ss:$20 sps:$4 sm:$0xff]  }
 0xa43   : > { %8866 = vmatpush1.bf16.msra.mxu1 %v22160_v60  ;;  %v22268_v60 = vld [vmem:[%s27673_s7 + $0xf2c] ss:$20 sps:$4 sm:$0xff]  }
 0xa44   : > { %8867 = vmatprep.subr.bf16.mxu1 %v22165_v9  ;;  %13981 = vmatprep.subr.bf16.mxu0 %v22268_v60  ;;  %v22201_v60 = vld [vmem:[%s27673_s7 + $0x140] ss:$20 sps:$4 sm:$0xff]  }
 0xa47   : > { %8868 = vmatpush1.bf16.msra.mxu1 %v22163_v24  ;;  %v22266_v24 = vld [vmem:[%s27673_s7 + $0xf28] ss:$20 sps:$4 sm:$0xff]  }
 0xa48   : > { %8869 = vmatprep.subr.bf16.mxu1 %v22168_v6  ;;  %13982 = vmatpush1.bf16.msra.mxu0 %v22266_v24  ;;  %v22206_v24 = vld [vmem:[%s27673_s7 + $0x16c] ss:$20 sps:$4 sm:$0xff]  }
 0xa4b   : > { %8870 = vmatpush1.bf16.msra.mxu1 %v22166_v1 }
 0xa4c   : > { %8896 = vmatprep.subr.bf16.mxu1 %v22171_v56 }
 0xa4e   : > { %8888 = vmatmul.mubr.bf16.vlgmr.msra.gmra.mrb[20].mxu1 %v25970_v29 }
 0xa4f   : > { %8897 = vmatpush1.bf16.msra.mxu1 %v22169_v0  ;;  %8928 = vmatprep.mubr.bf16.mxu1 %v27717_v39 }
 0xa50   : > { %8898 = vmatprep.subr.bf16.mxu1 %v22174_v41  ;;  %v22272_v41 = vld [vmem:[%s27673_s7 + $0xf50] ss:$20 sps:$4 sm:$0xff]  }
 0xa53   : > { %8899 = vmatpush1.bf16.msra.mxu1 %v22172_v55  ;;  %v22274_v55 = vld [vmem:[%s27673_s7 + $0xf54] ss:$20 sps:$4 sm:$0xff]  }
 0xa54   : > { %8900 = vmatprep.subr.bf16.mxu1 %v22177_v18  ;;  %v22196_v18 = vld [vmem:[%s27673_s7 + $0x88] ss:$20 sps:$4 sm:$0xff]   ;;  %13983 = vmatprep.subr.bf16.mxu0 %v22274_v55 }
 0xa55   : > { %13984 = vmatpush1.bf16.msra.mxu0 %v22272_v41 }
 0xa57   : > { %8901 = vmatpush1.bf16.msra.mxu1 %v22175_v63  ;;  %v22278_v63 = vld [vmem:[%s27673_s7 + $0xf78] ss:$20 sps:$4 sm:$0xff]  }
 0xa58   : > { %8902 = vmatprep.subr.bf16.mxu1 %v22180_v33  ;;  %v22280_v33 = vld [vmem:[%s27673_s7 + $0xf7c] ss:$20 sps:$4 sm:$0xff]  }
 0xa59   : > { %13985 = vmatprep.subr.bf16.mxu0 %v22280_v33  ;;  %v22210_v33 = vld [vmem:[%s27673_s7 + $0x1b8] ss:$20 sps:$4 sm:$0xff]  }
 0xa5a   : > { %13986 = vmatpush1.bf16.msra.mxu0 %v22278_v63  ;;  %v22212_v63 = vld [vmem:[%s27673_s7 + $0x1bc] ss:$20 sps:$4 sm:$0xff]  }
 0xa5b   : > { %8903 = vmatpush1.bf16.msra.mxu1 %v22178_v43  ;;  %v22197_v43 = vld [vmem:[%s27673_s7 + $0xb0] ss:$20 sps:$4 sm:$0xff]  }
 0xa5c   : > { %8904 = vmatprep.subr.bf16.mxu1 %v22183_v31  ;;  %v22284_v31 = vld [vmem:[%s27673_s7 + $0xfa0] ss:$20 sps:$4 sm:$0xff]  }
 0xa5f   : > { %8905 = vmatpush1.bf16.msra.mxu1 %v22181_v15  ;;  %v22286_v15 = vld [vmem:[%s27673_s7 + $0xfa4] ss:$20 sps:$4 sm:$0xff]  }
 0xa60   : > { %8906 = vmatprep.subr.bf16.mxu1 %v22186_v58  ;;  %13987 = vmatprep.subr.bf16.mxu0 %v22286_v15  ;;  %v22198_v58 = vld [vmem:[%s27673_s7 + $0xd8] ss:$20 sps:$4 sm:$0xff]  }
 0xa61   : > { %13988 = vmatpush1.bf16.msra.mxu0 %v22284_v31  ;;  %v22213_v31 = vld [vmem:[%s27673_s7 + $0x1e0] ss:$20 sps:$4 sm:$0xff]  }
 0xa62   : > { %v22218_v15 = vld [vmem:[%s27673_s7 + $0x20c] ss:$20 sps:$4 sm:$0xff]  }
 0xa63   : > { %8907 = vmatpush1.bf16.msra.mxu1 %v22184_v20  ;;  %v22292_v20 = vld [vmem:[%s27673_s7 + $0xfcc] ss:$20 sps:$4 sm:$0xff]  }
 0xa64   : > { %8908 = vmatprep.subr.bf16.mxu1 %v22189_v22  ;;  %v22290_v22 = vld [vmem:[%s27673_s7 + $0xfc8] ss:$20 sps:$4 sm:$0xff]   ;;  %13989 = vmatprep.subr.bf16.mxu0 %v22292_v20 }
 0xa65   : > { %13990 = vmatpush1.bf16.msra.mxu0 %v22290_v22  ;;  %v22221_v20 = vld [vmem:[%s27673_s7 + $0x234] ss:$20 sps:$4 sm:$0xff]   ;;  %v22219_v22 = vld [vmem:[%s27673_s7 + $0x230] ss:$20 sps:$4 sm:$0xff]  }
 0xa67   : > { %8909 = vmatpush1.bf16.msra.mxu1 %v22187_v46  ;;  %v22199_v46 = vld [vmem:[%s27673_s7 + $0x100] ss:$20 sps:$4 sm:$0xff]  }
 0xa68   : > { %8910 = vmatprep.subr.bf16.mxu1 %v22192_v3  ;;  %v22296_v3 = vld [vmem:[%s27673_s7 + $0xff0] ss:$20 sps:$4 sm:$0xff]  }
 0xa6b   : > { %8911 = vmatpush1.bf16.msra.mxu1 %v22190_v49  ;;  %v22298_v49 = vld [vmem:[%s27673_s7 + $0xff4] ss:$20 sps:$4 sm:$0xff]  }
 0xa6c   : > { %20194 = vmatprep.subr.bf16.mxu1 %v27715_v40  ;;  %13991 = vmatprep.subr.bf16.mxu0 %v22298_v49  ;;  %v22225_v49 = vld [vmem:[%s27673_s7 + $0x150] ss:$20 sps:$4 sm:$0xff]  }
 0xa6d   : > { %13992 = vmatpush1.bf16.msra.mxu0 %v22296_v3  ;;  %v22222_v3 = vld [vmem:[%s27673_s7 + $0x258] ss:$20 sps:$4 sm:$0xff]  }
 0xa6e   : > { %8929 = vmatmul.mubr.bf16.vlgmr.msra.gmra.mrb[24].mxu1 %v25970_v29 }
 0xa6f   : > { %20195 = vmatpush3.bf16.msra.mxu1 %v22193_v26  ;;  %20210 = vmatprep.mubr.msk.bf16.mxu1 %vm22994_vm0, %v27715_v40  ;;  %v22200_v26 = vld [vmem:[%s27673_s7 + $0x128] ss:$20 sps:$4 sm:$0xff]  }
 0xa70   : > { %20196 = vmatprep.subr.bf16.mxu1 %v27715_v40 }
 0xa71   : > { %v26036_v9 = vpop.f32.mrb[52].mxu0 }
 0xa72   : > { %v26041_v6 = vpop.f32.mrb[53].mxu0 }
 0xa73   : > { %20197 = vmatpush3.bf16.msra.mxu1 %v22194_v54  ;;  %v12398_v1 = vcombine.low %v26036_v9, %v26041_v6  ;;  %v12309_v56 = vpop.f32.mrb[54].mxu0  ;;  %v22304_v54 = vld [vmem:[%s27673_s7 + $0x101c] ss:$20 sps:$4 sm:$0xff]  }
 0xa74   : > { %20198 = vmatprep.subr.bf16.mxu1 %v27715_v40  ;;  %v12310_v0 = vpop.f32.mrb[55].mxu0  ;;  %13993 = vmatprep.subr.bf16.mxu0 %v22304_v54  ;;  %v22204_v56 = vld [vmem:[%s27673_s7 + $0x168] ss:$20 sps:$4 sm:$0xff]   ;;  %v22673_v9 = vld [vmem:[%s27673_s7 + $0x1050] ss:$20 sps:$4 sm:$0xff]  }
 0xa75   : > { %13994 = vmatpush1.bf16.msra.mxu0 %v22302_v34 }
 0xa76   : > { %20434 = vmatprep.subr.bf16.mxu0 %v27715_v40 }
 0xa77   : > { %20199 = vmatpush3.bf16.msra.mxu1 %v22195_v10  ;;  %v22209_v10 = vld [vmem:[%s27673_s7 + $0x194] ss:$20 sps:$4 sm:$0xff]  }
 0xa78   : > { %20200 = vmatprep.subr.bf16.mxu1 %v27715_v40 }
 0xa7b   : > { %20201 = vmatpush3.bf16.msra.mxu1 %v22196_v18 }
 0xa7c   : > { %20202 = vmatprep.subr.bf16.mxu1 %v27715_v40 }
 0xa7f   : > { %20203 = vmatpush3.bf16.msra.mxu1 %v22197_v43  ;;  %v22215_v43 = vld [vmem:[%s27673_s7 + $0x1e4] ss:$20 sps:$4 sm:$0xff]  }
 0xa80   : > { %20204 = vmatprep.subr.bf16.mxu1 %v27715_v40 }
 0xa83   : > { %20205 = vmatpush3.bf16.msra.mxu1 %v22198_v58  ;;  %v22216_v58 = vld [vmem:[%s27673_s7 + $0x208] ss:$20 sps:$4 sm:$0xff]  }
 0xa84   : > { %20206 = vmatprep.subr.bf16.mxu1 %v27715_v40 }
 0xa87   : > { %20207 = vmatpush3.bf16.msra.mxu1 %v22199_v46  ;;  %v22224_v46 = vld [vmem:[%s27673_s7 + $0x25c] ss:$20 sps:$4 sm:$0xff]  }
 0xa88   : > { %20208 = vmatprep.subr.bf16.mxu1 %v27715_v40 }
 0xa8b   : > { %20209 = vmatpush3.bf16.msra.mxu1 %v22200_v26  ;;  %v22226_v26 = vld [vmem:[%s27673_s7 + $0x178] ss:$20 sps:$4 sm:$0xff]  }
 0xa8c   : > { %9282 = vmatprep.subr.bf16.mxu1 %v22203_v32 }
 0xa8e   : > { %20211 = vmatmul.mubr.bf16.vlgmr.msra.gmra.mrb[28].mxu1 %v25970_v29  ;;  %v22207_v29 = vld [vmem:[%s27673_s7 + $0x190] ss:$20 sps:$4 sm:$0xff]  }
 0xa8f   : > { %9283 = vmatpush1.bf16.msra.mxu1 %v22201_v60  ;;  %9314 = vmatprep.mubr.bf16.mxu1 %v27717_v39 }
 0xa90   : > { %9284 = vmatprep.subr.bf16.mxu1 %v22206_v24  ;;  %v22227_v24 = vld [vmem:[%s27673_s7 + $0x1a0] ss:$20 sps:$4 sm:$0xff]  }
 0xa91   : > { %v26123_v0 = vpop.f32.mrb[56].mxu0 }
 0xa92   : > { %v20372_v41 = vpop.f32.mrb[57].mxu0 }
 0xa93   : > { %9285 = vmatpush1.bf16.msra.mxu1 %v22204_v56  ;;  %v12390_v55 = vpop.f32.mrb[58].mxu0  ;;  %v22229_v41 = vld [vmem:[%s27673_s7 + $0x1f0] ss:$20 sps:$4 sm:$0xff]  }
 0xa94   : > { %v20373_v18 = vpop.f32.mrb[59].mxu0  ;;  %9286 = vmatprep.subr.bf16.mxu1 %v22209_v10  ;;  %v22228_v10 = vld [vmem:[%s27673_s7 + $0x1c8] ss:$20 sps:$4 sm:$0xff]   ;;  %v22230_v55 = vld [vmem:[%s27673_s7 + $0x218] ss:$20 sps:$4 sm:$0xff]  }
 0xa95   : > { %v22232_v18 = vld [vmem:[%s27673_s7 + $0x268] ss:$20 sps:$4 sm:$0xff]  }
 0xa97   : > { %9287 = vmatpush1.bf16.msra.mxu1 %v22207_v29  ;;  %v22231_v29 = vld [vmem:[%s27673_s7 + $0x240] ss:$20 sps:$4 sm:$0xff]  }
 0xa98   : > { %9288 = vmatprep.subr.bf16.mxu1 %v22212_v63  ;;  %v22235_v63 = vld [vmem:[%s27673_s7 + $0x28c] ss:$20 sps:$4 sm:$0xff]  }
 0xa9b   : > { %9289 = vmatpush1.bf16.msra.mxu1 %v22210_v33  ;;  %v22233_v33 = vld [vmem:[%s27673_s7 + $0x288] ss:$20 sps:$4 sm:$0xff]  }
 0xa9c   : > { %9290 = vmatprep.subr.bf16.mxu1 %v22215_v43  ;;  %v22238_v43 = vld [vmem:[%s27673_s7 + $0x2b4] ss:$20 sps:$4 sm:$0xff]  }
 0xa9f   : > { %9291 = vmatpush1.bf16.msra.mxu1 %v22213_v31  ;;  %v22236_v31 = vld [vmem:[%s27673_s7 + $0x2b0] ss:$20 sps:$4 sm:$0xff]  }
 0xaa0   : > { %9292 = vmatprep.subr.bf16.mxu1 %v22218_v15  ;;  %v22241_v15 = vld [vmem:[%s27673_s7 + $0x2dc] ss:$20 sps:$4 sm:$0xff]  }
 0xaa3   : > { %9293 = vmatpush1.bf16.msra.mxu1 %v22216_v58 }
 0xaa4   : > { %9294 = vmatprep.subr.bf16.mxu1 %v22221_v20 }
 0xaa7   : > { %9295 = vmatpush1.bf16.msra.mxu1 %v22219_v22 }
 0xaa8   : > { %9296 = vmatprep.subr.bf16.mxu1 %v22224_v46  ;;  %v22239_v46 = vld [vmem:[%s27673_s7 + $0x2d8] ss:$20 sps:$4 sm:$0xff]  }
 0xaab   : > { %9297 = vmatpush1.bf16.msra.mxu1 %v22222_v3 }
 0xaac   : > { %20214 = vmatprep.subr.bf16.mxu1 %v27715_v40 }
 0xaae   : > { %9315 = vmatmul.mubr.bf16.vlgmr.msra.gmra.mrb[32].mxu1 %v25002_v13 }
 0xaaf   : > { %20215 = vmatpush3.bf16.msra.mxu1 %v22225_v49  ;;  %20230 = vmatprep.mubr.msk.bf16.mxu1 %vm22994_vm0, %v27715_v40  ;;  %v22244_v49 = vld [vmem:[%s27673_s7 + $0x304] ss:$20 sps:$4 sm:$0xff]  }
 0xab0   : > { %20216 = vmatprep.subr.bf16.mxu1 %v27715_v40 }
 0xab1   : > { %v26169_v32 = vpop.f32.mrb[60].mxu0 }
 0xab2   : > { %v26171_v34 = vpop.f32.mrb[61].mxu0 }
 0xab3   : > { %20217 = vmatpush3.bf16.msra.mxu1 %v22226_v26  ;;  %v12777_v60 = vpop.f32.mrb[62].mxu0  ;;  %v22242_v26 = vld [vmem:[%s27673_s7 + $0x300] ss:$20 sps:$4 sm:$0xff]  }
 0xab4   : > { %v12778_v56 = vpop.f32.mrb[63].mxu0  ;;  %20218 = vmatprep.subr.bf16.mxu1 %v27715_v40  ;;  %v22247_v60 = vld [vmem:[%s27673_s7 + $0x32c] ss:$20 sps:$4 sm:$0xff]  }
 0xab5   : > { %v22250_v56 = vld [vmem:[%s27673_s7 + $0x354] ss:$20 sps:$4 sm:$0xff]  }
 0xab7   : > { %20219 = vmatpush3.bf16.msra.mxu1 %v22227_v24  ;;  %v22245_v24 = vld [vmem:[%s27673_s7 + $0x328] ss:$20 sps:$4 sm:$0xff]  }
 0xab8   : > { %20220 = vmatprep.subr.bf16.mxu1 %v27715_v40 }
 0xabb   : > { %20221 = vmatpush3.bf16.msra.mxu1 %v22228_v10  ;;  %v22248_v10 = vld [vmem:[%s27673_s7 + $0x350] ss:$20 sps:$4 sm:$0xff]  }
 0xabc   : > { %20222 = vmatprep.subr.bf16.mxu1 %v27715_v40 }
 0xabf   : > { %20223 = vmatpush3.bf16.msra.mxu1 %v22229_v41  ;;  %v22253_v41 = vld [vmem:[%s27673_s7 + $0x37c] ss:$20 sps:$4 sm:$0xff]  }
 0xac0   : > { %20224 = vmatprep.subr.bf16.mxu1 %v27715_v40 }
 0xac3   : > { %20225 = vmatpush3.bf16.msra.mxu1 %v22230_v55  ;;  %v22251_v55 = vld [vmem:[%s27673_s7 + $0x378] ss:$20 sps:$4 sm:$0xff]  }
 0xac4   : > { %20226 = vmatprep.subr.bf16.mxu1 %v27715_v40 }
 0xac7   : > { %20227 = vmatpush3.bf16.msra.mxu1 %v22231_v29  ;;  %v22256_v29 = vld [vmem:[%s27673_s7 + $0x3a4] ss:$20 sps:$4 sm:$0xff]  }
 0xac8   : > { %20228 = vmatprep.subr.bf16.mxu1 %v27715_v40 }
 0xacb   : > { %20229 = vmatpush3.bf16.msra.mxu1 %v22232_v18  ;;  %v22254_v18 = vld [vmem:[%s27673_s7 + $0x3a0] ss:$20 sps:$4 sm:$0xff]  }
 0xacc   : > { %9750 = vmatprep.subr.bf16.mxu1 %v22235_v63  ;;  %v22259_v63 = vld [vmem:[%s27673_s7 + $0x3c4] ss:$20 sps:$4 sm:$0xff]  }
 0xace   : > { %20231 = vmatmul.mubr.bf16.vlgmr.msra.gmra.mrb[36].mxu1 %v25002_v13 }
 0xacf   : > { %9751 = vmatpush1.bf16.msra.mxu1 %v22233_v33  ;;  %9782 = vmatprep.mubr.bf16.mxu1 %v27717_v39  ;;  %v22257_v33 = vld [vmem:[%s27673_s7 + $0x3c0] ss:$20 sps:$4 sm:$0xff]  }
 0xad0   : > { %9752 = vmatprep.subr.bf16.mxu1 %v22238_v43  ;;  %v22265_v43 = vld [vmem:[%s27673_s7 + $0x3ec] ss:$20 sps:$4 sm:$0xff]  }
 0xad1   : > { %v26216_v58 = vpop.f32.mrb[64].mxu0 }
 0xad2   : > { %v26218_v20 = vpop.f32.mrb[65].mxu0 }
 0xad3   : > { %9753 = vmatpush1.bf16.msra.mxu1 %v22236_v31  ;;  %v13163_v22 = vpop.f32.mrb[66].mxu0  ;;  %v22263_v31 = vld [vmem:[%s27673_s7 + $0x3e8] ss:$20 sps:$4 sm:$0xff]  }
 0xad4   : > { %v13164_v3 = vpop.f32.mrb[67].mxu0  ;;  %9754 = vmatprep.subr.bf16.mxu1 %v22241_v15  ;;  %v22271_v15 = vld [vmem:[%s27673_s7 + $0x414] ss:$20 sps:$4 sm:$0xff]  }
 0xad7   : > { %9755 = vmatpush1.bf16.msra.mxu1 %v22239_v46 }
 0xad8   : > { %9756 = vmatprep.subr.bf16.mxu1 %v22244_v49 }
 0xadb   : > { %9757 = vmatpush1.bf16.msra.mxu1 %v22242_v26  ;;  %v22277_v26 = vld [vmem:[%s27673_s7 + $0x43c] ss:$20 sps:$4 sm:$0xff]  }
 0xadc   : > { %9758 = vmatprep.subr.bf16.mxu1 %v22247_v60  ;;  %v22275_v60 = vld [vmem:[%s27673_s7 + $0x438] ss:$20 sps:$4 sm:$0xff]  }
 0xadf   : > { %9759 = vmatpush1.bf16.msra.mxu1 %v22245_v24  ;;  %v22283_v24 = vld [vmem:[%s27673_s7 + $0x464] ss:$20 sps:$4 sm:$0xff]  }
 0xae0   : > { %9760 = vmatprep.subr.bf16.mxu1 %v22250_v56  ;;  %v22281_v56 = vld [vmem:[%s27673_s7 + $0x460] ss:$20 sps:$4 sm:$0xff]  }
 0xae3   : > { %9761 = vmatpush1.bf16.msra.mxu1 %v22248_v10  ;;  %v22289_v10 = vld [vmem:[%s27673_s7 + $0x48c] ss:$20 sps:$4 sm:$0xff]  }
 0xae4   : > { %9762 = vmatprep.subr.bf16.mxu1 %v22253_v41 }
 0xae7   : > { %9763 = vmatpush1.bf16.msra.mxu1 %v22251_v55 }
 0xae8   : > { %9764 = vmatprep.subr.bf16.mxu1 %v22256_v29  ;;  %v22287_v29 = vld [vmem:[%s27673_s7 + $0x488] ss:$20 sps:$4 sm:$0xff]  }
 0xaeb   : > { %9765 = vmatpush1.bf16.msra.mxu1 %v22254_v18  ;;  %v22295_v18 = vld [vmem:[%s27673_s7 + $0x4b4] ss:$20 sps:$4 sm:$0xff]  }
 0xaec   : > { %10136 = vmatprep.subr.bf16.mxu1 %v22259_v63 }
 0xaee   : > { %9783 = vmatmul.mubr.bf16.vlgmr.msra.gmra.mrb[40].mxu1 %v25075_v11  ;;  %v22269_v11 = vld [vmem:[%s27673_s7 + $0x410] ss:$20 sps:$4 sm:$0xff]  }
 0xaef   : > { %10137 = vmatpush1.bf16.msra.mxu1 %v22257_v33  ;;  %10168 = vmatprep.mubr.bf16.mxu1 %v27717_v39 }
 0xaf0   : > { %10138 = vmatprep.subr.bf16.mxu1 %v22265_v43 }
 0xaf1   : > { %v26272_v22 = vpop.f32.mrb[68].mxu0 }
 0xaf2   : > { %v20412_v46 = vpop.f32.mrb[69].mxu0 }
 0xaf3   : > { %10139 = vmatpush1.bf16.msra.mxu1 %v22263_v31  ;;  %v13244_v3 = vpop.f32.mrb[70].mxu0  ;;  %v22293_v31 = vld [vmem:[%s27673_s7 + $0x4b0] ss:$20 sps:$4 sm:$0xff]   ;;  %v22299_v46 = vld [vmem:[%s27673_s7 + $0x4d8] ss:$20 sps:$4 sm:$0xff]  }
 0xaf4   : > { %v20413_v49 = vpop.f32.mrb[71].mxu0  ;;  %10140 = vmatprep.subr.bf16.mxu1 %v22271_v15  ;;  %v22301_v15 = vld [vmem:[%s27673_s7 + $0x4dc] ss:$20 sps:$4 sm:$0xff]  }
 0xaf5   : > { %v22305_v3 = vld [vmem:[%s27673_s7 + $0x3d0] ss:$20 sps:$4 sm:$0xff]  }
 0xaf6   : > { %v22306_v49 = vld [vmem:[%s27673_s7 + $0xf10] ss:$20 sps:$4 sm:$0xff]  }
 0xaf7   : > { %10141 = vmatpush1.bf16.msra.mxu1 %v22269_v11 }
 0xaf8   : > { %10142 = vmatprep.subr.bf16.mxu1 %v22277_v26 }
 0xafb   : > { %10143 = vmatpush1.bf16.msra.mxu1 %v22275_v60  ;;  %v22307_v60 = vld [vmem:[%s27673_s7 + $0x3f8] ss:$20 sps:$4 sm:$0xff]  }
 0xafc   : > { %10144 = vmatprep.subr.bf16.mxu1 %v22283_v24  ;;  %v22308_v24 = vld [vmem:[%s27673_s7 + $0xf38] ss:$20 sps:$4 sm:$0xff]  }
 0xafd   : > { %v8519_v41 = vpop.f32.mrb[16].mxu1 }
 0xafe   : > { %v20188_v55 = vpop.f32.mrb[17].mxu1 }
 0xaff   : > { %10145 = vmatpush1.bf16.msra.mxu1 %v22281_v56 }
 0xb00   : > { %10146 = vmatprep.subr.bf16.mxu1 %v22289_v10 }
 0xb01   : > { %v8589_v63 = vpop.f32.mrb[18].mxu1 }
 0xb02   : > { %v8593_v33 = vmax.f32 %v8519_v41, %v8589_v63  ;;  %v20193_v43 = vpop.f32.mrb[19].mxu1 }
 0xb03   : > { %10147 = vmatpush1.bf16.msra.mxu1 %v22287_v29  ;;  %v22309_v29 = vld [vmem:[%s27673_s7 + $0x420] ss:$20 sps:$4 sm:$0xff]   ;;  %v22312_v43 = vld [vmem:[%s27673_s7 + $0xf88] ss:$20 sps:$4 sm:$0xff]  }
 0xb04   : > { %8594 = vst [vmem:[#allocation4 + $0xc] sm:$0xf] %v8593_v33  ;;  %10148 = vmatprep.subr.bf16.mxu1 %v22295_v18  ;;  %v22310_v18 = vld [vmem:[%s27673_s7 + $0xf60] ss:$20 sps:$4 sm:$0xff]   ;;  %v22311_v33 = vld [vmem:[%s27673_s7 + $0x448] ss:$20 sps:$4 sm:$0xff]  }
 0xb07   : > { %10149 = vmatpush1.bf16.msra.mxu1 %v22293_v31  ;;  %v22313_v31 = vld [vmem:[%s27673_s7 + $0x470] ss:$20 sps:$4 sm:$0xff]  }
 0xb08   : > { %10150 = vmatprep.subr.bf16.mxu1 %v22301_v15  ;;  %v22314_v15 = vld [vmem:[%s27673_s7 + $0xfb0] ss:$20 sps:$4 sm:$0xff]  }
 0xb0b   : > { %10151 = vmatpush1.bf16.msra.mxu1 %v22299_v46  ;;  %v13720_v11 = vld [vmem:[#allocation4 + $0xc] sm:$0x1]  ;;  %v22315_v46 = vld [vmem:[%s27673_s7 + $0x498] ss:$20 sps:$4 sm:$0xff]  }
 0xb0c   : > { %20254 = vmatprep.subr.bf16.mxu1 %v27715_v40  ;;  %v26314_v26 = vpack.c.bf16 %v13720_v11, %v13720_v11 }
 0xb0e   : > { %10169 = vmatmul.mubr.bf16.vlgmr.msra.gmra.mrb[44].mxu1 %v25183_v37  ;;  %14012 = vmatmul.mubr.bf16.vlgmr.msra.gmra.mrb[76].mxu0 %v26314_v26 }
 0xb0f   : > { %20255 = vmatpush3.bf16.msra.mxu1 %v22305_v3  ;;  %20435 = vmatpush3.bf16.msra.mxu0 %v22306_v49  ;;  %v22316_v3 = vld [vmem:[%s27673_s7 + $0xfd8] ss:$20 sps:$4 sm:$0xff]  }
 0xb10   : > { %20256 = vmatprep.subr.bf16.mxu1 %v27715_v40  ;;  %20436 = vmatprep.subr.bf16.mxu0 %v27715_v40 }
 0xb11   : > { %v26326_v56 = vpop.f32.mrb[72].mxu0  ;;  %20270 = vmatprep.mubr.msk.bf16.mxu1 %vm22994_vm0, %v27715_v40  ;;  %20450 = vmatprep.mubr.msk.bf16.mxu0 %vm22994_vm0, %v27715_v40 }
 0xb12   : > { %v26332_v10 = vpop.f32.mrb[73].mxu0 }
 0xb13   : > { %20257 = vmatpush3.bf16.msra.mxu1 %v22307_v60  ;;  %20437 = vmatpush3.bf16.msra.mxu0 %v22308_v24  ;;  %v13631_v55 = vpop.f32.mrb[74].mxu0 }
 0xb14   : > { %v13632_v63 = vpop.f32.mrb[75].mxu0  ;;  %20258 = vmatprep.subr.bf16.mxu1 %v27715_v40  ;;  %20438 = vmatprep.subr.bf16.mxu0 %v27715_v40  ;;  %v22317_v55 = vld [vmem:[%s27673_s7 + $0x4c0] ss:$20 sps:$4 sm:$0xff]  }
 0xb15   : > { %v22319_v63 = vld [vmem:[%s27673_s7 + $0x4e8] ss:$20 sps:$4 sm:$0xff]  }
 0xb17   : > { %20259 = vmatpush3.bf16.msra.mxu1 %v22309_v29  ;;  %20439 = vmatpush3.bf16.msra.mxu0 %v22310_v18  ;;  %v22318_v29 = vld [vmem:[%s27673_s7 + $0x1000] ss:$20 sps:$4 sm:$0xff]  }
 0xb18   : > { %20260 = vmatprep.subr.bf16.mxu1 %v27715_v40  ;;  %20440 = vmatprep.subr.bf16.mxu0 %v27715_v40 }
 0xb1b   : > { %20261 = vmatpush3.bf16.msra.mxu1 %v22311_v33  ;;  %20441 = vmatpush3.bf16.msra.mxu0 %v22312_v43  ;;  %v22320_v33 = vld [vmem:[%s27673_s7 + $0x1028] ss:$20 sps:$4 sm:$0xff]   ;;  %v22323_v43 = vld [vmem:[%s27673_s7 + $0x50c] ss:$20 sps:$4 sm:$0xff]  }
 0xb1c   : > { %20262 = vmatprep.subr.bf16.mxu1 %v27715_v40  ;;  %20442 = vmatprep.subr.bf16.mxu0 %v27715_v40 }
 0xb1f   : > { %20263 = vmatpush3.bf16.msra.mxu1 %v22313_v31  ;;  %20443 = vmatpush3.bf16.msra.mxu0 %v22314_v15  ;;  %v22326_v31 = vld [vmem:[%s27673_s7 + $0x104c] ss:$20 sps:$4 sm:$0xff]   ;;  %v22321_v15 = vld [vmem:[%s27673_s7 + $0x508] ss:$20 sps:$4 sm:$0xff]  }
 0xb20   : > { %20264 = vmatprep.subr.bf16.mxu1 %v27715_v40  ;;  %20444 = vmatprep.subr.bf16.mxu0 %v27715_v40 }
 0xb21   : > { %v26368_v11 = vpop.f32.mrb[20].mxu1 }
 0xb22   : > { %v26370_v49 = vpop.f32.mrb[21].mxu1 }
 0xb23   : > { %v8982_v60 = vcombine.low %v26368_v11, %v26370_v49  ;;  %v8893_v24 = vpop.f32.mrb[22].mxu1  ;;  %20265 = vmatpush3.bf16.msra.mxu1 %v22315_v46  ;;  %20445 = vmatpush3.bf16.msra.mxu0 %v22316_v3  ;;  %v22324_v46 = vld [vmem:[%s27673_s7 + $0x1048] ss:$20 sps:$4 sm:$0xff]   ;;  %v22371_v11 = vld [vmem:[%s27673_s7 + $0x644] ss:$20 sps:$4 sm:$0xff]  }
 0xb24   : > { %v8894_v18 = vpop.f32.mrb[23].mxu1  ;;  %20266 = vmatprep.subr.bf16.mxu1 %v27715_v40  ;;  %20446 = vmatprep.subr.bf16.mxu0 %v27715_v40  ;;  %v22329_v3 = vld [vmem:[%s27673_s7 + $0x534] ss:$20 sps:$4 sm:$0xff]   ;;  %v22374_v49 = vld [vmem:[%s27673_s7 + $0x1184] ss:$20 sps:$4 sm:$0xff]  }
 0xb25   : > { %v22332_v24 = vld [vmem:[%s27673_s7 + $0x1074] ss:$20 sps:$4 sm:$0xff]   ;;  %v22335_v18 = vld [vmem:[%s27673_s7 + $0x55c] ss:$20 sps:$4 sm:$0xff]  }
 0xb27   : > { %20267 = vmatpush3.bf16.msra.mxu1 %v22317_v55  ;;  %20447 = vmatpush3.bf16.msra.mxu0 %v22318_v29  ;;  %v22327_v55 = vld [vmem:[%s27673_s7 + $0x530] ss:$20 sps:$4 sm:$0xff]  }
 0xb28   : > { %20268 = vmatprep.subr.bf16.mxu1 %v27715_v40  ;;  %20448 = vmatprep.subr.bf16.mxu0 %v27715_v40  ;;  %v22330_v29 = vld [vmem:[%s27673_s7 + $0x1070] ss:$20 sps:$4 sm:$0xff]  }
 0xb2b   : > { %20269 = vmatpush3.bf16.msra.mxu1 %v22319_v63  ;;  %20449 = vmatpush3.bf16.msra.mxu0 %v22320_v33  ;;  %v22333_v63 = vld [vmem:[%s27673_s7 + $0x558] ss:$20 sps:$4 sm:$0xff]  }
 0xb2c   : > { %10604 = vmatprep.subr.bf16.mxu1 %v22323_v43  ;;  %14447 = vmatprep.subr.bf16.mxu0 %v22326_v31  ;;  %v22336_v33 = vld [vmem:[%s27673_s7 + $0x1098] ss:$20 sps:$4 sm:$0xff]  }
 0xb2d   : > { %v22341_v43 = vld [vmem:[%s27673_s7 + $0x584] ss:$20 sps:$4 sm:$0xff]  }
 0xb2e   : > { %20271 = vmatmul.mubr.bf16.vlgmr.msra.gmra.mrb[48].mxu1 %v25183_v37  ;;  %20451 = vmatmul.mubr.bf16.vlgmr.msra.gmra.mrb[80].mxu0 %v26314_v26  ;;  %v22338_v37 = vld [vmem:[%s27673_s7 + $0x109c] ss:$20 sps:$4 sm:$0xff]   ;;  %v22344_v31 = vld [vmem:[%s27673_s7 + $0x10c4] ss:$20 sps:$4 sm:$0xff]  }
 0xb2f   : > { %10605 = vmatpush1.bf16.msra.mxu1 %v22321_v15  ;;  %14448 = vmatpush1.bf16.msra.mxu0 %v22324_v46  ;;  %v22339_v15 = vld [vmem:[%s27673_s7 + $0x580] ss:$20 sps:$4 sm:$0xff]  }
 0xb30   : > { %10606 = vmatprep.subr.bf16.mxu1 %v22329_v3  ;;  %14449 = vmatprep.subr.bf16.mxu0 %v22332_v24  ;;  %v22342_v46 = vld [vmem:[%s27673_s7 + $0x10c0] ss:$20 sps:$4 sm:$0xff]  }
 0xb31   : > { %10636 = vmatprep.mubr.bf16.mxu1 %v27717_v39  ;;  %14479 = vmatprep.mubr.bf16.mxu0 %v27717_v39  ;;  %v22347_v3 = vld [vmem:[%s27673_s7 + $0x5ac] ss:$20 sps:$4 sm:$0xff]  }
 0xb32   : > { %v22350_v24 = vld [vmem:[%s27673_s7 + $0x10ec] ss:$20 sps:$4 sm:$0xff]  }
 0xb33   : > { %10607 = vmatpush1.bf16.msra.mxu1 %v22327_v55  ;;  %14450 = vmatpush1.bf16.msra.mxu0 %v22330_v29  ;;  %v22996_v55 = vmov 1966171168  }
 0xb34   : > { %10608 = vmatprep.subr.bf16.mxu1 %v22335_v18  ;;  %14451 = vmatprep.subr.bf16.mxu0 %v22338_v37  ;;  %v8985_v29 = vunpack.c.l.s4 %v22996_v55  ;;  %v22345_v18 = vld [vmem:[%s27673_s7 + $0x5a8] ss:$20 sps:$4 sm:$0xff]  }
 0xb35   : > { %v22348_v37 = vld [vmem:[%s27673_s7 + $0x10e8] ss:$20 sps:$4 sm:$0xff]  }
 0xb37   : > { %10609 = vmatpush1.bf16.msra.mxu1 %v22333_v63  ;;  %14452 = vmatpush1.bf16.msra.mxu0 %v22336_v33  ;;  %v22353_v63 = vld [vmem:[%s27673_s7 + $0x5d4] ss:$20 sps:$4 sm:$0xff]  }
 0xb38   : > { %10610 = vmatprep.subr.bf16.mxu1 %v22341_v43  ;;  %14453 = vmatprep.subr.bf16.mxu0 %v22344_v31  ;;  %v22356_v33 = vld [vmem:[%s27673_s7 + $0x1114] ss:$20 sps:$4 sm:$0xff]   ;;  %v8986_v43 = vunpack.c.0.s8 %v8985_v29  ;;  %v22351_v31 = vld [vmem:[%s27673_s7 + $0x5d0] ss:$20 sps:$4 sm:$0xff]  }
 0xb3a   : > { %v26473_v29 = vsub.s32 %v8986_v43, %v23308_v2  ;;  %v22365_v43 = vld [vmem:[%s27673_s7 + $0x624] ss:$20 sps:$4 sm:$0xff]  }
 0xb3b   : > { %10611 = vmatpush1.bf16.msra.mxu1 %v22339_v15  ;;  %14454 = vmatpush1.bf16.msra.mxu0 %v22342_v46  ;;  %v22354_v15 = vld [vmem:[%s27673_s7 + $0x1110] ss:$20 sps:$4 sm:$0xff]  }
 0xb3c   : > { %10612 = vmatprep.subr.bf16.mxu1 %v22347_v3  ;;  %14455 = vmatprep.subr.bf16.mxu0 %v22350_v24  ;;  %v22359_v46 = vld [vmem:[%s27673_s7 + $0x5fc] ss:$20 sps:$4 sm:$0xff]  }
 0xb3d   : > { %v22362_v3 = vld [vmem:[%s27673_s7 + $0x113c] ss:$20 sps:$4 sm:$0xff]  }
 0xb3f   : > { %10613 = vmatpush1.bf16.msra.mxu1 %v22345_v18  ;;  %14456 = vmatpush1.bf16.msra.mxu0 %v22348_v37 }
 0xb40   : > { %10614 = vmatprep.subr.bf16.mxu1 %v22353_v63  ;;  %14457 = vmatprep.subr.bf16.mxu0 %v22356_v33  ;;  %v22357_v63 = vld [vmem:[%s27673_s7 + $0x5f8] ss:$20 sps:$4 sm:$0xff]  }
 0xb41   : > { %v8930_v24 = vpop.f32.mrb[24].mxu1  ;;  %v22360_v33 = vld [vmem:[%s27673_s7 + $0x1138] ss:$20 sps:$4 sm:$0xff]  }
 0xb42   : > { %v8932_v55 = vpop.f32.mrb[25].mxu1 }
 0xb43   : > { %v8983_v18 = vcombine.low %v8930_v24, %v8932_v55  ;;  %v8934_v37 = vpop.f32.mrb[26].mxu1  ;;  %10615 = vmatpush1.bf16.msra.mxu1 %v22351_v31  ;;  %14458 = vmatpush1.bf16.msra.mxu0 %v22354_v15  ;;  %v22368_v31 = vld [vmem:[%s27673_s7 + $0x1164] ss:$20 sps:$4 sm:$0xff]   ;;  %v26491_v15 = vrot.slane %v8982_v60, %v26473_v29  ;;  %v14147_v60 = vld [vmem:[#allocation4 + $0xd] sm:$0x1] }
 0xb44   : > { %v8935_v41 = vpop.f32.mrb[27].mxu1  ;;  %10616 = vmatprep.subr.bf16.mxu1 %v22359_v46  ;;  %14459 = vmatprep.subr.bf16.mxu0 %v22362_v3  ;;  %v22363_v46 = vld [vmem:[%s27673_s7 + $0x620] ss:$20 sps:$4 sm:$0xff]   ;;  %v26516_v37 = vpack.c.bf16 %v14147_v60, %v14147_v60  ;;  %v22392_v60 = vld [vmem:[%s27673_s7 + $0x11fc] ss:$20 sps:$4 sm:$0xff]  }
 0xb45   : > { %v26494_v24 = vrot.slane %v8983_v18, %v26473_v29  ;;  %v22366_v3 = vld [vmem:[%s27673_s7 + $0x1160] ss:$20 sps:$4 sm:$0xff]  }
 0xb46   : > { %v22369_v55 = vld [vmem:[%s27673_s7 + $0x640] ss:$20 sps:$4 sm:$0xff]  }
 0xb47   : > { %v9005_v41 = vcombine.low %v26491_v15, %v26494_v24  ;;  %10617 = vmatpush1.bf16.msra.mxu1 %v22357_v63  ;;  %14460 = vmatpush1.bf16.msra.mxu0 %v22360_v33  ;;  %v22372_v18 = vld [vmem:[%s27673_s7 + $0x1180] ss:$20 sps:$4 sm:$0xff]   ;;  %v22411_v15 = vld [vmem:[%s27673_s7 + $0x758] ss:$20 sps:$4 sm:$0xff]  }
 0xb48   : > { %10618 = vmatprep.subr.bf16.mxu1 %v22365_v43  ;;  %14461 = vmatprep.subr.bf16.mxu0 %v22368_v31  ;;  %v22377_v63 = vld [vmem:[%s27673_s7 + $0x66c] ss:$20 sps:$4 sm:$0xff]   ;;  %v22375_v43 = vld [vmem:[%s27673_s7 + $0x668] ss:$20 sps:$4 sm:$0xff]  }
 0xb49   : > { %v22380_v33 = vld [vmem:[%s27673_s7 + $0x11ac] ss:$20 sps:$4 sm:$0xff]   ;;  %v22378_v31 = vld [vmem:[%s27673_s7 + $0x11a8] ss:$20 sps:$4 sm:$0xff]  }
 0xb4a   : > { %v22414_v24 = vld [vmem:[%s27673_s7 + $0x1298] ss:$20 sps:$4 sm:$0xff]  }
 0xb4b   : > { %10619 = vmatpush1.bf16.msra.mxu1 %v22363_v46  ;;  %14462 = vmatpush1.bf16.msra.mxu0 %v22366_v3  ;;  %v22383_v46 = vld [vmem:[%s27673_s7 + $0x694] ss:$20 sps:$4 sm:$0xff]   ;;  %v22381_v3 = vld [vmem:[%s27673_s7 + $0x690] ss:$20 sps:$4 sm:$0xff]  }
 0xb4c   : > { %10990 = vmatprep.subr.bf16.mxu1 %v22371_v11  ;;  %14833 = vmatprep.subr.bf16.mxu0 %v22374_v49  ;;  %v22384_v11 = vld [vmem:[%s27673_s7 + $0x11d0] ss:$20 sps:$4 sm:$0xff]  }
 0xb4d   : > { %v22389_v49 = vld [vmem:[%s27673_s7 + $0x6bc] ss:$20 sps:$4 sm:$0xff]  }
 0xb4e   : > { %10637 = vmatmul.mubr.bf16.vlgmr.msra.gmra.mrb[52].mxu1 %v25232_v23  ;;  %14480 = vmatmul.mubr.bf16.vlgmr.msra.gmra.mrb[84].mxu0 %v26516_v37  ;;  %v22386_v23 = vld [vmem:[%s27673_s7 + $0x11d4] ss:$20 sps:$4 sm:$0xff]  }
 0xb4f   : > { %10991 = vmatpush1.bf16.msra.mxu1 %v22369_v55  ;;  %14834 = vmatpush1.bf16.msra.mxu0 %v22372_v18  ;;  %v22387_v55 = vld [vmem:[%s27673_s7 + $0x6b8] ss:$20 sps:$4 sm:$0xff]  }
 0xb50   : > { %10992 = vmatprep.subr.bf16.mxu1 %v22377_v63  ;;  %14835 = vmatprep.subr.bf16.mxu0 %v22380_v33  ;;  %v22390_v18 = vld [vmem:[%s27673_s7 + $0x11f8] ss:$20 sps:$4 sm:$0xff]  }
 0xb51   : > { %11022 = vmatprep.mubr.bf16.mxu1 %v27717_v39  ;;  %14865 = vmatprep.mubr.bf16.mxu0 %v27717_v39  ;;  %v22395_v63 = vld [vmem:[%s27673_s7 + $0x6e4] ss:$20 sps:$4 sm:$0xff]  }
 0xb52   : > { %v22398_v33 = vld [vmem:[%s27673_s7 + $0x1224] ss:$20 sps:$4 sm:$0xff]  }
 0xb53   : > { %10993 = vmatpush1.bf16.msra.mxu1 %v22375_v43  ;;  %14836 = vmatpush1.bf16.msra.mxu0 %v22378_v31  ;;  %v22393_v43 = vld [vmem:[%s27673_s7 + $0x6e0] ss:$20 sps:$4 sm:$0xff]  }
 0xb54   : > { %10994 = vmatprep.subr.bf16.mxu1 %v22383_v46  ;;  %14837 = vmatprep.subr.bf16.mxu0 %v22386_v23  ;;  %v22396_v31 = vld [vmem:[%s27673_s7 + $0x1220] ss:$20 sps:$4 sm:$0xff]  }
 0xb55   : > { %v22401_v46 = vld [vmem:[%s27673_s7 + $0x70c] ss:$20 sps:$4 sm:$0xff]  }
 0xb56   : > { %v22404_v23 = vld [vmem:[%s27673_s7 + $0x124c] ss:$20 sps:$4 sm:$0xff]  }
 0xb57   : > { %10995 = vmatpush1.bf16.msra.mxu1 %v22381_v3  ;;  %14838 = vmatpush1.bf16.msra.mxu0 %v22384_v11  ;;  %v22399_v3 = vld [vmem:[%s27673_s7 + $0x708] ss:$20 sps:$4 sm:$0xff]  }
 0xb58   : > { %10996 = vmatprep.subr.bf16.mxu1 %v22389_v49  ;;  %14839 = vmatprep.subr.bf16.mxu0 %v22392_v60  ;;  %v22402_v11 = vld [vmem:[%s27673_s7 + $0x1248] ss:$20 sps:$4 sm:$0xff]  }
 0xb59   : > { %v22407_v49 = vld [vmem:[%s27673_s7 + $0x734] ss:$20 sps:$4 sm:$0xff]  }
 0xb5a   : > { %v22410_v60 = vld [vmem:[%s27673_s7 + $0x1274] ss:$20 sps:$4 sm:$0xff]  }
 0xb5b   : > { %10997 = vmatpush1.bf16.msra.mxu1 %v22387_v55  ;;  %14840 = vmatpush1.bf16.msra.mxu0 %v22390_v18 }
 0xb5c   : > { %10998 = vmatprep.subr.bf16.mxu1 %v22395_v63  ;;  %14841 = vmatprep.subr.bf16.mxu0 %v22398_v33 }
 0xb5f   : > { %10999 = vmatpush1.bf16.msra.mxu1 %v22393_v43  ;;  %14842 = vmatpush1.bf16.msra.mxu0 %v22396_v31  ;;  %v22405_v43 = vld [vmem:[%s27673_s7 + $0x730] ss:$20 sps:$4 sm:$0xff]  }
 0xb60   : > { %11000 = vmatprep.subr.bf16.mxu1 %v22401_v46  ;;  %14843 = vmatprep.subr.bf16.mxu0 %v22404_v23  ;;  %v22408_v31 = vld [vmem:[%s27673_s7 + $0x1270] ss:$20 sps:$4 sm:$0xff]   ;;  %v26599_v46 = vrot.slane %v9005_v41, %v26473_v29  ;;  %v14574_v41 = vld [vmem:[#allocation4 + $0xe] sm:$0x1] }
 0xb61   : > { %v8971_v55 = vpop.f32.mrb[28].mxu1 }
 0xb62   : > { %v9004_v18 = vrot.slane %v8971_v55, %v26473_v29  ;;  %v20212_v63 = vpop.f32.mrb[29].mxu1 }
 0xb63   : > { %v8974_v33 = vpop.f32.mrb[30].mxu1  ;;  %11001 = vmatpush1.bf16.msra.mxu1 %v22399_v3  ;;  %14844 = vmatpush1.bf16.msra.mxu0 %v22402_v11  ;;  %v22413_v3 = vld [vmem:[%s27673_s7 + $0x75c] ss:$20 sps:$4 sm:$0xff]  }
 0xb64   : > { %v26602_v23 = vrot.slane %v9004_v18, %v26473_v29  ;;  %v20213_v55 = vpop.f32.mrb[31].mxu1  ;;  %11002 = vmatprep.subr.bf16.mxu1 %v22407_v49  ;;  %14845 = vmatprep.subr.bf16.mxu0 %v22410_v60  ;;  %v22416_v11 = vld [vmem:[%s27673_s7 + $0x129c] ss:$20 sps:$4 sm:$0xff]   ;;  %v26625_v18 = vpack.c.bf16 %v14574_v41, %v14574_v41  ;;  %v22419_v33 = vld [vmem:[%s27673_s7 + $0x678] ss:$20 sps:$4 sm:$0xff]  }
 0xb65   : > { %v22417_v49 = vld [vmem:[%s27673_s7 + $0x650] ss:$20 sps:$4 sm:$0xff]   ;;  %v22422_v55 = vld [vmem:[%s27673_s7 + $0x11e0] ss:$20 sps:$4 sm:$0xff]   ;;  %v22427_v41 = vld [vmem:[%s27673_s7 + $0x718] ss:$20 sps:$4 sm:$0xff]  }
 0xb66   : > { %v9020_v63 = vcombine.low %v26599_v46, %v26602_v23  ;;  %v22418_v60 = vld [vmem:[%s27673_s7 + $0x1190] ss:$20 sps:$4 sm:$0xff]   ;;  %v15001_v46 = vld [vmem:[#allocation4 + $0xf] sm:$0x1]  ;;  %v22486_v23 = vld [vmem:[%s27673_s7 + $0x8ec] ss:$20 sps:$4 sm:$0xff]  }
 0xb67   : > { %11003 = vmatpush1.bf16.msra.mxu1 %v22405_v43  ;;  %14846 = vmatpush1.bf16.msra.mxu0 %v22408_v31  ;;  %v22420_v43 = vld [vmem:[%s27673_s7 + $0x11b8] ss:$20 sps:$4 sm:$0xff]   ;;  %v22421_v31 = vld [vmem:[%s27673_s7 + $0x6a0] ss:$20 sps:$4 sm:$0xff]  }
 0xb68   : > { %11004 = vmatprep.subr.bf16.mxu1 %v22413_v3  ;;  %14847 = vmatprep.subr.bf16.mxu0 %v22416_v11  ;;  %v22423_v3 = vld [vmem:[%s27673_s7 + $0x6c8] ss:$20 sps:$4 sm:$0xff]  }
 0xb69   : > { %v22424_v11 = vld [vmem:[%s27673_s7 + $0x1208] ss:$20 sps:$4 sm:$0xff]  }
 0xb6b   : > { %11005 = vmatpush1.bf16.msra.mxu1 %v22411_v15  ;;  %14848 = vmatpush1.bf16.msra.mxu0 %v22414_v24  ;;  %v22425_v15 = vld [vmem:[%s27673_s7 + $0x6f0] ss:$20 sps:$4 sm:$0xff]  }
 0xb6c   : > { %20294 = vmatprep.subr.bf16.mxu1 %v27715_v40  ;;  %20474 = vmatprep.subr.bf16.mxu0 %v27715_v40  ;;  %v22426_v24 = vld [vmem:[%s27673_s7 + $0x1230] ss:$20 sps:$4 sm:$0xff]  }
 0xb6e   : > { %11023 = vmatmul.mubr.bf16.vlgmr.msra.gmra.mrb[56].mxu1 %v25324_v21  ;;  %14866 = vmatmul.mubr.bf16.vlgmr.msra.gmra.mrb[88].mxu0 %v26625_v18 }
 0xb6f   : > { %20295 = vmatpush3.bf16.msra.mxu1 %v22417_v49  ;;  %20475 = vmatpush3.bf16.msra.mxu0 %v22418_v60  ;;  %v22428_v49 = vld [vmem:[%s27673_s7 + $0x1258] ss:$20 sps:$4 sm:$0xff]  }
 0xb70   : > { %20296 = vmatprep.subr.bf16.mxu1 %v27715_v40  ;;  %20476 = vmatprep.subr.bf16.mxu0 %v27715_v40 }
 0xb71   : > { %20310 = vmatprep.mubr.msk.bf16.mxu1 %vm22994_vm0, %v27715_v40  ;;  %20490 = vmatprep.mubr.msk.bf16.mxu0 %vm22994_vm0, %v27715_v40 }
 0xb73   : > { %20297 = vmatpush3.bf16.msra.mxu1 %v22419_v33  ;;  %20477 = vmatpush3.bf16.msra.mxu0 %v22420_v43 }
 0xb74   : > { %20298 = vmatprep.subr.bf16.mxu1 %v27715_v40  ;;  %20478 = vmatprep.subr.bf16.mxu0 %v27715_v40 }
 0xb77   : > { %20299 = vmatpush3.bf16.msra.mxu1 %v22421_v31  ;;  %20479 = vmatpush3.bf16.msra.mxu0 %v22422_v55  ;;  %v22429_v55 = vld [vmem:[%s27673_s7 + $0x740] ss:$20 sps:$4 sm:$0xff]  }
 0xb78   : > { %20300 = vmatprep.subr.bf16.mxu1 %v27715_v40  ;;  %20480 = vmatprep.subr.bf16.mxu0 %v27715_v40 }
 0xb7b   : > { %20301 = vmatpush3.bf16.msra.mxu1 %v22423_v3  ;;  %20481 = vmatpush3.bf16.msra.mxu0 %v22424_v11  ;;  %v22430_v3 = vld [vmem:[%s27673_s7 + $0x1280] ss:$20 sps:$4 sm:$0xff]  }
 0xb7c   : > { %20302 = vmatprep.subr.bf16.mxu1 %v27715_v40  ;;  %20482 = vmatprep.subr.bf16.mxu0 %v27715_v40 }
 0xb7f   : > { %20303 = vmatpush3.bf16.msra.mxu1 %v22425_v15  ;;  %20483 = vmatpush3.bf16.msra.mxu0 %v22426_v24  ;;  %v27718_v15 = vcombine.low %v25361_v59, %v25363_v47  ;;  %v22435_v59 = vld [vmem:[%s27673_s7 + $0x78c] ss:$20 sps:$4 sm:$0xff]  }
 0xb80   : > { %20304 = vmatprep.subr.bf16.mxu1 %v27715_v40  ;;  %20484 = vmatprep.subr.bf16.mxu0 %v27715_v40  ;;  %v22438_v47 = vld [vmem:[%s27673_s7 + $0x12cc] ss:$20 sps:$4 sm:$0xff]  }
 0xb81   : > { %v9316_v60 = vpop.f32.mrb[32].mxu1  ;;  %v26686_v24 = vrot.slane %v27718_v15, %v26473_v29  ;;  %v22442_v15 = vld [vmem:[%s27673_s7 + $0x12f0] ss:$20 sps:$4 sm:$0xff]  }
 0xb82   : > { %v9318_v33 = vpop.f32.mrb[33].mxu1 }
 0xb83   : > { %v9409_v43 = vcombine.low %v9316_v60, %v9318_v33  ;;  %v9320_v31 = vpop.f32.mrb[34].mxu1  ;;  %20305 = vmatpush3.bf16.msra.mxu1 %v22427_v41  ;;  %20485 = vmatpush3.bf16.msra.mxu0 %v22428_v49  ;;  %v22431_v60 = vld [vmem:[%s27673_s7 + $0x768] ss:$20 sps:$4 sm:$0xff]  }
 0xb84   : > { %v9321_v11 = vpop.f32.mrb[35].mxu1  ;;  %20306 = vmatprep.subr.bf16.mxu1 %v27715_v40  ;;  %20486 = vmatprep.subr.bf16.mxu0 %v27715_v40  ;;  %v22432_v33 = vld [vmem:[%s27673_s7 + $0x12a8] ss:$20 sps:$4 sm:$0xff]  }
 0xb85   : > { %v26689_v41 = vrot.slane %v9409_v43, %v26473_v29  ;;  %v22433_v43 = vld [vmem:[%s27673_s7 + $0x788] ss:$20 sps:$4 sm:$0xff]   ;;  %v22439_v11 = vld [vmem:[%s27673_s7 + $0x7b0] ss:$20 sps:$4 sm:$0xff]  }
 0xb86   : > { %v22436_v31 = vld [vmem:[%s27673_s7 + $0x12c8] ss:$20 sps:$4 sm:$0xff]  }
 0xb87   : > { %v9432_v49 = vcombine.low %v26689_v41, %v26686_v24  ;;  %20307 = vmatpush3.bf16.msra.mxu1 %v22429_v55  ;;  %20487 = vmatpush3.bf16.msra.mxu0 %v22430_v3  ;;  %v22441_v55 = vld [vmem:[%s27673_s7 + $0x7b4] ss:$20 sps:$4 sm:$0xff]  }
 0xb88   : > { %20308 = vmatprep.subr.bf16.mxu1 %v27715_v40  ;;  %20488 = vmatprep.subr.bf16.mxu0 %v27715_v40  ;;  %v22444_v3 = vld [vmem:[%s27673_s7 + $0x12f4] ss:$20 sps:$4 sm:$0xff]  }
 0xb89   : > { %v9439_v13 = vrot.slane %v9432_v49, %v26473_v29  ;;  %v22475_v24 = vld [vmem:[%s27673_s7 + $0x8a0] ss:$20 sps:$4 sm:$0xff]  }
 0xb8a   : > { %v22478_v41 = vld [vmem:[%s27673_s7 + $0x13e0] ss:$20 sps:$4 sm:$0xff]  }
 0xb8b   : > { %20309 = vmatpush3.bf16.msra.mxu1 %v22431_v60  ;;  %20489 = vmatpush3.bf16.msra.mxu0 %v22432_v33  ;;  %v22447_v60 = vld [vmem:[%s27673_s7 + $0x7dc] ss:$20 sps:$4 sm:$0xff]   ;;  %v22445_v33 = vld [vmem:[%s27673_s7 + $0x7d8] ss:$20 sps:$4 sm:$0xff]  }
 0xb8c   : > { %11458 = vmatprep.subr.bf16.mxu1 %v22435_v59  ;;  %15301 = vmatprep.subr.bf16.mxu0 %v22438_v47  ;;  %v22448_v59 = vld [vmem:[%s27673_s7 + $0x1318] ss:$20 sps:$4 sm:$0xff]  }
 0xb8d   : > { %v22453_v47 = vld [vmem:[%s27673_s7 + $0x804] ss:$20 sps:$4 sm:$0xff]  }
 0xb8e   : > { %20311 = vmatmul.mubr.bf16.vlgmr.msra.gmra.mrb[60].mxu1 %v25324_v21  ;;  %20491 = vmatmul.mubr.bf16.vlgmr.msra.gmra.mrb[92].mxu0 %v26625_v18  ;;  %v22450_v21 = vld [vmem:[%s27673_s7 + $0x131c] ss:$20 sps:$4 sm:$0xff]  }
 0xb8f   : > { %11459 = vmatpush1.bf16.msra.mxu1 %v22433_v43  ;;  %15302 = vmatpush1.bf16.msra.mxu0 %v22436_v31  ;;  %v22456_v43 = vld [vmem:[%s27673_s7 + $0x1344] ss:$20 sps:$4 sm:$0xff]   ;;  %v22451_v31 = vld [vmem:[%s27673_s7 + $0x800] ss:$20 sps:$4 sm:$0xff]  }
 0xb90   : > { %11460 = vmatprep.subr.bf16.mxu1 %v22441_v55  ;;  %15303 = vmatprep.subr.bf16.mxu0 %v22444_v3  ;;  %v22454_v55 = vld [vmem:[%s27673_s7 + $0x1340] ss:$20 sps:$4 sm:$0xff]  }
 0xb91   : > { %11490 = vmatprep.mubr.bf16.mxu1 %v27717_v39  ;;  %15333 = vmatprep.mubr.bf16.mxu0 %v27717_v39  ;;  %v22459_v3 = vld [vmem:[%s27673_s7 + $0x82c] ss:$20 sps:$4 sm:$0xff]  }
 0xb93   : > { %11461 = vmatpush1.bf16.msra.mxu1 %v22439_v11  ;;  %15304 = vmatpush1.bf16.msra.mxu0 %v22442_v15  ;;  %v22462_v11 = vld [vmem:[%s27673_s7 + $0x136c] ss:$20 sps:$4 sm:$0xff]   ;;  %v22457_v15 = vld [vmem:[%s27673_s7 + $0x828] ss:$20 sps:$4 sm:$0xff]  }
 0xb94   : > { %11462 = vmatprep.subr.bf16.mxu1 %v22447_v60  ;;  %15305 = vmatprep.subr.bf16.mxu0 %v22450_v21  ;;  %v22460_v60 = vld [vmem:[%s27673_s7 + $0x1368] ss:$20 sps:$4 sm:$0xff]  }
 0xb95   : > { %v22465_v21 = vld [vmem:[%s27673_s7 + $0x854] ss:$20 sps:$4 sm:$0xff]  }
 0xb97   : > { %11463 = vmatpush1.bf16.msra.mxu1 %v22445_v33  ;;  %15306 = vmatpush1.bf16.msra.mxu0 %v22448_v59  ;;  %v22468_v33 = vld [vmem:[%s27673_s7 + $0x1394] ss:$20 sps:$4 sm:$0xff]   ;;  %v22463_v59 = vld [vmem:[%s27673_s7 + $0x850] ss:$20 sps:$4 sm:$0xff]  }
 0xb98   : > { %11464 = vmatprep.subr.bf16.mxu1 %v22453_v47  ;;  %15307 = vmatprep.subr.bf16.mxu0 %v22456_v43  ;;  %v22466_v47 = vld [vmem:[%s27673_s7 + $0x1390] ss:$20 sps:$4 sm:$0xff]  }
 0xb99   : > { %v22471_v43 = vld [vmem:[%s27673_s7 + $0x87c] ss:$20 sps:$4 sm:$0xff]  }
 0xb9b   : > { %11465 = vmatpush1.bf16.msra.mxu1 %v22451_v31  ;;  %15308 = vmatpush1.bf16.msra.mxu0 %v22454_v55  ;;  %v22474_v31 = vld [vmem:[%s27673_s7 + $0x13bc] ss:$20 sps:$4 sm:$0xff]  }
 0xb9c   : > { %11466 = vmatprep.subr.bf16.mxu1 %v22459_v3  ;;  %15309 = vmatprep.subr.bf16.mxu0 %v22462_v11  ;;  %v8595_v3 = vld [vmem:[#allocation10] sm:$0x1f] }
 0xb9f   : > { %11467 = vmatpush1.bf16.msra.mxu1 %v22457_v15  ;;  %15310 = vmatpush1.bf16.msra.mxu0 %v22460_v60 }
 0xba0   : > { %11468 = vmatprep.subr.bf16.mxu1 %v22465_v21  ;;  %15311 = vmatprep.subr.bf16.mxu0 %v22468_v33  ;;  %v22469_v21 = vld [vmem:[%s27673_s7 + $0x878] ss:$20 sps:$4 sm:$0xff]  }
 0xba1   : > { %v9398_v55 = vpop.f32.mrb[36].mxu1  ;;  %v22472_v33 = vld [vmem:[%s27673_s7 + $0x13b8] ss:$20 sps:$4 sm:$0xff]  }
 0xba2   : > { %v9431_v11 = vrot.slane %v9398_v55, %v26473_v29  ;;  %v20232_v15 = vpop.f32.mrb[37].mxu1 }
 0xba3   : > { %v9401_v60 = vpop.f32.mrb[38].mxu1  ;;  %11469 = vmatpush1.bf16.msra.mxu1 %v22463_v59  ;;  %15312 = vmatpush1.bf16.msra.mxu0 %v22466_v47  ;;  %v22477_v59 = vld [vmem:[%s27673_s7 + $0x8a4] ss:$20 sps:$4 sm:$0xff]   ;;  %v9022_v15 = vadd.f32 %v9020_v63, %v8595_v3  ;;  %v22484_v63 = vld [vmem:[%s27673_s7 + $0x8e8] ss:$20 sps:$4 sm:$0xff]  }
 0xba4   : > { %v9446_v54 = vrot.slane %v9431_v11, %v26473_v29  ;;  %v20233_v55 = vpop.f32.mrb[39].mxu1  ;;  %11470 = vmatprep.subr.bf16.mxu1 %v22471_v43  ;;  %15313 = vmatprep.subr.bf16.mxu0 %v22474_v31  ;;  %v22480_v47 = vld [vmem:[%s27673_s7 + $0x13e4] ss:$20 sps:$4 sm:$0xff]   ;;  %v22489_v31 = vld [vmem:[%s27673_s7 + $0x914] ss:$20 sps:$4 sm:$0xff]  }
 0xba5   : > { %v22483_v43 = vld [vmem:[%s27673_s7 + $0x8c4] ss:$20 sps:$4 sm:$0xff]   ;;  %v22498_v55 = vld [vmem:[%s27673_s7 + $0x98c] ss:$20 sps:$4 sm:$0xff]  }
 0xba6   : > { %v9447_v60 = vcombine.low %v9439_v13, %v9446_v54  ;;  %v22481_v54 = vld [vmem:[%s27673_s7 + $0x8c0] ss:$20 sps:$4 sm:$0xff]   ;;  %v26816_v13 = vpack.c.bf16 %v15001_v46, %v15001_v46  ;;  %v22487_v3 = vld [vmem:[%s27673_s7 + $0x910] ss:$20 sps:$4 sm:$0xff]   ;;  %v22490_v11 = vld [vmem:[%s27673_s7 + $0x938] ss:$20 sps:$4 sm:$0xff]  }
 0xba7   : > { %11471 = vmatpush1.bf16.msra.mxu1 %v22469_v21  ;;  %15314 = vmatpush1.bf16.msra.mxu0 %v22472_v33  ;;  %v22495_v21 = vld [vmem:[%s27673_s7 + $0x964] ss:$20 sps:$4 sm:$0xff]   ;;  %v22493_v33 = vld [vmem:[%s27673_s7 + $0x960] ss:$20 sps:$4 sm:$0xff]  }
 0xba8   : > { %v9449_v49 = vadd.f32 %v9447_v60, %v9022_v15  ;;  %11472 = vmatprep.subr.bf16.mxu1 %v22477_v59  ;;  %15315 = vmatprep.subr.bf16.mxu0 %v22480_v47  ;;  %v22496_v59 = vld [vmem:[%s27673_s7 + $0x988] ss:$20 sps:$4 sm:$0xff]  }
 0xba9   : > { %v22501_v47 = vld [vmem:[%s27673_s7 + $0x9b4] ss:$20 sps:$4 sm:$0xff]  }
 0xbab   : > { %11473 = vmatpush1.bf16.msra.mxu1 %v22475_v24  ;;  %15316 = vmatpush1.bf16.msra.mxu0 %v22478_v41 }
 0xbac   : > { %11844 = vmatprep.subr.bf16.mxu1 %v22483_v43  ;;  %v22499_v43 = vld [vmem:[%s27673_s7 + $0x9b0] ss:$20 sps:$4 sm:$0xff]  }
 0xbae   : > { %11491 = vmatmul.mubr.bf16.vlgmr.msra.gmra.mrb[64].mxu1 %v25379_v62  ;;  %15334 = vmatmul.mubr.bf16.vlgmr.msra.gmra.mrb[96].mxu0 %v26816_v13  ;;  %v22492_v62 = vld [vmem:[%s27673_s7 + $0x93c] ss:$20 sps:$4 sm:$0xff]  }
 0xbaf   : > { %11845 = vmatpush1.bf16.msra.mxu1 %v22481_v54  ;;  %11876 = vmatprep.mubr.bf16.mxu1 %v27717_v39  ;;  %v22504_v54 = vld [vmem:[%s27673_s7 + $0x9dc] ss:$20 sps:$4 sm:$0xff]  }
 0xbb0   : > { %11846 = vmatprep.subr.bf16.mxu1 %v22486_v23  ;;  %v27719_v23 = vcombine.low %v25405_v17, %v25407_v19  ;;  %v22505_v17 = vld [vmem:[%s27673_s7 + $0x8d0] ss:$20 sps:$4 sm:$0xff]  }
 0xbb3   : > { %11847 = vmatpush1.bf16.msra.mxu1 %v22484_v63  ;;  %v9844_v63 = vrot.slane %v27719_v23, %v26473_v29 }
 0xbb4   : > { %11848 = vmatprep.subr.bf16.mxu1 %v22489_v31  ;;  %v9858_v31 = vrot.slane %v25477_v61, %v26473_v29  ;;  %v22506_v61 = vld [vmem:[%s27673_s7 + $0x8f8] ss:$20 sps:$4 sm:$0xff]  }
 0xbb7   : > { %11849 = vmatpush1.bf16.msra.mxu1 %v22487_v3 }
 0xbb8   : > { %11850 = vmatprep.subr.bf16.mxu1 %v22492_v62 }
 0xbbb   : > { %11851 = vmatpush1.bf16.msra.mxu1 %v22490_v11  ;;  %v22502_v11 = vld [vmem:[%s27673_s7 + $0x9d8] ss:$20 sps:$4 sm:$0xff]  }
 0xbbc   : > { %11852 = vmatprep.subr.bf16.mxu1 %v22495_v21  ;;  %v9873_v21 = vrot.slane %v9858_v31, %v26473_v29  ;;  %v22511_v31 = vld [vmem:[%s27673_s7 + $0x9c0] ss:$20 sps:$4 sm:$0xff]  }
 0xbbf   : > { %11853 = vmatpush1.bf16.msra.mxu1 %v22493_v33 }
 0xbc0   : > { %11854 = vmatprep.subr.bf16.mxu1 %v22498_v55 }
 0xbc1   : > { %v9784_v15 = vpop.f32.mrb[40].mxu1 }
 0xbc2   : > { %v9786_v60 = vpop.f32.mrb[41].mxu1 }
 0xbc3   : > { %v9837_v24 = vcombine.low %v9784_v15, %v9786_v60  ;;  %v9788_v41 = vpop.f32.mrb[42].mxu1  ;;  %11855 = vmatpush1.bf16.msra.mxu1 %v22496_v59  ;;  %v22507_v59 = vld [vmem:[%s27673_s7 + $0x920] ss:$20 sps:$4 sm:$0xff]   ;;  %v22510_v15 = vld [vmem:[%s27673_s7 + $0x998] ss:$20 sps:$4 sm:$0xff]  }
 0xbc4   : > { %v9789_v46 = vpop.f32.mrb[43].mxu1  ;;  %11856 = vmatprep.subr.bf16.mxu1 %v22501_v47  ;;  %v22509_v47 = vld [vmem:[%s27673_s7 + $0x970] ss:$20 sps:$4 sm:$0xff]  }
 0xbc5   : > { %v9851_v3 = vrot.slane %v9837_v24, %v26473_v29 }
 0xbc7   : > { %v9859_v62 = vcombine.low %v9844_v63, %v9851_v3  ;;  %11857 = vmatpush1.bf16.msra.mxu1 %v22499_v43 }
 0xbc8   : > { %11858 = vmatprep.subr.bf16.mxu1 %v22504_v54 }
 0xbc9   : > { %v9866_v33 = vrot.slane %v9859_v62, %v26473_v29 }
 0xbcb   : > { %v9874_v55 = vcombine.low %v9866_v33, %v9873_v21  ;;  %11859 = vmatpush1.bf16.msra.mxu1 %v22502_v11  ;;  %v10278_v11 = vrot.slane %v10264_v35, %v26473_v29  ;;  %v22516_v35 = vld [vmem:[%s27673_s7 + $0xa30] ss:$20 sps:$4 sm:$0xff]  }
 0xbcc   : > { %20334 = vmatprep.subr.bf16.mxu1 %v27715_v40 }
 0xbcd   : > { %v26876_v19 = vadd.f32 %v9874_v55, %v9449_v49  ;;  %v22508_v49 = vld [vmem:[%s27673_s7 + $0x948] ss:$20 sps:$4 sm:$0xff]  }
 0xbce   : > { %11877 = vmatmul.mubr.bf16.vlgmr.msra.gmra.mrb[68].mxu1 %v25496_v36  ;;  %v22512_v55 = vld [vmem:[%s27673_s7 + $0x9e8] ss:$20 sps:$4 sm:$0xff]  }
 0xbcf   : > { %20335 = vmatpush3.bf16.msra.mxu1 %v22505_v17  ;;  %20350 = vmatprep.mubr.msk.bf16.mxu1 %vm22994_vm0, %v27715_v40  ;;  %v22515_v17 = vld [vmem:[%s27673_s7 + $0xa0c] ss:$20 sps:$4 sm:$0xff]  }
 0xbd0   : > { %20336 = vmatprep.subr.bf16.mxu1 %v27715_v40 }
 0xbd3   : > { %20337 = vmatpush3.bf16.msra.mxu1 %v22506_v61  ;;  %v22521_v61 = vld [vmem:[%s27673_s7 + $0xa5c] ss:$20 sps:$4 sm:$0xff]  }
 0xbd4   : > { %20338 = vmatprep.subr.bf16.mxu1 %v27715_v40 }
 0xbd7   : > { %20339 = vmatpush3.bf16.msra.mxu1 %v22507_v59  ;;  %v22519_v59 = vld [vmem:[%s27673_s7 + $0xa58] ss:$20 sps:$4 sm:$0xff]  }
 0xbd8   : > { %20340 = vmatprep.subr.bf16.mxu1 %v27715_v40 }
 0xbdb   : > { %20341 = vmatpush3.bf16.msra.mxu1 %v22508_v49  ;;  %v22522_v49 = vld [vmem:[%s27673_s7 + $0xa80] ss:$20 sps:$4 sm:$0xff]  }
 0xbdc   : > { %20342 = vmatprep.subr.bf16.mxu1 %v27715_v40 }
 0xbdf   : > { %20343 = vmatpush3.bf16.msra.mxu1 %v22509_v47  ;;  %v22527_v47 = vld [vmem:[%s27673_s7 + $0xaac] ss:$20 sps:$4 sm:$0xff]  }
 0xbe0   : > { %20344 = vmatprep.subr.bf16.mxu1 %v27715_v40 }
 0xbe1   : > { %v10170_v60 = vpop.f32.mrb[44].mxu1  ;;  %v26901_v24 = vpop.f32.mrb[76].mxu0 }
 0xbe2   : > { %v10172_v41 = vpop.f32.mrb[45].mxu1  ;;  %v26903_v43 = vpop.f32.mrb[77].mxu0 }
 0xbe3   : > { %v10263_v46 = vcombine.low %v10170_v60, %v10172_v41  ;;  %v10174_v54 = vpop.f32.mrb[46].mxu1  ;;  %20345 = vmatpush3.bf16.msra.mxu1 %v22510_v15  ;;  %v14106_v23 = vcombine.low %v26901_v24, %v26903_v43  ;;  %v14017_v63 = vpop.f32.mrb[78].mxu0  ;;  %v22525_v15 = vld [vmem:[%s27673_s7 + $0xaa8] ss:$20 sps:$4 sm:$0xff]   ;;  %v22528_v41 = vld [vmem:[%s27673_s7 + $0xad0] ss:$20 sps:$4 sm:$0xff]  }
 0xbe4   : > { %v10175_v3 = vpop.f32.mrb[47].mxu1  ;;  %v14018_v62 = vpop.f32.mrb[79].mxu0  ;;  %20346 = vmatprep.subr.bf16.mxu1 %v27715_v40  ;;  %v22530_v60 = vld [vmem:[%s27673_s7 + $0xad4] ss:$20 sps:$4 sm:$0xff]  }
 0xbe5   : > { %v10271_v21 = vrot.slane %v10263_v46, %v26473_v29  ;;  %v22533_v46 = vld [vmem:[%s27673_s7 + $0xafc] ss:$20 sps:$4 sm:$0xff]   ;;  %v15463_v43 = vld [vmem:[#allocation11 + $0x100] sm:$0xff] }
 0xbe7   : > { %v10286_v33 = vcombine.low %v10271_v21, %v10278_v11  ;;  %20347 = vmatpush3.bf16.msra.mxu1 %v22511_v31 }
 0xbe8   : > { %20348 = vmatprep.subr.bf16.mxu1 %v27715_v40 }
 0xbeb   : > { %20349 = vmatpush3.bf16.msra.mxu1 %v22512_v55  ;;  %v22531_v55 = vld [vmem:[%s27673_s7 + $0xaf8] ss:$20 sps:$4 sm:$0xff]  }
 0xbec   : > { %12312 = vmatprep.subr.bf16.mxu1 %v22515_v17  ;;  %v10293_v17 = vrot.slane %v10286_v33, %v26473_v29  ;;  %v22539_v33 = vld [vmem:[%s27673_s7 + $0xb44] ss:$20 sps:$4 sm:$0xff]  }
 0xbee   : > { %20351 = vmatmul.mubr.bf16.vlgmr.msra.gmra.mrb[72].mxu1 %v25496_v36  ;;  %v22524_v36 = vld [vmem:[%s27673_s7 + $0xa84] ss:$20 sps:$4 sm:$0xff]  }
 0xbef   : > { %12313 = vmatpush1.bf16.msra.mxu1 %v22513_v50  ;;  %12344 = vmatprep.mubr.bf16.mxu1 %v27717_v39 }
 0xbf0   : > { %12314 = vmatprep.subr.bf16.mxu1 %v22518_v5 }
 0xbf3   : > { %12315 = vmatpush1.bf16.msra.mxu1 %v22516_v35 }
 0xbf4   : > { %12316 = vmatprep.subr.bf16.mxu1 %v22521_v61  ;;  %v22536_v61 = vld [vmem:[%s27673_s7 + $0xb24] ss:$20 sps:$4 sm:$0xff]  }
 0xbf7   : > { %12317 = vmatpush1.bf16.msra.mxu1 %v22519_v59 }
 0xbf8   : > { %12318 = vmatprep.subr.bf16.mxu1 %v22524_v36  ;;  %v22534_v36 = vld [vmem:[%s27673_s7 + $0xb20] ss:$20 sps:$4 sm:$0xff]  }
 0xbfb   : > { %12319 = vmatpush1.bf16.msra.mxu1 %v22522_v49 }
 0xbfc   : > { %12320 = vmatprep.subr.bf16.mxu1 %v22527_v47  ;;  %v22537_v47 = vld [vmem:[%s27673_s7 + $0xb40] ss:$20 sps:$4 sm:$0xff]  }
 0xbff   : > { %12321 = vmatpush1.bf16.msra.mxu1 %v22525_v15  ;;  %v22542_v15 = vld [vmem:[%s27673_s7 + $0xb6c] ss:$20 sps:$4 sm:$0xff]  }
 0xc00   : > { %12322 = vmatprep.subr.bf16.mxu1 %v22530_v60  ;;  %v22545_v60 = vld [vmem:[%s27673_s7 + $0xb94] ss:$20 sps:$4 sm:$0xff]  }
 0xc01   : > { %v10252_v54 = vpop.f32.mrb[48].mxu1  ;;  %v26961_v63 = vpop.f32.mrb[80].mxu0 }
 0xc02   : > { %v10285_v31 = vrot.slane %v10252_v54, %v26473_v29  ;;  %v20272_v3 = vpop.f32.mrb[49].mxu1  ;;  %v20452_v62 = vpop.f32.mrb[81].mxu0  ;;  %v22551_v54 = vld [vmem:[%s27673_s7 + $0xbe4] ss:$20 sps:$4 sm:$0xff]  }
 0xc03   : > { %v10255_v11 = vpop.f32.mrb[50].mxu1  ;;  %12323 = vmatpush1.bf16.msra.mxu1 %v22528_v41  ;;  %v14098_v21 = vpop.f32.mrb[82].mxu0  ;;  %v22543_v41 = vld [vmem:[%s27673_s7 + $0xb90] ss:$20 sps:$4 sm:$0xff]   ;;  %v22554_v3 = vld [vmem:[%s27673_s7 + $0xc0c] ss:$20 sps:$4 sm:$0xff]  }
 0xc04   : > { %v10300_v50 = vrot.slane %v10285_v31, %v26473_v29  ;;  %v20273_v5 = vpop.f32.mrb[51].mxu1  ;;  %v20453_v35 = vpop.f32.mrb[83].mxu0  ;;  %12324 = vmatprep.subr.bf16.mxu1 %v22533_v46  ;;  %v22546_v46 = vld [vmem:[%s27673_s7 + $0xbb8] ss:$20 sps:$4 sm:$0xff]   ;;  %v22549_v31 = vld [vmem:[%s27673_s7 + $0xbe0] ss:$20 sps:$4 sm:$0xff]  }
 0xc05   : > { %v22552_v62 = vld [vmem:[%s27673_s7 + $0xc08] ss:$20 sps:$4 sm:$0xff]  }
 0xc06   : > { %v10301_v59 = vcombine.low %v10293_v17, %v10300_v50  ;;  %v22557_v11 = vld [vmem:[%s27673_s7 + $0xc34] ss:$20 sps:$4 sm:$0xff]  }
 0xc07   : > { %12325 = vmatpush1.bf16.msra.mxu1 %v22531_v55 }
 0xc08   : > { %v10303_v49 = vadd.f32 %v10301_v59, %v26876_v19  ;;  %12326 = vmatprep.subr.bf16.mxu1 %v22536_v61  ;;  %v22540_v19 = vld [vmem:[%s27673_s7 + $0xb68] ss:$20 sps:$4 sm:$0xff]  }
 0xc0b   : > { %12327 = vmatpush1.bf16.msra.mxu1 %v22534_v36  ;;  %v22555_v36 = vld [vmem:[%s27673_s7 + $0xc30] ss:$20 sps:$4 sm:$0xff]  }
 0xc0c   : > { %12698 = vmatprep.subr.bf16.mxu1 %v22539_v33 }
 0xc0e   : > { %12345 = vmatmul.mubr.bf16.vlgmr.msra.gmra.mrb[76].mxu1 %v25671_v28  ;;  %v22548_v28 = vld [vmem:[%s27673_s7 + $0xbbc] ss:$20 sps:$4 sm:$0xff]  }
 0xc0f   : > { %12699 = vmatpush1.bf16.msra.mxu1 %v22537_v47  ;;  %12730 = vmatprep.mubr.bf16.mxu1 %v27717_v39 }
 0xc10   : > { %12700 = vmatprep.subr.bf16.mxu1 %v22542_v15  ;;  %v22560_v15 = vld [vmem:[%s27673_s7 + $0xc5c] ss:$20 sps:$4 sm:$0xff]  }
 0xc13   : > { %12701 = vmatpush1.bf16.msra.mxu1 %v22540_v19  ;;  %v10698_v19 = vrot.slane %v10690_v51, %v26473_v29  ;;  %v22562_v51 = vld [vmem:[%s27673_s7 + $0xb78] ss:$20 sps:$4 sm:$0xff]  }
 0xc14   : > { %12702 = vmatprep.subr.bf16.mxu1 %v22545_v60  ;;  %v10712_v60 = vrot.slane %v25621_v38, %v26473_v29  ;;  %v22563_v38 = vld [vmem:[%s27673_s7 + $0xba0] ss:$20 sps:$4 sm:$0xff]  }
 0xc17   : > { %12703 = vmatpush1.bf16.msra.mxu1 %v22543_v41 }
 0xc18   : > { %12704 = vmatprep.subr.bf16.mxu1 %v22548_v28 }
 0xc1b   : > { %12705 = vmatpush1.bf16.msra.mxu1 %v22546_v46  ;;  %v22558_v46 = vld [vmem:[%s27673_s7 + $0xc58] ss:$20 sps:$4 sm:$0xff]  }
 0xc1c   : > { %12706 = vmatprep.subr.bf16.mxu1 %v22551_v54  ;;  %v10727_v54 = vrot.slane %v10712_v60, %v26473_v29 }
 0xc1f   : > { %12707 = vmatpush1.bf16.msra.mxu1 %v22549_v31 }
 0xc20   : > { %12708 = vmatprep.subr.bf16.mxu1 %v22554_v3 }
 0xc21   : > { %v10638_v21 = vpop.f32.mrb[52].mxu1  ;;  %v27017_v55 = vpop.f32.mrb[84].mxu0 }
 0xc22   : > { %v10640_v17 = vpop.f32.mrb[53].mxu1  ;;  %v27019_v50 = vpop.f32.mrb[85].mxu0 }
 0xc23   : > { %v10691_v5 = vcombine.low %v10638_v21, %v10640_v17  ;;  %v14534_v35 = vcombine.low %v27017_v55, %v27019_v50  ;;  %v10642_v61 = vpop.f32.mrb[54].mxu1  ;;  %12709 = vmatpush1.bf16.msra.mxu1 %v22552_v62  ;;  %v14485_v59 = vpop.f32.mrb[86].mxu0  ;;  %v22565_v62 = vld [vmem:[%s27673_s7 + $0xbf0] ss:$20 sps:$4 sm:$0xff]  }
 0xc24   : > { %v10643_v33 = vpop.f32.mrb[55].mxu1  ;;  %v14486_v47 = vpop.f32.mrb[87].mxu0  ;;  %12710 = vmatprep.subr.bf16.mxu1 %v22557_v11  ;;  %v22566_v11 = vld [vmem:[%s27673_s7 + $0xc18] ss:$20 sps:$4 sm:$0xff]   ;;  %v15462_v55 = vld [vmem:[#allocation11 + $0xf8] sm:$0xff] }
 0xc25   : > { %v10705_v41 = vrot.slane %v10691_v5, %v26473_v29 }
 0xc27   : > { %v10713_v28 = vcombine.low %v10698_v19, %v10705_v41  ;;  %12711 = vmatpush1.bf16.msra.mxu1 %v22555_v36  ;;  %v11132_v41 = vrot.slane %v11118_v27, %v26473_v29  ;;  %v22572_v27 = vld [vmem:[%s27673_s7 + $0xcb0] ss:$20 sps:$4 sm:$0xff]  }
 0xc28   : > { %12712 = vmatprep.subr.bf16.mxu1 %v22560_v15  ;;  %v22567_v15 = vld [vmem:[%s27673_s7 + $0xc40] ss:$20 sps:$4 sm:$0xff]  }
 0xc29   : > { %v10720_v31 = vrot.slane %v10713_v28, %v26473_v29 }
 0xc2b   : > { %v10728_v3 = vcombine.low %v10720_v31, %v10727_v54  ;;  %12713 = vmatpush1.bf16.msra.mxu1 %v22558_v46  ;;  %v22568_v54 = vld [vmem:[%s27673_s7 + $0xc68] ss:$20 sps:$4 sm:$0xff]   ;;  %v22571_v31 = vld [vmem:[%s27673_s7 + $0xc8c] ss:$20 sps:$4 sm:$0xff]  }
 0xc2c   : > { %20374 = vmatprep.subr.bf16.mxu1 %v27715_v40 }
 0xc2d   : > { %v27045_v25 = vadd.f32 %v10728_v3, %v10303_v49  ;;  %v22564_v49 = vld [vmem:[%s27673_s7 + $0xbc8] ss:$20 sps:$4 sm:$0xff]  }
 0xc2e   : > { %12731 = vmatmul.mubr.bf16.vlgmr.msra.gmra.mrb[80].mxu1 %v25766_v45  ;;  %v22577_v3 = vld [vmem:[%s27673_s7 + $0xcdc] ss:$20 sps:$4 sm:$0xff]  }
 0xc2f   : > { %20375 = vmatpush3.bf16.msra.mxu1 %v22561_v57  ;;  %20390 = vmatprep.mubr.msk.bf16.mxu1 %vm22994_vm0, %v27715_v40  ;;  %v22575_v57 = vld [vmem:[%s27673_s7 + $0xcd8] ss:$20 sps:$4 sm:$0xff]  }
 0xc30   : > { %20376 = vmatprep.subr.bf16.mxu1 %v27715_v40 }
 0xc33   : > { %20377 = vmatpush3.bf16.msra.mxu1 %v22562_v51  ;;  %v22578_v51 = vld [vmem:[%s27673_s7 + $0xd00] ss:$20 sps:$4 sm:$0xff]  }
 0xc34   : > { %20378 = vmatprep.subr.bf16.mxu1 %v27715_v40 }
 0xc37   : > { %20379 = vmatpush3.bf16.msra.mxu1 %v22563_v38  ;;  %v22583_v38 = vld [vmem:[%s27673_s7 + $0xd2c] ss:$20 sps:$4 sm:$0xff]  }
 0xc38   : > { %20380 = vmatprep.subr.bf16.mxu1 %v27715_v40 }
 0xc3b   : > { %20381 = vmatpush3.bf16.msra.mxu1 %v22564_v49  ;;  %v22581_v49 = vld [vmem:[%s27673_s7 + $0xd28] ss:$20 sps:$4 sm:$0xff]  }
 0xc3c   : > { %20382 = vmatprep.subr.bf16.mxu1 %v27715_v40 }
 0xc3f   : > { %20383 = vmatpush3.bf16.msra.mxu1 %v22565_v62  ;;  %v22586_v62 = vld [vmem:[%s27673_s7 + $0xd54] ss:$20 sps:$4 sm:$0xff]  }
 0xc40   : > { %20384 = vmatprep.subr.bf16.mxu1 %v27715_v40 }
 0xc41   : > { %v11024_v21 = vpop.f32.mrb[56].mxu1  ;;  %v27070_v17 = vpop.f32.mrb[88].mxu0 }
 0xc42   : > { %v11026_v5 = vpop.f32.mrb[57].mxu1  ;;  %v27072_v61 = vpop.f32.mrb[89].mxu0 }
 0xc43   : > { %v11117_v59 = vcombine.low %v11024_v21, %v11026_v5  ;;  %v14960_v36 = vcombine.low %v27070_v17, %v27072_v61  ;;  %v11028_v33 = vpop.f32.mrb[58].mxu1  ;;  %20385 = vmatpush3.bf16.msra.mxu1 %v22566_v11  ;;  %v14871_v47 = vpop.f32.mrb[90].mxu0  ;;  %v22584_v11 = vld [vmem:[%s27673_s7 + $0xd50] ss:$20 sps:$4 sm:$0xff]  }
 0xc44   : > { %v11029_v19 = vpop.f32.mrb[59].mxu1  ;;  %v14872_v60 = vpop.f32.mrb[91].mxu0  ;;  %20386 = vmatprep.subr.bf16.mxu1 %v27715_v40  ;;  %v22589_v21 = vld [vmem:[%s27673_s7 + $0xd7c] ss:$20 sps:$4 sm:$0xff]  }
 0xc45   : > { %v11125_v28 = vrot.slane %v11117_v59, %v26473_v29 }
 0xc47   : > { %v11140_v46 = vcombine.low %v11125_v28, %v11132_v41  ;;  %20387 = vmatpush3.bf16.msra.mxu1 %v22567_v15  ;;  %v22587_v41 = vld [vmem:[%s27673_s7 + $0xd78] ss:$20 sps:$4 sm:$0xff]  }
 0xc48   : > { %20388 = vmatprep.subr.bf16.mxu1 %v27715_v40 }
 0xc49   : > { %v11147_v28 = vrot.slane %v11140_v46, %v26473_v29  ;;  %v22595_v46 = vld [vmem:[%s27673_s7 + $0xdc4] ss:$20 sps:$4 sm:$0xff]  }
 0xc4b   : > { %20389 = vmatpush3.bf16.msra.mxu1 %v22568_v54 }
 0xc4c   : > { %13166 = vmatprep.subr.bf16.mxu1 %v22571_v31 }
 0xc4e   : > { %20391 = vmatmul.mubr.bf16.vlgmr.msra.gmra.mrb[84].mxu1 %v25766_v45  ;;  %v22580_v45 = vld [vmem:[%s27673_s7 + $0xd04] ss:$20 sps:$4 sm:$0xff]  }
 0xc4f   : > { %13167 = vmatpush1.bf16.msra.mxu1 %v22569_v8  ;;  %13198 = vmatprep.mubr.bf16.mxu1 %v27717_v39 }
 0xc50   : > { %13168 = vmatprep.subr.bf16.mxu1 %v22574_v48  ;;  %v22592_v48 = vld [vmem:[%s27673_s7 + $0xda4] ss:$20 sps:$4 sm:$0xff]  }
 0xc53   : > { %13169 = vmatpush1.bf16.msra.mxu1 %v22572_v27 }
 0xc54   : > { %13170 = vmatprep.subr.bf16.mxu1 %v22577_v3  ;;  %v22590_v3 = vld [vmem:[%s27673_s7 + $0xda0] ss:$20 sps:$4 sm:$0xff]  }
 0xc57   : > { %13171 = vmatpush1.bf16.msra.mxu1 %v22575_v57 }
 0xc58   : > { %13172 = vmatprep.subr.bf16.mxu1 %v22580_v45  ;;  %v22593_v45 = vld [vmem:[%s27673_s7 + $0xdc0] ss:$20 sps:$4 sm:$0xff]  }
 0xc5b   : > { %13173 = vmatpush1.bf16.msra.mxu1 %v22578_v51  ;;  %v22598_v51 = vld [vmem:[%s27673_s7 + $0xdec] ss:$20 sps:$4 sm:$0xff]  }
 0xc5c   : > { %13174 = vmatprep.subr.bf16.mxu1 %v22583_v38  ;;  %v22601_v38 = vld [vmem:[%s27673_s7 + $0xe14] ss:$20 sps:$4 sm:$0xff]  }
 0xc5f   : > { %13175 = vmatpush1.bf16.msra.mxu1 %v22581_v49  ;;  %v22599_v49 = vld [vmem:[%s27673_s7 + $0xe10] ss:$20 sps:$4 sm:$0xff]  }
 0xc60   : > { %13176 = vmatprep.subr.bf16.mxu1 %v22586_v62  ;;  %v22602_v62 = vld [vmem:[%s27673_s7 + $0xe38] ss:$20 sps:$4 sm:$0xff]  }
 0xc61   : > { %v11106_v5 = vpop.f32.mrb[60].mxu1  ;;  %v27130_v59 = vpop.f32.mrb[92].mxu0 }
 0xc62   : > { %v11139_v33 = vrot.slane %v11106_v5, %v26473_v29  ;;  %v20312_v47 = vpop.f32.mrb[61].mxu1  ;;  %v20492_v15 = vpop.f32.mrb[93].mxu0  ;;  %v22610_v5 = vld [vmem:[%s27673_s7 + $0xe8c] ss:$20 sps:$4 sm:$0xff]  }
 0xc63   : > { %v11109_v19 = vpop.f32.mrb[62].mxu1  ;;  %13177 = vmatpush1.bf16.msra.mxu1 %v22584_v11  ;;  %v14952_v60 = vpop.f32.mrb[94].mxu0  ;;  %v22607_v11 = vld [vmem:[%s27673_s7 + $0xe64] ss:$20 sps:$4 sm:$0xff]   ;;  %v22613_v47 = vld [vmem:[%s27673_s7 + $0xeb4] ss:$20 sps:$4 sm:$0xff]  }
 0xc64   : > { %v11154_v54 = vrot.slane %v11139_v33, %v26473_v29  ;;  %v20313_v31 = vpop.f32.mrb[63].mxu1  ;;  %v20493_v8 = vpop.f32.mrb[95].mxu0  ;;  %13178 = vmatprep.subr.bf16.mxu1 %v22589_v21  ;;  %v22605_v21 = vld [vmem:[%s27673_s7 + $0xe60] ss:$20 sps:$4 sm:$0xff]   ;;  %v22608_v33 = vld [vmem:[%s27673_s7 + $0xe88] ss:$20 sps:$4 sm:$0xff]  }
 0xc66   : > { %v11155_v27 = vcombine.low %v11147_v28, %v11154_v54 }
 0xc67   : > { %13179 = vmatpush1.bf16.msra.mxu1 %v22587_v41 }
 0xc68   : > { %v11157_v57 = vadd.f32 %v11155_v27, %v27045_v25  ;;  %13180 = vmatprep.subr.bf16.mxu1 %v22592_v48  ;;  %v22596_v25 = vld [vmem:[%s27673_s7 + $0xde8] ss:$20 sps:$4 sm:$0xff]   ;;  %v22611_v48 = vld [vmem:[%s27673_s7 + $0xeb0] ss:$20 sps:$4 sm:$0xff]  }
 0xc6b   : > { %13181 = vmatpush1.bf16.msra.mxu1 %v22590_v3 }
 0xc6c   : > { %13552 = vmatprep.subr.bf16.mxu1 %v22595_v46  ;;  %v22616_v46 = vld [vmem:[%s27673_s7 + $0xedc] ss:$20 sps:$4 sm:$0xff]  }
 0xc6e   : > { %13199 = vmatmul.mubr.bf16.vlgmr.msra.gmra.mrb[88].mxu1 %v25815_v53  ;;  %v22604_v53 = vld [vmem:[%s27673_s7 + $0xe3c] ss:$20 sps:$4 sm:$0xff]  }
 0xc6f   : > { %13553 = vmatpush1.bf16.msra.mxu1 %v22593_v45  ;;  %13584 = vmatprep.mubr.bf16.mxu1 %v27717_v39  ;;  %v11552_v45 = vrot.slane %v11544_v52, %v26473_v29  ;;  %v22618_v52 = vld [vmem:[%s27673_s7 + $0xdf8] ss:$20 sps:$4 sm:$0xff]  }
 0xc70   : > { %13554 = vmatprep.subr.bf16.mxu1 %v22598_v51  ;;  %v11566_v51 = vrot.slane %v25666_v42, %v26473_v29  ;;  %v22619_v42 = vld [vmem:[%s27673_s7 + $0xe20] ss:$20 sps:$4 sm:$0xff]  }
 0xc73   : > { %13555 = vmatpush1.bf16.msra.mxu1 %v22596_v25 }
 0xc74   : > { %13556 = vmatprep.subr.bf16.mxu1 %v22601_v38 }
 0xc77   : > { %13557 = vmatpush1.bf16.msra.mxu1 %v22599_v49  ;;  %v22614_v49 = vld [vmem:[%s27673_s7 + $0xed8] ss:$20 sps:$4 sm:$0xff]  }
 0xc78   : > { %13558 = vmatprep.subr.bf16.mxu1 %v22604_v53  ;;  %v11581_v53 = vrot.slane %v11566_v51, %v26473_v29  ;;  %v22631_v51 = vld [vmem:[%s27673_s7 + $0xf58] ss:$20 sps:$4 sm:$0xff]  }
 0xc7b   : > { %13559 = vmatpush1.bf16.msra.mxu1 %v22602_v62 }
 0xc7c   : > { %13560 = vmatprep.subr.bf16.mxu1 %v22607_v11 }
 0xc7f   : > { %13561 = vmatpush1.bf16.msra.mxu1 %v22605_v21  ;;  %v22621_v21 = vld [vmem:[%s27673_s7 + $0xe70] ss:$20 sps:$4 sm:$0xff]  }
 0xc80   : > { %13562 = vmatprep.subr.bf16.mxu1 %v22610_v5  ;;  %v22622_v5 = vld [vmem:[%s27673_s7 + $0xe98] ss:$20 sps:$4 sm:$0xff]  }
 0xc81   : > { %v11492_v15 = vpop.f32.mrb[64].mxu1  ;;  %v27186_v19 = vpop.f32.mrb[96].mxu0 }
 0xc82   : > { %v11494_v60 = vpop.f32.mrb[65].mxu1  ;;  %v27188_v41 = vpop.f32.mrb[97].mxu0 }
 0xc83   : > { %v11545_v28 = vcombine.low %v11492_v15, %v11494_v60  ;;  %v15388_v54 = vcombine.low %v27186_v19, %v27188_v41  ;;  %v11496_v31 = vpop.f32.mrb[66].mxu1  ;;  %13563 = vmatpush1.bf16.msra.mxu1 %v22608_v33  ;;  %v15339_v8 = vpop.f32.mrb[98].mxu0  ;;  %v15527_v19 = vsub.s32 3, %v23308_v2  ;;  %v15515_v41 = vsub.s32 0, %v23308_v2 }
 0xc84   : > { %v11497_v27 = vpop.f32.mrb[67].mxu1  ;;  %v15340_v3 = vpop.f32.mrb[99].mxu0  ;;  %13564 = vmatprep.subr.bf16.mxu1 %v22613_v47  ;;  %v11986_v8 = vrot.slane %v11972_v12, %v26473_v29  ;;  %v22628_v12 = vld [vmem:[%s27673_s7 + $0xf30] ss:$20 sps:$4 sm:$0xff]  }
 0xc85   : > { %v11559_v25 = vrot.slane %v11545_v28, %v26473_v29  ;;  %v22623_v28 = vld [vmem:[%s27673_s7 + $0xec0] ss:$20 sps:$4 sm:$0xff]   ;;  %v22624_v3 = vld [vmem:[%s27673_s7 + $0xee8] ss:$20 sps:$4 sm:$0xff]   ;;  %v15402_v17 = vrot.slane %v15388_v54, %v26473_v29  ;;  %v15523_v54 = vsub.s32 2, %v23308_v2 }
 0xc87   : > { %v11567_v38 = vcombine.low %v11552_v45, %v11559_v25  ;;  %13565 = vmatpush1.bf16.msra.mxu1 %v22611_v48  ;;  %v22633_v45 = vld [vmem:[%s27673_s7 + $0xf5c] ss:$20 sps:$4 sm:$0xff]   ;;  %v22634_v25 = vld [vmem:[%s27673_s7 + $0xf80] ss:$20 sps:$4 sm:$0xff]  }
 0xc88   : > { %13566 = vmatprep.subr.bf16.mxu1 %v22616_v46  ;;  %v22627_v46 = vld [vmem:[%s27673_s7 + $0xf0c] ss:$20 sps:$4 sm:$0xff]  }
 0xc89   : > { %v11574_v62 = vrot.slane %v11567_v38, %v26473_v29  ;;  %v22639_v38 = vld [vmem:[%s27673_s7 + $0xfac] ss:$20 sps:$4 sm:$0xff]  }
 0xc8b   : > { %v11582_v11 = vcombine.low %v11574_v62, %v11581_v53  ;;  %13567 = vmatpush1.bf16.msra.mxu1 %v22614_v49  ;;  %v22637_v49 = vld [vmem:[%s27673_s7 + $0xfa8] ss:$20 sps:$4 sm:$0xff]   ;;  %v22640_v62 = vld [vmem:[%s27673_s7 + $0xfd0] ss:$20 sps:$4 sm:$0xff]  }
 0xc8c   : > { %20414 = vmatprep.subr.bf16.mxu1 %v27715_v40  ;;  %v22642_v53 = vld [vmem:[%s27673_s7 + $0xfd4] ss:$20 sps:$4 sm:$0xff]  }
 0xc8d   : > { %v27214_v4 = vadd.f32 %v11582_v11, %v11157_v57  ;;  %v22620_v57 = vld [vmem:[%s27673_s7 + $0xe48] ss:$20 sps:$4 sm:$0xff]  }
 0xc8e   : > { %13585 = vmatmul.mubr.bf16.vlgmr.msra.gmra.mrb[92].mxu1 %v25942_v7  ;;  %v22645_v11 = vld [vmem:[%s27673_s7 + $0xffc] ss:$20 sps:$4 sm:$0xff]  }
 0xc8f   : > { %20415 = vmatpush3.bf16.msra.mxu1 %v22617_v14  ;;  %20430 = vmatprep.mubr.msk.bf16.mxu1 %vm22994_vm0, %v27715_v40 }
 0xc90   : > { %20416 = vmatprep.subr.bf16.mxu1 %v27715_v40 }
 0xc93   : > { %20417 = vmatpush3.bf16.msra.mxu1 %v22618_v52 }
 0xc94   : > { %20418 = vmatprep.subr.bf16.mxu1 %v27715_v40 }
 0xc97   : > { %20419 = vmatpush3.bf16.msra.mxu1 %v22619_v42 }
 0xc98   : > { %20420 = vmatprep.subr.bf16.mxu1 %v27715_v40 }
 0xc9b   : > { %20421 = vmatpush3.bf16.msra.mxu1 %v22620_v57 }
 0xc9c   : > { %20422 = vmatprep.subr.bf16.mxu1 %v27715_v40 }
 0xc9f   : > { %20423 = vmatpush3.bf16.msra.mxu1 %v22621_v21  ;;  %v22643_v21 = vld [vmem:[%s27673_s7 + $0xff8] ss:$20 sps:$4 sm:$0xff]  }
 0xca0   : > { %20424 = vmatprep.subr.bf16.mxu1 %v27715_v40 }
 0xca1   : > { %v11878_v33 = vpop.f32.mrb[68].mxu1 }
 0xca2   : > { %v11880_v47 = vpop.f32.mrb[69].mxu1 }
 0xca3   : > { %v11971_v15 = vcombine.low %v11878_v33, %v11880_v47  ;;  %v11882_v60 = vpop.f32.mrb[70].mxu1  ;;  %20425 = vmatpush3.bf16.msra.mxu1 %v22622_v5 }
 0xca4   : > { %v11883_v31 = vpop.f32.mrb[71].mxu1  ;;  %20426 = vmatprep.subr.bf16.mxu1 %v27715_v40 }
 0xca5   : > { %v11979_v48 = vrot.slane %v11971_v15, %v26473_v29  ;;  %v22648_v15 = vld [vmem:[%s27673_s7 + $0x1024] ss:$20 sps:$4 sm:$0xff]  }
 0xca7   : > { %v11994_v27 = vcombine.low %v11979_v48, %v11986_v8  ;;  %20427 = vmatpush3.bf16.msra.mxu1 %v22623_v28  ;;  %v22646_v28 = vld [vmem:[%s27673_s7 + $0x1020] ss:$20 sps:$4 sm:$0xff]   ;;  %v22651_v8 = vld [vmem:[%s27673_s7 + $0x1044] ss:$20 sps:$4 sm:$0xff]  }
 0xca8   : > { %20428 = vmatprep.subr.bf16.mxu1 %v27715_v40  ;;  %v22649_v48 = vld [vmem:[%s27673_s7 + $0x1040] ss:$20 sps:$4 sm:$0xff]  }
 0xca9   : > { %v12001_v5 = vrot.slane %v11994_v27, %v26473_v29  ;;  %v22654_v27 = vld [vmem:[%s27673_s7 + $0x106c] ss:$20 sps:$4 sm:$0xff]  }
 0xcab   : > { %20429 = vmatpush3.bf16.msra.mxu1 %v22624_v3  ;;  %v22657_v3 = vld [vmem:[%s27673_s7 + $0x1094] ss:$20 sps:$4 sm:$0xff]  }
 0xcac   : > { %14020 = vmatprep.subr.bf16.mxu1 %v22627_v46  ;;  %v22655_v46 = vld [vmem:[%s27673_s7 + $0x1090] ss:$20 sps:$4 sm:$0xff]  }
 0xcae   : > { %20431 = vmatmul.mubr.bf16.vlgmr.msra.gmra.mrb[96].mxu1 %v25942_v7  ;;  %v22636_v7 = vld [vmem:[%s27673_s7 + $0xf84] ss:$20 sps:$4 sm:$0xff]  }
 0xcaf   : > { %14021 = vmatpush1.bf16.msra.mxu1 %v22625_v44  ;;  %14052 = vmatprep.mubr.bf16.mxu1 %v27717_v39  ;;  %v22658_v44 = vld [vmem:[%s27673_s7 + $0x10b8] ss:$20 sps:$4 sm:$0xff]  }
 0xcb0   : > { %14022 = vmatprep.subr.bf16.mxu1 %v22630_v16  ;;  %v22663_v16 = vld [vmem:[%s27673_s7 + $0x10e4] ss:$20 sps:$4 sm:$0xff]  }
 0xcb3   : > { %14023 = vmatpush1.bf16.msra.mxu1 %v22628_v12  ;;  %v22661_v12 = vld [vmem:[%s27673_s7 + $0x10e0] ss:$20 sps:$4 sm:$0xff]  }
 0xcb4   : > { %14024 = vmatprep.subr.bf16.mxu1 %v22633_v45  ;;  %v22666_v45 = vld [vmem:[%s27673_s7 + $0x110c] ss:$20 sps:$4 sm:$0xff]  }
 0xcb7   : > { %14025 = vmatpush1.bf16.msra.mxu1 %v22631_v51  ;;  %v22664_v51 = vld [vmem:[%s27673_s7 + $0x1108] ss:$20 sps:$4 sm:$0xff]  }
 0xcb8   : > { %14026 = vmatprep.subr.bf16.mxu1 %v22636_v7  ;;  %v22669_v7 = vld [vmem:[%s27673_s7 + $0x1134] ss:$20 sps:$4 sm:$0xff]  }
 0xcbb   : > { %14027 = vmatpush1.bf16.msra.mxu1 %v22634_v25 }
 0xcbc   : > { %14028 = vmatprep.subr.bf16.mxu1 %v22639_v38 }
 0xcbf   : > { %14029 = vmatpush1.bf16.msra.mxu1 %v22637_v49 }
 0xcc0   : > { %14030 = vmatprep.subr.bf16.mxu1 %v22642_v53 }
 0xcc1   : > { %v11960_v14 = vpop.f32.mrb[72].mxu1 }
 0xcc2   : > { %v11993_v52 = vrot.slane %v11960_v14, %v26473_v29  ;;  %v20352_v42 = vpop.f32.mrb[73].mxu1  ;;  %v22672_v14 = vld [vmem:[%s27673_s7 + $0x115c] ss:$20 sps:$4 sm:$0xff]  }
 0xcc3   : > { %v11963_v57 = vpop.f32.mrb[74].mxu1  ;;  %14031 = vmatpush1.bf16.msra.mxu1 %v22640_v62  ;;  %v22667_v62 = vld [vmem:[%s27673_s7 + $0x1130] ss:$20 sps:$4 sm:$0xff]   ;;  %v12420_v42 = vrot.slane %v26123_v0, %v26473_v29  ;;  %v22675_v0 = vld [vmem:[%s27673_s7 + $0x10a0] ss:$20 sps:$4 sm:$0xff]  }
 0xcc4   : > { %v12008_v33 = vrot.slane %v11993_v52, %v26473_v29  ;;  %v20353_v47 = vpop.f32.mrb[75].mxu1  ;;  %14032 = vmatprep.subr.bf16.mxu1 %v22645_v11  ;;  %v12406_v52 = vrot.slane %v12398_v1, %v26473_v29  ;;  %v22674_v1 = vld [vmem:[%s27673_s7 + $0x1078] ss:$20 sps:$4 sm:$0xff]  }
 0xcc6   : > { %v12009_v60 = vcombine.low %v12001_v5, %v12008_v33  ;;  %v22670_v5 = vld [vmem:[%s27673_s7 + $0x1158] ss:$20 sps:$4 sm:$0xff]   ;;  %v12435_v33 = vrot.slane %v12420_v42, %v26473_v29 }
 0xcc7   : > { %14033 = vmatpush1.bf16.msra.mxu1 %v22643_v21 }
 0xcc8   : > { %v12011_v31 = vadd.f32 %v12009_v60, %v27214_v4  ;;  %14034 = vmatprep.subr.bf16.mxu1 %v22648_v15  ;;  %v22652_v4 = vld [vmem:[%s27673_s7 + $0x1068] ss:$20 sps:$4 sm:$0xff]  }
 0xcc9   : > { %v22676_v60 = vld [vmem:[%s27673_s7 + $0x10c8] ss:$20 sps:$4 sm:$0xff]  }
 0xccb   : > { %14035 = vmatpush1.bf16.msra.mxu1 %v22646_v28  ;;  %v22677_v28 = vld [vmem:[%s27673_s7 + $0x10f0] ss:$20 sps:$4 sm:$0xff]  }
 0xccc   : > { %14406 = vmatprep.subr.bf16.mxu1 %v22651_v8 }
 0xcce   : > { %14053 = vmatmul.mubr.bf16.vlgmr.msra.gmra.mrb[100].mxu1 %v26314_v26  ;;  %v22660_v26 = vld [vmem:[%s27673_s7 + $0x10bc] ss:$20 sps:$4 sm:$0xff]  }
 0xccf   : > { %14407 = vmatpush1.bf16.msra.mxu1 %v22649_v48  ;;  %14438 = vmatprep.mubr.bf16.mxu1 %v27717_v39 }
 0xcd0   : > { %14408 = vmatprep.subr.bf16.mxu1 %v22654_v27 }
 0xcd3   : > { %14409 = vmatpush1.bf16.msra.mxu1 %v22652_v4 }
 0xcd4   : > { %14410 = vmatprep.subr.bf16.mxu1 %v22657_v3  ;;  %v22679_v3 = vld [vmem:[%s27673_s7 + $0x1140] ss:$20 sps:$4 sm:$0xff]  }
 0xcd7   : > { %14411 = vmatpush1.bf16.msra.mxu1 %v22655_v46 }
 0xcd8   : > { %14412 = vmatprep.subr.bf16.mxu1 %v22660_v26  ;;  %v27720_v26 = vcombine.low %v26169_v32, %v26171_v34  ;;  %v22681_v32 = vld [vmem:[%s27673_s7 + $0x1188] ss:$20 sps:$4 sm:$0xff]  }
 0xcd9   : > { %v22686_v34 = vld [vmem:[%s27673_s7 + $0x11b4] ss:$20 sps:$4 sm:$0xff]  }
 0xcdb   : > { %14413 = vmatpush1.bf16.msra.mxu1 %v22658_v44  ;;  %v12840_v44 = vrot.slane %v27720_v26, %v26473_v29  ;;  %v22722_v26 = vld [vmem:[%s27673_s7 + $0x138c] ss:$20 sps:$4 sm:$0xff]  }
 0xcdc   : > { %14414 = vmatprep.subr.bf16.mxu1 %v22663_v16 }
 0xcdf   : > { %14415 = vmatpush1.bf16.msra.mxu1 %v22661_v12 }
 0xce0   : > { %14416 = vmatprep.subr.bf16.mxu1 %v22666_v45  ;;  %v22680_v45 = vld [vmem:[%s27673_s7 + $0x1168] ss:$20 sps:$4 sm:$0xff]  }
 0xce1   : > { %v12346_v25 = vpop.f32.mrb[76].mxu1 }
 0xce2   : > { %v12348_v38 = vpop.f32.mrb[77].mxu1 }
 0xce3   : > { %v12399_v49 = vcombine.low %v12346_v25, %v12348_v38  ;;  %v12350_v53 = vpop.f32.mrb[78].mxu1  ;;  %14417 = vmatpush1.bf16.msra.mxu1 %v22664_v51  ;;  %v22683_v51 = vld [vmem:[%s27673_s7 + $0x118c] ss:$20 sps:$4 sm:$0xff]   ;;  %v22689_v25 = vld [vmem:[%s27673_s7 + $0x11dc] ss:$20 sps:$4 sm:$0xff]  }
 0xce4   : > { %v12351_v11 = vpop.f32.mrb[79].mxu1  ;;  %14418 = vmatprep.subr.bf16.mxu1 %v22669_v7  ;;  %v22684_v7 = vld [vmem:[%s27673_s7 + $0x11b0] ss:$20 sps:$4 sm:$0xff]   ;;  %v22687_v38 = vld [vmem:[%s27673_s7 + $0x11d8] ss:$20 sps:$4 sm:$0xff]  }
 0xce5   : > { %v12413_v57 = vrot.slane %v12399_v49, %v26473_v29  ;;  %v22690_v49 = vld [vmem:[%s27673_s7 + $0x1200] ss:$20 sps:$4 sm:$0xff]  }
 0xce6   : > { %v22695_v53 = vld [vmem:[%s27673_s7 + $0x122c] ss:$20 sps:$4 sm:$0xff]   ;;  %v22698_v11 = vld [vmem:[%s27673_s7 + $0x1254] ss:$20 sps:$4 sm:$0xff]  }
 0xce7   : > { %v12421_v21 = vcombine.low %v12406_v52, %v12413_v57  ;;  %14419 = vmatpush1.bf16.msra.mxu1 %v22667_v62  ;;  %v22693_v62 = vld [vmem:[%s27673_s7 + $0x1228] ss:$20 sps:$4 sm:$0xff]  }
 0xce8   : > { %14420 = vmatprep.subr.bf16.mxu1 %v22672_v14  ;;  %v22696_v14 = vld [vmem:[%s27673_s7 + $0x1250] ss:$20 sps:$4 sm:$0xff]  }
 0xce9   : > { %v12428_v47 = vrot.slane %v12421_v21, %v26473_v29  ;;  %v22701_v52 = vld [vmem:[%s27673_s7 + $0x127c] ss:$20 sps:$4 sm:$0xff]  }
 0xceb   : > { %v12436_v15 = vcombine.low %v12428_v47, %v12435_v33  ;;  %14421 = vmatpush1.bf16.msra.mxu1 %v22670_v5  ;;  %v22699_v33 = vld [vmem:[%s27673_s7 + $0x1278] ss:$20 sps:$4 sm:$0xff]  }
 0xcec   : > { %20454 = vmatprep.subr.bf16.mxu1 %v27715_v40 }
 0xced   : > { %v27369_v6 = vadd.f32 %v12436_v15, %v12011_v31  ;;  %v22678_v31 = vld [vmem:[%s27673_s7 + $0x1118] ss:$20 sps:$4 sm:$0xff]  }
 0xcee   : > { %14439 = vmatmul.mubr.bf16.vlgmr.msra.gmra.mrb[104].mxu1 %v26516_v37 }
 0xcef   : > { %20455 = vmatpush3.bf16.msra.mxu1 %v22673_v9  ;;  %20470 = vmatprep.mubr.msk.bf16.mxu1 %vm22994_vm0, %v27715_v40 }
 0xcf0   : > { %20456 = vmatprep.subr.bf16.mxu1 %v27715_v40 }
 0xcf3   : > { %20457 = vmatpush3.bf16.msra.mxu1 %v22674_v1  ;;  %v22704_v1 = vld [vmem:[%s27673_s7 + $0x12a4] ss:$20 sps:$4 sm:$0xff]  }
 0xcf4   : > { %20458 = vmatprep.subr.bf16.mxu1 %v27715_v40 }
 0xcf7   : > { %20459 = vmatpush3.bf16.msra.mxu1 %v22675_v0 }
 0xcf8   : > { %20460 = vmatprep.subr.bf16.mxu1 %v27715_v40 }
 0xcfb   : > { %20461 = vmatpush3.bf16.msra.mxu1 %v22676_v60  ;;  %v22702_v60 = vld [vmem:[%s27673_s7 + $0x12a0] ss:$20 sps:$4 sm:$0xff]  }
 0xcfc   : > { %20462 = vmatprep.subr.bf16.mxu1 %v27715_v40 }
 0xcff   : > { %20463 = vmatpush3.bf16.msra.mxu1 %v22677_v28 }
 0xd00   : > { %20464 = vmatprep.subr.bf16.mxu1 %v27715_v40 }
 0xd01   : > { %v12732_v8 = vpop.f32.mrb[80].mxu1 }
 0xd02   : > { %v12734_v48 = vpop.f32.mrb[81].mxu1 }
 0xd03   : > { %v12825_v27 = vcombine.low %v12732_v8, %v12734_v48  ;;  %v12736_v4 = vpop.f32.mrb[82].mxu1  ;;  %20465 = vmatpush3.bf16.msra.mxu1 %v22678_v31  ;;  %v22707_v31 = vld [vmem:[%s27673_s7 + $0x12c4] ss:$20 sps:$4 sm:$0xff]   ;;  %v22705_v8 = vld [vmem:[%s27673_s7 + $0x12c0] ss:$20 sps:$4 sm:$0xff]  }
 0xd04   : > { %v12737_v46 = vpop.f32.mrb[83].mxu1  ;;  %20466 = vmatprep.subr.bf16.mxu1 %v27715_v40  ;;  %v22710_v48 = vld [vmem:[%s27673_s7 + $0x12ec] ss:$20 sps:$4 sm:$0xff]   ;;  %v22711_v4 = vld [vmem:[%s27673_s7 + $0x1310] ss:$20 sps:$4 sm:$0xff]  }
 0xd05   : > { %v12833_v16 = vrot.slane %v12825_v27, %v26473_v29  ;;  %v22713_v27 = vld [vmem:[%s27673_s7 + $0x1314] ss:$20 sps:$4 sm:$0xff]  }
 0xd06   : > { %v22717_v46 = vld [vmem:[%s27673_s7 + $0x1360] ss:$20 sps:$4 sm:$0xff]  }
 0xd07   : > { %v12848_v12 = vcombine.low %v12833_v16, %v12840_v44  ;;  %20467 = vmatpush3.bf16.msra.mxu1 %v22679_v3  ;;  %v22719_v3 = vld [vmem:[%s27673_s7 + $0x1364] ss:$20 sps:$4 sm:$0xff]   ;;  %v22720_v44 = vld [vmem:[%s27673_s7 + $0x1388] ss:$20 sps:$4 sm:$0xff]  }
 0xd08   : > { %20468 = vmatprep.subr.bf16.mxu1 %v27715_v40  ;;  %v22725_v16 = vld [vmem:[%s27673_s7 + $0x13b4] ss:$20 sps:$4 sm:$0xff]  }
 0xd09   : > { %v12855_v47 = vrot.slane %v12848_v12, %v26473_v29 }
 0xd0b   : > { %20469 = vmatpush3.bf16.msra.mxu1 %v22680_v45 }
 0xd0c   : > { %14874 = vmatprep.subr.bf16.mxu1 %v22683_v51 }
 0xd0e   : > { %20471 = vmatmul.mubr.bf16.vlgmr.msra.gmra.mrb[108].mxu1 %v26516_v37  ;;  %v22692_v37 = vld [vmem:[%s27673_s7 + $0x1204] ss:$20 sps:$4 sm:$0xff]  }
 0xd0f   : > { %14875 = vmatpush1.bf16.msra.mxu1 %v22681_v32  ;;  %14906 = vmatprep.mubr.bf16.mxu1 %v27717_v39 }
 0xd10   : > { %14876 = vmatprep.subr.bf16.mxu1 %v22686_v34  ;;  %v22723_v34 = vld [vmem:[%s27673_s7 + $0x13b0] ss:$20 sps:$4 sm:$0xff]  }
 0xd13   : > { %14877 = vmatpush1.bf16.msra.mxu1 %v22684_v7 }
 0xd14   : > { %14878 = vmatprep.subr.bf16.mxu1 %v22689_v25  ;;  %v22728_v25 = vld [vmem:[%s27673_s7 + $0x13dc] ss:$20 sps:$4 sm:$0xff]  }
 0xd17   : > { %14879 = vmatpush1.bf16.msra.mxu1 %v22687_v38  ;;  %v27721_v38 = vcombine.low %v26216_v58, %v26218_v20  ;;  %v22729_v58 = vld [vmem:[%s27673_s7 + $0x12d0] ss:$20 sps:$4 sm:$0xff]  }
 0xd18   : > { %14880 = vmatprep.subr.bf16.mxu1 %v22692_v37 }
 0xd19   : > { %v13260_v37 = vrot.slane %v27721_v38, %v26473_v29  ;;  %v15448_v38 = vld [vmem:[#allocation11 + $0x88] sm:$0xff] }
 0xd1b   : > { %14881 = vmatpush1.bf16.msra.mxu1 %v22690_v49  ;;  %v13274_v49 = vrot.slane %v26272_v22, %v26473_v29  ;;  %v22730_v22 = vld [vmem:[%s27673_s7 + $0x12f8] ss:$20 sps:$4 sm:$0xff]  }
 0xd1c   : > { %14882 = vmatprep.subr.bf16.mxu1 %v22695_v53 }
 0xd1f   : > { %14883 = vmatpush1.bf16.msra.mxu1 %v22693_v62 }
 0xd20   : > { %14884 = vmatprep.subr.bf16.mxu1 %v22698_v11  ;;  %v22726_v11 = vld [vmem:[%s27673_s7 + $0x13d8] ss:$20 sps:$4 sm:$0xff]  }
 0xd21   : > { %v12814_v42 = vpop.f32.mrb[84].mxu1 }
 0xd22   : > { %v12847_v57 = vrot.slane %v12814_v42, %v26473_v29  ;;  %v20392_v21 = vpop.f32.mrb[85].mxu1 }
 0xd23   : > { %v12817_v5 = vpop.f32.mrb[86].mxu1  ;;  %14885 = vmatpush1.bf16.msra.mxu1 %v22696_v14  ;;  %v13289_v14 = vrot.slane %v13274_v49, %v26473_v29  ;;  %v22732_v21 = vld [vmem:[%s27673_s7 + $0x1348] ss:$20 sps:$4 sm:$0xff]  }
 0xd24   : > { %v12862_v15 = vrot.slane %v12847_v57, %v26473_v29  ;;  %v20393_v9 = vpop.f32.mrb[87].mxu1  ;;  %14886 = vmatprep.subr.bf16.mxu1 %v22701_v52  ;;  %v22731_v57 = vld [vmem:[%s27673_s7 + $0x1320] ss:$20 sps:$4 sm:$0xff]   ;;  %v22733_v5 = vld [vmem:[%s27673_s7 + $0x1370] ss:$20 sps:$4 sm:$0xff]  }
 0xd26   : > { %v12863_v0 = vcombine.low %v12855_v47, %v12862_v15 }
 0xd27   : > { %14887 = vmatpush1.bf16.msra.mxu1 %v22699_v33  ;;  %v22734_v33 = vld [vmem:[%s27673_s7 + $0x1398] ss:$20 sps:$4 sm:$0xff]  }
 0xd28   : > { %v12865_v28 = vadd.f32 %v12863_v0, %v27369_v6  ;;  %14888 = vmatprep.subr.bf16.mxu1 %v22704_v1  ;;  %v22708_v6 = vld [vmem:[%s27673_s7 + $0x12e8] ss:$20 sps:$4 sm:$0xff]   ;;  %v22735_v0 = vld [vmem:[%s27673_s7 + $0x13c0] ss:$20 sps:$4 sm:$0xff]  }
 0xd2b   : > { %14889 = vmatpush1.bf16.msra.mxu1 %v22702_v60 }
 0xd2c   : > { %15260 = vmatprep.subr.bf16.mxu1 %v22707_v31 }
 0xd2e   : > { %14907 = vmatmul.mubr.bf16.vlgmr.msra.gmra.mrb[112].mxu1 %v26625_v18  ;;  %v22716_v18 = vld [vmem:[%s27673_s7 + $0x133c] ss:$20 sps:$4 sm:$0xff]  }
 0xd2f   : > { %15261 = vmatpush1.bf16.msra.mxu1 %v22705_v8  ;;  %15292 = vmatprep.mubr.bf16.mxu1 %v27717_v39  ;;  %v22714_v39 = vld [vmem:[%s27673_s7 + $0x1338] ss:$20 sps:$4 sm:$0xff]  }
 0xd30   : > { %15262 = vmatprep.subr.bf16.mxu1 %v22710_v48 }
 0xd33   : > { %15263 = vmatpush1.bf16.msra.mxu1 %v22708_v6  ;;  %v22736_v6 = vld [vmem:[%s27673_s7 + $0x13e8] ss:$20 sps:$4 sm:$0xff]  }
 0xd34   : > { %15264 = vmatprep.subr.bf16.mxu1 %v22713_v27 }
 0xd37   : > { %15265 = vmatpush1.bf16.msra.mxu1 %v22711_v4 }
 0xd38   : > { %15266 = vmatprep.subr.bf16.mxu1 %v22716_v18 }
 0xd3b   : > { %15267 = vmatpush1.bf16.msra.mxu1 %v22714_v39 }
 0xd3c   : > { %15268 = vmatprep.subr.bf16.mxu1 %v22719_v3 }
 0xd3f   : > { %15269 = vmatpush1.bf16.msra.mxu1 %v22717_v46 }
 0xd40   : > { %15270 = vmatprep.subr.bf16.mxu1 %v22722_v26 }
 0xd41   : > { %v13200_v12 = vpop.f32.mrb[88].mxu1 }
 0xd42   : > { %v13202_v45 = vpop.f32.mrb[89].mxu1 }
 0xd43   : > { %v13253_v51 = vcombine.low %v13200_v12, %v13202_v45  ;;  %v13204_v32 = vpop.f32.mrb[90].mxu1  ;;  %15271 = vmatpush1.bf16.msra.mxu1 %v22720_v44 }
 0xd44   : > { %v13205_v7 = vpop.f32.mrb[91].mxu1  ;;  %15272 = vmatprep.subr.bf16.mxu1 %v22725_v16  ;;  %v14128_v32 = vrot.slane %v26961_v63, %v26473_v29 }
 0xd45   : > { %v13267_v53 = vrot.slane %v13253_v51, %v26473_v29 }
 0xd47   : > { %v13275_v62 = vcombine.low %v13260_v37, %v13267_v53  ;;  %15273 = vmatpush1.bf16.msra.mxu1 %v22723_v34  ;;  %v15431_v37 = vld [vmem:[#allocation11] sm:$0xff]  ;;  %v15432_v53 = vld [vmem:[#allocation11 + $0x8] sm:$0xff] }
 0xd48   : > { %15274 = vmatprep.subr.bf16.mxu1 %v22728_v25  ;;  %v15447_v25 = vld [vmem:[#allocation11 + $0x80] sm:$0xff] }
 0xd49   : > { %v13282_v52 = vrot.slane %v13275_v62, %v26473_v29  ;;  %v21477_v49 = vpack.c.bf16 %v15448_v38, %v15447_v25  ;;  %v15479_v62 = vld [vmem:[#allocation11 + $0x180] sm:$0xff]  ;;  %v15456_v38 = vld [vmem:[#allocation11 + $0xc8] sm:$0xff] }
 0xd4a   : > { %v15455_v25 = vld [vmem:[#allocation11 + $0xc0] sm:$0xff] }
 0xd4b   : > { %v13290_v42 = vcombine.low %v13282_v52, %v13289_v14  ;;  %15275 = vmatpush1.bf16.msra.mxu1 %v22726_v11  ;;  %v15480_v11 = vld [vmem:[#allocation11 + $0x188] sm:$0xff]  ;;  %v14143_v14 = vrot.slane %v14128_v32, %v26473_v29  ;;  %21478 = vmatprep.subr.bf16.mxu0 %v21477_v49  ;;  %v15487_v49 = vld [vmem:[#allocation11 + $0x1c0] sm:$0xff] }
 0xd4c   : > { %20494 = vmatprep.subr.bf16.mxu1 %v27715_v40  ;;  %v21509_v24 = vpack.c.bf16 %v15480_v11, %v15479_v62  ;;  %v21493_v11 = vpack.c.bf16 %v15456_v38, %v15455_v25  ;;  %v15494_v38 = vld [vmem:[#allocation11 + $0x1f8] sm:$0xff] }
 0xd4d   : > { %v13292_v20 = vadd.f32 %v13290_v42, %v12865_v28  ;;  %v27722_v28 = vcombine.low %v26326_v56, %v26332_v10  ;;  %v21479_v42 = vpack.c.bf16 %v15432_v53, %v15431_v37  ;;  %v15488_v53 = vld [vmem:[#allocation11 + $0x1c8] sm:$0xff] }
 0xd4e   : > { %15293 = vmatmul.mubr.bf16.vlgmr.msra.gmra.mrb[116].mxu1 %v26816_v13 }
 0xd4f   : > { %20495 = vmatpush3.bf16.msra.mxu1 %v22729_v58  ;;  %20510 = vmatprep.mubr.msk.bf16.mxu1 %vm22994_vm0, %v27715_v40  ;;  %v13694_v31 = vrot.slane %v27722_v28, %v26473_v29  ;;  %v15449_v58 = vld [vmem:[#allocation11 + $0x90] sm:$0xff]  ;;  %v15452_v28 = vld [vmem:[#allocation11 + $0xa8] sm:$0xff] }
 0xd50   : > { %20496 = vmatprep.subr.bf16.mxu1 %v27715_v40  ;;  %21480 = vmatpush3.bf16.msra.mxu0 %v21479_v42  ;;  %v21525_v42 = vpack.c.bf16 %v15488_v53, %v15487_v49  ;;  %v15478_v49 = vld [vmem:[#allocation11 + $0x178] sm:$0xff] }
 0xd53   : > { %20497 = vmatpush3.bf16.msra.mxu1 %v22730_v22  ;;  %v15433_v22 = vld [vmem:[#allocation11 + $0x10] sm:$0xff] }
 0xd54   : > { %20498 = vmatprep.subr.bf16.mxu1 %v27715_v40 }
 0xd57   : > { %20499 = vmatpush3.bf16.msra.mxu1 %v22731_v57  ;;  %v15434_v57 = vld [vmem:[#allocation11 + $0x18] sm:$0xff] }
 0xd58   : > { %20500 = vmatprep.subr.bf16.mxu1 %v27715_v40 }
 0xd5b   : > { %20501 = vmatpush3.bf16.msra.mxu1 %v22732_v21 }
 0xd5c   : > { %20502 = vmatprep.subr.bf16.mxu1 %v27715_v40 }
 0xd5f   : > { %20503 = vmatpush3.bf16.msra.mxu1 %v22733_v5 }
 0xd60   : > { %20504 = vmatprep.subr.bf16.mxu1 %v27715_v40 }
 0xd61   : > { %v13586_v47 = vpop.f32.mrb[92].mxu1 }
 0xd62   : > { %v13588_v15 = vpop.f32.mrb[93].mxu1 }
 0xd63   : > { %v13679_v9 = vcombine.low %v13586_v47, %v13588_v15  ;;  %v13590_v1 = vpop.f32.mrb[94].mxu1  ;;  %20505 = vmatpush3.bf16.msra.mxu1 %v22734_v33  ;;  %v21483_v33 = vpack.c.bf16 %v15434_v57, %v15433_v22  ;;  %v15481_v47 = vld [vmem:[#allocation11 + $0x190] sm:$0xff]  ;;  %v15482_v15 = vld [vmem:[#allocation11 + $0x198] sm:$0xff] }
 0xd64   : > { %v13591_v60 = vpop.f32.mrb[95].mxu1  ;;  %20506 = vmatprep.subr.bf16.mxu1 %v27715_v40  ;;  %v21513_v1 = vpack.c.bf16 %v15482_v15, %v15481_v47 }
 0xd65   : > { %v13687_v8 = vrot.slane %v13679_v9, %v26473_v29  ;;  %v15465_v9 = vld [vmem:[#allocation11 + $0x110] sm:$0xff]  ;;  %v15451_v60 = vld [vmem:[#allocation11 + $0xa0] sm:$0xff] }
 0xd67   : > { %v13702_v48 = vcombine.low %v13687_v8, %v13694_v31  ;;  %20507 = vmatpush3.bf16.msra.mxu1 %v22735_v0  ;;  %v15466_v0 = vld [vmem:[#allocation11 + $0x118] sm:$0xff] }
 0xd68   : > { %20508 = vmatprep.subr.bf16.mxu1 %v27715_v40  ;;  %v21515_v8 = vpack.c.bf16 %v15466_v0, %v15465_v9  ;;  %v15490_v9 = vld [vmem:[#allocation11 + $0x1d8] sm:$0xff] }
 0xd69   : > { %v13709_v56 = vrot.slane %v13702_v48, %v26473_v29  ;;  %v21485_v48 = vpack.c.bf16 %v15452_v28, %v15451_v60  ;;  %v15474_v0 = vld [vmem:[#allocation11 + $0x158] sm:$0xff] }
 0xd6b   : > { %20509 = vmatpush3.bf16.msra.mxu1 %v22736_v6  ;;  %v15435_v6 = vld [vmem:[#allocation11 + $0x20] sm:$0xff] }
 0xd6c   : > { %21510 = vmatprep.subr.bf16.mxu1 %v21509_v24 }
 0xd6e   : > { %20511 = vmatmul.mubr.bf16.vlgmr.msra.gmra.mrb[120].mxu1 %v26816_v13  ;;  %v14114_v13 = vrot.slane %v14106_v23, %v26473_v29  ;;  %v15464_v23 = vld [vmem:[#allocation11 + $0x108] sm:$0xff] }
 0xd6f   : > { %v21511_v63 = vpack.c.bf16 %v15464_v23, %v15463_v43  ;;  %v15471_v43 = vld [vmem:[#allocation11 + $0x140] sm:$0xff]  ;;  %v15472_v23 = vld [vmem:[#allocation11 + $0x148] sm:$0xff] }
 0xd71   : > { %21512 = vmatpush3.bf16.msra.mxu1 %v21511_v63  ;;  %v15457_v63 = vld [vmem:[#allocation11 + $0xd0] sm:$0xff] }
 0xd72   : > { %21514 = vmatprep.subr.bf16.mxu1 %v21513_v1  ;;  %v15473_v1 = vld [vmem:[#allocation11 + $0x150] sm:$0xff] }
 0xd75   : > { %21516 = vmatpush3.bf16.msra.mxu1 %v21515_v8 }
 0xd81   : > { %v13668_v27 = vpop.f32.mrb[96].mxu1 }
 0xd82   : > { %v13701_v4 = vrot.slane %v13668_v27, %v26473_v29  ;;  %v20432_v18 = vpop.f32.mrb[97].mxu1  ;;  %v15436_v27 = vld [vmem:[#allocation11 + $0x28] sm:$0xff] }
 0xd83   : > { %v13671_v39 = vpop.f32.mrb[98].mxu1  ;;  %v15484_v18 = vld [vmem:[#allocation11 + $0x1a8] sm:$0xff] }
 0xd84   : > { %v13716_v10 = vrot.slane %v13701_v4, %v26473_v29  ;;  %v20433_v3 = vpop.f32.mrb[99].mxu1  ;;  %v15483_v4 = vld [vmem:[#allocation11 + $0x1a0] sm:$0xff] }
 0xd85   : > { %v15467_v39 = vld [vmem:[#allocation11 + $0x120] sm:$0xff]  ;;  %v21517_v3 = vpack.c.bf16 %v15484_v18, %v15483_v4  ;;  %v15460_v4 = vld [vmem:[#allocation11 + $0xe8] sm:$0xff]  ;;  %v14548_v18 = vrot.slane %v14534_v35, %v26473_v29  ;;  %v15445_v35 = vld [vmem:[#allocation11 + $0x70] sm:$0xff] }
 0xd86   : > { %v13717_v46 = vcombine.low %v13709_v56, %v13716_v10  ;;  %v15468_v56 = vld [vmem:[#allocation11 + $0x128] sm:$0xff]  ;;  %v21487_v10 = vpack.c.bf16 %v15436_v27, %v15435_v6  ;;  %v15459_v27 = vld [vmem:[#allocation11 + $0xe0] sm:$0xff] }
 0xd87   : > { %21518 = vmatprep.subr.bf16.mxu1 %v21517_v3  ;;  %v15444_v3 = vld [vmem:[#allocation11 + $0x68] sm:$0xff] }
 0xd88   : > { %v13719_v26 = vadd.f32 %v13717_v46, %v13292_v20  ;;  %v15450_v20 = vld [vmem:[#allocation11 + $0x98] sm:$0xff]  ;;  %v15453_v46 = vld [vmem:[#allocation11 + $0xb0] sm:$0xff] }
 0xd89   : > { %v21481_v5 = vpack.c.bf16 %v15450_v20, %v15449_v58  ;;  %v21527_v58 = vpack.c.bf16 %v15472_v23, %v15471_v43  ;;  %v15458_v20 = vld [vmem:[#allocation11 + $0xd8] sm:$0xff] }
 0xd8a   : > { %v21497_v57 = vpack.c.bf16 %v15458_v20, %v15457_v63 }
 0xd8b   : > { %21482 = vmatprep.subr.bf16.mxu0 %v21481_v5  ;;  %v15442_v5 = vld [vmem:[#allocation11 + $0x58] sm:$0xff] }
 0xd8c   : > { %21484 = vmatpush3.bf16.msra.mxu0 %v21483_v33  ;;  %v15489_v33 = vld [vmem:[#allocation11 + $0x1d0] sm:$0xff] }
 0xd8d   : > { %21486 = vmatprep.subr.bf16.mxu0 %v21485_v48  ;;  %v21529_v8 = vpack.c.bf16 %v15490_v9, %v15489_v33  ;;  %v21531_v48 = vpack.c.bf16 %v15474_v0, %v15473_v1  ;;  %v14968_v33 = vrot.slane %v14960_v36, %v26473_v29 }
 0xd90   : > { %21488 = vmatpush3.bf16.msra.mxu0 %v21487_v10  ;;  %v15443_v10 = vld [vmem:[#allocation11 + $0x60] sm:$0xff] }
 0xda1   : > { %v14054_v44 = vpop.f32.mrb[100].mxu1 }
 0xda2   : > { %v14056_v16 = vpop.f32.mrb[101].mxu1 }
 0xda3   : > { %v14107_v12 = vcombine.low %v14054_v44, %v14056_v16  ;;  %v14058_v45 = vpop.f32.mrb[102].mxu1  ;;  %v15454_v44 = vld [vmem:[#allocation11 + $0xb8] sm:$0xff]  ;;  %v15437_v16 = vld [vmem:[#allocation11 + $0x30] sm:$0xff] }
 0xda4   : > { %v14059_v51 = vpop.f32.mrb[103].mxu1  ;;  %v15438_v45 = vld [vmem:[#allocation11 + $0x38] sm:$0xff] }
 0xda5   : > { %v14121_v34 = vrot.slane %v14107_v12, %v26473_v29  ;;  %v21489_v12 = vpack.c.bf16 %v15454_v44, %v15453_v46  ;;  %v15485_v51 = vld [vmem:[#allocation11 + $0x1b0] sm:$0xff]  ;;  %v21491_v37 = vpack.c.bf16 %v15438_v45, %v15437_v16  ;;  %v15491_v46 = vld [vmem:[#allocation11 + $0x1e0] sm:$0xff]  ;;  %v21503_v44 = vpack.c.bf16 %v15444_v3, %v15443_v10  ;;  %v15492_v16 = vld [vmem:[#allocation11 + $0x1e8] sm:$0xff] }
 0xda7   : > { %v14129_v7 = vcombine.low %v14114_v13, %v14121_v34  ;;  %v15486_v13 = vld [vmem:[#allocation11 + $0x1b8] sm:$0xff]  ;;  %v15469_v34 = vld [vmem:[#allocation11 + $0x130] sm:$0xff]  ;;  %21490 = vmatprep.subr.bf16.mxu0 %v21489_v12  ;;  %v15476_v12 = vld [vmem:[#allocation11 + $0x168] sm:$0xff] }
 0xda8   : > { %v21521_v32 = vpack.c.bf16 %v15486_v13, %v15485_v51  ;;  %21492 = vmatpush3.bf16.msra.mxu0 %v21491_v37  ;;  %v21533_v51 = vpack.c.bf16 %v15492_v16, %v15491_v46  ;;  %v15477_v37 = vld [vmem:[#allocation11 + $0x170] sm:$0xff]  ;;  %v15519_v16 = vsub.s32 1, %v23308_v2 }
 0xda9   : > { %v14136_v52 = vrot.slane %v14129_v7, %v26473_v29  ;;  %v15470_v7 = vld [vmem:[#allocation11 + $0x138] sm:$0xff]  ;;  %21494 = vmatprep.subr.bf16.mxu0 %v21493_v11 }
 0xdaa   : > { %v21523_v62 = vpack.c.bf16 %v15470_v7, %v15469_v34  ;;  %v15446_v34 = vld [vmem:[#allocation11 + $0x78] sm:$0xff]  ;;  %v15493_v7 = vld [vmem:[#allocation11 + $0x1f0] sm:$0xff] }
 0xdab   : > { %v14144_v21 = vcombine.low %v14136_v52, %v14143_v14  ;;  %v15439_v14 = vld [vmem:[#allocation11 + $0x40] sm:$0xff]  ;;  %v15440_v52 = vld [vmem:[#allocation11 + $0x48] sm:$0xff]  ;;  %v21507_v25 = vpack.c.bf16 %v15446_v34, %v15445_v35  ;;  %v21537_v53 = vpack.c.bf16 %v15494_v38, %v15493_v7  ;;  %v15497_v35 = vld [vmem:[#allocation11 + $0x210] sm:$0xff] }
 0xdac   : > { %v21495_v24 = vpack.c.bf16 %v15440_v52, %v15439_v14  ;;  %v15498_v34 = vld [vmem:[#allocation11 + $0x218] sm:$0xff]  ;;  %v15500_v38 = vld [vmem:[#allocation11 + $0x228] sm:$0xff] }
 0xdad   : > { %v27573_v31 = vadd.f32 %v14144_v21, %v13719_v26  ;;  %v21519_v26 = vpack.c.bf16 %v15468_v56, %v15467_v39  ;;  %v15441_v21 = vld [vmem:[#allocation11 + $0x50] sm:$0xff]  ;;  %v21501_v56 = vpack.c.bf16 %v15460_v4, %v15459_v27  ;;  %v21545_v7 = vpack.c.bf16 %v15498_v34, %v15497_v35 }
 0xdae   : > { %21496 = vmatpush3.bf16.msra.mxu0 %v21495_v24  ;;  %v21499_v15 = vpack.c.bf16 %v15442_v5, %v15441_v21 }
 0xdaf   : > { %21520 = vmatpush3.bf16.msra.mxu1 %v21519_v26  ;;  %21498 = vmatprep.subr.bf16.mxu0 %v21497_v57  ;;  %v15475_v26 = vld [vmem:[#allocation11 + $0x160] sm:$0xff] }
 0xdb0   : > { %21522 = vmatprep.subr.bf16.mxu1 %v21521_v32  ;;  %v21535_v13 = vpack.c.bf16 %v15476_v12, %v15475_v26  ;;  %v15461_v32 = vld [vmem:[#allocation11 + $0xf0] sm:$0xff]  ;;  %v15495_v26 = vld [vmem:[#allocation11 + $0x200] sm:$0xff]  ;;  %v15496_v12 = vld [vmem:[#allocation11 + $0x208] sm:$0xff] }
 0xdb1   : > { %v21505_v50 = vpack.c.bf16 %v15462_v55, %v15461_v32 }
 0xdb2   : > { %21500 = vmatpush3.bf16.msra.mxu0 %v21499_v15 }
 0xdb3   : > { %21524 = vmatpush3.bf16.msra.mxu1 %v21523_v62  ;;  %21502 = vmatprep.subr.bf16.mxu0 %v21501_v56  ;;  %v21539_v62 = vpack.c.bf16 %v15478_v49, %v15477_v37  ;;  %v15501_v49 = vld [vmem:[#allocation11 + $0x230] sm:$0xff] }
 0xdb4   : > { %21526 = vmatprep.subr.bf16.mxu1 %v21525_v42 }
 0xdb6   : > { %21504 = vmatpush3.bf16.msra.mxu0 %v21503_v44 }
 0xdb7   : > { %21528 = vmatpush3.bf16.msra.mxu1 %v21527_v58  ;;  %21506 = vmatprep.subr.bf16.mxu0 %v21505_v50 }
 0xdb8   : > { %21530 = vmatprep.subr.bf16.mxu1 %v21529_v8 }
 0xdba   : > { %21508 = vmatpush3.bf16.msra.mxu0 %v21507_v25  ;;  %v15499_v25 = vld [vmem:[#allocation11 + $0x220] sm:$0xff] }
 0xdbb   : > { %21532 = vmatpush3.bf16.msra.mxu1 %v21531_v48  ;;  %21541 = vmatprep.subr.bf16.mxu0 %v27716_v30  ;;  %v21548_v37 = vpack.c.bf16 %v15500_v38, %v15499_v25 }
 0xdbc   : > { %21534 = vmatprep.subr.bf16.mxu1 %v21533_v51 }
 0xdbf   : > { %21536 = vmatpush3.bf16.msra.mxu1 %v21535_v13  ;;  %v21542_v13 = vpack.c.bf16 %v15496_v12, %v15495_v26 }
 0xdc0   : > { %21538 = vmatprep.subr.bf16.mxu1 %v21537_v53  ;;  %v15502_v53 = vld [vmem:[#allocation11 + $0x238] sm:$0xff] }
 0xdc1   : > { %v14440_v22 = vpop.f32.mrb[104].mxu1 }
 0xdc2   : > { %v14442_v47 = vpop.f32.mrb[105].mxu1 }
 0xdc3   : > { %v14533_v60 = vcombine.low %v14440_v22, %v14442_v47  ;;  %v14444_v28 = vpop.f32.mrb[106].mxu1  ;;  %21540 = vmatpush3.bf16.msra.mxu1 %v21539_v62  ;;  %v14982_v47 = vrot.slane %v27130_v59, %v26473_v29  ;;  %v21551_v62 = vpack.c.bf16 %v15502_v53, %v15501_v49 }
 0xdc4   : > { %v14445_v6 = vpop.f32.mrb[107].mxu1 }
 0xdc5   : > { %v14541_v39 = vrot.slane %v14533_v60, %v26473_v29  ;;  %v14997_v1 = vrot.slane %v14982_v47, %v26473_v29  ;;  %v15511_v47 = vld [vmem:[#allocation13] sm:$0x1] }
 0xdc7   : > { %v14556_v45 = vcombine.low %v14541_v39, %v14548_v18 }
 0xdc9   : > { %v14563_v24 = vrot.slane %v14556_v45, %v26473_v29 }
 0xde1   : > { %v14522_v11 = vpop.f32.mrb[108].mxu1 }
 0xde2   : > { %v14555_v14 = vrot.slane %v14522_v11, %v26473_v29  ;;  %v20472_v52 = vpop.f32.mrb[109].mxu1  ;;  %v15503_v11 = vld [vmem:[#allocation11 + $0x240] sm:$0xff] }
 0xde3   : > { %v14525_v42 = vpop.f32.mrb[110].mxu1 }
 0xde4   : > { %v14570_v43 = vrot.slane %v14555_v14, %v26473_v29  ;;  %v20473_v23 = vpop.f32.mrb[111].mxu1  ;;  %v15504_v14 = vld [vmem:[#allocation11 + $0x248] sm:$0xff]  ;;  %v15506_v42 = vld [vmem:[#allocation11 + $0x258] sm:$0xff] }
 0xde5   : > { %v21554_v52 = vpack.c.bf16 %v15504_v14, %v15503_v11  ;;  %v15508_v23 = vld [vmem:[#allocation11 + $0x268] sm:$0xff] }
 0xde6   : > { %v14571_v58 = vcombine.low %v14563_v24, %v14570_v43  ;;  %v15507_v43 = vld [vmem:[#allocation11 + $0x260] sm:$0xff] }
 0xde8   : > { %v14573_v63 = vadd.f32 %v14571_v58, %v27573_v31  ;;  %v21560_v58 = vpack.c.bf16 %v15508_v23, %v15507_v43 }
 0xe01   : > { %v14908_v20 = vpop.f32.mrb[112].mxu1 }
 0xe02   : > { %v14910_v22 = vpop.f32.mrb[113].mxu1 }
 0xe03   : > { %v14961_v57 = vcombine.low %v14908_v20, %v14910_v22  ;;  %v14912_v21 = vpop.f32.mrb[114].mxu1  ;;  %v15510_v20 = vld [vmem:[#allocation11 + $0x278] sm:$0xff] }
 0xe04   : > { %v14913_v5 = vpop.f32.mrb[115].mxu1 }
 0xe05   : > { %v14975_v15 = vrot.slane %v14961_v57, %v26473_v29  ;;  %v15531_v57 = vsub.s32 4, %v23308_v2 }
 0xe07   : > { %v14983_v9 = vcombine.low %v14968_v33, %v14975_v15 }
 0xe09   : > { %v14990_v31 = vrot.slane %v14983_v9, %v26473_v29 }
 0xe0b   : > { %v14998_v0 = vcombine.low %v14990_v31, %v14997_v1 }
 0xe0d   : > { %v15000_v60 = vadd.f32 %v14998_v0, %v14573_v63  ;;  %v15509_v63 = vld [vmem:[#allocation11 + $0x270] sm:$0xff] }
 0xe0e   : > { %v21563_v22 = vpack.c.bf16 %v15510_v20, %v15509_v63 }
 0xe21   : > { %v15294_v28 = vpop.f32.mrb[116].mxu1 }
 0xe22   : > { %v15296_v8 = vpop.f32.mrb[117].mxu1 }
 0xe23   : > { %v15387_v48 = vcombine.low %v15294_v28, %v15296_v8  ;;  %v15298_v6 = vpop.f32.mrb[118].mxu1 }
 0xe24   : > { %v15299_v27 = vpop.f32.mrb[119].mxu1 }
 0xe25   : > { %v15395_v61 = vrot.slane %v15387_v48, %v26473_v29 }
 0xe27   : > { %v15410_v36 = vcombine.low %v15395_v61, %v15402_v17 }
 0xe29   : > { %v15417_v56 = vrot.slane %v15410_v36, %v26473_v29 }
 0xe41   : > { %v15376_v59 = vpop.f32.mrb[120].mxu1 }
 0xe42   : > { %v15409_v4 = vrot.slane %v15376_v59, %v26473_v29  ;;  %v20512_v18 = vpop.f32.mrb[121].mxu1 }
 0xe43   : > { %v15379_v39 = vpop.f32.mrb[122].mxu1 }
 0xe44   : > { %v15424_v10 = vrot.slane %v15409_v4, %v26473_v29  ;;  %v20513_v3 = vpop.f32.mrb[123].mxu1 }
 0xe46   : > { %v15425_v46 = vcombine.low %v15417_v56, %v15424_v10 }
 0xe48   : > { %v15427_v44 = vadd.f32 %v15425_v46, %v15000_v60 }
 0xe4a   : > { %vm15428_vm15 = vcmp.ge.f32.partialorder %v15427_v44, 0.0  ;;  %v15429_v45 = vmul.f32 0.01, %v15427_v44 }
 0xe4c   : > { %v15430_v51 = vsel %vm15428_vm15, %v15427_v44, %v15429_v45 }
 0xe4d   : > { %v15520_v32 = vrot.slane %v15430_v51, %v15519_v16  ;;  %v15528_v55 = vrot.slane %v15430_v51, %v15527_v19  ;;  %v15516_v29 = vrot.slane %v15430_v51, %v15515_v41  ;;  %v15524_v50 = vrot.slane %v15430_v51, %v15523_v54 }
 0xe4e   : > { %v15532_v21 = vrot.slane %v15430_v51, %v15531_v57 }
 0xe4f   : > { %15602 = vmatprep.mubr.f32.mxu0 %v15520_v32  ;;  %15672 = vmatprep.mubr.f32.mxu1 %v15528_v55 }
 0xe50   : > { %15603 = vmatmul.mubr.f32.vlgmr.msra.gmra.mrb[100].mxu0 %v15516_v29  ;;  %15673 = vmatmul.mubr.f32.vlgmr.msra.gmra.mrb[124].mxu1 %v15524_v50 }
 0xe51   : > { %21543 = vmatpush3.bf16.msra.mxu0 %v21542_v13  ;;  %20546 = vmatprep.mubr.msk.f32.mxu0 %vm22994_vm0, %v27715_v40  ;;  %v15505_v40 = vld [vmem:[#allocation11 + $0x250] sm:$0xff] }
 0xe52   : > { %21544 = vmatprep.subr.bf16.mxu0 %v27716_v30  ;;  %v21557_v24 = vpack.c.bf16 %v15506_v42, %v15505_v40 }
 0xe55   : > { %21546 = vmatpush3.bf16.msra.mxu0 %v21545_v7 }
 0xe56   : > { %21547 = vmatprep.subr.bf16.mxu0 %v27716_v30 }
 0xe59   : > { %21549 = vmatpush3.bf16.msra.mxu0 %v21548_v37 }
 0xe5a   : > { %21550 = vmatprep.subr.bf16.mxu0 %v27716_v30 }
 0xe5d   : > { %21552 = vmatpush3.bf16.msra.mxu0 %v21551_v62 }
 0xe5e   : > { %21553 = vmatprep.subr.bf16.mxu0 %v27716_v30 }
 0xe61   : > { %21555 = vmatpush3.bf16.msra.mxu0 %v21554_v52 }
 0xe62   : > { %21556 = vmatprep.subr.bf16.mxu0 %v27716_v30 }
 0xe65   : > { %21558 = vmatpush3.bf16.msra.mxu0 %v21557_v24 }
 0xe66   : > { %21559 = vmatprep.subr.bf16.mxu0 %v27716_v30 }
 0xe69   : > { %21561 = vmatpush3.bf16.msra.mxu0 %v21560_v58 }
 0xe6a   : > { %21562 = vmatprep.subr.bf16.mxu0 %v27716_v30 }
 0xe6d   : > { %21564 = vmatpush3.bf16.msra.mxu0 %v21563_v22 }
 0xe70   : > { %20547 = vmatmul.mubr.f32.vlgmr.msra.gmra.mrb[102].mxu0 %v15532_v21 }
 0xf23   : > { %v18668_v5 = vpop.f32.mrb[100].mxu0  ;;  %v18703_v33 = vpop.f32.mrb[124].mxu1 }
 0xf24   : > { %v18669_v15 = vpop.f32.mrb[101].mxu0  ;;  %v18704_v9 = vpop.f32.mrb[125].mxu1 }
 0xf25   : > { %v18670_v1 = vadd.f32 %v18669_v15, %v18668_v5  ;;  %v18705_v31 = vadd.f32 %v18704_v9, %v18703_v33 }
 0xf27   : > { %v15605_v0 = vadd.f32 %v18670_v1, %v15511_v47 }
 0xf29   : > { %v15675_v60 = vadd.f32 %v18705_v31, %v15605_v0 }
 0xf43   : > { %v15744_v30 = vpop.f32.mrb[102].mxu0 }
 0xf44   : > { %v15745_v28 = vadd.f32 %v15744_v30, %v15675_v60  ;;  %v20548_v2 = vpop.f32.mrb[103].mxu0 }
 0xf46   : > { %15748 = vst [vmem:[%s23373_s28] sm:$0x1] %v15745_v28 }
 0xf47   : > { %22900 = shalt.err (!%p22897_p6)
}
 0xf48   : > { %s22901_s23 = scalar_lea.hbm %s27621_s12, 16  ;;  %s22905_s13 = scalar_lea.hbm %s27677_s11, 32 }
 0xf49   : > { %p22902_p5 = scmp.ne.s32.totalorder %s27621_s12, %s22901_s23  ;;  %p22906_p10 = scmp.lt.u32.totalorder %s27621_s12, %s27677_s11 }
 0xf4a   : > { %p22907_p2 = scmp.lt.u32.totalorder %s22905_s13, %s22901_s23  ;;  %p22909_p4 = scmp.lt.u32.totalorder %s22901_s23, %s27621_s12 }
 0xf4b   : > { %p22903_p9 = pnand %p22902_p5, %p27723_p7 }
 0xf4c   : > { %p22908_p3 = por %p22907_p2, %p22906_p10 }
 0xf4d   : > { %p22904_p12 = pneg %p22903_p9 }
 0xf4e   : > { %p22910_p8 = por %p22909_p4, %p22908_p3 }
 0xf50   : > { %p22911_p11 = pnand %p22910_p8, %p22904_p12 }
 0xf52   : > { %22914 = shalt.err (!%p22911_p11)
}
 0xf53   : > { %21740 = dma.vmem_to_hbm [thread:$0]  (%p27723_p7), %s27623_s14, 16, %s27621_s12, %s15750_s26  }
 0xf54 PF: > { %s27724_s16 = sld [smem:[#allocation21_spill]]  ;;  %s27725_s17 = sld [smem:[#allocation19_spill]] }
 0xf55   : > { %s27726_s25 = sld [smem:[#allocation24_spill]] }
 0xf5a   : > { %p21772_p13 = scmp.ge.s32.totalorder %s27724_s16, 2  ;;  %s15774_s6 = sand.u32 1, %s27725_s17  }
 0xf5b   : > { %p27727_p1 = scmp.ne.s32.totalorder %s27726_s25, 0  ;;  %s15775_s24 = scalar_lea.sflag [#allocation7], %s15774_s6 }
 0xf5d   : > { %p21759_p0 = pnand %p21772_p13, %p27727_p1 }
 0xf5f   : > { %22952 = dma.done.wait (!%p21759_p0), %s15775_s24, 16  }
 0xf60   : > { %22954 = vsyncadd (!%p21759_p0), %s15775_s24, 4294967280  ;;  %s27728_s20 = sld [smem:[#allocation22_spill]]  ;;  %s27729_s19 = sld [smem:[#allocation20_spill]] }
 0xf61   : > { %s27730_s30 = sld [smem:[#allocation23_spill]]  ;;  %s27731_s17 = smov %s22961_s18 }
 0xf66   : > { %p24_p6 = scmp.ge.s32.totalorder %s27728_s20, 4   ;;  %s27732_s18 = smov %s27729_s19 }
 0xf67   : > { %s27733_s19 = smov %s27730_s30 }
 0xf68   :  { %26 = sbr.rel (!%p24_p6) target bundleno = 9 (0x9), region = 213 }
 0xf6f   :  { %15779 = vsyncpa [#allocation6], 1 }
 0xf70   :  { %15781 = vsyncpa [#allocation6 + $0x1], 1 }
 0xf71   :  { %15782 = vsyncpa [#allocation9], 1 }
 0xf72   :  { %15783 = vsyncpa [#allocation12], 1 }
 0xf73   :  { %15784 = vsyncpa [#allocation7], 1 }
 0xf74   :  { %15786 = vsyncpa [#allocation7 + $0x1], 1 }

</bundles_post_ra>
